<compile_context>
chip_gen: v7x
topology: tpu7x:2x2x1
jax: 0.10.0
libtpu: 0.0.40
codegen_flags: <defaults>
</compile_context>

<pallas_src>
import jax
import jax.numpy as jnp
from jax import lax
from jax.experimental import pallas as pl
from jax.experimental.pallas import tpu as pltpu

# ---- fixed model geometry (from the PyTorch module) -------------------------
C = 120            # channels
H, W_SP = 120, 1   # spatial dims implied by nn.Linear(120 * 120 * 1, 1000)
S = H * W_SP       # 120 spatial positions per image
NEG_SLOPE = 0.01   # torch.nn.LeakyReLU default

# ---- padded kernel geometry --------------------------------------------------
SP = 128                 # spatial rows padded 120 -> 128 (sublane aligned)
CP = 128                 # channels padded 120 -> 128 (lane dense)
K1 = C * S               # 14400 FC1 input features
K_PAD = 14848            # FC1 K padded to 116*128 (tighter than 15360)
TK = 3712                # FC1 K tile: 4 steps; 3.6 MiB bf16 tile, double buffered
OUT1_PAD = 1024          # FC1 out 1000 -> 1024
OUT2_PAD = 128           # FC2 out 6 -> 128
NUM_CLASSES = 6
COL_SPLIT = 2            # FC1 output columns split in halves (megacore axis)
OUT_HALF = OUT1_PAD // COL_SPLIT   # 512
CONV_BATCH = 8           # max images folded into one conv grid step


# ============================ fused conv-chain kernel =========================
def fused_convchain_kernel(x_ref, w_ref, b_ref, o_ref):
    # x_ref/o_ref: (B, SP, CP) f32 activations; halo rows (>=S) / cols (>=C) zero
    # w_ref:       (8, 3*CP, CP) bf16 stacked per-layer weights, row = ky*CP+cin
    # b_ref:       (8, 1, CP)   f32 per-layer bias (zero padded)
    b = x_ref.shape[0]
    m = b * SP
    h = x_ref[...].reshape(m, CP)                       # stack images along rows

    # per-image row index; halo rows of EVERY stacked image are forced to zero
    row = lax.broadcasted_iota(jnp.int32, (m, CP), 0)
    valid = (row & (SP - 1)) < S                        # SP is a power of two
    zero_row = jnp.zeros((1, CP), jnp.float32)

    def conv(v, layer):
        # 3-tap 1-D conv over rows (W=1 => only kw=1 column is ever used):
        #   out[y] = W_ky0.v[y-1] + W_ky1.v[y] + W_ky2.v[y+1]
        # Zero halo rows between stacked images supply the conv zero padding.
        top = jnp.concatenate([zero_row, v[:m - 1, :]], axis=0)   # v[y-1]
        bot = jnp.concatenate([v[1:, :], zero_row], axis=0)       # v[y+1]
        p = jnp.concatenate([top, v, bot], axis=1).astype(jnp.bfloat16)
        return (jnp.dot(p, w_ref[layer], preferred_element_type=jnp.float32)
                + b_ref[layer])                                    # (m, CP) f32

    for blk in range(4):
        # residual_block: Conv -> ReLU -> Conv ; then +residual ; LeakyReLU
        t = conv(h, 2 * blk)
        t = jnp.where(valid, jnp.maximum(t, 0.0), 0.0)
        y = conv(t, 2 * blk + 1) + h
        h = jnp.where(valid, jnp.where(y > 0, y, NEG_SLOPE * y), 0.0)

    o_ref[...] = h.reshape(b, SP, CP).astype(o_ref.dtype)


def conv_chain(x_pad, w_conv, b_conv, b_tile):
    n = x_pad.shape[0]
    return pl.pallas_call(
        fused_convchain_kernel,
        out_shape=jax.ShapeDtypeStruct((n, SP, CP), jnp.float32),
        grid=(n // b_tile,),
        in_specs=[pl.BlockSpec((b_tile, SP, CP), lambda i: (i, 0, 0)),
                  pl.BlockSpec((8, 3 * CP, CP), lambda i: (0, 0, 0)),
                  pl.BlockSpec((8, 1, CP), lambda i: (0, 0, 0))],
        out_specs=pl.BlockSpec((b_tile, SP, CP), lambda i: (i, 0, 0)),
        compiler_params=pltpu.CompilerParams(
            dimension_semantics=("parallel",),
            vmem_limit_bytes=40 * 1024 * 1024),
    )(x_pad, w_conv, b_conv)


# ============================ fused FC1+FC2 head ==============================
def fc_fused_kernel(x_ref, w1_ref, b1_ref, w2_ref, out_ref, acc_ref):
    # Grid: (j = output-column half [parallel], k = K tile [arbitrary]).
    # x_ref:  (n, TK)            bf16 flattened activations
    # w1_ref: (TK, OUT_HALF)     bf16 FC1 weight K-tile for this column half
    # b1_ref: (1, OUT_HALF)      f32
    # w2_ref: (OUT_HALF, OUT2P)  f32 FC2 rows belonging to this half
    # out_ref:(1, n, OUT2_PAD)   f32 partial logits (no FC2 bias)
    k = pl.program_id(1)

    @pl.when(k == 0)
    def _():
        acc_ref[...] = jnp.zeros_like(acc_ref)

    acc_ref[...] += jnp.dot(x_ref[...], w1_ref[...],
                            preferred_element_type=jnp.float32)

    @pl.when(k == pl.num_programs(1) - 1)
    def _():
        h1 = acc_ref[...] + b1_ref[...]                             # (n, 512) f32
        part = jnp.dot(h1, w2_ref[...],
                       preferred_element_type=jnp.float32)          # (n, 128)
        out_ref[0] = part.astype(out_ref.dtype)


def fc_head(x_flat, w1, b1, w2):
    n = x_flat.shape[0]
    return pl.pallas_call(
        fc_fused_kernel,
        out_shape=jax.ShapeDtypeStruct((COL_SPLIT, n, OUT2_PAD), jnp.float32),
        grid=(COL_SPLIT, K_PAD // TK),
        in_specs=[pl.BlockSpec((n, TK), lambda j, k: (0, k)),
                  pl.BlockSpec((TK, OUT_HALF), lambda j, k: (k, j)),
                  pl.BlockSpec((1, OUT_HALF), lambda j, k: (0, j)),
                  pl.BlockSpec((OUT_HALF, OUT2_PAD), lambda j, k: (j, 0))],
        out_specs=pl.BlockSpec((1, n, OUT2_PAD), lambda j, k: (j, 0, 0)),
        scratch_shapes=[pltpu.VMEM((n, OUT_HALF), jnp.float32)],
        compiler_params=pltpu.CompilerParams(
            dimension_semantics=("parallel", "arbitrary")),
    )(x_flat, w1, b1, w2)


# ============================ params & forward ================================
def init_params(key):
    keys = jax.random.split(key, 20)
    ki = iter(keys)

    w_conv, b_conv = [], []
    for _ in range(8):
        # PyTorch layout (Cout, Cin, kh, kw); with W=1 only the kw=1 column is
        # ever multiplied by real data, so keep just those 3 taps.
        w_pt = jax.random.normal(next(ki), (C, C, 3, 3), jnp.float32) / jnp.sqrt(9.0 * C)
        b_pt = jax.random.normal(next(ki), (C,), jnp.float32) * 0.01
        wk = jnp.transpose(w_pt[:, :, :, 1], (2, 1, 0))              # (ky, Cin, Cout)
        wk = jnp.pad(wk, ((0, 0), (0, CP - C), (0, CP - C)))          # (3, CP, CP)
        w_conv.append(wk.reshape(3 * CP, CP))                         # row = ky*CP + cin
        b_conv.append(jnp.pad(b_pt, (0, CP - C)).reshape(1, CP))

    params = {"w_conv": jnp.stack(w_conv, axis=0).astype(jnp.bfloat16),  # (8,384,128)
              "b_conv": jnp.stack(b_conv, axis=0)}                       # (8,1,128) f32

    # FC1: Linear(14400, 1000) stored as W.T; rows permuted once from PyTorch
    # flatten order (c*S + s) to kernel order (s*C + c) so the runtime flatten
    # needs no transpose; K padded 14400->14848, out 1000->1024; bf16 storage.
    w1 = jax.random.normal(next(ki), (K1, 1000), jnp.float32) / jnp.sqrt(float(K1))
    b1 = jax.random.normal(next(ki), (1000,), jnp.float32) * 0.01
    w1 = w1.reshape(C, S, 1000).transpose(1, 0, 2).reshape(K1, 1000)
    params["w_fc1"] = jnp.pad(
        w1, ((0, K_PAD - K1), (0, OUT1_PAD - 1000))).astype(jnp.bfloat16)
    params["b_fc1"] = jnp.pad(b1, (0, OUT1_PAD - 1000)).reshape(1, OUT1_PAD)

    # FC2: Linear(1000, 6), stored as W.T, padded to (1024, 128); tiny -> f32.
    w2 = jax.random.normal(next(ki), (1000, 6), jnp.float32) / jnp.sqrt(1000.0)
    b2 = jax.random.normal(next(ki), (6,), jnp.float32) * 0.01
    params["w_fc2"] = jnp.pad(w2, ((0, OUT1_PAD - 1000), (0, OUT2_PAD - 6)))
    params["b_fc2"] = jnp.pad(b2, (0, OUT2_PAD - 6)).reshape(1, OUT2_PAD)
    return params


def forward(params, x_nchw):
    n = x_nchw.shape[0]
    # NCHW (N, 120, 120, 1) -> (N, S, C), zero-pad to (N, 128, 128) tiles.
    h0 = jnp.transpose(x_nchw, (0, 2, 3, 1)).reshape(n, S, C)
    h0 = jnp.pad(h0, ((0, 0), (0, SP - S), (0, CP - C)))

    # Batch CONV_BATCH images per grid step (pad batch with zero images).
    b_tile = max(1, min(CONV_BATCH, n))
    n_pad = ((n + b_tile - 1) // b_tile) * b_tile
    if n_pad != n:
        h0 = jnp.pad(h0, ((0, n_pad - n), (0, 0), (0, 0)))
    conv_out = conv_chain(h0, params["w_conv"], params["b_conv"], b_tile)[:n]

    # Flatten valid region; the row permutation was absorbed into w_fc1.
    # TODO(synk): this slice/pad relayout between the two pallas_calls could be
    # folded into the conv kernel's output for larger batches.
    flat = conv_out[:, :S, :C].reshape(n, K1).astype(jnp.bfloat16)
    flat = jnp.pad(flat, ((0, 0), (0, K_PAD - K1)))

    partials = fc_head(flat, params["w_fc1"], params["b_fc1"], params["w_fc2"])
    # Tiny 6-class combine + bias + softmax done outside the kernel (per review).
    logits = (partials[0] + partials[1] + params["b_fc2"])[:, :NUM_CLASSES]
    softmax = jax.nn.softmax(logits, axis=-1)
    return logits, softmax


if __name__ == "__main__":
    key = jax.random.PRNGKey(0)
    kx, kp = jax.random.split(key)
    x = jax.random.normal(kx, (2, C, H, W_SP), jnp.float32)   # NCHW like PyTorch
    params = init_params(kp)
    logits, softmax = jax.jit(forward)(params, x)
    jax.block_until_ready((logits, softmax))
    assert logits.shape == (2, NUM_CLASSES) and softmax.shape == (2, NUM_CLASSES)
    assert bool(jnp.all(jnp.isfinite(logits))) and bool(jnp.all(jnp.isfinite(softmax)))
    assert bool(jnp.all(jnp.abs(jnp.sum(softmax, axis=-1) - 1.0) < 1e-4))
    print("KERNEL_OK")
</pallas_src>

<mosaic_0001>
module attributes {stable_mosaic.version = 11 : i64} {
  func.func @fused_convchain_kernel(%arg0: i32, %arg1: memref<2x128x128xf32, #tpu.memory_space<vmem>>, %arg2: memref<8x384x128xbf16, #tpu.memory_space<vmem>>, %arg3: memref<8x1x128xf32, #tpu.memory_space<vmem>>, %arg4: memref<2x128x128xf32, #tpu.memory_space<vmem>>) attributes {dimension_semantics = [#tpu.dimension_semantics<parallel>], iteration_bounds = array<i64: 1>, scalar_prefetch = 0 : i64, scratch_operands = 0 : i64, tpu.core_type = #tpu.core_type<tc>, window_params = [{transform_indices = @transform_0, window_bounds = array<i64: 2, 128, 128>}, {pipeline_mode = #tpu.pipeline_mode<synchronous>, transform_indices = @transform_1, window_bounds = array<i64: 8, 384, 128>}, {pipeline_mode = #tpu.pipeline_mode<synchronous>, transform_indices = @transform_2, window_bounds = array<i64: 8, 1, 128>}, {transform_indices = @transform_3, window_bounds = array<i64: 2, 128, 128>}]} {
    %c0 = arith.constant 0 : index
    %c0_0 = arith.constant 0 : index
    %c0_1 = arith.constant 0 : index
    %0 = vector.load %arg1[%c0, %c0_0, %c0_1] : memref<2x128x128xf32, #tpu.memory_space<vmem>>, vector<2x128x128xf32>
    %1 = vector.shape_cast %0 : vector<2x128x128xf32> to vector<256x128xf32>
    %2 = tpu.iota {dimensions = array<i32: 0>} : vector<256x128xi32>
    %c127_i32 = arith.constant 127 : i32
    %3 = vector.broadcast %c127_i32 : i32 to vector<256x128xi32>
    %4 = arith.andi %2, %3 : vector<256x128xi32>
    %c120_i32 = arith.constant 120 : i32
    %5 = vector.broadcast %c120_i32 : i32 to vector<256x128xi32>
    %6 = arith.cmpi slt, %4, %5 : vector<256x128xi32>
    %cst = arith.constant 0.000000e+00 : f32
    %7 = vector.broadcast %cst : f32 to vector<1x128xf32>
    %8 = vector.extract_strided_slice %1 {offsets = [0, 0], sizes = [255, 128], strides = [1, 1]} : vector<256x128xf32> to vector<255x128xf32>
    %9 = tpu.concatenate %7, %8 in 0 : vector<1x128xf32>, vector<255x128xf32> -> vector<256x128xf32>
    %10 = vector.extract_strided_slice %1 {offsets = [1, 0], sizes = [255, 128], strides = [1, 1]} : vector<256x128xf32> to vector<255x128xf32>
    %11 = tpu.concatenate %10, %7 in 0 : vector<255x128xf32>, vector<1x128xf32> -> vector<256x128xf32>
    %12 = tpu.concatenate %9, %1, %11 in 1 : vector<256x128xf32>, vector<256x128xf32>, vector<256x128xf32> -> vector<256x384xf32>
    %13 = arith.truncf %12 : vector<256x384xf32> to vector<256x384xbf16>
    %c0_2 = arith.constant 0 : index
    %c0_3 = arith.constant 0 : index
    %c0_4 = arith.constant 0 : index
    %14 = vector.load %arg2[%c0_2, %c0_3, %c0_4] : memref<8x384x128xbf16, #tpu.memory_space<vmem>>, vector<1x384x128xbf16>
    %15 = vector.shape_cast %14 : vector<1x384x128xbf16> to vector<384x128xbf16>
    %cst_5 = arith.constant dense<0.000000e+00> : vector<256x128xf32>
    %16 = tpu.matmul %13, %15, %cst_5 {dimension_numbers = #tpu.dot_dimension_numbers<[1], [0], [0], [1], [0, 0, 1, 1], [], []>} : vector<256x384xbf16>, vector<384x128xbf16>, vector<256x128xf32> -> vector<256x128xf32>
    %c0_6 = arith.constant 0 : index
    %c0_7 = arith.constant 0 : index
    %c0_8 = arith.constant 0 : index
    %17 = vector.load %arg3[%c0_6, %c0_7, %c0_8] : memref<8x1x128xf32, #tpu.memory_space<vmem>>, vector<1x1x128xf32>
    %18 = vector.shape_cast %17 : vector<1x1x128xf32> to vector<1x128xf32>
    %19 = vector.broadcast %18 : vector<1x128xf32> to vector<256x128xf32>
    %20 = arith.addf %16, %19 : vector<256x128xf32>
    %cst_9 = arith.constant 0.000000e+00 : f32
    %21 = vector.broadcast %cst_9 : f32 to vector<256x128xf32>
    %22 = arith.maximumf %20, %21 : vector<256x128xf32>
    %cst_10 = arith.constant 0.000000e+00 : f32
    %23 = vector.broadcast %cst_10 : f32 to vector<256x128xf32>
    %24 = arith.select %6, %22, %23 : vector<256x128xi1>, vector<256x128xf32>
    %25 = vector.extract_strided_slice %24 {offsets = [0, 0], sizes = [255, 128], strides = [1, 1]} : vector<256x128xf32> to vector<255x128xf32>
    %26 = tpu.concatenate %7, %25 in 0 : vector<1x128xf32>, vector<255x128xf32> -> vector<256x128xf32>
    %27 = vector.extract_strided_slice %24 {offsets = [1, 0], sizes = [255, 128], strides = [1, 1]} : vector<256x128xf32> to vector<255x128xf32>
    %28 = tpu.concatenate %27, %7 in 0 : vector<255x128xf32>, vector<1x128xf32> -> vector<256x128xf32>
    %29 = tpu.concatenate %26, %24, %28 in 1 : vector<256x128xf32>, vector<256x128xf32>, vector<256x128xf32> -> vector<256x384xf32>
    %30 = arith.truncf %29 : vector<256x384xf32> to vector<256x384xbf16>
    %c1 = arith.constant 1 : index
    %c0_11 = arith.constant 0 : index
    %c0_12 = arith.constant 0 : index
    %31 = vector.load %arg2[%c1, %c0_11, %c0_12] : memref<8x384x128xbf16, #tpu.memory_space<vmem>>, vector<1x384x128xbf16>
    %32 = vector.shape_cast %31 : vector<1x384x128xbf16> to vector<384x128xbf16>
    %cst_13 = arith.constant dense<0.000000e+00> : vector<256x128xf32>
    %33 = tpu.matmul %30, %32, %cst_13 {dimension_numbers = #tpu.dot_dimension_numbers<[1], [0], [0], [1], [0, 0, 1, 1], [], []>} : vector<256x384xbf16>, vector<384x128xbf16>, vector<256x128xf32> -> vector<256x128xf32>
    %c1_14 = arith.constant 1 : index
    %c0_15 = arith.constant 0 : index
    %c0_16 = arith.constant 0 : index
    %34 = vector.load %arg3[%c1_14, %c0_15, %c0_16] : memref<8x1x128xf32, #tpu.memory_space<vmem>>, vector<1x1x128xf32>
    %35 = vector.shape_cast %34 : vector<1x1x128xf32> to vector<1x128xf32>
    %36 = vector.broadcast %35 : vector<1x128xf32> to vector<256x128xf32>
    %37 = arith.addf %33, %36 : vector<256x128xf32>
    %38 = arith.addf %37, %1 : vector<256x128xf32>
    %cst_17 = arith.constant 0.000000e+00 : f32
    %39 = vector.broadcast %cst_17 : f32 to vector<256x128xf32>
    %40 = arith.cmpf ogt, %38, %39 : vector<256x128xf32>
    %cst_18 = arith.constant 0.00999999977 : f32
    %41 = vector.broadcast %cst_18 : f32 to vector<256x128xf32>
    %42 = arith.mulf %41, %38 : vector<256x128xf32>
    %43 = arith.select %40, %38, %42 : vector<256x128xi1>, vector<256x128xf32>
    %cst_19 = arith.constant 0.000000e+00 : f32
    %44 = vector.broadcast %cst_19 : f32 to vector<256x128xf32>
    %45 = arith.select %6, %43, %44 : vector<256x128xi1>, vector<256x128xf32>
    %46 = vector.extract_strided_slice %45 {offsets = [0, 0], sizes = [255, 128], strides = [1, 1]} : vector<256x128xf32> to vector<255x128xf32>
    %47 = tpu.concatenate %7, %46 in 0 : vector<1x128xf32>, vector<255x128xf32> -> vector<256x128xf32>
    %48 = vector.extract_strided_slice %45 {offsets = [1, 0], sizes = [255, 128], strides = [1, 1]} : vector<256x128xf32> to vector<255x128xf32>
    %49 = tpu.concatenate %48, %7 in 0 : vector<255x128xf32>, vector<1x128xf32> -> vector<256x128xf32>
    %50 = tpu.concatenate %47, %45, %49 in 1 : vector<256x128xf32>, vector<256x128xf32>, vector<256x128xf32> -> vector<256x384xf32>
    %51 = arith.truncf %50 : vector<256x384xf32> to vector<256x384xbf16>
    %c2 = arith.constant 2 : index
    %c0_20 = arith.constant 0 : index
    %c0_21 = arith.constant 0 : index
    %52 = vector.load %arg2[%c2, %c0_20, %c0_21] : memref<8x384x128xbf16, #tpu.memory_space<vmem>>, vector<1x384x128xbf16>
    %53 = vector.shape_cast %52 : vector<1x384x128xbf16> to vector<384x128xbf16>
    %cst_22 = arith.constant dense<0.000000e+00> : vector<256x128xf32>
    %54 = tpu.matmul %51, %53, %cst_22 {dimension_numbers = #tpu.dot_dimension_numbers<[1], [0], [0], [1], [0, 0, 1, 1], [], []>} : vector<256x384xbf16>, vector<384x128xbf16>, vector<256x128xf32> -> vector<256x128xf32>
    %c2_23 = arith.constant 2 : index
    %c0_24 = arith.constant 0 : index
    %c0_25 = arith.constant 0 : index
    %55 = vector.load %arg3[%c2_23, %c0_24, %c0_25] : memref<8x1x128xf32, #tpu.memory_space<vmem>>, vector<1x1x128xf32>
    %56 = vector.shape_cast %55 : vector<1x1x128xf32> to vector<1x128xf32>
    %57 = vector.broadcast %56 : vector<1x128xf32> to vector<256x128xf32>
    %58 = arith.addf %54, %57 : vector<256x128xf32>
    %cst_26 = arith.constant 0.000000e+00 : f32
    %59 = vector.broadcast %cst_26 : f32 to vector<256x128xf32>
    %60 = arith.maximumf %58, %59 : vector<256x128xf32>
    %cst_27 = arith.constant 0.000000e+00 : f32
    %61 = vector.broadcast %cst_27 : f32 to vector<256x128xf32>
    %62 = arith.select %6, %60, %61 : vector<256x128xi1>, vector<256x128xf32>
    %63 = vector.extract_strided_slice %62 {offsets = [0, 0], sizes = [255, 128], strides = [1, 1]} : vector<256x128xf32> to vector<255x128xf32>
    %64 = tpu.concatenate %7, %63 in 0 : vector<1x128xf32>, vector<255x128xf32> -> vector<256x128xf32>
    %65 = vector.extract_strided_slice %62 {offsets = [1, 0], sizes = [255, 128], strides = [1, 1]} : vector<256x128xf32> to vector<255x128xf32>
    %66 = tpu.concatenate %65, %7 in 0 : vector<255x128xf32>, vector<1x128xf32> -> vector<256x128xf32>
    %67 = tpu.concatenate %64, %62, %66 in 1 : vector<256x128xf32>, vector<256x128xf32>, vector<256x128xf32> -> vector<256x384xf32>
    %68 = arith.truncf %67 : vector<256x384xf32> to vector<256x384xbf16>
    %c3 = arith.constant 3 : index
    %c0_28 = arith.constant 0 : index
    %c0_29 = arith.constant 0 : index
    %69 = vector.load %arg2[%c3, %c0_28, %c0_29] : memref<8x384x128xbf16, #tpu.memory_space<vmem>>, vector<1x384x128xbf16>
    %70 = vector.shape_cast %69 : vector<1x384x128xbf16> to vector<384x128xbf16>
    %cst_30 = arith.constant dense<0.000000e+00> : vector<256x128xf32>
    %71 = tpu.matmul %68, %70, %cst_30 {dimension_numbers = #tpu.dot_dimension_numbers<[1], [0], [0], [1], [0, 0, 1, 1], [], []>} : vector<256x384xbf16>, vector<384x128xbf16>, vector<256x128xf32> -> vector<256x128xf32>
    %c3_31 = arith.constant 3 : index
    %c0_32 = arith.constant 0 : index
    %c0_33 = arith.constant 0 : index
    %72 = vector.load %arg3[%c3_31, %c0_32, %c0_33] : memref<8x1x128xf32, #tpu.memory_space<vmem>>, vector<1x1x128xf32>
    %73 = vector.shape_cast %72 : vector<1x1x128xf32> to vector<1x128xf32>
    %74 = vector.broadcast %73 : vector<1x128xf32> to vector<256x128xf32>
    %75 = arith.addf %71, %74 : vector<256x128xf32>
    %76 = arith.addf %75, %45 : vector<256x128xf32>
    %cst_34 = arith.constant 0.000000e+00 : f32
    %77 = vector.broadcast %cst_34 : f32 to vector<256x128xf32>
    %78 = arith.cmpf ogt, %76, %77 : vector<256x128xf32>
    %cst_35 = arith.constant 0.00999999977 : f32
    %79 = vector.broadcast %cst_35 : f32 to vector<256x128xf32>
    %80 = arith.mulf %79, %76 : vector<256x128xf32>
    %81 = arith.select %78, %76, %80 : vector<256x128xi1>, vector<256x128xf32>
    %cst_36 = arith.constant 0.000000e+00 : f32
    %82 = vector.broadcast %cst_36 : f32 to vector<256x128xf32>
    %83 = arith.select %6, %81, %82 : vector<256x128xi1>, vector<256x128xf32>
    %84 = vector.extract_strided_slice %83 {offsets = [0, 0], sizes = [255, 128], strides = [1, 1]} : vector<256x128xf32> to vector<255x128xf32>
    %85 = tpu.concatenate %7, %84 in 0 : vector<1x128xf32>, vector<255x128xf32> -> vector<256x128xf32>
    %86 = vector.extract_strided_slice %83 {offsets = [1, 0], sizes = [255, 128], strides = [1, 1]} : vector<256x128xf32> to vector<255x128xf32>
    %87 = tpu.concatenate %86, %7 in 0 : vector<255x128xf32>, vector<1x128xf32> -> vector<256x128xf32>
    %88 = tpu.concatenate %85, %83, %87 in 1 : vector<256x128xf32>, vector<256x128xf32>, vector<256x128xf32> -> vector<256x384xf32>
    %89 = arith.truncf %88 : vector<256x384xf32> to vector<256x384xbf16>
    %c4 = arith.constant 4 : index
    %c0_37 = arith.constant 0 : index
    %c0_38 = arith.constant 0 : index
    %90 = vector.load %arg2[%c4, %c0_37, %c0_38] : memref<8x384x128xbf16, #tpu.memory_space<vmem>>, vector<1x384x128xbf16>
    %91 = vector.shape_cast %90 : vector<1x384x128xbf16> to vector<384x128xbf16>
    %cst_39 = arith.constant dense<0.000000e+00> : vector<256x128xf32>
    %92 = tpu.matmul %89, %91, %cst_39 {dimension_numbers = #tpu.dot_dimension_numbers<[1], [0], [0], [1], [0, 0, 1, 1], [], []>} : vector<256x384xbf16>, vector<384x128xbf16>, vector<256x128xf32> -> vector<256x128xf32>
    %c4_40 = arith.constant 4 : index
    %c0_41 = arith.constant 0 : index
    %c0_42 = arith.constant 0 : index
    %93 = vector.load %arg3[%c4_40, %c0_41, %c0_42] : memref<8x1x128xf32, #tpu.memory_space<vmem>>, vector<1x1x128xf32>
    %94 = vector.shape_cast %93 : vector<1x1x128xf32> to vector<1x128xf32>
    %95 = vector.broadcast %94 : vector<1x128xf32> to vector<256x128xf32>
    %96 = arith.addf %92, %95 : vector<256x128xf32>
    %cst_43 = arith.constant 0.000000e+00 : f32
    %97 = vector.broadcast %cst_43 : f32 to vector<256x128xf32>
    %98 = arith.maximumf %96, %97 : vector<256x128xf32>
    %cst_44 = arith.constant 0.000000e+00 : f32
    %99 = vector.broadcast %cst_44 : f32 to vector<256x128xf32>
    %100 = arith.select %6, %98, %99 : vector<256x128xi1>, vector<256x128xf32>
    %101 = vector.extract_strided_slice %100 {offsets = [0, 0], sizes = [255, 128], strides = [1, 1]} : vector<256x128xf32> to vector<255x128xf32>
    %102 = tpu.concatenate %7, %101 in 0 : vector<1x128xf32>, vector<255x128xf32> -> vector<256x128xf32>
    %103 = vector.extract_strided_slice %100 {offsets = [1, 0], sizes = [255, 128], strides = [1, 1]} : vector<256x128xf32> to vector<255x128xf32>
    %104 = tpu.concatenate %103, %7 in 0 : vector<255x128xf32>, vector<1x128xf32> -> vector<256x128xf32>
    %105 = tpu.concatenate %102, %100, %104 in 1 : vector<256x128xf32>, vector<256x128xf32>, vector<256x128xf32> -> vector<256x384xf32>
    %106 = arith.truncf %105 : vector<256x384xf32> to vector<256x384xbf16>
    %c5 = arith.constant 5 : index
    %c0_45 = arith.constant 0 : index
    %c0_46 = arith.constant 0 : index
    %107 = vector.load %arg2[%c5, %c0_45, %c0_46] : memref<8x384x128xbf16, #tpu.memory_space<vmem>>, vector<1x384x128xbf16>
    %108 = vector.shape_cast %107 : vector<1x384x128xbf16> to vector<384x128xbf16>
    %cst_47 = arith.constant dense<0.000000e+00> : vector<256x128xf32>
    %109 = tpu.matmul %106, %108, %cst_47 {dimension_numbers = #tpu.dot_dimension_numbers<[1], [0], [0], [1], [0, 0, 1, 1], [], []>} : vector<256x384xbf16>, vector<384x128xbf16>, vector<256x128xf32> -> vector<256x128xf32>
    %c5_48 = arith.constant 5 : index
    %c0_49 = arith.constant 0 : index
    %c0_50 = arith.constant 0 : index
    %110 = vector.load %arg3[%c5_48, %c0_49, %c0_50] : memref<8x1x128xf32, #tpu.memory_space<vmem>>, vector<1x1x128xf32>
    %111 = vector.shape_cast %110 : vector<1x1x128xf32> to vector<1x128xf32>
    %112 = vector.broadcast %111 : vector<1x128xf32> to vector<256x128xf32>
    %113 = arith.addf %109, %112 : vector<256x128xf32>
    %114 = arith.addf %113, %83 : vector<256x128xf32>
    %cst_51 = arith.constant 0.000000e+00 : f32
    %115 = vector.broadcast %cst_51 : f32 to vector<256x128xf32>
    %116 = arith.cmpf ogt, %114, %115 : vector<256x128xf32>
    %cst_52 = arith.constant 0.00999999977 : f32
    %117 = vector.broadcast %cst_52 : f32 to vector<256x128xf32>
    %118 = arith.mulf %117, %114 : vector<256x128xf32>
    %119 = arith.select %116, %114, %118 : vector<256x128xi1>, vector<256x128xf32>
    %cst_53 = arith.constant 0.000000e+00 : f32
    %120 = vector.broadcast %cst_53 : f32 to vector<256x128xf32>
    %121 = arith.select %6, %119, %120 : vector<256x128xi1>, vector<256x128xf32>
    %122 = vector.extract_strided_slice %121 {offsets = [0, 0], sizes = [255, 128], strides = [1, 1]} : vector<256x128xf32> to vector<255x128xf32>
    %123 = tpu.concatenate %7, %122 in 0 : vector<1x128xf32>, vector<255x128xf32> -> vector<256x128xf32>
    %124 = vector.extract_strided_slice %121 {offsets = [1, 0], sizes = [255, 128], strides = [1, 1]} : vector<256x128xf32> to vector<255x128xf32>
    %125 = tpu.concatenate %124, %7 in 0 : vector<255x128xf32>, vector<1x128xf32> -> vector<256x128xf32>
    %126 = tpu.concatenate %123, %121, %125 in 1 : vector<256x128xf32>, vector<256x128xf32>, vector<256x128xf32> -> vector<256x384xf32>
    %127 = arith.truncf %126 : vector<256x384xf32> to vector<256x384xbf16>
    %c6 = arith.constant 6 : index
    %c0_54 = arith.constant 0 : index
    %c0_55 = arith.constant 0 : index
    %128 = vector.load %arg2[%c6, %c0_54, %c0_55] : memref<8x384x128xbf16, #tpu.memory_space<vmem>>, vector<1x384x128xbf16>
    %129 = vector.shape_cast %128 : vector<1x384x128xbf16> to vector<384x128xbf16>
    %cst_56 = arith.constant dense<0.000000e+00> : vector<256x128xf32>
    %130 = tpu.matmul %127, %129, %cst_56 {dimension_numbers = #tpu.dot_dimension_numbers<[1], [0], [0], [1], [0, 0, 1, 1], [], []>} : vector<256x384xbf16>, vector<384x128xbf16>, vector<256x128xf32> -> vector<256x128xf32>
    %c6_57 = arith.constant 6 : index
    %c0_58 = arith.constant 0 : index
    %c0_59 = arith.constant 0 : index
    %131 = vector.load %arg3[%c6_57, %c0_58, %c0_59] : memref<8x1x128xf32, #tpu.memory_space<vmem>>, vector<1x1x128xf32>
    %132 = vector.shape_cast %131 : vector<1x1x128xf32> to vector<1x128xf32>
    %133 = vector.broadcast %132 : vector<1x128xf32> to vector<256x128xf32>
    %134 = arith.addf %130, %133 : vector<256x128xf32>
    %cst_60 = arith.constant 0.000000e+00 : f32
    %135 = vector.broadcast %cst_60 : f32 to vector<256x128xf32>
    %136 = arith.maximumf %134, %135 : vector<256x128xf32>
    %cst_61 = arith.constant 0.000000e+00 : f32
    %137 = vector.broadcast %cst_61 : f32 to vector<256x128xf32>
    %138 = arith.select %6, %136, %137 : vector<256x128xi1>, vector<256x128xf32>
    %139 = vector.extract_strided_slice %138 {offsets = [0, 0], sizes = [255, 128], strides = [1, 1]} : vector<256x128xf32> to vector<255x128xf32>
    %140 = tpu.concatenate %7, %139 in 0 : vector<1x128xf32>, vector<255x128xf32> -> vector<256x128xf32>
    %141 = vector.extract_strided_slice %138 {offsets = [1, 0], sizes = [255, 128], strides = [1, 1]} : vector<256x128xf32> to vector<255x128xf32>
    %142 = tpu.concatenate %141, %7 in 0 : vector<255x128xf32>, vector<1x128xf32> -> vector<256x128xf32>
    %143 = tpu.concatenate %140, %138, %142 in 1 : vector<256x128xf32>, vector<256x128xf32>, vector<256x128xf32> -> vector<256x384xf32>
    %144 = arith.truncf %143 : vector<256x384xf32> to vector<256x384xbf16>
    %c7 = arith.constant 7 : index
    %c0_62 = arith.constant 0 : index
    %c0_63 = arith.constant 0 : index
    %145 = vector.load %arg2[%c7, %c0_62, %c0_63] : memref<8x384x128xbf16, #tpu.memory_space<vmem>>, vector<1x384x128xbf16>
    %146 = vector.shape_cast %145 : vector<1x384x128xbf16> to vector<384x128xbf16>
    %cst_64 = arith.constant dense<0.000000e+00> : vector<256x128xf32>
    %147 = tpu.matmul %144, %146, %cst_64 {dimension_numbers = #tpu.dot_dimension_numbers<[1], [0], [0], [1], [0, 0, 1, 1], [], []>} : vector<256x384xbf16>, vector<384x128xbf16>, vector<256x128xf32> -> vector<256x128xf32>
    %c7_65 = arith.constant 7 : index
    %c0_66 = arith.constant 0 : index
    %c0_67 = arith.constant 0 : index
    %148 = vector.load %arg3[%c7_65, %c0_66, %c0_67] : memref<8x1x128xf32, #tpu.memory_space<vmem>>, vector<1x1x128xf32>
    %149 = vector.shape_cast %148 : vector<1x1x128xf32> to vector<1x128xf32>
    %150 = vector.broadcast %149 : vector<1x128xf32> to vector<256x128xf32>
    %151 = arith.addf %147, %150 : vector<256x128xf32>
    %152 = arith.addf %151, %121 : vector<256x128xf32>
    %cst_68 = arith.constant 0.000000e+00 : f32
    %153 = vector.broadcast %cst_68 : f32 to vector<256x128xf32>
    %154 = arith.cmpf ogt, %152, %153 : vector<256x128xf32>
    %cst_69 = arith.constant 0.00999999977 : f32
    %155 = vector.broadcast %cst_69 : f32 to vector<256x128xf32>
    %156 = arith.mulf %155, %152 : vector<256x128xf32>
    %157 = arith.select %154, %152, %156 : vector<256x128xi1>, vector<256x128xf32>
    %cst_70 = arith.constant 0.000000e+00 : f32
    %158 = vector.broadcast %cst_70 : f32 to vector<256x128xf32>
    %159 = arith.select %6, %157, %158 : vector<256x128xi1>, vector<256x128xf32>
    %160 = vector.shape_cast %159 : vector<256x128xf32> to vector<2x128x128xf32>
    %c0_71 = arith.constant 0 : index
    %c0_72 = arith.constant 0 : index
    %c0_73 = arith.constant 0 : index
    %161 = vector.load %arg4[%c0_71, %c0_72, %c0_73] : memref<2x128x128xf32, #tpu.memory_space<vmem>>, vector<2x128x128xf32>
    tpu.vector_store %arg4[%c0_71, %c0_72, %c0_73], %160 {strides = array<i32>} : memref<2x128x128xf32, #tpu.memory_space<vmem>>, vector<2x128x128xf32>,
    return
  }
  func.func @transform_0(%arg0: i32) -> (i32, i32, i32) {
    %c0_i32 = arith.constant 0 : i32
    %c0_i32_0 = arith.constant 0 : i32
    %c0_i32_1 = arith.constant 0 : i32
    return %arg0, %c0_i32, %c0_i32_0 : i32, i32, i32
  }
  func.func @transform_1(%arg0: i32) -> (i32, i32, i32) {
    %c0_i32 = arith.constant 0 : i32
    %c0_i32_0 = arith.constant 0 : i32
    %c0_i32_1 = arith.constant 0 : i32
    %c0_i32_2 = arith.constant 0 : i32
    return %c0_i32, %c0_i32_0, %c0_i32_1 : i32, i32, i32
  }
  func.func @transform_2(%arg0: i32) -> (i32, i32, i32) {
    %c0_i32 = arith.constant 0 : i32
    %c0_i32_0 = arith.constant 0 : i32
    %c0_i32_1 = arith.constant 0 : i32
    %c0_i32_2 = arith.constant 0 : i32
    return %c0_i32, %c0_i32_0, %c0_i32_1 : i32, i32, i32
  }
  func.func @transform_3(%arg0: i32) -> (i32, i32, i32) {
    %c0_i32 = arith.constant 0 : i32
    %c0_i32_0 = arith.constant 0 : i32
    %c0_i32_1 = arith.constant 0 : i32
    return %arg0, %c0_i32, %c0_i32_0 : i32, i32, i32
  }
}

module attributes {stable_mosaic.version = 11 : i64} {
  func.func @fc_fused_kernel(%arg0: i32, %arg1: i32, %arg2: memref<2x3712xbf16, #tpu.memory_space<vmem>>, %arg3: memref<3712x512xbf16, #tpu.memory_space<vmem>>, %arg4: memref<1x512xf32, #tpu.memory_space<vmem>>, %arg5: memref<512x128xf32, #tpu.memory_space<vmem>>, %arg6: memref<1x2x128xf32, #tpu.memory_space<vmem>>, %arg7: memref<2x512xf32, #tpu.memory_space<vmem>>) attributes {dimension_semantics = [#tpu.dimension_semantics<parallel>, #tpu.dimension_semantics<arbitrary>], iteration_bounds = array<i64: 2, 4>, scalar_prefetch = 0 : i64, scratch_operands = 1 : i64, tpu.core_type = #tpu.core_type<tc>, window_params = [{transform_indices = @transform_0, window_bounds = array<i64: 2, 3712>}, {transform_indices = @transform_1, window_bounds = array<i64: 3712, 512>}, {transform_indices = @transform_2, window_bounds = array<i64: 1, 512>}, {transform_indices = @transform_3, window_bounds = array<i64: 512, 128>}, {transform_indices = @transform_4, window_bounds = array<i64: 1, 2, 128>}]} {
    %c0_i32 = arith.constant 0 : i32
    %0 = arith.cmpi eq, %arg1, %c0_i32 : i32
    %1 = arith.extui %0 : i1 to i32
    %c0_i32_0 = arith.constant 0 : i32
    %2 = arith.cmpi ne, %1, %c0_i32_0 : i32
    scf.if %2 {
      %cst_9 = arith.constant 0.000000e+00 : f32
      %12 = vector.broadcast %cst_9 : f32 to vector<2x512xf32>
      %c0_10 = arith.constant 0 : index
      %c0_11 = arith.constant 0 : index
      %13 = vector.load %arg7[%c0_10, %c0_11] : memref<2x512xf32, #tpu.memory_space<vmem>>, vector<2x512xf32>
      tpu.vector_store %arg7[%c0_10, %c0_11], %12 {strides = array<i32>} : memref<2x512xf32, #tpu.memory_space<vmem>>, vector<2x512xf32>,
    } else {
    }
    %c0 = arith.constant 0 : index
    %c0_1 = arith.constant 0 : index
    %3 = vector.load %arg7[%c0, %c0_1] : memref<2x512xf32, #tpu.memory_space<vmem>>, vector<2x512xf32>
    %c0_2 = arith.constant 0 : index
    %c0_3 = arith.constant 0 : index
    %4 = vector.load %arg2[%c0_2, %c0_3] : memref<2x3712xbf16, #tpu.memory_space<vmem>>, vector<2x3712xbf16>
    %c0_4 = arith.constant 0 : index
    %c0_5 = arith.constant 0 : index
    %5 = vector.load %arg3[%c0_4, %c0_5] : memref<3712x512xbf16, #tpu.memory_space<vmem>>, vector<3712x512xbf16>
    %cst = arith.constant dense<0.000000e+00> : vector<2x512xf32>
    %6 = tpu.matmul %4, %5, %cst {dimension_numbers = #tpu.dot_dimension_numbers<[1], [0], [0], [1], [0, 0, 1, 1], [], []>} : vector<2x3712xbf16>, vector<3712x512xbf16>, vector<2x512xf32> -> vector<2x512xf32>
    %7 = arith.addf %3, %6 : vector<2x512xf32>
    %c0_6 = arith.constant 0 : index
    %c0_7 = arith.constant 0 : index
    %8 = vector.load %arg7[%c0_6, %c0_7] : memref<2x512xf32, #tpu.memory_space<vmem>>, vector<2x512xf32>
    tpu.vector_store %arg7[%c0_6, %c0_7], %7 {strides = array<i32>} : memref<2x512xf32, #tpu.memory_space<vmem>>, vector<2x512xf32>,
    %c3_i32 = arith.constant 3 : i32
    %9 = arith.cmpi eq, %arg1, %c3_i32 : i32
    %10 = arith.extui %9 : i1 to i32
    %c0_i32_8 = arith.constant 0 : i32
    %11 = arith.cmpi ne, %10, %c0_i32_8 : i32
    scf.if %11 {
      %c0_9 = arith.constant 0 : index
      %c0_10 = arith.constant 0 : index
      %12 = vector.load %arg7[%c0_9, %c0_10] : memref<2x512xf32, #tpu.memory_space<vmem>>, vector<2x512xf32>
      %c0_11 = arith.constant 0 : index
      %c0_12 = arith.constant 0 : index
      %13 = vector.load %arg4[%c0_11, %c0_12] : memref<1x512xf32, #tpu.memory_space<vmem>>, vector<1x512xf32>
      %14 = vector.broadcast %13 : vector<1x512xf32> to vector<2x512xf32>
      %15 = arith.addf %12, %14 : vector<2x512xf32>
      %c0_13 = arith.constant 0 : index
      %c0_14 = arith.constant 0 : index
      %16 = vector.load %arg5[%c0_13, %c0_14] : memref<512x128xf32, #tpu.memory_space<vmem>>, vector<512x128xf32>
      %cst_15 = arith.constant dense<0.000000e+00> : vector<2x128xf32>
      %17 = tpu.matmul %15, %16, %cst_15 {dimension_numbers = #tpu.dot_dimension_numbers<[1], [0], [0], [1], [0, 0, 1, 1], [], []>} : vector<2x512xf32>, vector<512x128xf32>, vector<2x128xf32> -> vector<2x128xf32>
      %c0_16 = arith.constant 0 : index
      %c0_17 = arith.constant 0 : index
      %c0_18 = arith.constant 0 : index
      %18 = vector.load %arg6[%c0_16, %c0_17, %c0_18] : memref<1x2x128xf32, #tpu.memory_space<vmem>>, vector<1x2x128xf32>
      %19 = vector.shape_cast %18 : vector<1x2x128xf32> to vector<2x128xf32>
      %20 = vector.shape_cast %17 : vector<2x128xf32> to vector<1x2x128xf32>
      tpu.vector_store %arg6[%c0_16, %c0_17, %c0_18], %20 {strides = array<i32>} : memref<1x2x128xf32, #tpu.memory_space<vmem>>, vector<1x2x128xf32>,
    } else {
    }
    return
  }
  func.func @transform_0(%arg0: i32, %arg1: i32) -> (i32, i32) {
    %c0_i32 = arith.constant 0 : i32
    %c0_i32_0 = arith.constant 0 : i32
    return %c0_i32, %arg1 : i32, i32
  }
  func.func @transform_1(%arg0: i32, %arg1: i32) -> (i32, i32) {
    %c0_i32 = arith.constant 0 : i32
    return %arg1, %arg0 : i32, i32
  }
  func.func @transform_2(%arg0: i32, %arg1: i32) -> (i32, i32) {
    %c0_i32 = arith.constant 0 : i32
    %c0_i32_0 = arith.constant 0 : i32
    return %c0_i32, %arg0 : i32, i32
  }
  func.func @transform_3(%arg0: i32, %arg1: i32) -> (i32, i32) {
    %c0_i32 = arith.constant 0 : i32
    %c0_i32_0 = arith.constant 0 : i32
    return %arg0, %c0_i32 : i32, i32
  }
  func.func @transform_4(%arg0: i32, %arg1: i32) -> (i32, i32, i32) {
    %c0_i32 = arith.constant 0 : i32
    %c0_i32_0 = arith.constant 0 : i32
    %c0_i32_1 = arith.constant 0 : i32
    return %arg0, %c0_i32, %c0_i32_0 : i32, i32, i32
  }
}

</mosaic_0001>

<bundles_post_ra>
// kernel: forward.2
= control target key start
LH: loop header
LB: loop body
LE: loop exit
PB: predicated region body
PF: predicated region fallthrough
CT: control target
= control target key end

     0   :  { %8 = vsyncpa [#allocation3], 0  ;;  %s11752_s0 = inlined_call_operand.vmem [shape: f32[2,128,128], index: 0, kind: input, shape index: {}]   ;;  %s11753_s1 = inlined_call_operand.hbm [shape: bf16[8,384,128], index: 1, kind: input, shape index: {}]   ;;  %s11754_s2 = inlined_call_operand.hbm [shape: f32[8,1,128], index: 2, kind: input, shape index: {}]   ;;  %s11755_s3 = inlined_call_operand.vmem [shape: f32[2,128,128], index: 3, kind: output, shape index: {}]  }
   0x1   :  { %9 = vsyncpa [#allocation5], 0  ;;  %s9478_s12 = smov [#allocation2]   ;;  %s9430_s16 = scalar_lea.hbm %s11753_s1, 24576 }
   0x2   :  { %s17_s13 = sshll.u32 %s9478_s12, 4  ;;  %p9431_p0 = scmp.ne.s32.totalorder %s11753_s1, %s9430_s16  ;;  %s18_s13 = int_to_ptr.vmem [resolvable:$true] %s17_s13 }
   0x3   :  { %p9434_p1 = scmp.lt.u32.totalorder %s9430_s16, %s11753_s1 }
   0x5   :  { %p9436_p2 = pnand %p9434_p1, %p9431_p0 }
   0x7   :  { %9439 = shalt.err (!%p9436_p2)
}
   0x8   :  { %s9440_s21 = scalar_lea.vmem %s18_s13, 24576  ;;  %p9445_p4 = scmp.lt.s32.totalorder %s18_s13, %s18_s13 }
   0x9   :  { %p9441_p3 = scmp.ne.s32.totalorder %s18_s13, %s9440_s21  ;;  %p9446_p5 = scmp.lt.s32.totalorder %s9440_s21, %s9440_s21 }
   0xb   :  { %p9447_p6 = por %p9446_p5, %p9445_p4 }
   0xd   :  { %p9448_p7 = pnand %p9447_p6, %p9441_p3 }
   0xf   :  { %9451 = shalt.err (!%p9448_p7)
}
  0x10   :  { %s9479_s22 = smov 64   ;;  %s9480_s23 = smov 4  }
  0x11   :  { %23 = dma.hbm_to_vmem [thread:$0]  %s11753_s1, 24576, %s18_s13, [#allocation3], %s9479_s22, %s9479_s22, %s9480_s23  }
  0x12   :  { %s9481_s26 = smov [#allocation4]   ;;  %s9452_s30 = scalar_lea.hbm %s11754_s2, 128 }
  0x13   :  { %s29_s27 = sshll.u32 %s9481_s26, 4  ;;  %p9453_p8 = scmp.ne.s32.totalorder %s11754_s2, %s9452_s30  ;;  %s30_s27 = int_to_ptr.vmem [resolvable:$true] %s29_s27 }
  0x14   :  { %p9456_p9 = scmp.lt.u32.totalorder %s9452_s30, %s11754_s2 }
  0x16   :  { %p9458_p10 = pnand %p9456_p9, %p9453_p8 }
  0x18   :  { %9461 = shalt.err (!%p9458_p10)
}
  0x19   :  { %s9462_s8 = scalar_lea.vmem %s30_s27, 128  ;;  %p9467_p12 = scmp.lt.s32.totalorder %s30_s27, %s30_s27 }
  0x1a   :  { %p9463_p11 = scmp.ne.s32.totalorder %s30_s27, %s9462_s8  ;;  %p9468_p13 = scmp.lt.s32.totalorder %s9462_s8, %s9462_s8 }
  0x1c   :  { %p9469_p0 = por %p9468_p13, %p9467_p12 }
  0x1e   :  { %p9470_p1 = pnand %p9469_p0, %p9463_p11 }
  0x20   :  { %9473 = shalt.err (!%p9470_p1)
}
  0x21   :  { %s9482_s1 = smov 16   ;;  %s9483_s9 = smov 1  }
  0x22   :  { %35 = dma.hbm_to_vmem [thread:$0]  %s11754_s2, 128, %s30_s27, [#allocation5], %s9482_s1, %s9482_s1, %s9483_s9  }
  0x23   :  { %9474 = dma.done.wait [#allocation3], 24576  }
  0x24   :  { %9475 = vsyncadd [#allocation3], 4294942720 }
  0x25   :  { %9476 = dma.done.wait [#allocation5], 128  }
  0x26   :  { %9477 = vsyncadd [#allocation5], 4294967168  ;;  %v9202_v0 = vld [vmem:[#allocation2 + $0x40] sm:$0xff]   ;;  %v9204_v2 = vld [vmem:[#allocation2 + $0x48] sm:$0xff]   ;;  %vm204_vm0 = vcmask 1040384   ;;  %vm301_vm1 = vcmask 1046528  }
  0x27   :  { %v9203_v1 = vld [vmem:[#allocation2] sm:$0xff]   ;;  %7722 = vmatprep.subr.bf16.mxu0 %v9202_v0  ;;  %v9206_v4 = vld [vmem:[#allocation2 + $0x8] sm:$0xff]   ;;  %v9207_v5 = vld [vmem:[#allocation2 + $0x50] sm:$0xff]   ;;  %vm9484_vm3 = vmmov 1  }
  0x28   :  { %7723 = vmatpush3.bf16.msra.mxu0 %v9203_v1  ;;  %v9205_v3 = vld [vmem:[#allocation2 + $0x80] sm:$0xff]   ;;  %v9208_v6 = vld [vmem:[#allocation2 + $0x88] sm:$0xff]   ;;  %v9209_v7 = vld [vmem:[#allocation2 + $0x10] sm:$0xff]  }
  0x29   :  { %7724 = vmatprep.subr.bf16.mxu0 %v9204_v2  ;;  %8810 = vmatprep.subr.bf16.mxu1 %v9205_v3  ;;  %v9210_v8 = vld [vmem:[#allocation2 + $0x58] sm:$0xff]   ;;  %v9211_v9 = vld [vmem:[#allocation2 + $0x90] sm:$0xff]   ;;  %v9213_v11 = vld [vmem:[#allocation2 + $0x60] sm:$0xff]  }
  0x2a   :  { %8811 = vmatpush3.bf16.msra.mxu1 %v9205_v3  ;;  %v9212_v10 = vld [vmem:[#allocation2 + $0x18] sm:$0xff]   ;;  %v9215_v13 = vld [vmem:[#allocation2 + $0x20] sm:$0xff]   ;;  %v9216_v15 = vld [vmem:[#allocation2 + $0x68] sm:$0xff]  }
  0x2b   :  { %8812 = vmatprep.subr.bf16.mxu1 %v9208_v6  ;;  %v9214_v12 = vld [vmem:[#allocation2 + $0x98] sm:$0xff]   ;;  %v9217_v14 = vld [vmem:[#allocation2 + $0xa0] sm:$0xff]   ;;  %v9218_v16 = vld [vmem:[#allocation2 + $0x28] sm:$0xff]  }
  0x2c   :  { %7725 = vmatpush3.bf16.msra.mxu0 %v9206_v4  ;;  %v9220_v17 = vld [vmem:[#allocation2 + $0xa8] sm:$0xff]   ;;  %v9219_v18 = vld [vmem:[#allocation2 + $0x70] sm:$0xff]   ;;  %v43_v21 = vld [vmem:[%s11752_s0] sm:$0xff] }
  0x2d   :  { %7726 = vmatprep.subr.bf16.mxu0 %v9207_v5  ;;  %v9221_v19 = vld [vmem:[#allocation2 + $0x30] sm:$0xff]   ;;  %v44_v22 = vld [vmem:[%s11752_s0 + $0x8] sm:$0xff]  ;;  %v9222_v23 = vld [vmem:[#allocation2 + $0x78] sm:$0xff]   ;;  %v205_v24 = vrot.slane %v43_v21, 7  ;;  %v302_v28 = vrot.slane %v43_v21, 1 }
  0x2e   :  { %8813 = vmatpush3.bf16.msra.mxu1 %v9208_v6  ;;  %v9223_v20 = vld [vmem:[#allocation2 + $0xb0] sm:$0xff]   ;;  %v206_v25 = vrot.slane %v44_v22, 7  ;;  %v399_v26 = vpack.c.bf16 %v44_v22, %v43_v21  ;;  %v303_v29 = vrot.slane %v44_v22, 1  ;;  %v9542_v31 = vld [vmem:[%s11752_s0 + $0x18] sm:$0xff]  ;;  %v9547_v32 = vld [vmem:[%s11752_s0 + $0x20] sm:$0xff] }
  0x2f   :  { %8814 = vmatprep.subr.bf16.mxu1 %v9211_v9  ;;  %v45_v27 = vld [vmem:[%s11752_s0 + $0x10] sm:$0xff]  ;;  %v307_v34 = vrot.slane %v9542_v31, 1  ;;  %v309_v35 = vrot.slane %v9547_v32, 1  ;;  %v9224_v36 = vld [vmem:[#allocation2 + $0x38] sm:$0xff]   ;;  %vm7491_vm2 = vmneg %vm204_vm0  ;;  %v210_v51 = vrot.slane %v9542_v31, 7 }
  0x30   :  { %7727 = vmatpush3.bf16.msra.mxu0 %v9209_v7  ;;  %v305_v30 = vrot.slane %v45_v27, 1  ;;  %677 = vmatprep.mubr.bf16.mxu0 %v399_v26  ;;  %v207_v33 = vsel %vm204_vm0, %v205_v24, %v206_v25  ;;  %v9225_v37 = vld [vmem:[#allocation2 + $0xb8] sm:$0xff]   ;;  %v304_v38 = vsel %vm301_vm1, %v302_v28, %v303_v29  ;;  %v9557_v40 = vld [vmem:[%s11752_s0 + $0x30] sm:$0xff]  ;;  %v9563_v43 = vld [vmem:[%s11752_s0 + $0x28] sm:$0xff]  ;;  %v402_v49 = vpack.c.bf16 %v9542_v31, %v45_v27 }
  0x31   :  { %7728 = vmatprep.subr.bf16.mxu0 %v9210_v8  ;;  %v7493_v42 = vpack.c.bf16 %v207_v33, %v205_v24  ;;  %v310_v45 = vsel %vm301_vm1, %v307_v34, %v309_v35  ;;  %v311_v46 = vrot.slane %v9563_v43, 1  ;;  %v313_v47 = vrot.slane %v9557_v40, 1  ;;  %vm9570_vm4 = vmpackc.low %vm9484_vm3, %vm7491_vm2  ;;  %v9579_v52 = vld [vmem:[%s11752_s0 + $0x38] sm:$0xff]  ;;  %v9584_v53 = vld [vmem:[%s11752_s0 + $0x40] sm:$0xff] }
  0x32   :  { %8815 = vmatpush3.bf16.msra.mxu1 %v9211_v9  ;;  %v306_v39 = vsel %vm301_vm1, %v303_v29, %v305_v30  ;;  %v308_v44 = vsel %vm301_vm1, %v305_v30, %v307_v34  ;;  %v208_v50 = vrot.slane %v45_v27, 7  ;;  %v9591_v56 = vld [vmem:[%s11752_s0 + $0x50] sm:$0xff]  ;;  %v315_v59 = vrot.slane %v9579_v52, 1  ;;  %v9600_v61 = vld [vmem:[%s11752_s0 + $0x48] sm:$0xff]  ;;  %v9609_v2 = vld [vmem:[%s11752_s0 + $0x58] sm:$0xff] }
  0x33   :  { %8816 = vmatprep.subr.bf16.mxu1 %v9214_v12  ;;  %v400_v41 = vpack.c.bf16 %v306_v39, %v304_v38  ;;  %v312_v54 = vsel %vm301_vm1, %v309_v35, %v311_v46  ;;  %v314_v55 = vsel %vm301_vm1, %v311_v46, %v313_v47  ;;  %v403_v57 = vpack.c.bf16 %v310_v45, %v308_v44  ;;  %v9614_v3 = vld [vmem:[%s11752_s0 + $0x60] sm:$0xff]  ;;  %v9227_v5 = vld [vmem:[#allocation2 + $0x148] sm:$0xff]   ;;  %v9228_v22 = vld [vmem:[#allocation2 + $0x150] sm:$0xff]  }
  0x34   :  { %7729 = vmatpush3.bf16.msra.mxu0 %v9212_v10  ;;  %v406_v58 = vpack.c.bf16 %v314_v55, %v312_v54  ;;  %v317_v60 = vrot.slane %v9584_v53, 1  ;;  %v209_v62 = vsel %vm204_vm0, %v206_v25, %v208_v50  ;;  %v211_v63 = vsel %vm204_vm0, %v208_v50, %v210_v51  ;;  %v9226_v4 = vld [vmem:[#allocation2 + $0x140] sm:$0xff]   ;;  %v9643_v27 = vld [vmem:[%s11752_s0 + $0x78] sm:$0xff]  ;;  %v9232_v28 = vld [vmem:[#allocation2 + $0x108] sm:$0xff]  }
  0x35   :  { %7730 = vmatprep.subr.bf16.mxu0 %v9213_v11  ;;  %8826 = vmatprep.mubr.bf16.mxu1 %v400_v41  ;;  %v319_v0 = vrot.slane %v9600_v61, 1  ;;  %v321_v1 = vrot.slane %v9591_v56, 1  ;;  %v401_v6 = vpack.c.bf16 %v211_v63, %v209_v62  ;;  %v405_v7 = vpack.c.bf16 %v9563_v43, %v9547_v32  ;;  %v9233_v33 = vld [vmem:[#allocation2 + $0xc8] sm:$0xff]   ;;  %v9229_v35 = vld [vmem:[#allocation2 + $0x158] sm:$0xff]   ;;  %v9660_v41 = vld [vmem:[%s11752_s0 + $0x90] sm:$0xff] }
  0x36   :  { %8817 = vmatpush3.bf16.msra.mxu1 %v9214_v12  ;;  %v316_v8 = vsel %vm301_vm1, %v313_v47, %v315_v59  ;;  %v318_v9 = vsel %vm301_vm1, %v315_v59, %v317_v60  ;;  %v212_v10 = vrot.slane %v9547_v32, 7  ;;  %v214_v11 = vrot.slane %v9563_v43, 7  ;;  %v9651_v32 = vld [vmem:[%s11752_s0 + $0x80] sm:$0xff]  ;;  %v9672_v47 = vld [vmem:[%s11752_s0 + $0x88] sm:$0xff]  ;;  %v9680_v54 = vld [vmem:[%s11752_s0 + $0x98] sm:$0xff] }
  0x37   :  { %8818 = vmatprep.subr.bf16.mxu1 %v9217_v14  ;;  %v320_v12 = vsel %vm301_vm1, %v317_v60, %v319_v0  ;;  %v216_v29 = vrot.slane %v9557_v40, 7  ;;  %v218_v30 = vrot.slane %v9579_v52, 7  ;;  %v220_v31 = vrot.slane %v9584_v53, 7  ;;  %v9237_v55 = vld [vmem:[#allocation2 + $0x118] sm:$0xff]   ;;  %v9687_v60 = vld [vmem:[%s11752_s0 + $0xa0] sm:$0xff]  ;;  %vm9831_vm5 = vmpackc.low %vm301_vm1, %vm9484_vm3 }
  0x38   :  { %7731 = vmatpush3.bf16.msra.mxu0 %v9215_v13  ;;  %v322_v13 = vsel %vm301_vm1, %v319_v0, %v321_v1  ;;  %v213_v24 = vsel %vm204_vm0, %v210_v51, %v212_v10  ;;  %v215_v25 = vsel %vm204_vm0, %v212_v10, %v214_v11  ;;  %v222_v34 = vrot.slane %v9600_v61, 7  ;;  %v9234_v62 = vld [vmem:[#allocation2 + $0x160] sm:$0xff]   ;;  %v9701_v10 = vld [vmem:[%s11752_s0 + $0xa8] sm:$0xff] }
  0x39   :  { %7732 = vmatprep.subr.bf16.mxu0 %v9216_v15  ;;  %v9230_v15 = vld [vmem:[#allocation2 + $0x100] sm:$0xff]   ;;  %v224_v39 = vrot.slane %v9591_v56, 7  ;;  %v408_v43 = vpack.c.bf16 %v9579_v52, %v9557_v40  ;;  %v226_v44 = vrot.slane %v9609_v2, 7  ;;  %v228_v50 = vrot.slane %v9614_v3, 7 }
  0x3a   :  { %8819 = vmatpush3.bf16.msra.mxu1 %v9217_v14  ;;  %v9627_v14 = vld [vmem:[%s11752_s0 + $0x68] sm:$0xff]  ;;  %v331_v40 = vrot.slane %v9643_v27, 1  ;;  %v333_v59 = vrot.slane %v9651_v32, 1  ;;  %v219_v63 = vsel %vm204_vm0, %v216_v29, %v218_v30 }
  0x3b   :  { %8820 = vmatprep.subr.bf16.mxu1 %v9220_v17  ;;  %v327_v21 = vrot.slane %v9627_v14, 1  ;;  %v230_v51 = vrot.slane %v9627_v14, 7 }
  0x3c   :  { %7733 = vmatpush3.bf16.msra.mxu0 %v9218_v16  ;;  %v323_v16 = vrot.slane %v9609_v2, 1 }
  0x3d   :  { %7734 = vmatprep.subr.bf16.mxu0 %v9219_v18  ;;  %v9634_v18 = vld [vmem:[%s11752_s0 + $0x70] sm:$0xff] }
  0x3e   :  { %8821 = vmatpush3.bf16.msra.mxu1 %v9220_v17  ;;  %v325_v17 = vrot.slane %v9614_v3, 1  ;;  %v329_v26 = vrot.slane %v9634_v18, 1 }
  0x3f   :  { %8822 = vmatprep.subr.bf16.mxu1 %v9223_v20 }
  0x40   :  { %7735 = vmatpush3.bf16.msra.mxu0 %v9221_v19  ;;  %v9231_v19 = vld [vmem:[#allocation2 + $0xc0] sm:$0xff]   ;;  %v326_v38 = vsel %vm301_vm1, %v323_v16, %v325_v17  ;;  %v328_v45 = vsel %vm301_vm1, %v325_v17, %v327_v21  ;;  %v330_v46 = vsel %vm301_vm1, %v327_v21, %v329_v26  ;;  %v334_v21 = vsel %vm301_vm1, %v331_v40, %v333_v59 }
  0x41   :  { %7736 = vmatprep.subr.bf16.mxu0 %v9222_v23  ;;  %v412_v23 = vpack.c.bf16 %v322_v13, %v320_v12  ;;  %v418_v0 = vpack.c.bf16 %v330_v46, %v328_v45  ;;  %v9240_v12 = vld [vmem:[#allocation2 + $0x120] sm:$0xff]  }
  0x42   :  { %8823 = vmatpush3.bf16.msra.mxu1 %v9223_v20  ;;  %v409_v20 = vpack.c.bf16 %v318_v9, %v316_v8  ;;  %v236_v8 = vrot.slane %v9651_v32, 7  ;;  %v238_v9 = vrot.slane %v9672_v47, 7  ;;  %v9717_v17 = vld [vmem:[%s11752_s0 + $0xc0] sm:$0xff] }
  0x43   :  { %8824 = vmatprep.subr.bf16.mxu1 %v9225_v37  ;;  %v349_v46 = vrot.slane %v9717_v17, 1 }
  0x44   :  { %7737 = vmatpush3.bf16.msra.mxu0 %v9224_v36  ;;  %v404_v36 = vpack.c.bf16 %v215_v25, %v213_v24  ;;  %v411_v24 = vpack.c.bf16 %v9600_v61, %v9584_v53  ;;  %v9752_v53 = vld [vmem:[%s11752_s0 + $0xd0] sm:$0xff] }
  0x45   :  { %8858 = vmatprep.subr.bf16.mxu0 %v9226_v4 }
  0x46   :  { %8825 = vmatpush3.bf16.msra.mxu1 %v9225_v37  ;;  %v324_v37 = vsel %vm301_vm1, %v321_v1, %v323_v16  ;;  %v232_v1 = vrot.slane %v9634_v18, 7  ;;  %v9712_v16 = vld [vmem:[%s11752_s0 + $0xb8] sm:$0xff] }
  0x47   :  { %7494 = vmatmul.mubr.msk.bf16.vlgmr.msra.gmra.mrb[0].mxu0 %vm9570_vm4, %v7493_v42  ;;  %7858 = vmatprep.subr.bf16.mxu1 %v9230_v15  ;;  %v9235_v42 = vld [vmem:[#allocation2 + $0x110] sm:$0xff]   ;;  %v339_v15 = vrot.slane %v9680_v54, 1  ;;  %v347_v45 = vrot.slane %v9712_v16, 1 }
  0x48   :  { %685 = vmatprep.mubr.bf16.mxu0 %v402_v49  ;;  %8859 = vmatpush3.bf16.msra.mxu0 %v9226_v4  ;;  %v9236_v49 = vld [vmem:[#allocation2 + $0xd0] sm:$0xff]   ;;  %v335_v4 = vrot.slane %v9672_v47, 1 }
  0x49   :  { %8827 = vmatmul.mubr.bf16.vlgmr.msra.gmra.mrb[0].mxu1 %v403_v57  ;;  %8860 = vmatprep.subr.bf16.mxu0 %v9227_v5  ;;  %v217_v57 = vsel %vm204_vm0, %v214_v11, %v216_v29  ;;  %v9706_v11 = vld [vmem:[%s11752_s0 + $0xb0] sm:$0xff]  ;;  %v223_v29 = vsel %vm204_vm0, %v220_v31, %v222_v34 }
  0x4a   :  { %8830 = vmatprep.mubr.bf16.mxu1 %v406_v58  ;;  %7859 = vmatpush3.bf16.msra.mxu1 %v9231_v19  ;;  %v415_v58 = vpack.c.bf16 %v326_v38, %v324_v37  ;;  %v407_v13 = vpack.c.bf16 %v219_v63, %v217_v57  ;;  %v9239_v19 = vld [vmem:[#allocation2 + $0x168] sm:$0xff]   ;;  %v336_v25 = vsel %vm301_vm1, %v333_v59, %v335_v4  ;;  %v246_v37 = vrot.slane %v9701_v10, 7 }
  0x4b   :  { %7860 = vmatprep.subr.bf16.mxu1 %v9232_v28  ;;  %v343_v38 = vrot.slane %v9701_v10, 1  ;;  %v345_v52 = vrot.slane %v9706_v11, 1  ;;  %v414_v57 = vpack.c.bf16 %v9609_v2, %v9591_v56  ;;  %v250_v63 = vrot.slane %v9712_v16, 7 }
  0x4c   :  { %8861 = vmatpush3.bf16.msra.mxu0 %v9227_v5  ;;  %v337_v5 = vrot.slane %v9660_v41, 1  ;;  %v229_v56 = vsel %vm204_vm0, %v226_v44, %v228_v50 }
  0x4d   :  { %8862 = vmatprep.subr.bf16.mxu0 %v9228_v22 }
  0x4e   :  { %7861 = vmatpush3.bf16.msra.mxu1 %v9233_v33  ;;  %v338_v28 = vsel %vm301_vm1, %v335_v4, %v337_v5  ;;  %v242_v33 = vrot.slane %v9680_v54, 7  ;;  %v9785_v4 = vld [vmem:[%s11752_s0 + $0xf8] sm:$0xff] }
  0x4f   :  { %686 = vmatmul.mubr.bf16.gmra.mrb[4].mxu0 %v401_v6  ;;  %7862 = vmatprep.subr.bf16.mxu1 %v9235_v42  ;;  %v9238_v6 = vld [vmem:[#allocation2 + $0xd8] sm:$0xff]   ;;  %v9241_v42 = vld [vmem:[#allocation2 + $0xe0] sm:$0xff]  }
  0x50   :  { %693 = vmatprep.mubr.bf16.mxu0 %v405_v7  ;;  %8863 = vmatpush3.bf16.msra.mxu0 %v9228_v22  ;;  %v234_v7 = vrot.slane %v9643_v27, 7  ;;  %v341_v22 = vrot.slane %v9687_v60, 1 }
  0x51   :  { %8831 = vmatmul.mubr.bf16.gmra.mrb[4].mxu1 %v409_v20  ;;  %8864 = vmatprep.subr.bf16.mxu0 %v9229_v35  ;;  %v332_v20 = vsel %vm301_vm1, %v329_v26, %v331_v40  ;;  %v221_v26 = vsel %vm204_vm0, %v218_v30, %v220_v31  ;;  %v9747_v30 = vld [vmem:[%s11752_s0 + $0xc8] sm:$0xff]  ;;  %v9757_v31 = vld [vmem:[%s11752_s0 + $0xd8] sm:$0xff] }
  0x52   :  { %8834 = vmatprep.mubr.bf16.mxu1 %v412_v23  ;;  %7863 = vmatpush3.bf16.msra.mxu1 %v9236_v49  ;;  %v240_v23 = vrot.slane %v9660_v41, 7  ;;  %v9764_v49 = vld [vmem:[%s11752_s0 + $0xe0] sm:$0xff]  ;;  %v9769_v40 = vld [vmem:[%s11752_s0 + $0xe8] sm:$0xff]  ;;  %v342_v59 = vsel %vm301_vm1, %v339_v15, %v341_v22 }
  0x53   :  { %7864 = vmatprep.subr.bf16.mxu1 %v9237_v55  ;;  %v410_v55 = vpack.c.bf16 %v223_v29, %v221_v26  ;;  %v363_v26 = vrot.slane %v9785_v4, 1  ;;  %v227_v29 = vsel %vm204_vm0, %v224_v39, %v226_v44 }
  0x54   :  { %8865 = vmatpush3.bf16.msra.mxu0 %v9229_v35  ;;  %v244_v35 = vrot.slane %v9687_v60, 7 }
  0x55   :  { %8866 = vmatprep.subr.bf16.mxu0 %v9234_v62 }
  0x56   :  { %7865 = vmatpush3.bf16.msra.mxu1 %v9238_v6  ;;  %v252_v6 = vrot.slane %v9717_v17, 7 }
  0x57   :  { %694 = vmatmul.mubr.bf16.gmra.mrb[8].mxu0 %v404_v36  ;;  %7866 = vmatprep.subr.bf16.mxu1 %v9240_v12  ;;  %v421_v36 = vpack.c.bf16 %v334_v21, %v332_v20  ;;  %v353_v12 = vrot.slane %v9752_v53, 1  ;;  %v357_v20 = vrot.slane %v9764_v49, 1  ;;  %v359_v21 = vrot.slane %v9769_v40, 1 }
  0x58   :  { %701 = vmatprep.mubr.bf16.mxu0 %v408_v43  ;;  %8867 = vmatpush3.bf16.msra.mxu0 %v9234_v62  ;;  %v424_v43 = vpack.c.bf16 %v338_v28, %v336_v25  ;;  %v248_v62 = vrot.slane %v9706_v11, 7 }
  0x59   :  { %8835 = vmatmul.mubr.bf16.gmra.mrb[8].mxu1 %v415_v58  ;;  %8868 = vmatprep.subr.bf16.mxu0 %v9239_v19  ;;  %v340_v58 = vsel %vm301_vm1, %v337_v5, %v339_v15  ;;  %v351_v5 = vrot.slane %v9747_v30, 1  ;;  %v344_v15 = vsel %vm301_vm1, %v341_v22, %v343_v38  ;;  %v225_v22 = vsel %vm204_vm0, %v222_v34, %v224_v39 }
  0x5a   :  { %8838 = vmatprep.mubr.bf16.mxu1 %v418_v0  ;;  %v9780_v0 = vld [vmem:[%s11752_s0 + $0xf0] sm:$0xff]  ;;  %7867 = vmatpush3.bf16.msra.mxu1 %v9241_v42  ;;  %v350_v42 = vsel %vm301_vm1, %v347_v45, %v349_v46  ;;  %v231_v39 = vsel %vm204_vm0, %v228_v50, %v230_v51  ;;  %v360_v2 = vsel %vm301_vm1, %v357_v20, %v359_v21 }
  0x5b   :  { %v361_v28 = vrot.slane %v9780_v0, 1  ;;  %v352_v61 = vsel %vm301_vm1, %v349_v46, %v351_v5  ;;  %v354_v34 = vsel %vm301_vm1, %v351_v5, %v353_v12  ;;  %v233_v50 = vsel %vm204_vm0, %v230_v51, %v232_v1 }
  0x5c   :  { %8869 = vmatpush3.bf16.msra.mxu0 %v9239_v19  ;;  %v346_v19 = vsel %vm301_vm1, %v343_v38, %v345_v52  ;;  %v348_v38 = vsel %vm301_vm1, %v345_v52, %v347_v45  ;;  %v416_v52 = vpack.c.bf16 %v231_v39, %v229_v56  ;;  %v9249_v56 = vld [vmem:[#allocation2 + $0x178] sm:$0xff]  }
  0x5d   :  { %v430_v25 = vpack.c.bf16 %v346_v19, %v344_v15  ;;  %v362_v44 = vsel %vm301_vm1, %v359_v21, %v361_v28  ;;  %v364_v15 = vsel %vm301_vm1, %v361_v28, %v363_v26  ;;  %v423_v19 = vpack.c.bf16 %v9672_v47, %v9651_v32  ;;  %v9246_v28 = vld [vmem:[#allocation2 + $0xf0] sm:$0xff]  }
  0x5e   :  { %v442_v5 = vpack.c.bf16 %v362_v44, %v360_v2  ;;  %v243_v32 = vsel %vm204_vm0, %v240_v23, %v242_v33  ;;  %v245_v47 = vsel %vm204_vm0, %v242_v33, %v244_v35  ;;  %v254_v21 = vrot.slane %v9747_v30, 7 }
  0x5f   :  { %702 = vmatmul.mubr.bf16.gmra.mrb[12].mxu0 %v407_v13  ;;  %v355_v13 = vrot.slane %v9757_v31, 1 }
  0x60   :  { %709 = vmatprep.mubr.bf16.mxu0 %v411_v24  ;;  %v427_v24 = vpack.c.bf16 %v342_v59, %v340_v58  ;;  %v420_v58 = vpack.c.bf16 %v9643_v27, %v9634_v18  ;;  %v239_v18 = vsel %vm204_vm0, %v236_v8, %v238_v9  ;;  %v241_v27 = vsel %vm204_vm0, %v238_v9, %v240_v23 }
  0x61   :  { %8839 = vmatmul.mubr.bf16.gmra.mrb[12].mxu1 %v421_v36  ;;  %v413_v36 = vpack.c.bf16 %v227_v29, %v225_v22  ;;  %v356_v45 = vsel %vm301_vm1, %v353_v12, %v355_v13  ;;  %v358_v46 = vsel %vm301_vm1, %v355_v13, %v357_v20  ;;  %v235_v12 = vsel %vm204_vm0, %v232_v1, %v234_v7  ;;  %v9248_v29 = vld [vmem:[#allocation2 + $0xf8] sm:$0xff]  }
  0x62   :  { %8842 = vmatprep.mubr.bf16.mxu1 %v424_v43  ;;  %v417_v43 = vpack.c.bf16 %v9627_v14, %v9614_v3  ;;  %v439_v59 = vpack.c.bf16 %v358_v46, %v356_v45  ;;  %v419_v13 = vpack.c.bf16 %v235_v12, %v233_v50  ;;  %v7496_v20 = vpack.c.bf16 %v363_v26, %v364_v15  ;;  %v9933_v45 = vld [vmem:[#allocation4] ss:$0 sm:$0xff] }
  0x63   :  { %v237_v14 = vsel %vm204_vm0, %v234_v7, %v236_v8  ;;  %v426_v1 = vpack.c.bf16 %v9680_v54, %v9660_v41  ;;  %v425_v7 = vpack.c.bf16 %v243_v32, %v241_v27  ;;  %v429_v8 = vpack.c.bf16 %v9701_v10, %v9687_v60 }
  0x64   :  { %v422_v51 = vpack.c.bf16 %v239_v18, %v237_v14  ;;  %v247_v41 = vsel %vm204_vm0, %v244_v35, %v246_v37  ;;  %v432_v23 = vpack.c.bf16 %v9712_v16, %v9706_v11  ;;  %v249_v54 = vsel %vm204_vm0, %v246_v37, %v248_v62 }
  0x65   :  { %v428_v9 = vpack.c.bf16 %v247_v41, %v245_v47  ;;  %v251_v60 = vsel %vm204_vm0, %v248_v62, %v250_v63  ;;  %v435_v35 = vpack.c.bf16 %v9747_v30, %v9717_v17  ;;  %v253_v10 = vsel %vm204_vm0, %v250_v63, %v252_v6  ;;  %v9245_v62 = vld [vmem:[#allocation2 + $0x130] sm:$0xff]   ;;  %v9247_v63 = vld [vmem:[#allocation2 + $0x138] sm:$0xff]  }
  0x66   :  { %v431_v33 = vpack.c.bf16 %v251_v60, %v249_v54  ;;  %v255_v11 = vsel %vm204_vm0, %v252_v6, %v254_v21  ;;  %v256_v37 = vrot.slane %v9752_v53, 7  ;;  %v258_v30 = vrot.slane %v9757_v31, 7 }
  0x67   :  { %710 = vmatmul.mubr.bf16.gmra.mrb[16].mxu0 %v410_v55  ;;  %v433_v55 = vpack.c.bf16 %v350_v42, %v348_v38  ;;  %v434_v26 = vpack.c.bf16 %v255_v11, %v253_v10  ;;  %v438_v22 = vpack.c.bf16 %v9757_v31, %v9752_v53  ;;  %v260_v16 = vrot.slane %v9764_v49, 7  ;;  %v9244_v42 = vld [vmem:[#allocation2 + $0x170] sm:$0xff]  }
  0x68   :  { %717 = vmatprep.mubr.bf16.mxu0 %v414_v57  ;;  %v436_v57 = vpack.c.bf16 %v354_v34, %v352_v61  ;;  %v262_v17 = vrot.slane %v9769_v40, 7  ;;  %v257_v6 = vsel %vm204_vm0, %v254_v21, %v256_v37  ;;  %v264_v38 = vrot.slane %v9780_v0, 7  ;;  %8870 = vmatprep.subr.bf16.mxu0 %v9244_v42 }
  0x69   :  { %8843 = vmatmul.mubr.bf16.gmra.mrb[16].mxu1 %v427_v24  ;;  %v9242_v24 = vld [vmem:[#allocation2 + $0x128] sm:$0xff]   ;;  %v441_v53 = vpack.c.bf16 %v9769_v40, %v9764_v49  ;;  %8871 = vmatpush3.bf16.msra.mxu0 %v9244_v42  ;;  %v261_v31 = vsel %vm204_vm0, %v258_v30, %v260_v16 }
  0x6a   :  { %8846 = vmatprep.mubr.bf16.mxu1 %v430_v25  ;;  %7868 = vmatprep.subr.bf16.mxu1 %v9242_v24  ;;  %v9243_v25 = vld [vmem:[#allocation2 + $0xe8] sm:$0xff]   ;;  %v263_v61 = vsel %vm204_vm0, %v260_v16, %v262_v17  ;;  %v265_v39 = vsel %vm204_vm0, %v262_v17, %v264_v38 }
  0x6b   :  { %7869 = vmatpush3.bf16.msra.mxu1 %v9243_v25  ;;  %v440_v34 = vpack.c.bf16 %v263_v61, %v261_v31  ;;  %8872 = vmatprep.subr.bf16.mxu0 %v9249_v56 }
  0x6c   :  { %7870 = vmatprep.subr.bf16.mxu1 %v9245_v62 }
  0x6d   :  { %8873 = vmatpush3.bf16.msra.mxu0 %v9249_v56  ;;  %v9252_v56 = vld [vmem:[#allocation2 + $0x210] sm:$0xff]  }
  0x6f   :  { %718 = vmatmul.mubr.bf16.gmra.mrb[20].mxu0 %v413_v36  ;;  %7871 = vmatpush3.bf16.msra.mxu1 %v9246_v28  ;;  %v259_v36 = vsel %vm204_vm0, %v256_v37, %v258_v30 }
  0x70   :  { %725 = vmatprep.mubr.bf16.mxu0 %v417_v43  ;;  %7872 = vmatprep.subr.bf16.mxu1 %v9247_v63  ;;  %v437_v43 = vpack.c.bf16 %v259_v36, %v257_v6 }
  0x71   :  { %8847 = vmatmul.mubr.bf16.gmra.mrb[20].mxu1 %v433_v55  ;;  %v444_v55 = vpack.c.bf16 %v9785_v4, %v9780_v0 }
  0x72   :  { %8850 = vmatprep.mubr.bf16.mxu1 %v436_v57  ;;  %v266_v57 = vrot.slane %v9785_v4, 7 }
  0x73   :  { %7873 = vmatpush3.bf16.msra.mxu1 %v9248_v29 }
  0x74   :  { %v267_v49 = vsel %vm204_vm0, %v264_v38, %v266_v57 }
  0x75   :  { %v443_v40 = vpack.c.bf16 %v267_v49, %v265_v39 }
  0x77   :  { %726 = vmatmul.mubr.bf16.gmra.mrb[24].mxu0 %v416_v52  ;;  %v9485_v52 = vmov 0.0  }
  0x78   :  { %733 = vmatprep.mubr.bf16.mxu0 %v420_v58  ;;  %7443 = vst [vmem:[%s11755_s3 + $0x78] sm:$0xff] %v9485_v52  ;;  %7459 = vst [vmem:[%s11755_s3 + $0xf8] sm:$0xff] %v9485_v52 }
  0x79   :  { %8851 = vmatmul.mubr.bf16.gmra.mrb[24].mxu1 %v439_v59 }
  0x7a   :  { %8854 = vmatprep.mubr.bf16.mxu1 %v442_v5 }
  0x7f   :  { %734 = vmatmul.mubr.bf16.gmra.mrb[28].mxu0 %v419_v13 }
  0x80   :  { %741 = vmatprep.mubr.bf16.mxu0 %v423_v19 }
  0x81   :  { %8855 = vmatmul.mubr.msk.bf16.gmra.mrb[28].mxu1 %vm9831_vm5, %v7496_v20 }
  0x87   :  { %742 = vmatmul.mubr.bf16.gmra.mrb[32].mxu0 %v422_v51 }
  0x88   :  { %749 = vmatprep.mubr.bf16.mxu0 %v426_v1 }
  0x8f   :  { %750 = vmatmul.mubr.bf16.gmra.mrb[36].mxu0 %v425_v7  ;;  %v9250_v7 = vld [vmem:[#allocation2 + $0x200] sm:$0xff]  }
  0x90   :  { %757 = vmatprep.mubr.bf16.mxu0 %v429_v8  ;;  %8906 = vmatprep.subr.bf16.mxu1 %v9250_v7 }
  0x97   :  { %758 = vmatmul.mubr.bf16.gmra.mrb[40].mxu0 %v428_v9 }
  0x98   :  { %765 = vmatprep.mubr.bf16.mxu0 %v432_v23  ;;  %v9254_v23 = vld [vmem:[#allocation2 + $0x1c0] sm:$0xff]  }
  0x99   :  { %7994 = vmatprep.subr.bf16.mxu0 %v9254_v23 }
  0x9f   :  { %766 = vmatmul.mubr.bf16.gmra.mrb[44].mxu0 %v431_v33 }
  0xa0   :  { %773 = vmatprep.mubr.bf16.mxu0 %v435_v35 }
  0xa7   :  { %774 = vmatmul.mubr.bf16.gmra.mrb[48].mxu0 %v434_v26  ;;  %v9251_v26 = vld [vmem:[#allocation2 + $0x208] sm:$0xff]  }
  0xa8   :  { %781 = vmatprep.mubr.bf16.mxu0 %v438_v22 }
  0xaf   :  { %782 = vmatmul.mubr.bf16.gmra.mrb[52].mxu0 %v437_v43 }
  0xb0   :  { %789 = vmatprep.mubr.bf16.mxu0 %v441_v53 }
  0xb7   :  { %790 = vmatmul.mubr.bf16.gmra.mrb[56].mxu0 %v440_v34 }
  0xb8   :  { %797 = vmatprep.mubr.bf16.mxu0 %v444_v55 }
  0xbf   :  { %798 = vmatmul.mubr.bf16.gmra.mrb[60].mxu0 %v443_v40 }
 0x11a   :  { %v7738_v0 = vpop.f32.mrb[0].mxu0 }
 0x11b   :  { %v7739_v4 = vpop.f32.mrb[1].mxu0 }
 0x11c   :  { %v7740_v46 = vadd.f32 %v7739_v4, %v7738_v0  ;;  %v7741_v58 = vpop.f32.mrb[2].mxu0  ;;  %v8828_v44 = vpop.f32.mrb[0].mxu1 }
 0x11d   :  { %v7742_v2 = vpop.f32.mrb[3].mxu0  ;;  %v840_v50 = vpop.f32.mrb[1].mxu1 }
 0x11e   :  { %v7743_v59 = vadd.f32 %v7742_v2, %v7741_v58  ;;  %v680_v5 = vadd.f32 %v7740_v46, %v9933_v45  ;;  %v8829_v12 = vpop.f32.mrb[2].mxu1 }
 0x11f   :  { %v843_v19 = vpop.f32.mrb[3].mxu1 }
 0x120   :  { %v841_v13 = vadd.f32 %v840_v50, %v680_v5  ;;  %v683_v15 = vadd.f32 %v7743_v59, %v9933_v45 }
 0x122   :  { %v967_v20 = vmax.f32 %v841_v13, 0.0  ;;  %v844_v14 = vadd.f32 %v843_v19, %v683_v15  ;;  %v7744_v18 = vpop.f32.mrb[4].mxu0  ;;  %v9253_v15 = vld [vmem:[#allocation2 + $0x218] sm:$0xff]  }
 0x123   :  { %v7745_v51 = vpop.f32.mrb[5].mxu0 }
 0x124   :  { %v968_v1 = vmax.f32 %v844_v14, 0.0  ;;  %v7746_v27 = vadd.f32 %v7745_v51, %v7744_v18  ;;  %v7747_v32 = vpop.f32.mrb[6].mxu0  ;;  %v1063_v8 = vrot.slane %v967_v20, 7  ;;  %v1159_v47 = vrot.slane %v967_v20, 1  ;;  %v9937_v9 = vpop.f32.mrb[4].mxu1 }
 0x125   :  { %v7748_v41 = vpop.f32.mrb[7].mxu0  ;;  %v856_v21 = vpop.f32.mrb[5].mxu1 }
 0x126   :  { %v1064_v54 = vrot.slane %v968_v1, 7  ;;  %v1160_v60 = vrot.slane %v968_v1, 1  ;;  %v688_v33 = vadd.f32 %v7746_v27, %v9933_v45  ;;  %v7749_v35 = vadd.f32 %v7748_v41, %v7747_v32  ;;  %v9940_v25 = vpop.f32.mrb[6].mxu1 }
 0x127   :  { %v1256_v24 = vpack.c.bf16 %v968_v1, %v967_v20  ;;  %v859_v62 = vpop.f32.mrb[7].mxu1 }
 0x128   :  { %v1065_v10 = vsel %vm204_vm0, %v1063_v8, %v1064_v54  ;;  %v849_v11 = vadd.f32 %v8828_v44, %v688_v33  ;;  %v691_v37 = vadd.f32 %v7749_v35, %v9933_v45  ;;  %v1161_v30 = vsel %vm301_vm1, %v1159_v47, %v1160_v60 }
 0x129   :  { %v7525_v28 = vpack.c.bf16 %v1065_v10, %v1063_v8  ;;  %1536 = vmatprep.mubr.bf16.mxu1 %v1256_v24  ;;  %v9255_v24 = vld [vmem:[#allocation2 + $0x180] sm:$0xff]  }
 0x12a   :  { %v969_v22 = vmax.f32 %v849_v11, 0.0  ;;  %v852_v16 = vadd.f32 %v8829_v12, %v691_v37  ;;  %v7750_v63 = vpop.f32.mrb[8].mxu0 }
 0x12b   :  { %v7751_v17 = vpop.f32.mrb[9].mxu0  ;;  %7526 = vmatmul.mubr.msk.bf16.vlgmr.msra.gmra.mrb[32].mxu1 %vm9570_vm4, %v7525_v28  ;;  %v9256_v28 = vld [vmem:[#allocation2 + $0x1c8] sm:$0xff]  }
 0x12c   :  { %v970_v29 = vmax.f32 %v852_v16, 0.0  ;;  %v7752_v6 = vadd.f32 %v7751_v17, %v7750_v63  ;;  %v7753_v36 = vpop.f32.mrb[10].mxu0  ;;  %v1162_v38 = vrot.slane %v969_v22, 1  ;;  %v1066_v42 = vrot.slane %v969_v22, 7  ;;  %8907 = vmatpush3.bf16.msra.mxu1 %v9250_v7  ;;  %v9947_v53 = vpop.f32.mrb[8].mxu1 }
 0x12d   :  { %v7754_v43 = vpop.f32.mrb[11].mxu0  ;;  %8908 = vmatprep.subr.bf16.mxu1 %v9251_v26  ;;  %v9950_v57 = vpop.f32.mrb[9].mxu1 }
 0x12e   :  { %v1164_v31 = vrot.slane %v970_v29, 1  ;;  %v7755_v61 = vadd.f32 %v7754_v43, %v7753_v36  ;;  %v696_v34 = vadd.f32 %v7752_v6, %v9933_v45  ;;  %v1259_v55 = vpack.c.bf16 %v970_v29, %v969_v22  ;;  %v9954_v0 = vpop.f32.mrb[10].mxu1 }
 0x12f   :  { %v1163_v39 = vsel %vm301_vm1, %v1160_v60, %v1162_v38  ;;  %v1067_v49 = vsel %vm204_vm0, %v1064_v54, %v1066_v42  ;;  %v1068_v40 = vrot.slane %v970_v29, 7  ;;  %v9958_v44 = vpop.f32.mrb[11].mxu1  ;;  %v9258_v54 = vld [vmem:[#allocation2 + $0x220] sm:$0xff]   ;;  %v9257_v29 = vld [vmem:[#allocation2 + $0x188] sm:$0xff]  }
 0x130   :  { %v857_v4 = vadd.f32 %v856_v21, %v696_v34  ;;  %1544 = vmatprep.mubr.bf16.mxu1 %v1259_v55  ;;  %v699_v46 = vadd.f32 %v7755_v61, %v9933_v45  ;;  %v1257_v58 = vpack.c.bf16 %v1163_v39, %v1161_v30  ;;  %v1165_v2 = vsel %vm301_vm1, %v1162_v38, %v1164_v31 }
 0x131   :  { %v1069_v59 = vsel %vm204_vm0, %v1066_v42, %v1068_v40  ;;  %8909 = vmatpush3.bf16.msra.mxu1 %v9251_v26 }
 0x132   :  { %v971_v5 = vmax.f32 %v857_v4, 0.0  ;;  %v860_v50 = vadd.f32 %v859_v62, %v699_v46  ;;  %8874 = vmatprep.mubr.bf16.mxu0 %v1257_v58  ;;  %v7756_v12 = vpop.f32.mrb[12].mxu0  ;;  %v1258_v13 = vpack.c.bf16 %v1069_v59, %v1067_v49  ;;  %8910 = vmatprep.subr.bf16.mxu1 %v9252_v56  ;;  %v9260_v59 = vld [vmem:[#allocation2 + $0x190] sm:$0xff]  }
 0x133   :  { %v7757_v19 = vpop.f32.mrb[13].mxu0 }
 0x134   :  { %v1070_v20 = vrot.slane %v971_v5, 7  ;;  %v1166_v14 = vrot.slane %v971_v5, 1  ;;  %v972_v18 = vmax.f32 %v860_v50, 0.0  ;;  %v7758_v51 = vadd.f32 %v7757_v19, %v7756_v12  ;;  %1545 = vmatmul.mubr.bf16.gmra.mrb[36].mxu1 %v1258_v13  ;;  %v7759_v1 = vpop.f32.mrb[14].mxu0  ;;  %v9961_v32 = vpop.f32.mrb[12].mxu1  ;;  %v9261_v13 = vld [vmem:[#allocation2 + $0x1d8] sm:$0xff]  }
 0x135   :  { %v7760_v27 = vpop.f32.mrb[15].mxu0  ;;  %8911 = vmatpush3.bf16.msra.mxu1 %v9252_v56  ;;  %v9964_v23 = vpop.f32.mrb[13].mxu1 }
 0x136   :  { %v1072_v7 = vrot.slane %v972_v18, 7  ;;  %v1168_v8 = vrot.slane %v972_v18, 1  ;;  %v704_v47 = vadd.f32 %v7758_v51, %v9933_v45  ;;  %v7761_v41 = vadd.f32 %v7760_v27, %v7759_v1  ;;  %8912 = vmatprep.subr.bf16.mxu1 %v9253_v15  ;;  %v8841_v21 = vpop.f32.mrb[14].mxu1 }
 0x137   :  { %v1262_v60 = vpack.c.bf16 %v972_v18, %v971_v5  ;;  %v1167_v33 = vsel %vm301_vm1, %v1164_v31, %v1166_v14  ;;  %v1071_v35 = vsel %vm204_vm0, %v1068_v40, %v1070_v20  ;;  %v9971_v30 = vpop.f32.mrb[15].mxu1  ;;  %v9259_v31 = vld [vmem:[#allocation2 + $0x1d0] sm:$0xff]  }
 0x138   :  { %v865_v10 = vadd.f32 %v9937_v9, %v704_v47  ;;  %v707_v11 = vadd.f32 %v7761_v41, %v9933_v45  ;;  %v1260_v37 = vpack.c.bf16 %v1167_v33, %v1165_v2  ;;  %v1073_v62 = vsel %vm204_vm0, %v1070_v20, %v1072_v7 }
 0x139   :  { %1552 = vmatprep.mubr.bf16.mxu1 %v1262_v60  ;;  %v1261_v26 = vpack.c.bf16 %v1073_v62, %v1071_v35  ;;  %v1169_v22 = vsel %vm301_vm1, %v1166_v14, %v1168_v8  ;;  %8913 = vmatpush3.bf16.msra.mxu1 %v9253_v15 }
 0x13a   :  { %v973_v16 = vmax.f32 %v865_v10, 0.0  ;;  %v868_v63 = vadd.f32 %v9940_v25, %v707_v11  ;;  %8875 = vmatmul.mubr.bf16.vlgmr.msra.gmra.mrb[64].mxu0 %v1260_v37  ;;  %v7762_v17 = vpop.f32.mrb[16].mxu0  ;;  %8914 = vmatprep.subr.bf16.mxu1 %v9258_v54 }
 0x13b   :  { %v7763_v9 = vpop.f32.mrb[17].mxu0  ;;  %7995 = vmatpush3.bf16.msra.mxu0 %v9255_v24 }
 0x13c   :  { %v974_v6 = vmax.f32 %v868_v63, 0.0  ;;  %v7764_v36 = vadd.f32 %v7763_v9, %v7762_v17  ;;  %1553 = vmatmul.mubr.bf16.gmra.mrb[40].mxu1 %v1261_v26  ;;  %v7765_v38 = vpop.f32.mrb[18].mxu0  ;;  %v1170_v42 = vrot.slane %v973_v16, 1  ;;  %v1074_v43 = vrot.slane %v973_v16, 7  ;;  %7996 = vmatprep.subr.bf16.mxu0 %v9256_v28  ;;  %v9975_v34 = vpop.f32.mrb[16].mxu1 }
 0x13d   :  { %v7766_v61 = vpop.f32.mrb[19].mxu0  ;;  %8915 = vmatpush3.bf16.msra.mxu1 %v9258_v54  ;;  %v9979_v49 = vpop.f32.mrb[17].mxu1 }
 0x13e   :  { %v7767_v55 = vadd.f32 %v7766_v61, %v7765_v38  ;;  %v712_v25 = vadd.f32 %v7764_v36, %v9933_v45  ;;  %v1265_v56 = vpack.c.bf16 %v974_v6, %v973_v16  ;;  %v1171_v39 = vsel %vm301_vm1, %v1168_v8, %v1170_v42  ;;  %v9982_v2 = vpop.f32.mrb[18].mxu1 }
 0x13f   :  { %v1263_v40 = vpack.c.bf16 %v1171_v39, %v1169_v22  ;;  %v1075_v4 = vsel %vm204_vm0, %v1072_v7, %v1074_v43  ;;  %v1076_v46 = vrot.slane %v974_v6, 7  ;;  %v1172_v58 = vrot.slane %v974_v6, 1  ;;  %7997 = vmatpush3.bf16.msra.mxu0 %v9257_v29  ;;  %v9986_v12 = vpop.f32.mrb[19].mxu1 }
 0x140   :  { %v873_v5 = vadd.f32 %v9950_v57, %v712_v25  ;;  %1560 = vmatprep.mubr.bf16.mxu1 %v1265_v56  ;;  %v715_v50 = vadd.f32 %v7767_v55, %v9933_v45  ;;  %7998 = vmatprep.subr.bf16.mxu0 %v9259_v31 }
 0x141   :  { %8878 = vmatprep.mubr.bf16.mxu0 %v1263_v40  ;;  %v1077_v15 = vsel %vm204_vm0, %v1074_v43, %v1076_v46  ;;  %v1173_v19 = vsel %vm301_vm1, %v1170_v42, %v1172_v58 }
 0x142   :  { %v975_v20 = vmax.f32 %v873_v5, 0.0  ;;  %v876_v14 = vadd.f32 %v9958_v44, %v715_v50  ;;  %v7768_v18 = vpop.f32.mrb[20].mxu0  ;;  %v1264_v51 = vpack.c.bf16 %v1077_v15, %v1075_v4 }
 0x143   :  { %v7769_v1 = vpop.f32.mrb[21].mxu0  ;;  %7999 = vmatpush3.bf16.msra.mxu0 %v9260_v59 }
 0x144   :  { %v1078_v57 = vrot.slane %v975_v20, 7  ;;  %v1174_v27 = vrot.slane %v975_v20, 1  ;;  %v976_v7 = vmax.f32 %v876_v14, 0.0  ;;  %v7770_v8 = vadd.f32 %v7769_v1, %v7768_v18  ;;  %1561 = vmatmul.mubr.bf16.gmra.mrb[44].mxu1 %v1264_v51  ;;  %v7771_v47 = vpop.f32.mrb[22].mxu0  ;;  %8000 = vmatprep.subr.bf16.mxu0 %v9261_v13  ;;  %v9991_v54 = vpop.f32.mrb[20].mxu1 }
 0x145   :  { %v7772_v41 = vpop.f32.mrb[23].mxu0  ;;  %v9994_v44 = vpop.f32.mrb[21].mxu1 }
 0x146   :  { %v1080_v60 = vrot.slane %v976_v7, 7  ;;  %v1176_v33 = vrot.slane %v976_v7, 1  ;;  %v720_v35 = vadd.f32 %v7770_v8, %v9933_v45  ;;  %v7773_v21 = vadd.f32 %v7772_v41, %v7771_v47  ;;  %v9998_v37 = vpop.f32.mrb[22].mxu1 }
 0x147   :  { %v1268_v24 = vpack.c.bf16 %v976_v7, %v975_v20  ;;  %v1175_v10 = vsel %vm301_vm1, %v1172_v58, %v1174_v27  ;;  %v1079_v11 = vsel %vm204_vm0, %v1076_v46, %v1078_v57  ;;  %v10003_v16 = vpop.f32.mrb[23].mxu1 }
 0x148   :  { %v881_v62 = vadd.f32 %v9947_v53, %v720_v35  ;;  %v723_v28 = vadd.f32 %v7773_v21, %v9933_v45  ;;  %v1266_v26 = vpack.c.bf16 %v1175_v10, %v1173_v19  ;;  %v1081_v22 = vsel %vm204_vm0, %v1078_v57, %v1080_v60 }
 0x149   :  { %1568 = vmatprep.mubr.bf16.mxu1 %v1268_v24  ;;  %v1267_v63 = vpack.c.bf16 %v1081_v22, %v1079_v11  ;;  %v1177_v17 = vsel %vm301_vm1, %v1174_v27, %v1176_v33 }
 0x14a   :  { %v977_v9 = vmax.f32 %v881_v62, 0.0  ;;  %v884_v29 = vadd.f32 %v9954_v0, %v723_v28  ;;  %8879 = vmatmul.mubr.bf16.gmra.mrb[68].mxu0 %v1266_v26  ;;  %v7774_v6 = vpop.f32.mrb[24].mxu0 }
 0x14b   :  { %v7775_v36 = vpop.f32.mrb[25].mxu0 }
 0x14c   :  { %v978_v38 = vmax.f32 %v884_v29, 0.0  ;;  %v7776_v42 = vadd.f32 %v7775_v36, %v7774_v6  ;;  %1569 = vmatmul.mubr.bf16.gmra.mrb[48].mxu1 %v1267_v63  ;;  %v7777_v53 = vpop.f32.mrb[26].mxu0  ;;  %v1178_v43 = vrot.slane %v977_v9, 1  ;;  %v1082_v31 = vrot.slane %v977_v9, 7  ;;  %v10007_v55 = vpop.f32.mrb[24].mxu1 }
 0x14d   :  { %v7778_v61 = vpop.f32.mrb[27].mxu0  ;;  %v10011_v4 = vpop.f32.mrb[25].mxu1 }
 0x14e   :  { %v7779_v25 = vadd.f32 %v7778_v61, %v7777_v53  ;;  %v728_v56 = vadd.f32 %v7776_v42, %v9933_v45  ;;  %v1271_v39 = vpack.c.bf16 %v978_v38, %v977_v9  ;;  %v1179_v40 = vsel %vm301_vm1, %v1176_v33, %v1178_v43  ;;  %v10014_v5 = vpop.f32.mrb[26].mxu1 }
 0x14f   :  { %v1269_v0 = vpack.c.bf16 %v1179_v40, %v1177_v17  ;;  %v1083_v46 = vsel %vm204_vm0, %v1080_v60, %v1082_v31  ;;  %v1084_v58 = vrot.slane %v978_v38, 7  ;;  %v1180_v59 = vrot.slane %v978_v38, 1  ;;  %v10018_v15 = vpop.f32.mrb[27].mxu1 }
 0x150   :  { %v889_v50 = vadd.f32 %v9964_v23, %v728_v56  ;;  %1576 = vmatprep.mubr.bf16.mxu1 %v1271_v39  ;;  %v731_v13 = vadd.f32 %v7779_v25, %v9933_v45  ;;  %v10036_v38 = vrot.slane %v9485_v52, 7 }
 0x151   :  { %8882 = vmatprep.mubr.bf16.mxu0 %v1269_v0  ;;  %v1085_v19 = vsel %vm204_vm0, %v1082_v31, %v1084_v58  ;;  %v1181_v20 = vsel %vm301_vm1, %v1178_v43, %v1180_v59 }
 0x152   :  { %v979_v14 = vmax.f32 %v889_v50, 0.0  ;;  %v892_v18 = vadd.f32 %v9971_v30, %v731_v13  ;;  %v7780_v51 = vpop.f32.mrb[28].mxu0  ;;  %v1270_v1 = vpack.c.bf16 %v1085_v19, %v1083_v46 }
 0x153   :  { %v7781_v57 = vpop.f32.mrb[29].mxu0 }
 0x154   :  { %v1086_v27 = vrot.slane %v979_v14, 7  ;;  %v1182_v7 = vrot.slane %v979_v14, 1  ;;  %v980_v8 = vmax.f32 %v892_v18, 0.0  ;;  %v7782_v23 = vadd.f32 %v7781_v57, %v7780_v51  ;;  %1577 = vmatmul.mubr.bf16.gmra.mrb[52].mxu1 %v1270_v1  ;;  %v7783_v47 = vpop.f32.mrb[30].mxu0  ;;  %v10023_v60 = vpop.f32.mrb[28].mxu1 }
 0x155   :  { %v7784_v41 = vpop.f32.mrb[31].mxu0  ;;  %v10026_v10 = vpop.f32.mrb[29].mxu1 }
 0x156   :  { %v1088_v33 = vrot.slane %v980_v8, 7  ;;  %v1184_v35 = vrot.slane %v980_v8, 1  ;;  %v736_v21 = vadd.f32 %v7782_v23, %v9933_v45  ;;  %v1274_v24 = vpack.c.bf16 %v980_v8, %v979_v14  ;;  %v8857_v62 = vpop.f32.mrb[30].mxu1 }
 0x157   :  { %v1183_v30 = vsel %vm301_vm1, %v1180_v59, %v1182_v7  ;;  %v1087_v11 = vsel %vm204_vm0, %v1084_v58, %v1086_v27  ;;  %v10033_v17 = vpop.f32.mrb[31].mxu1  ;;  %v10048_v14 = vrot.slane %v9485_v52, 1 }
 0x158   :  { %v897_v28 = vadd.f32 %v9961_v32, %v736_v21  ;;  %1584 = vmatprep.mubr.bf16.mxu1 %v1274_v24  ;;  %v1272_v26 = vpack.c.bf16 %v1183_v30, %v1181_v20  ;;  %v1089_v22 = vsel %vm204_vm0, %v1086_v27, %v1088_v33  ;;  %v1185_v63 = vsel %vm301_vm1, %v1182_v7, %v1184_v35 }
 0x159   :  { %v1273_v9 = vpack.c.bf16 %v1089_v22, %v1087_v11 }
 0x15a   :  { %v981_v29 = vmax.f32 %v897_v28, 0.0  ;;  %8883 = vmatmul.mubr.bf16.gmra.mrb[72].mxu0 %v1272_v26  ;;  %v7786_v6 = vpop.f32.mrb[32].mxu0 }
 0x15b   :  { %v7787_v36 = vpop.f32.mrb[33].mxu0 }
 0x15c   :  { %v7788_v42 = vadd.f32 %v7787_v36, %v7786_v6  ;;  %1585 = vmatmul.mubr.bf16.gmra.mrb[56].mxu1 %v1273_v9  ;;  %v7789_v53 = vpop.f32.mrb[34].mxu0  ;;  %v1277_v32 = vpack.c.bf16 %v9485_v52, %v981_v29  ;;  %v1186_v43 = vrot.slane %v981_v29, 1  ;;  %v1090_v31 = vrot.slane %v981_v29, 7 }
 0x15d   :  { %v7790_v61 = vpop.f32.mrb[35].mxu0 }
 0x15e   :  { %v7791_v25 = vadd.f32 %v7790_v61, %v7789_v53  ;;  %1592 = vmatprep.mubr.bf16.mxu1 %v1277_v32  ;;  %v744_v56 = vadd.f32 %v7788_v42, %v9933_v45  ;;  %v1187_v39 = vsel %vm301_vm1, %v1184_v35, %v1186_v43  ;;  %v1091_v40 = vsel %vm204_vm0, %v1088_v33, %v1090_v31 }
 0x15f   :  { %v1275_v0 = vpack.c.bf16 %v1187_v39, %v1185_v63  ;;  %v1093_v46 = vsel %vm204_vm0, %v1090_v31, %v10036_v38 }
 0x160   :  { %v905_v58 = vadd.f32 %v9979_v49, %v744_v56  ;;  %v747_v59 = vadd.f32 %v7791_v25, %v9933_v45  ;;  %v1276_v50 = vpack.c.bf16 %v1093_v46, %v1091_v40 }
 0x161   :  { %8886 = vmatprep.mubr.bf16.mxu0 %v1275_v0 }
 0x162   :  { %v983_v13 = vmax.f32 %v905_v58, 0.0  ;;  %v908_v19 = vadd.f32 %v9986_v12, %v747_v59  ;;  %v7792_v20 = vpop.f32.mrb[36].mxu0  ;;  %v1189_v12 = vsel %vm301_vm1, %v1186_v43, %v10048_v14 }
 0x163   :  { %v7793_v18 = vpop.f32.mrb[37].mxu0 }
 0x164   :  { %v1094_v51 = vrot.slane %v983_v13, 7  ;;  %v1190_v1 = vrot.slane %v983_v13, 1  ;;  %v984_v57 = vmax.f32 %v908_v19, 0.0  ;;  %v7794_v27 = vadd.f32 %v7793_v18, %v7792_v20  ;;  %1593 = vmatmul.mubr.bf16.gmra.mrb[60].mxu1 %v1276_v50  ;;  %v7795_v7 = vpop.f32.mrb[38].mxu0 }
 0x165   :  { %v7796_v8 = vpop.f32.mrb[39].mxu0 }
 0x166   :  { %v1096_v49 = vrot.slane %v984_v57, 7  ;;  %v1192_v23 = vrot.slane %v984_v57, 1  ;;  %v752_v47 = vadd.f32 %v7794_v27, %v9933_v45  ;;  %v7797_v41 = vadd.f32 %v7796_v8, %v7795_v7 }
 0x167   :  { %v1280_v33 = vpack.c.bf16 %v984_v57, %v983_v13  ;;  %v1191_v35 = vsel %vm301_vm1, %v10048_v14, %v1190_v1  ;;  %v1095_v21 = vsel %vm204_vm0, %v10036_v38, %v1094_v51 }
 0x168   :  { %v913_v24 = vadd.f32 %v9975_v34, %v752_v47  ;;  %v755_v30 = vadd.f32 %v7797_v41, %v9933_v45  ;;  %v1278_v11 = vpack.c.bf16 %v1191_v35, %v1189_v12  ;;  %v1097_v62 = vsel %vm204_vm0, %v1094_v51, %v1096_v49 }
 0x169   :  { %1600 = vmatprep.mubr.bf16.mxu1 %v1280_v33  ;;  %v1279_v28 = vpack.c.bf16 %v1097_v62, %v1095_v21  ;;  %v1193_v26 = vsel %vm301_vm1, %v1190_v1, %v1192_v23 }
 0x16a   :  { %v985_v22 = vmax.f32 %v913_v24, 0.0  ;;  %v916_v63 = vadd.f32 %v9982_v2, %v755_v30  ;;  %8887 = vmatmul.mubr.bf16.gmra.mrb[76].mxu0 %v1278_v11  ;;  %v7798_v9 = vpop.f32.mrb[40].mxu0 }
 0x16b   :  { %v7799_v29 = vpop.f32.mrb[41].mxu0 }
 0x16c   :  { %v986_v6 = vmax.f32 %v916_v63, 0.0  ;;  %v7800_v36 = vadd.f32 %v7799_v29, %v7798_v9  ;;  %1601 = vmatmul.mubr.bf16.gmra.mrb[64].mxu1 %v1279_v28  ;;  %v7801_v42 = vpop.f32.mrb[42].mxu0  ;;  %v1194_v34 = vrot.slane %v985_v22, 1  ;;  %v1098_v53 = vrot.slane %v985_v22, 7 }
 0x16d   :  { %v7802_v32 = vpop.f32.mrb[43].mxu0 }
 0x16e   :  { %v7803_v43 = vadd.f32 %v7802_v32, %v7801_v42  ;;  %v760_v31 = vadd.f32 %v7800_v36, %v9933_v45  ;;  %v1283_v61 = vpack.c.bf16 %v986_v6, %v985_v22  ;;  %v1195_v25 = vsel %vm301_vm1, %v1192_v23, %v1194_v34 }
 0x16f   :  { %v1281_v56 = vpack.c.bf16 %v1195_v25, %v1193_v26  ;;  %v1099_v39 = vsel %vm204_vm0, %v1096_v49, %v1098_v53  ;;  %v1100_v2 = vrot.slane %v986_v6, 7  ;;  %v1196_v40 = vrot.slane %v986_v6, 1 }
 0x170   :  { %v921_v0 = vadd.f32 %v9994_v44, %v760_v31  ;;  %1608 = vmatprep.mubr.bf16.mxu1 %v1283_v61  ;;  %v763_v46 = vadd.f32 %v7803_v43, %v9933_v45  ;;  %v9262_v43 = vld [vmem:[#allocation2 + $0x198] sm:$0xff]  }
 0x171   :  { %8890 = vmatprep.mubr.bf16.mxu0 %v1281_v56  ;;  %v1101_v58 = vsel %vm204_vm0, %v1098_v53, %v1100_v2  ;;  %v1197_v59 = vsel %vm301_vm1, %v1194_v34, %v1196_v40  ;;  %8001 = vmatpush3.bf16.msra.mxu0 %v9262_v43 }
 0x172   :  { %v987_v50 = vmax.f32 %v921_v0, 0.0  ;;  %v924_v13 = vadd.f32 %v10003_v16, %v763_v46  ;;  %v7804_v19 = vpop.f32.mrb[44].mxu0  ;;  %v1282_v20 = vpack.c.bf16 %v1101_v58, %v1099_v39 }
 0x173   :  { %v7805_v18 = vpop.f32.mrb[45].mxu0 }
 0x174   :  { %v1102_v51 = vrot.slane %v987_v50, 7  ;;  %v1198_v1 = vrot.slane %v987_v50, 1  ;;  %v988_v57 = vmax.f32 %v924_v13, 0.0  ;;  %v7806_v27 = vadd.f32 %v7805_v18, %v7804_v19  ;;  %1609 = vmatmul.mubr.bf16.gmra.mrb[68].mxu1 %v1282_v20  ;;  %v7807_v44 = vpop.f32.mrb[46].mxu0  ;;  %v9264_v13 = vld [vmem:[#allocation2 + $0x1e0] sm:$0xff]  }
 0x175   :  { %v7808_v7 = vpop.f32.mrb[47].mxu0  ;;  %8002 = vmatprep.subr.bf16.mxu0 %v9264_v13 }
 0x176   :  { %v1104_v8 = vrot.slane %v988_v57, 7  ;;  %v1200_v49 = vrot.slane %v988_v57, 1  ;;  %v768_v23 = vadd.f32 %v7806_v27, %v9933_v45  ;;  %v7809_v47 = vadd.f32 %v7808_v7, %v7807_v44 }
 0x177   :  { %v1286_v41 = vpack.c.bf16 %v988_v57, %v987_v50  ;;  %v1199_v33 = vsel %vm301_vm1, %v1196_v40, %v1198_v1  ;;  %v1103_v16 = vsel %vm204_vm0, %v1100_v2, %v1102_v51  ;;  %v9263_v50 = vld [vmem:[#allocation2 + $0x228] sm:$0xff]  }
 0x178   :  { %v929_v12 = vadd.f32 %v9991_v54, %v768_v23  ;;  %v771_v35 = vadd.f32 %v7809_v47, %v9933_v45  ;;  %v1284_v21 = vpack.c.bf16 %v1199_v33, %v1197_v59  ;;  %v1105_v24 = vsel %vm204_vm0, %v1102_v51, %v1104_v8  ;;  %8916 = vmatprep.subr.bf16.mxu1 %v9263_v50  ;;  %v9265_v47 = vld [vmem:[#allocation2 + $0x1a0] sm:$0xff]  }
 0x179   :  { %1616 = vmatprep.mubr.bf16.mxu1 %v1286_v41  ;;  %v1285_v30 = vpack.c.bf16 %v1105_v24, %v1103_v16  ;;  %v1201_v11 = vsel %vm301_vm1, %v1198_v1, %v1200_v49  ;;  %8917 = vmatpush3.bf16.msra.mxu1 %v9263_v50 }
 0x17a   :  { %v989_v62 = vmax.f32 %v929_v12, 0.0  ;;  %v932_v28 = vadd.f32 %v9998_v37, %v771_v35  ;;  %8891 = vmatmul.mubr.bf16.gmra.mrb[80].mxu0 %v1284_v21  ;;  %v7810_v26 = vpop.f32.mrb[48].mxu0 }
 0x17b   :  { %v7811_v22 = vpop.f32.mrb[49].mxu0  ;;  %8003 = vmatpush3.bf16.msra.mxu0 %v9265_v47 }
 0x17c   :  { %v990_v63 = vmax.f32 %v932_v28, 0.0  ;;  %v7812_v9 = vadd.f32 %v7811_v22, %v7810_v26  ;;  %1617 = vmatmul.mubr.bf16.gmra.mrb[72].mxu1 %v1285_v30  ;;  %v7813_v29 = vpop.f32.mrb[50].mxu0  ;;  %v1202_v54 = vrot.slane %v989_v62, 1  ;;  %v1106_v6 = vrot.slane %v989_v62, 7 }
 0x17d   :  { %v7814_v36 = vpop.f32.mrb[51].mxu0 }
 0x17e   :  { %v776_v42 = vadd.f32 %v7812_v9, %v9933_v45  ;;  %v7815_v34 = vadd.f32 %v7814_v36, %v7813_v29  ;;  %v1289_v53 = vpack.c.bf16 %v990_v63, %v989_v62  ;;  %v1203_v32 = vsel %vm301_vm1, %v1200_v49, %v1202_v54 }
 0x17f   :  { %v1287_v31 = vpack.c.bf16 %v1203_v32, %v1201_v11  ;;  %v1107_v37 = vsel %vm204_vm0, %v1104_v8, %v1106_v6  ;;  %v1108_v61 = vrot.slane %v990_v63, 7  ;;  %v1204_v25 = vrot.slane %v990_v63, 1  ;;  %v9266_v32 = vld [vmem:[#allocation2 + $0x1e8] sm:$0xff]  }
 0x180   :  { %v937_v56 = vadd.f32 %v10011_v4, %v776_v42  ;;  %v779_v39 = vadd.f32 %v7815_v34, %v9933_v45  ;;  %1624 = vmatprep.mubr.bf16.mxu1 %v1289_v53  ;;  %8004 = vmatprep.subr.bf16.mxu0 %v9266_v32 }
 0x181   :  { %8894 = vmatprep.mubr.bf16.mxu0 %v1287_v31  ;;  %v1109_v2 = vsel %vm204_vm0, %v1106_v6, %v1108_v61  ;;  %v1205_v40 = vsel %vm301_vm1, %v1202_v54, %v1204_v25 }
 0x182   :  { %v991_v0 = vmax.f32 %v937_v56, 0.0  ;;  %v940_v46 = vadd.f32 %v10018_v15, %v779_v39  ;;  %v7816_v58 = vpop.f32.mrb[52].mxu0  ;;  %v1288_v59 = vpack.c.bf16 %v1109_v2, %v1107_v37  ;;  %v9267_v37 = vld [vmem:[#allocation2 + $0x1a8] sm:$0xff]  }
 0x183   :  { %v7817_v19 = vpop.f32.mrb[53].mxu0  ;;  %8005 = vmatpush3.bf16.msra.mxu0 %v9267_v37 }
 0x184   :  { %v1110_v20 = vrot.slane %v991_v0, 7  ;;  %v1206_v18 = vrot.slane %v991_v0, 1  ;;  %v992_v4 = vmax.f32 %v940_v46, 0.0  ;;  %v7818_v51 = vadd.f32 %v7817_v19, %v7816_v58  ;;  %1625 = vmatmul.mubr.bf16.gmra.mrb[76].mxu1 %v1288_v59  ;;  %v7819_v1 = vpop.f32.mrb[54].mxu0  ;;  %v9269_v46 = vld [vmem:[#allocation2 + $0x1f0] sm:$0xff]  }
 0x185   :  { %v7820_v57 = vpop.f32.mrb[55].mxu0  ;;  %v9270_v19 = vld [vmem:[#allocation2 + $0x1b0] sm:$0xff]   ;;  %8006 = vmatprep.subr.bf16.mxu0 %v9269_v46 }
 0x186   :  { %v1112_v27 = vrot.slane %v992_v4, 7  ;;  %v1208_v44 = vrot.slane %v992_v4, 1  ;;  %v784_v7 = vadd.f32 %v7818_v51, %v9933_v45  ;;  %v7821_v15 = vadd.f32 %v7820_v57, %v7819_v1 }
 0x187   :  { %v1292_v8 = vpack.c.bf16 %v992_v4, %v991_v0  ;;  %v1207_v49 = vsel %vm301_vm1, %v1204_v25, %v1206_v18  ;;  %v1111_v23 = vsel %vm204_vm0, %v1108_v61, %v1110_v20  ;;  %8007 = vmatpush3.bf16.msra.mxu0 %v9270_v19 }
 0x188   :  { %v945_v41 = vadd.f32 %v10007_v55, %v784_v7  ;;  %v787_v33 = vadd.f32 %v7821_v15, %v9933_v45  ;;  %v1290_v16 = vpack.c.bf16 %v1207_v49, %v1205_v40  ;;  %v1113_v12 = vsel %vm204_vm0, %v1110_v20, %v1112_v27 }
 0x189   :  { %1632 = vmatprep.mubr.bf16.mxu1 %v1292_v8  ;;  %v1291_v35 = vpack.c.bf16 %v1113_v12, %v1111_v23  ;;  %v1209_v21 = vsel %vm301_vm1, %v1206_v18, %v1208_v44  ;;  %v9268_v18 = vld [vmem:[#allocation2 + $0x230] sm:$0xff]   ;;  %v9272_v23 = vld [vmem:[#allocation2 + $0x1b8] sm:$0xff]  }
 0x18a   :  { %v993_v24 = vmax.f32 %v945_v41, 0.0  ;;  %v948_v30 = vadd.f32 %v10014_v5, %v787_v33  ;;  %8895 = vmatmul.mubr.bf16.gmra.mrb[84].mxu0 %v1290_v16  ;;  %v7822_v11 = vpop.f32.mrb[56].mxu0  ;;  %8918 = vmatprep.subr.bf16.mxu1 %v9268_v18 }
 0x18b   :  { %v7823_v62 = vpop.f32.mrb[57].mxu0  ;;  %8919 = vmatpush3.bf16.msra.mxu1 %v9268_v18  ;;  %v9396_v18 = vld [vmem:[%s11752_s0 + $0x18] sm:$0xff] }
 0x18c   :  { %v994_v28 = vmax.f32 %v948_v30, 0.0  ;;  %v7824_v26 = vadd.f32 %v7823_v62, %v7822_v11  ;;  %1633 = vmatmul.mubr.bf16.gmra.mrb[80].mxu1 %v1291_v35  ;;  %v7825_v55 = vpop.f32.mrb[58].mxu0  ;;  %v1210_v22 = vrot.slane %v993_v24, 1  ;;  %v1114_v63 = vrot.slane %v993_v24, 7 }
 0x18d   :  { %v7826_v9 = vpop.f32.mrb[59].mxu0 }
 0x18e   :  { %v792_v29 = vadd.f32 %v7824_v26, %v9933_v45  ;;  %v7827_v54 = vadd.f32 %v7826_v9, %v7825_v55  ;;  %v1295_v6 = vpack.c.bf16 %v994_v28, %v993_v24  ;;  %v1211_v36 = vsel %vm301_vm1, %v1208_v44, %v1210_v22  ;;  %v9271_v44 = vld [vmem:[#allocation2 + $0x1f8] sm:$0xff]  }
 0x18f   :  { %v1293_v42 = vpack.c.bf16 %v1211_v36, %v1209_v21  ;;  %v1115_v34 = vsel %vm204_vm0, %v1112_v27, %v1114_v63  ;;  %v1116_v5 = vrot.slane %v994_v28, 7  ;;  %v1212_v53 = vrot.slane %v994_v28, 1  ;;  %8008 = vmatprep.subr.bf16.mxu0 %v9271_v44 }
 0x190   :  { %v953_v43 = vadd.f32 %v10026_v10, %v792_v29  ;;  %v795_v31 = vadd.f32 %v7827_v54, %v9933_v45  ;;  %1640 = vmatprep.mubr.bf16.mxu1 %v1295_v6  ;;  %8009 = vmatpush3.bf16.msra.mxu0 %v9272_v23 }
 0x191   :  { %8898 = vmatprep.mubr.bf16.mxu0 %v1293_v42  ;;  %v1117_v61 = vsel %vm204_vm0, %v1114_v63, %v1116_v5  ;;  %v1213_v25 = vsel %vm301_vm1, %v1210_v22, %v1212_v53  ;;  %v10118_v42 = vld [vmem:[#allocation4 + $0x1] ss:$0 sm:$0xff] }
 0x192   :  { %v995_v56 = vmax.f32 %v953_v43, 0.0  ;;  %v956_v39 = vadd.f32 %v10033_v17, %v795_v31  ;;  %v7828_v2 = vpop.f32.mrb[60].mxu0  ;;  %v1294_v40 = vpack.c.bf16 %v1117_v61, %v1115_v34 }
 0x193   :  { %v7829_v0 = vpop.f32.mrb[61].mxu0 }
 0x194   :  { %v1118_v58 = vrot.slane %v995_v56, 7  ;;  %v1214_v10 = vrot.slane %v995_v56, 1  ;;  %v996_v59 = vmax.f32 %v956_v39, 0.0  ;;  %v7830_v50 = vadd.f32 %v7829_v0, %v7828_v2  ;;  %1641 = vmatmul.mubr.bf16.gmra.mrb[84].mxu1 %v1294_v40  ;;  %v7831_v13 = vpop.f32.mrb[62].mxu0  ;;  %v9394_v2 = vld [vmem:[%s11752_s0 + $0x10] sm:$0xff] }
 0x195   :  { %v7832_v20 = vpop.f32.mrb[63].mxu0 }
 0x196   :  { %v1120_v4 = vrot.slane %v996_v59, 7  ;;  %v1216_v51 = vrot.slane %v996_v59, 1  ;;  %v800_v1 = vadd.f32 %v7830_v50, %v9933_v45  ;;  %v1298_v17 = vpack.c.bf16 %v996_v59, %v995_v56 }
 0x197   :  { %v1215_v57 = vsel %vm301_vm1, %v1212_v53, %v1214_v10  ;;  %v1119_v27 = vsel %vm204_vm0, %v1116_v5, %v1118_v58 }
 0x198   :  { %v961_v7 = vadd.f32 %v10023_v60, %v800_v1  ;;  %1648 = vmatprep.mubr.bf16.mxu1 %v1298_v17  ;;  %v1296_v15 = vpack.c.bf16 %v1215_v57, %v1213_v25  ;;  %v1121_v8 = vsel %vm204_vm0, %v1118_v58, %v1120_v4  ;;  %v1217_v49 = vsel %vm301_vm1, %v1214_v10, %v1216_v51  ;;  %v9395_v10 = vld [vmem:[%s11752_s0] sm:$0xff]  ;;  %v9397_v17 = vld [vmem:[%s11752_s0 + $0x8] sm:$0xff] }
 0x199   :  { %v1297_v47 = vpack.c.bf16 %v1121_v8, %v1119_v27 }
 0x19a   :  { %v997_v45 = vmax.f32 %v961_v7, 0.0  ;;  %8899 = vmatmul.mubr.bf16.gmra.mrb[88].mxu0 %v1296_v15 }
 0x19c   :  { %1649 = vmatmul.mubr.bf16.gmra.mrb[88].mxu1 %v1297_v47  ;;  %v1301_v41 = vpack.c.bf16 %v9485_v52, %v997_v45  ;;  %v1218_v33 = vrot.slane %v997_v45, 1  ;;  %v1122_v16 = vrot.slane %v997_v45, 7  ;;  %v9273_v52 = vld [vmem:[#allocation2 + $0x238] sm:$0xff]  }
 0x19d   :  { %8920 = vmatprep.subr.bf16.mxu1 %v9273_v52 }
 0x19e   :  { %1656 = vmatprep.mubr.bf16.mxu1 %v1301_v41  ;;  %v1219_v60 = vsel %vm301_vm1, %v1216_v51, %v1218_v33  ;;  %v1221_v12 = vsel %vm301_vm1, %v1218_v33, %v10048_v14  ;;  %v1123_v35 = vsel %vm204_vm0, %v1120_v4, %v1122_v16  ;;  %v1125_v21 = vsel %vm204_vm0, %v1122_v16, %v10036_v38  ;;  %v9278_v16 = vld [vmem:[#allocation2 + $0x280] sm:$0xff]  }
 0x19f   :  { %v1299_v24 = vpack.c.bf16 %v1219_v60, %v1217_v49  ;;  %v7528_v30 = vpack.c.bf16 %v10048_v14, %v1221_v12  ;;  %v1300_v11 = vpack.c.bf16 %v1125_v21, %v1123_v35  ;;  %8921 = vmatpush3.bf16.msra.mxu1 %v9273_v52  ;;  %v9274_v49 = vld [vmem:[#allocation2 + $0x2c0] sm:$0xff]  }
 0x1a0   :  { %8954 = vmatprep.subr.bf16.mxu0 %v9274_v49  ;;  %8130 = vmatprep.subr.bf16.mxu1 %v9278_v16 }
 0x1a1   :  { %8902 = vmatprep.mubr.bf16.mxu0 %v1299_v24 }
 0x1a2   :  { %8903 = vmatmul.mubr.msk.bf16.gmra.mrb[92].mxu0 %vm9831_vm5, %v7528_v30 }
 0x1a4   :  { %1657 = vmatmul.mubr.bf16.gmra.mrb[92].mxu1 %v1300_v11 }
 0x1fe   :  { %v7874_v62 = vpop.f32.mrb[32].mxu1 }
 0x1ff   :  { %v7875_v28 = vpop.f32.mrb[33].mxu1 }
 0x200   :  { %v7876_v26 = vadd.f32 %v7875_v28, %v7874_v62  ;;  %v7877_v55 = vpop.f32.mrb[34].mxu1 }
 0x201   :  { %v7878_v22 = vpop.f32.mrb[35].mxu1 }
 0x202   :  { %v7879_v63 = vadd.f32 %v7878_v22, %v7877_v55  ;;  %v1539_v32 = vadd.f32 %v7876_v26, %v10118_v42 }
 0x204   :  { %v1542_v39 = vadd.f32 %v7879_v63, %v10118_v42 }
 0x207   :  { %v7880_v9 = vpop.f32.mrb[36].mxu1 }
 0x208   :  { %v7881_v29 = vpop.f32.mrb[37].mxu1 }
 0x209   :  { %v7882_v54 = vadd.f32 %v7881_v29, %v7880_v9  ;;  %v7883_v6 = vpop.f32.mrb[38].mxu1 }
 0x20a   :  { %v7884_v36 = vpop.f32.mrb[39].mxu1 }
 0x20b   :  { %v7885_v34 = vadd.f32 %v7884_v36, %v7883_v6  ;;  %v1547_v5 = vadd.f32 %v7882_v54, %v10118_v42  ;;  %v9275_v54 = vld [vmem:[#allocation2 + $0x2c8] sm:$0xff]  }
 0x20d   :  { %v8876_v53 = vpop.f32.mrb[64].mxu0  ;;  %v1550_v43 = vadd.f32 %v7885_v34, %v10118_v42 }
 0x20e   :  { %v1708_v31 = vadd.f32 %v8876_v53, %v1547_v5  ;;  %v1699_v37 = vpop.f32.mrb[65].mxu0 }
 0x20f   :  { %v1700_v61 = vadd.f32 %v1699_v37, %v1539_v32  ;;  %v7886_v25 = vpop.f32.mrb[40].mxu1  ;;  %v8877_v56 = vpop.f32.mrb[66].mxu0 }
 0x210   :  { %v1828_v40 = vadd.f32 %v9394_v2, %v1708_v31  ;;  %v1711_v0 = vadd.f32 %v8877_v56, %v1550_v43  ;;  %v7887_v46 = vpop.f32.mrb[41].mxu1  ;;  %v1702_v58 = vpop.f32.mrb[67].mxu0  ;;  %v9276_v2 = vld [vmem:[#allocation2 + $0x2d0] sm:$0xff]  }
 0x211   :  { %v1826_v59 = vadd.f32 %v9395_v10, %v1700_v61  ;;  %v7888_v50 = vadd.f32 %v7887_v46, %v7886_v25  ;;  %v1703_v13 = vadd.f32 %v1702_v58, %v1542_v39  ;;  %v7889_v19 = vpop.f32.mrb[42].mxu1 }
 0x212   :  { %vm1860_vm6 = vcmp.gt.f32.partialorder %v1828_v40, 0.0  ;;  %v1892_v20 = vmul.f32 0.01, %v1828_v40  ;;  %v1829_v4 = vadd.f32 %v9396_v18, %v1711_v0  ;;  %v7890_v51 = vpop.f32.mrb[43].mxu1 }
 0x213   :  { %vm1858_vm7 = vcmp.gt.f32.partialorder %v1826_v59, 0.0  ;;  %v1890_v1 = vmul.f32 0.01, %v1826_v59  ;;  %v1827_v57 = vadd.f32 %v9397_v17, %v1703_v13  ;;  %v7891_v27 = vadd.f32 %v7890_v51, %v7889_v19 }
 0x214   :  { %v10136_v44 = vsel %vm1860_vm6, %v1828_v40, %v1892_v20  ;;  %vm1861_vm8 = vcmp.gt.f32.partialorder %v1829_v4, 0.0  ;;  %v1893_v7 = vmul.f32 0.01, %v1829_v4  ;;  %v1555_v34 = vadd.f32 %v7888_v50, %v10118_v42  ;;  %v9398_v40 = vld [vmem:[%s11752_s0 + $0x30] sm:$0xff] }
 0x215   :  { %vm1859_vm9 = vcmp.gt.f32.partialorder %v1827_v57, 0.0  ;;  %v1891_v15 = vmul.f32 0.01, %v1827_v57  ;;  %v10138_v8 = vsel %vm1858_vm7, %v1826_v59, %v1890_v1  ;;  %v2117_v41 = vrot.slane %v10136_v44, 1  ;;  %v9399_v59 = vld [vmem:[%s11752_s0 + $0x20] sm:$0xff] }
 0x216   :  { %v2018_v45 = vrot.slane %v10138_v8, 7  ;;  %v10144_v33 = vsel %vm1861_vm8, %v1829_v4, %v1893_v7  ;;  %v2114_v21 = vrot.slane %v10138_v8, 1  ;;  %v2021_v53 = vrot.slane %v10136_v44, 7  ;;  %v9400_v4 = vld [vmem:[%s11752_s0 + $0x38] sm:$0xff] }
 0x217   :  { %v7892_v23 = vpop.f32.mrb[44].mxu1  ;;  %v10140_v47 = vsel %vm1859_vm9, %v1827_v57, %v1891_v15  ;;  %v2023_v55 = vrot.slane %v10144_v33, 7  ;;  %v2214_v6 = vpack.c.bf16 %v10144_v33, %v10136_v44  ;;  %v1558_v25 = vadd.f32 %v7891_v27, %v10118_v42  ;;  %v9401_v27 = vld [vmem:[%s11752_s0 + $0x28] sm:$0xff] }
 0x218   :  { %v7893_v60 = vpop.f32.mrb[45].mxu1  ;;  %v2019_v12 = vrot.slane %v10140_v47, 7  ;;  %v2211_v35 = vpack.c.bf16 %v10140_v47, %v10138_v8  ;;  %v2115_v24 = vrot.slane %v10140_v47, 1 }
 0x219   :  { %v7894_v30 = vadd.f32 %v7893_v60, %v7892_v23  ;;  %v7895_v11 = vpop.f32.mrb[46].mxu1  ;;  %v2024_v39 = vsel %vm204_vm0, %v2021_v53, %v2023_v55  ;;  %v2119_v23 = vrot.slane %v10144_v33, 1 }
 0x21a   :  { %v7896_v52 = vpop.f32.mrb[47].mxu1  ;;  %v2020_v62 = vsel %vm204_vm0, %v2018_v45, %v2019_v12  ;;  %2491 = vmatprep.mubr.bf16.mxu0 %v2211_v35  ;;  %v2116_v28 = vsel %vm301_vm1, %v2114_v21, %v2115_v24  ;;  %v2118_v26 = vsel %vm301_vm1, %v2115_v24, %v2117_v41  ;;  %v2022_v56 = vsel %vm204_vm0, %v2019_v12, %v2021_v53 }
 0x21b   :  { %v7897_v22 = vadd.f32 %v7896_v52, %v7895_v11  ;;  %v7557_v63 = vpack.c.bf16 %v2020_v62, %v2018_v45  ;;  %v1563_v9 = vadd.f32 %v7894_v30, %v10118_v42  ;;  %v2212_v29 = vpack.c.bf16 %v2118_v26, %v2116_v28 }
 0x21c   :  { %v2213_v17 = vpack.c.bf16 %v2024_v39, %v2022_v56  ;;  %v2120_v28 = vsel %vm301_vm1, %v2117_v41, %v2119_v23  ;;  %v9281_v39 = vld [vmem:[#allocation2 + $0x248] sm:$0xff]  }
 0x21d   :  { %v8880_v36 = vpop.f32.mrb[68].mxu0  ;;  %7558 = vmatmul.mubr.msk.bf16.vlgmr.msra.gmra.mrb[96].mxu0 %vm9570_vm4, %v7557_v63  ;;  %8922 = vmatprep.mubr.bf16.mxu1 %v2212_v29  ;;  %v1566_v5 = vadd.f32 %v7897_v22, %v10118_v42  ;;  %v9279_v63 = vld [vmem:[#allocation2 + $0x240] sm:$0xff]  }
 0x21e   :  { %v1724_v32 = vadd.f32 %v8880_v36, %v1563_v9  ;;  %v1715_v43 = vpop.f32.mrb[69].mxu0  ;;  %2499 = vmatprep.mubr.bf16.mxu0 %v2214_v6  ;;  %8955 = vmatpush3.bf16.msra.mxu0 %v9274_v49  ;;  %v9277_v49 = vld [vmem:[#allocation2 + $0x2d8] sm:$0xff]   ;;  %v9282_v9 = vld [vmem:[#allocation2 + $0x2e0] sm:$0xff]  }
 0x21f   :  { %v1716_v31 = vadd.f32 %v1715_v43, %v1555_v34  ;;  %v7898_v37 = vpop.f32.mrb[48].mxu1  ;;  %v8881_v61 = vpop.f32.mrb[70].mxu0  ;;  %8956 = vmatprep.subr.bf16.mxu0 %v9275_v54  ;;  %v9280_v34 = vld [vmem:[#allocation2 + $0x288] sm:$0xff]  }
 0x220   :  { %v1832_v0 = vadd.f32 %v9398_v40, %v1724_v32  ;;  %v1727_v46 = vadd.f32 %v8881_v61, %v1566_v5  ;;  %v7899_v58 = vpop.f32.mrb[49].mxu1  ;;  %v1718_v10 = vpop.f32.mrb[71].mxu0 }
 0x221   :  { %v1830_v50 = vadd.f32 %v9399_v59, %v1716_v31  ;;  %v10176_v13 = vadd.f32 %v7899_v58, %v7898_v37  ;;  %v1719_v19 = vadd.f32 %v1718_v10, %v1558_v25  ;;  %v7901_v20 = vpop.f32.mrb[50].mxu1  ;;  %v9283_v10 = vld [vmem:[#allocation2 + $0x290] sm:$0xff]  }
 0x222   :  { %v1896_v18 = vmul.f32 0.01, %v1832_v0  ;;  %v1833_v51 = vadd.f32 %v9400_v4, %v1727_v46  ;;  %v7902_v1 = vpop.f32.mrb[51].mxu1  ;;  %8957 = vmatpush3.bf16.msra.mxu0 %v9275_v54  ;;  %vm1864_vm11 = vcmp.gt.f32.partialorder %v1832_v0, 0.0 }
 0x223   :  { %vm1862_vm10 = vcmp.gt.f32.partialorder %v1830_v50, 0.0  ;;  %v1894_v57 = vmul.f32 0.01, %v1830_v50  ;;  %v1831_v7 = vadd.f32 %v9401_v27, %v1719_v19  ;;  %v10184_v15 = vadd.f32 %v7902_v1, %v7901_v20  ;;  %8958 = vmatprep.subr.bf16.mxu0 %v9276_v2  ;;  %v9402_v1 = vld [vmem:[%s11752_s0 + $0x50] sm:$0xff] }
 0x224   :  { %vm1865_vm12 = vcmp.gt.f32.partialorder %v1833_v51, 0.0  ;;  %v1897_v45 = vmul.f32 0.01, %v1833_v51  ;;  %v10191_v21 = vsel %vm1864_vm11, %v1832_v0, %v1896_v18  ;;  %v1571_v0 = vadd.f32 %v10176_v13, %v10118_v42 }
 0x225   :  { %vm1863_vm13 = vcmp.gt.f32.partialorder %v1831_v7, 0.0  ;;  %v1895_v16 = vmul.f32 0.01, %v1831_v7  ;;  %2500 = vmatmul.mubr.bf16.gmra.mrb[100].mxu0 %v2213_v17  ;;  %v10187_v60 = vsel %vm1862_vm10, %v1830_v50, %v1894_v57  ;;  %v2125_v32 = vrot.slane %v10191_v21, 1 }
 0x226   :  { %v2121_v12 = vrot.slane %v10187_v60, 1  ;;  %v2025_v35 = vrot.slane %v10187_v60, 7  ;;  %8959 = vmatpush3.bf16.msra.mxu0 %v9276_v2  ;;  %v10195_v11 = vsel %vm1865_vm12, %v1833_v51, %v1897_v45  ;;  %v2029_v58 = vrot.slane %v10191_v21, 7 }
 0x227   :  { %v7904_v24 = vpop.f32.mrb[52].mxu1  ;;  %v10193_v30 = vsel %vm1863_vm13, %v1831_v7, %v1895_v16  ;;  %8960 = vmatprep.subr.bf16.mxu0 %v9277_v49  ;;  %v2031_v43 = vrot.slane %v10195_v11, 7  ;;  %v1574_v4 = vadd.f32 %v10184_v15, %v10118_v42  ;;  %v9403_v15 = vld [vmem:[%s11752_s0 + $0x40] sm:$0xff] }
 0x228   :  { %v7905_v52 = vpop.f32.mrb[53].mxu1  ;;  %v2217_v62 = vpack.c.bf16 %v10193_v30, %v10187_v60  ;;  %v2122_v26 = vsel %vm301_vm1, %v2119_v23, %v2121_v12  ;;  %v2027_v22 = vrot.slane %v10193_v30, 7  ;;  %v2123_v36 = vrot.slane %v10193_v30, 1 }
 0x229   :  { %v7906_v29 = vadd.f32 %v7905_v52, %v7904_v24  ;;  %v7907_v54 = vpop.f32.mrb[54].mxu1  ;;  %v2215_v6 = vpack.c.bf16 %v2122_v26, %v2120_v28  ;;  %v2026_v53 = vsel %vm204_vm0, %v2023_v55, %v2025_v35  ;;  %v2220_v55 = vpack.c.bf16 %v10195_v11, %v10191_v21  ;;  %v9404_v52 = vld [vmem:[%s11752_s0 + $0x58] sm:$0xff] }
 0x22a   :  { %v7908_v5 = vpop.f32.mrb[55].mxu1  ;;  %2507 = vmatprep.mubr.bf16.mxu0 %v2217_v62  ;;  %v2028_v41 = vsel %vm204_vm0, %v2025_v35, %v2027_v22  ;;  %8961 = vmatpush3.bf16.msra.mxu0 %v9277_v49  ;;  %v2124_v25 = vsel %vm301_vm1, %v2121_v12, %v2123_v36  ;;  %v2126_v56 = vsel %vm301_vm1, %v2123_v36, %v2125_v32  ;;  %v9284_v49 = vld [vmem:[#allocation2 + $0x250] sm:$0xff]   ;;  %v9285_v35 = vld [vmem:[#allocation2 + $0x298] sm:$0xff]  }
 0x22b   :  { %v7909_v31 = vadd.f32 %v7908_v5, %v7907_v54  ;;  %8923 = vmatmul.mubr.bf16.vlgmr.msra.gmra.mrb[96].mxu1 %v2215_v6  ;;  %v1579_v37 = vadd.f32 %v7906_v29, %v10118_v42  ;;  %v2216_v61 = vpack.c.bf16 %v2028_v41, %v2026_v53  ;;  %8962 = vmatprep.subr.bf16.mxu0 %v9282_v9  ;;  %v2127_v6 = vrot.slane %v10195_v11, 1  ;;  %v9286_v36 = vld [vmem:[#allocation2 + $0x258] sm:$0xff]  }
 0x22c   :  { %8131 = vmatpush3.bf16.msra.mxu1 %v9279_v63  ;;  %v2218_v40 = vpack.c.bf16 %v2126_v56, %v2124_v25  ;;  %v2030_v51 = vsel %vm204_vm0, %v2027_v22, %v2029_v58  ;;  %v2032_v13 = vsel %vm204_vm0, %v2029_v58, %v2031_v43  ;;  %v9405_v63 = vld [vmem:[%s11752_s0 + $0x48] sm:$0xff] }
 0x22d   :  { %v8884_v2 = vpop.f32.mrb[72].mxu0  ;;  %2508 = vmatmul.mubr.bf16.gmra.mrb[104].mxu0 %v2216_v61  ;;  %v1582_v46 = vadd.f32 %v7909_v31, %v10118_v42  ;;  %8132 = vmatprep.subr.bf16.mxu1 %v9280_v34  ;;  %v2219_v26 = vpack.c.bf16 %v2032_v13, %v2030_v51 }
 0x22e   :  { %v1740_v59 = vadd.f32 %v8884_v2, %v1579_v37  ;;  %v1731_v50 = vpop.f32.mrb[73].mxu0  ;;  %2515 = vmatprep.mubr.bf16.mxu0 %v2220_v55  ;;  %8963 = vmatpush3.bf16.msra.mxu0 %v9282_v9 }
 0x22f   :  { %8926 = vmatprep.mubr.bf16.mxu1 %v2218_v40  ;;  %v1732_v19 = vadd.f32 %v1731_v50, %v1571_v0  ;;  %v7910_v20 = vpop.f32.mrb[56].mxu1  ;;  %v8885_v18 = vpop.f32.mrb[74].mxu0 }
 0x230   :  { %v1836_v17 = vadd.f32 %v9402_v1, %v1740_v59  ;;  %v1743_v57 = vadd.f32 %v8885_v18, %v1582_v46  ;;  %v7911_v27 = vpop.f32.mrb[57].mxu1  ;;  %v1734_v7 = vpop.f32.mrb[75].mxu0  ;;  %8133 = vmatpush3.bf16.msra.mxu1 %v9281_v39  ;;  %v2128_v39 = vsel %vm301_vm1, %v2125_v32, %v2127_v6 }
 0x231   :  { %v1834_v23 = vadd.f32 %v9403_v15, %v1732_v19  ;;  %v7912_v45 = vadd.f32 %v7911_v27, %v7910_v20  ;;  %v1735_v16 = vadd.f32 %v1734_v7, %v1574_v4  ;;  %v7913_v12 = vpop.f32.mrb[58].mxu1  ;;  %8134 = vmatprep.subr.bf16.mxu1 %v9283_v10 }
 0x232   :  { %vm1868_vm14 = vcmp.gt.f32.partialorder %v1836_v17, 0.0  ;;  %v1900_v24 = vmul.f32 0.01, %v1836_v17  ;;  %v1837_v62 = vadd.f32 %v9404_v52, %v1743_v57  ;;  %v7914_v28 = vpop.f32.mrb[59].mxu1  ;;  %v9406_v52 = vld [vmem:[%s11752_s0 + $0x70] sm:$0xff] }
 0x233   :  { %vm1866_vm15 = vcmp.gt.f32.partialorder %v1834_v23, 0.0  ;;  %v1898_v22 = vmul.f32 0.01, %v1834_v23  ;;  %v1835_v9 = vadd.f32 %v9405_v63, %v1735_v16  ;;  %v7915_v29 = vadd.f32 %v7914_v28, %v7913_v12 }
 0x234   :  { %vm1869_vm2 = vcmp.gt.f32.partialorder %v1837_v62, 0.0  ;;  %v1901_v54 = vmul.f32 0.01, %v1837_v62  ;;  %8135 = vmatpush3.bf16.msra.mxu1 %v9284_v49  ;;  %v10244_v53 = vsel %vm1868_vm14, %v1836_v17, %v1900_v24 }
 0x235   :  { %vm1867_vm3 = vcmp.gt.f32.partialorder %v1835_v9, 0.0  ;;  %v1899_v34 = vmul.f32 0.01, %v1835_v9  ;;  %2516 = vmatmul.mubr.bf16.gmra.mrb[108].mxu0 %v2219_v26  ;;  %v10241_v5 = vsel %vm1866_vm15, %v1834_v23, %v1898_v22  ;;  %8136 = vmatprep.subr.bf16.mxu1 %v9285_v35  ;;  %v2133_v59 = vrot.slane %v10244_v53, 1  ;;  %v9407_v26 = vld [vmem:[%s11752_s0 + $0x60] sm:$0xff] }
 0x236   :  { %v2129_v41 = vrot.slane %v10241_v5, 1  ;;  %v2033_v31 = vrot.slane %v10241_v5, 7  ;;  %v10250_v25 = vsel %vm1869_vm2, %v1837_v62, %v1901_v54  ;;  %v2037_v27 = vrot.slane %v10244_v53, 7 }
 0x237   :  { %v7916_v37 = vpop.f32.mrb[60].mxu1  ;;  %v10248_v61 = vsel %vm1867_vm3, %v1835_v9, %v1899_v34  ;;  %v2039_v20 = vrot.slane %v10250_v25, 7  ;;  %v2226_v17 = vpack.c.bf16 %v10250_v25, %v10244_v53  ;;  %v1590_v12 = vadd.f32 %v7915_v29, %v10118_v42 }
 0x238   :  { %v7917_v56 = vpop.f32.mrb[61].mxu1  ;;  %v2223_v55 = vpack.c.bf16 %v10248_v61, %v10241_v5  ;;  %v2130_v2 = vsel %vm301_vm1, %v2127_v6, %v2129_v41  ;;  %v2035_v40 = vrot.slane %v10248_v61, 7  ;;  %8137 = vmatpush3.bf16.msra.mxu1 %v9286_v36  ;;  %v2131_v10 = vrot.slane %v10248_v61, 1 }
 0x239   :  { %v7918_v0 = vadd.f32 %v7917_v56, %v7916_v37  ;;  %v7919_v46 = vpop.f32.mrb[62].mxu1  ;;  %v2221_v58 = vpack.c.bf16 %v2130_v2, %v2128_v39  ;;  %v2034_v19 = vsel %vm204_vm0, %v2031_v43, %v2033_v31  ;;  %v1587_v43 = vadd.f32 %v7912_v45, %v10118_v42 }
 0x23a   :  { %v7920_v50 = vpop.f32.mrb[63].mxu1  ;;  %2523 = vmatprep.mubr.bf16.mxu0 %v2223_v55  ;;  %v2036_v32 = vsel %vm204_vm0, %v2033_v31, %v2035_v40  ;;  %v2132_v51 = vsel %vm301_vm1, %v2129_v41, %v2131_v10  ;;  %v2134_v13 = vsel %vm301_vm1, %v2131_v10, %v2133_v59  ;;  %v2038_v35 = vsel %vm204_vm0, %v2035_v40, %v2037_v27  ;;  %v9408_v41 = vld [vmem:[%s11752_s0 + $0x68] sm:$0xff] }
 0x23b   :  { %8927 = vmatmul.mubr.bf16.gmra.mrb[100].mxu1 %v2221_v58  ;;  %v1595_v18 = vadd.f32 %v7918_v0, %v10118_v42  ;;  %v2222_v4 = vpack.c.bf16 %v2036_v32, %v2034_v19  ;;  %v2224_v1 = vpack.c.bf16 %v2134_v13, %v2132_v51  ;;  %v2040_v24 = vsel %vm204_vm0, %v2037_v27, %v2039_v20 }
 0x23c   :  { %v2225_v36 = vpack.c.bf16 %v2040_v24, %v2038_v35  ;;  %v2135_v56 = vrot.slane %v10250_v25, 1 }
 0x23d   :  { %v8888_v57 = vpop.f32.mrb[76].mxu0  ;;  %2524 = vmatmul.mubr.bf16.gmra.mrb[112].mxu0 %v2222_v4  ;;  %8930 = vmatprep.mubr.bf16.mxu1 %v2224_v1 }
 0x23e   :  { %v1756_v7 = vadd.f32 %v8888_v57, %v1595_v18  ;;  %v1747_v49 = vpop.f32.mrb[77].mxu0  ;;  %2531 = vmatprep.mubr.bf16.mxu0 %v2226_v17  ;;  %v2136_v19 = vsel %vm301_vm1, %v2133_v59, %v2135_v56 }
 0x23f   :  { %v1748_v15 = vadd.f32 %v1747_v49, %v1587_v43  ;;  %v7922_v23 = vpop.f32.mrb[64].mxu1  ;;  %v8889_v16 = vpop.f32.mrb[78].mxu0 }
 0x240   :  { %v1840_v45 = vadd.f32 %v9406_v52, %v1756_v7  ;;  %v7923_v62 = vpop.f32.mrb[65].mxu1  ;;  %v1750_v28 = vpop.f32.mrb[79].mxu0  ;;  %v10309_v16 = vld [vmem:[%s11755_s3 + $0x78] sm:$0xff] }
 0x241   :  { %v1838_v22 = vadd.f32 %v9407_v26, %v1748_v15  ;;  %v7924_v63 = vadd.f32 %v7923_v62, %v7922_v23  ;;  %v1751_v9 = vadd.f32 %v1750_v28, %v1590_v12  ;;  %v7925_v54 = vpop.f32.mrb[66].mxu1 }
 0x242   :  { %v1904_v29 = vmul.f32 0.01, %v1840_v45  ;;  %v7926_v6 = vpop.f32.mrb[67].mxu1  ;;  %vm1872_vm7 = vcmp.gt.f32.partialorder %v1840_v45, 0.0 }
 0x243   :  { %vm1870_vm6 = vcmp.gt.f32.partialorder %v1838_v22, 0.0  ;;  %v1902_v34 = vmul.f32 0.01, %v1838_v22  ;;  %v1839_v31 = vadd.f32 %v9408_v41, %v1751_v9  ;;  %v7927_v37 = vadd.f32 %v7926_v6, %v7925_v54  ;;  %v9410_v6 = vld [vmem:[%s11752_s0 + $0x90] sm:$0xff] }
 0x244   :  { %v10290_v0 = vsel %vm1872_vm7, %v1840_v45, %v1904_v29  ;;  %v1603_v24 = vadd.f32 %v7924_v63, %v10118_v42 }
 0x245   :  { %vm1871_vm8 = vcmp.gt.f32.partialorder %v1839_v31, 0.0  ;;  %v1903_v55 = vmul.f32 0.01, %v1839_v31  ;;  %2532 = vmatmul.mubr.bf16.gmra.mrb[116].mxu0 %v2225_v36  ;;  %v10286_v39 = vsel %vm1870_vm6, %v1838_v22, %v1902_v34  ;;  %v2141_v27 = vrot.slane %v10290_v0, 1 }
 0x246   :  { %v2137_v2 = vrot.slane %v10286_v39, 1  ;;  %v2041_v40 = vrot.slane %v10286_v39, 7  ;;  %v2045_v45 = vrot.slane %v10290_v0, 7  ;;  %v1606_v54 = vadd.f32 %v7927_v37, %v10118_v42 }
 0x247   :  { %v7928_v46 = vpop.f32.mrb[68].mxu1  ;;  %v10292_v58 = vsel %vm1871_vm8, %v1839_v31, %v1903_v55  ;;  %v9411_v31 = vld [vmem:[%s11752_s0 + $0x80] sm:$0xff] }
 0x248   :  { %v7929_v10 = vpop.f32.mrb[69].mxu1  ;;  %v2229_v50 = vpack.c.bf16 %v10292_v58, %v10286_v39  ;;  %v2138_v32 = vsel %vm301_vm1, %v2135_v56, %v2137_v2  ;;  %v2043_v18 = vrot.slane %v10292_v58, 7  ;;  %v2139_v1 = vrot.slane %v10292_v58, 1 }
 0x249   :  { %v7930_v4 = vadd.f32 %v7929_v10, %v7928_v46  ;;  %v7931_v51 = vpop.f32.mrb[70].mxu1  ;;  %v2227_v13 = vpack.c.bf16 %v2138_v32, %v2136_v19  ;;  %v2042_v57 = vsel %vm204_vm0, %v2039_v20, %v2041_v40  ;;  %v2232_v20 = vpack.c.bf16 %v10309_v16, %v10290_v0  ;;  %v9412_v10 = vld [vmem:[%s11752_s0 + $0x98] sm:$0xff] }
 0x24a   :  { %v7932_v17 = vpop.f32.mrb[71].mxu1  ;;  %2539 = vmatprep.mubr.bf16.mxu0 %v2229_v50  ;;  %v2044_v43 = vsel %vm204_vm0, %v2041_v40, %v2043_v18  ;;  %v2140_v15 = vsel %vm301_vm1, %v2137_v2, %v2139_v1  ;;  %v2142_v23 = vsel %vm301_vm1, %v2139_v1, %v2141_v27  ;;  %v2046_v29 = vsel %vm204_vm0, %v2043_v18, %v2045_v45 }
 0x24b   :  { %v7933_v7 = vadd.f32 %v7932_v17, %v7931_v51  ;;  %8931 = vmatmul.mubr.bf16.gmra.mrb[104].mxu1 %v2227_v13  ;;  %v1611_v59 = vadd.f32 %v7930_v4, %v10118_v42  ;;  %v2228_v49 = vpack.c.bf16 %v2044_v43, %v2042_v57  ;;  %v2230_v35 = vpack.c.bf16 %v2142_v23, %v2140_v15  ;;  %v9413_v4 = vld [vmem:[%s11752_s0 + $0x88] sm:$0xff] }
 0x24c   :  { %v2048_v37 = vsel %vm204_vm0, %v2045_v45, %v10036_v38 }
 0x24d   :  { %v8892_v12 = vpop.f32.mrb[80].mxu0  ;;  %2540 = vmatmul.mubr.bf16.gmra.mrb[120].mxu0 %v2228_v49  ;;  %v1614_v52 = vadd.f32 %v7933_v7, %v10118_v42  ;;  %8934 = vmatprep.mubr.bf16.mxu1 %v2230_v35  ;;  %v2231_v32 = vpack.c.bf16 %v2048_v37, %v2046_v29  ;;  %v2144_v35 = vsel %vm301_vm1, %v2141_v27, %v10048_v14 }
 0x24e   :  { %v1772_v62 = vadd.f32 %v8892_v12, %v1611_v59  ;;  %v1763_v28 = vpop.f32.mrb[81].mxu0  ;;  %2547 = vmatprep.mubr.bf16.mxu0 %v2232_v20 }
 0x24f   :  { %v1764_v26 = vadd.f32 %v1763_v28, %v1603_v24  ;;  %v7934_v22 = vpop.f32.mrb[72].mxu1  ;;  %v8893_v9 = vpop.f32.mrb[82].mxu0 }
 0x250   :  { %v1844_v63 = vadd.f32 %v9410_v6, %v1772_v62  ;;  %v1775_v36 = vadd.f32 %v8893_v9, %v1614_v52  ;;  %v7935_v34 = vpop.f32.mrb[73].mxu1  ;;  %v1766_v41 = vpop.f32.mrb[83].mxu0 }
 0x251   :  { %v1842_v56 = vadd.f32 %v9411_v31, %v1764_v26  ;;  %v7936_v55 = vadd.f32 %v7935_v34, %v7934_v22  ;;  %v1767_v2 = vadd.f32 %v1766_v41, %v1606_v54  ;;  %v7937_v40 = vpop.f32.mrb[74].mxu1 }
 0x252   :  { %v1908_v46 = vmul.f32 0.01, %v1844_v63  ;;  %v1845_v50 = vadd.f32 %v9412_v10, %v1775_v36  ;;  %v7938_v19 = vpop.f32.mrb[75].mxu1  ;;  %vm1876_vm10 = vcmp.gt.f32.partialorder %v1844_v63, 0.0 }
 0x253   :  { %vm1874_vm9 = vcmp.gt.f32.partialorder %v1842_v56, 0.0  ;;  %v1906_v18 = vmul.f32 0.01, %v1842_v56  ;;  %v1843_v51 = vadd.f32 %v9413_v4, %v1767_v2  ;;  %v7939_v13 = vadd.f32 %v7938_v19, %v7937_v40 }
 0x254   :  { %vm1877_vm11 = vcmp.gt.f32.partialorder %v1845_v50, 0.0  ;;  %v1909_v1 = vmul.f32 0.01, %v1845_v50  ;;  %v10336_v59 = vsel %vm1876_vm10, %v1844_v63, %v1908_v46  ;;  %v1619_v40 = vadd.f32 %v7936_v55, %v10118_v42  ;;  %v9414_v55 = vld [vmem:[%s11752_s0 + $0xb0] sm:$0xff] }
 0x255   :  { %vm1875_vm12 = vcmp.gt.f32.partialorder %v1843_v51, 0.0  ;;  %v1907_v17 = vmul.f32 0.01, %v1843_v51  ;;  %2548 = vmatmul.mubr.bf16.gmra.mrb[124].mxu0 %v2231_v32  ;;  %v10332_v57 = vsel %vm1874_vm9, %v1842_v56, %v1906_v18  ;;  %v2149_v29 = vrot.slane %v10336_v59, 1 }
 0x256   :  { %v2145_v43 = vrot.slane %v10332_v57, 1  ;;  %v2049_v7 = vrot.slane %v10332_v57, 7  ;;  %v10340_v23 = vsel %vm1877_vm11, %v1845_v50, %v1909_v1  ;;  %v2053_v46 = vrot.slane %v10336_v59, 7 }
 0x257   :  { %v7940_v49 = vpop.f32.mrb[76].mxu1  ;;  %v10338_v15 = vsel %vm1875_vm12, %v1843_v51, %v1907_v17  ;;  %v2055_v27 = vrot.slane %v10340_v23, 7  ;;  %v2238_v31 = vpack.c.bf16 %v10340_v23, %v10336_v59  ;;  %v1622_v4 = vadd.f32 %v7939_v13, %v10118_v42 }
 0x258   :  { %v7941_v20 = vpop.f32.mrb[77].mxu1  ;;  %v2235_v12 = vpack.c.bf16 %v10338_v15, %v10332_v57  ;;  %v2146_v24 = vsel %vm301_vm1, %v10048_v14, %v2145_v43  ;;  %v2051_v52 = vrot.slane %v10338_v15, 7  ;;  %v2147_v26 = vrot.slane %v10338_v15, 1 }
 0x259   :  { %v7942_v45 = vadd.f32 %v7941_v20, %v7940_v49  ;;  %v7943_v62 = vpop.f32.mrb[78].mxu1  ;;  %v2233_v28 = vpack.c.bf16 %v2146_v24, %v2144_v35  ;;  %v2050_v9 = vsel %vm204_vm0, %v10036_v38, %v2049_v7  ;;  %v2056_v1 = vsel %vm204_vm0, %v2053_v46, %v2055_v27  ;;  %v9415_v20 = vld [vmem:[%s11752_s0 + $0xa0] sm:$0xff] }
 0x25a   :  { %v7944_v22 = vpop.f32.mrb[79].mxu1  ;;  %2555 = vmatprep.mubr.bf16.mxu0 %v2235_v12  ;;  %v2052_v54 = vsel %vm204_vm0, %v2049_v7, %v2051_v52  ;;  %v2148_v34 = vsel %vm301_vm1, %v2145_v43, %v2147_v26  ;;  %v2150_v41 = vsel %vm301_vm1, %v2147_v26, %v2149_v29  ;;  %v2054_v51 = vsel %vm204_vm0, %v2051_v52, %v2053_v46 }
 0x25b   :  { %v7945_v6 = vadd.f32 %v7944_v22, %v7943_v62  ;;  %8935 = vmatmul.mubr.bf16.gmra.mrb[108].mxu1 %v2233_v28  ;;  %v1627_v63 = vadd.f32 %v7942_v45, %v10118_v42  ;;  %v2234_v36 = vpack.c.bf16 %v2052_v54, %v2050_v9  ;;  %v2236_v2 = vpack.c.bf16 %v2150_v41, %v2148_v34  ;;  %v9416_v45 = vld [vmem:[%s11752_s0 + $0xb8] sm:$0xff]  ;;  %v9417_v9 = vld [vmem:[%s11752_s0 + $0xa8] sm:$0xff] }
 0x25c   :  { %v2237_v26 = vpack.c.bf16 %v2056_v1, %v2054_v51 }
 0x25d   :  { %v8896_v56 = vpop.f32.mrb[84].mxu0  ;;  %2556 = vmatmul.mubr.bf16.gmra.mrb[128].mxu0 %v2234_v36  ;;  %v1630_v37 = vadd.f32 %v7945_v6, %v10118_v42  ;;  %8938 = vmatprep.mubr.bf16.mxu1 %v2236_v2  ;;  %v2151_v36 = vrot.slane %v10340_v23, 1 }
 0x25e   :  { %v1788_v10 = vadd.f32 %v8896_v56, %v1627_v63  ;;  %v1779_v50 = vpop.f32.mrb[85].mxu0  ;;  %2563 = vmatprep.mubr.bf16.mxu0 %v2238_v31 }
 0x25f   :  { %v1780_v19 = vadd.f32 %v1779_v50, %v1619_v40  ;;  %v7946_v32 = vpop.f32.mrb[80].mxu1  ;;  %v8897_v18 = vpop.f32.mrb[86].mxu0 }
 0x260   :  { %v1848_v17 = vadd.f32 %v9414_v55, %v1788_v10  ;;  %v1791_v43 = vadd.f32 %v8897_v18, %v1630_v37  ;;  %v7947_v7 = vpop.f32.mrb[81].mxu1  ;;  %v1782_v49 = vpop.f32.mrb[87].mxu0 }
 0x261   :  { %v1846_v12 = vadd.f32 %v9415_v20, %v1780_v19  ;;  %v7948_v13 = vadd.f32 %v7947_v7, %v7946_v32  ;;  %v1783_v35 = vadd.f32 %v1782_v49, %v1622_v4  ;;  %v7949_v24 = vpop.f32.mrb[82].mxu1  ;;  %v2152_v19 = vsel %vm301_vm1, %v2149_v29, %v2151_v36 }
 0x262   :  { %v1912_v52 = vmul.f32 0.01, %v1848_v17  ;;  %v1849_v62 = vadd.f32 %v9416_v45, %v1791_v43  ;;  %v7950_v28 = vpop.f32.mrb[83].mxu1  ;;  %vm1880_vm14 = vcmp.gt.f32.partialorder %v1848_v17, 0.0 }
 0x263   :  { %vm1878_vm13 = vcmp.gt.f32.partialorder %v1846_v12, 0.0  ;;  %v1910_v22 = vmul.f32 0.01, %v1846_v12  ;;  %v1847_v54 = vadd.f32 %v9417_v9, %v1783_v35  ;;  %v7951_v6 = vadd.f32 %v7950_v28, %v7949_v24 }
 0x264   :  { %vm1881_vm15 = vcmp.gt.f32.partialorder %v1849_v62, 0.0  ;;  %v1913_v63 = vmul.f32 0.01, %v1849_v62  ;;  %v10385_v2 = vsel %vm1880_vm14, %v1848_v17, %v1912_v52  ;;  %v1635_v28 = vadd.f32 %v7948_v13, %v10118_v42  ;;  %v9418_v13 = vld [vmem:[%s11752_s0 + $0xd0] sm:$0xff] }
 0x265   :  { %vm1879_vm2 = vcmp.gt.f32.partialorder %v1847_v54, 0.0  ;;  %v1911_v34 = vmul.f32 0.01, %v1847_v54  ;;  %2564 = vmatmul.mubr.bf16.gmra.mrb[132].mxu0 %v2237_v26  ;;  %v10381_v41 = vsel %vm1878_vm13, %v1846_v12, %v1910_v22  ;;  %v2157_v49 = vrot.slane %v10385_v2, 1 }
 0x266   :  { %v2153_v31 = vrot.slane %v10381_v41, 1  ;;  %v2057_v56 = vrot.slane %v10381_v41, 7  ;;  %v10389_v46 = vsel %vm1881_vm15, %v1849_v62, %v1913_v63  ;;  %v2061_v22 = vrot.slane %v10385_v2, 7 }
 0x267   :  { %v7952_v40 = vpop.f32.mrb[84].mxu1  ;;  %v10387_v37 = vsel %vm1879_vm2, %v1847_v54, %v1911_v34  ;;  %v2063_v29 = vrot.slane %v10389_v46, 7  ;;  %v2244_v45 = vpack.c.bf16 %v10389_v46, %v10385_v2 }
 0x268   :  { %v7953_v10 = vpop.f32.mrb[85].mxu1  ;;  %v2241_v50 = vpack.c.bf16 %v10387_v37, %v10381_v41  ;;  %v2154_v32 = vsel %vm301_vm1, %v2151_v36, %v2153_v31  ;;  %v2059_v18 = vrot.slane %v10387_v37, 7  ;;  %v2155_v55 = vrot.slane %v10387_v37, 1 }
 0x269   :  { %v7954_v4 = vadd.f32 %v7953_v10, %v7952_v40  ;;  %v7955_v51 = vpop.f32.mrb[86].mxu1  ;;  %v2239_v1 = vpack.c.bf16 %v2154_v32, %v2152_v19  ;;  %v2058_v43 = vsel %vm204_vm0, %v2055_v27, %v2057_v56  ;;  %v2064_v40 = vsel %vm204_vm0, %v2061_v22, %v2063_v29 }
 0x26a   :  { %v7956_v17 = vpop.f32.mrb[87].mxu1  ;;  %2571 = vmatprep.mubr.bf16.mxu0 %v2241_v50  ;;  %v2060_v7 = vsel %vm204_vm0, %v2057_v56, %v2059_v18  ;;  %v2156_v24 = vsel %vm301_vm1, %v2153_v31, %v2155_v55  ;;  %v2158_v52 = vsel %vm301_vm1, %v2155_v55, %v2157_v49  ;;  %v1638_v31 = vadd.f32 %v7951_v6, %v10118_v42 }
 0x26b   :  { %v7957_v20 = vadd.f32 %v7956_v17, %v7955_v51  ;;  %8939 = vmatmul.mubr.bf16.gmra.mrb[112].mxu1 %v2239_v1  ;;  %v1643_v12 = vadd.f32 %v7954_v4, %v10118_v42  ;;  %v2240_v35 = vpack.c.bf16 %v2060_v7, %v2058_v43  ;;  %v2242_v27 = vpack.c.bf16 %v2158_v52, %v2156_v24  ;;  %v9419_v4 = vld [vmem:[%s11752_s0 + $0xc0] sm:$0xff]  ;;  %v9420_v43 = vld [vmem:[%s11752_s0 + $0xd8] sm:$0xff]  ;;  %v9421_v52 = vld [vmem:[%s11752_s0 + $0xc8] sm:$0xff] }
 0x26c   :  { %v2062_v56 = vsel %vm204_vm0, %v2059_v18, %v2061_v22  ;;  %v2159_v55 = vrot.slane %v10389_v46, 1  ;;  %v9289_v22 = vld [vmem:[#allocation2 + $0x260] sm:$0xff]  }
 0x26d   :  { %v8900_v62 = vpop.f32.mrb[88].mxu0  ;;  %2572 = vmatmul.mubr.bf16.gmra.mrb[136].mxu0 %v2240_v35  ;;  %v1646_v26 = vadd.f32 %v7957_v20, %v10118_v42  ;;  %8942 = vmatprep.mubr.bf16.mxu1 %v2242_v27  ;;  %v9287_v35 = vld [vmem:[#allocation2 + $0x2e8] sm:$0xff]  }
 0x26e   :  { %v1804_v9 = vadd.f32 %v8900_v62, %v1643_v12  ;;  %v1795_v54 = vpop.f32.mrb[89].mxu0  ;;  %2579 = vmatprep.mubr.bf16.mxu0 %v2244_v45  ;;  %v2243_v12 = vpack.c.bf16 %v2064_v40, %v2062_v56  ;;  %8964 = vmatprep.subr.bf16.mxu0 %v9287_v35 }
 0x26f   :  { %v1796_v63 = vadd.f32 %v1795_v54, %v1635_v28  ;;  %v7958_v36 = vpop.f32.mrb[88].mxu1  ;;  %v8901_v34 = vpop.f32.mrb[90].mxu0  ;;  %8965 = vmatpush3.bf16.msra.mxu0 %v9287_v35 }
 0x270   :  { %v1852_v10 = vadd.f32 %v9418_v13, %v1804_v9  ;;  %v1807_v50 = vadd.f32 %v8901_v34, %v1646_v26  ;;  %v7959_v19 = vpop.f32.mrb[89].mxu1  ;;  %v1798_v32 = vpop.f32.mrb[91].mxu0  ;;  %v9288_v26 = vld [vmem:[#allocation2 + $0x2a0] sm:$0xff]  }
 0x271   :  { %v1850_v51 = vadd.f32 %v9419_v4, %v1796_v63  ;;  %v7960_v6 = vadd.f32 %v7959_v19, %v7958_v36  ;;  %v1799_v1 = vadd.f32 %v1798_v32, %v1638_v31  ;;  %v7961_v18 = vpop.f32.mrb[90].mxu1  ;;  %v2160_v31 = vsel %vm301_vm1, %v2157_v49, %v2159_v55  ;;  %8138 = vmatprep.subr.bf16.mxu1 %v9288_v26 }
 0x272   :  { %vm1884_vm3 = vcmp.gt.f32.partialorder %v1852_v10, 0.0  ;;  %v1916_v17 = vmul.f32 0.01, %v1852_v10  ;;  %v1853_v7 = vadd.f32 %v9420_v43, %v1807_v50  ;;  %v7962_v20 = vpop.f32.mrb[91].mxu1  ;;  %8139 = vmatpush3.bf16.msra.mxu1 %v9289_v22  ;;  %v9422_v43 = vld [vmem:[%s11752_s0 + $0xe0] sm:$0xff] }
 0x273   :  { %vm1882_vm6 = vcmp.gt.f32.partialorder %v1850_v51, 0.0  ;;  %v1914_v24 = vmul.f32 0.01, %v1850_v51  ;;  %v1851_v45 = vadd.f32 %v9421_v52, %v1799_v1  ;;  %v7963_v62 = vadd.f32 %v7962_v20, %v7961_v18 }
 0x274   :  { %v10429_v27 = vsel %vm1884_vm3, %v1852_v10, %v1916_v17  ;;  %vm1885_vm7 = vcmp.gt.f32.partialorder %v1853_v7, 0.0  ;;  %v1917_v28 = vmul.f32 0.01, %v1853_v7  ;;  %v1651_v63 = vadd.f32 %v7960_v6, %v10118_v42 }
 0x275   :  { %vm1883_vm8 = vcmp.gt.f32.partialorder %v1851_v45, 0.0  ;;  %v1915_v9 = vmul.f32 0.01, %v1851_v45  ;;  %2580 = vmatmul.mubr.bf16.gmra.mrb[140].mxu0 %v2243_v12  ;;  %v8904_v54 = vpop.f32.mrb[92].mxu0  ;;  %v10433_v36 = vsel %vm1882_vm6, %v1850_v51, %v1914_v24  ;;  %v1654_v19 = vadd.f32 %v7963_v62, %v10118_v42 }
 0x276   :  { %v1811_v34 = vpop.f32.mrb[93].mxu0  ;;  %v2161_v56 = vrot.slane %v10433_v36, 1  ;;  %v2065_v40 = vrot.slane %v10433_v36, 7  ;;  %v10443_v4 = vsel %vm1885_vm7, %v1853_v7, %v1917_v28  ;;  %v2165_v17 = vrot.slane %v10429_v27, 1 }
 0x277   :  { %v7964_v13 = vpop.f32.mrb[92].mxu1  ;;  %v1812_v10 = vadd.f32 %v1811_v34, %v1651_v63  ;;  %v8905_v50 = vpop.f32.mrb[94].mxu0  ;;  %v10440_v32 = vsel %vm1883_vm8, %v1851_v45, %v1915_v9  ;;  %v2250_v28 = vpack.c.bf16 %v10443_v4, %v10429_v27  ;;  %v9423_v9 = vld [vmem:[%s11752_s0 + $0xe8] sm:$0xff] }
 0x278   :  { %v7965_v51 = vpop.f32.mrb[93].mxu1  ;;  %v1814_v49 = vpop.f32.mrb[95].mxu0  ;;  %v2247_v6 = vpack.c.bf16 %v10440_v32, %v10433_v36  ;;  %v2162_v1 = vsel %vm301_vm1, %v2159_v55, %v2161_v56  ;;  %v2067_v18 = vrot.slane %v10440_v32, 7  ;;  %v2066_v45 = vsel %vm204_vm0, %v2063_v29, %v2065_v40 }
 0x279   :  { %v1854_v20 = vadd.f32 %v9422_v43, %v1812_v10  ;;  %v7966_v12 = vadd.f32 %v7965_v51, %v7964_v13  ;;  %v7967_v7 = vpop.f32.mrb[94].mxu1  ;;  %v1815_v35 = vadd.f32 %v1814_v49, %v1654_v19  ;;  %v2245_v24 = vpack.c.bf16 %v2162_v1, %v2160_v31  ;;  %v9290_v13 = vld [vmem:[#allocation2 + $0x2a8] sm:$0xff]  }
 0x27a   :  { %v7968_v52 = vpop.f32.mrb[95].mxu1  ;;  %2587 = vmatprep.mubr.bf16.mxu0 %v2247_v6  ;;  %v2068_v55 = vsel %vm204_vm0, %v2065_v40, %v2067_v18  ;;  %v2163_v62 = vrot.slane %v10440_v32, 1  ;;  %v2167_v40 = vrot.slane %v10443_v4, 1  ;;  %v9291_v10 = vld [vmem:[#allocation2 + $0x268] sm:$0xff]   ;;  %v2069_v6 = vrot.slane %v10429_v27, 7  ;;  %8140 = vmatprep.subr.bf16.mxu1 %v9290_v13  ;;  %v9292_v13 = vld [vmem:[#allocation2 + $0x2f0] sm:$0xff]  }
 0x27b   :  { %vm1886_vm9 = vcmp.gt.f32.partialorder %v1854_v20, 0.0  ;;  %v1918_v26 = vmul.f32 0.01, %v1854_v20  ;;  %v1659_v22 = vadd.f32 %v7966_v12, %v10118_v42  ;;  %v1855_v63 = vadd.f32 %v9423_v9, %v1815_v35  ;;  %8943 = vmatmul.mubr.bf16.gmra.mrb[116].mxu1 %v2245_v24  ;;  %8966 = vmatprep.subr.bf16.mxu0 %v9292_v13 }
 0x27c   :  { %v2246_v34 = vpack.c.bf16 %v2068_v55, %v2066_v45  ;;  %v2164_v29 = vsel %vm301_vm1, %v2161_v56, %v2163_v62  ;;  %v2166_v31 = vsel %vm301_vm1, %v2163_v62, %v2165_v17  ;;  %v2071_v1 = vrot.slane %v10443_v4, 7  ;;  %v9424_v56 = vld [vmem:[%s11752_s0 + $0xf0] sm:$0xff]  ;;  %8141 = vmatpush3.bf16.msra.mxu1 %v9291_v10  ;;  %8967 = vmatpush3.bf16.msra.mxu0 %v9292_v13 }
 0x27d   :  { %v10467_v50 = vsel %vm1886_vm9, %v1854_v20, %v1918_v26  ;;  %v1820_v19 = vadd.f32 %v8904_v54, %v1659_v22  ;;  %vm1887_vm10 = vcmp.gt.f32.partialorder %v1855_v63, 0.0  ;;  %v1919_v42 = vmul.f32 0.01, %v1855_v63  ;;  %v9294_v10 = vld [vmem:[#allocation2 + $0x270] sm:$0xff]  }
 0x27e   :  { %11775 = vst [vmem:[#allocation8_spill] sm:$0xff] %v10467_v50  ;;  %2588 = vmatmul.mubr.bf16.gmra.mrb[144].mxu0 %v2246_v34  ;;  %v2248_v51 = vpack.c.bf16 %v2166_v31, %v2164_v29  ;;  %v2169_v49 = vrot.slane %v10467_v50, 1  ;;  %v2168_v54 = vsel %vm301_vm1, %v2165_v17, %v2167_v40  ;;  %v2070_v7 = vsel %vm204_vm0, %v2067_v18, %v2069_v6  ;;  %v9293_v29 = vld [vmem:[#allocation2 + $0x2b0] sm:$0xff]  }
 0x27f   :  { %v1856_v43 = vadd.f32 %v9424_v56, %v1820_v19  ;;  %2595 = vmatprep.mubr.bf16.mxu0 %v2250_v28  ;;  %v10475_v20 = vsel %vm1887_vm10, %v1855_v63, %v1919_v42  ;;  %v2072_v52 = vsel %vm204_vm0, %v2069_v6, %v2071_v1  ;;  %v2073_v34 = vrot.slane %v10467_v50, 7  ;;  %v9295_v19 = vld [vmem:[#allocation2 + $0x2b8] sm:$0xff]   ;;  %8142 = vmatprep.subr.bf16.mxu1 %v9293_v29 }
 0x280   :  { %11776 = vst [vmem:[#allocation9_spill] sm:$0xff] %v10475_v20  ;;  %8946 = vmatprep.mubr.bf16.mxu1 %v2248_v51  ;;  %v2170_v12 = vsel %vm301_vm1, %v2167_v40, %v2169_v49  ;;  %v2171_v45 = vrot.slane %v10475_v20, 1  ;;  %v2249_v62 = vpack.c.bf16 %v2072_v52, %v2070_v7  ;;  %v2253_v17 = vpack.c.bf16 %v10475_v20, %v10467_v50 }
 0x281   :  { %vm1888_vm11 = vcmp.gt.f32.partialorder %v1856_v43, 0.0  ;;  %v1920_v35 = vmul.f32 0.01, %v1856_v43  ;;  %v2251_v24 = vpack.c.bf16 %v2170_v12, %v2168_v54  ;;  %v2075_v26 = vrot.slane %v10475_v20, 7  ;;  %8143 = vmatpush3.bf16.msra.mxu1 %v9294_v10  ;;  %v9297_v12 = vld [vmem:[#allocation2 + $0x2f8] sm:$0xff]  }
 0x282   :  { %v2172_v18 = vsel %vm301_vm1, %v2169_v49, %v2171_v45  ;;  %v2074_v42 = vsel %vm204_vm0, %v2071_v1, %v2073_v34  ;;  %v9296_v49 = vld [vmem:[#allocation2 + $0x278] sm:$0xff]   ;;  %8144 = vmatprep.subr.bf16.mxu1 %v9295_v19  ;;  %8968 = vmatprep.subr.bf16.mxu0 %v9297_v12 }
 0x283   :  { %8947 = vmatmul.mubr.bf16.gmra.mrb[120].mxu1 %v2251_v24  ;;  %v10482_v55 = vsel %vm1888_vm11, %v1856_v43, %v1920_v35  ;;  %v2076_v40 = vsel %vm204_vm0, %v2073_v34, %v2075_v26  ;;  %8969 = vmatpush3.bf16.msra.mxu0 %v9297_v12 }
 0x284   :  { %11777 = vst [vmem:[#allocation10_spill] sm:$0xff] %v10482_v55  ;;  %v2173_v28 = vrot.slane %v10482_v55, 1  ;;  %v2252_v51 = vpack.c.bf16 %v2076_v40, %v2074_v42  ;;  %v2256_v6 = vpack.c.bf16 %v10309_v16, %v10482_v55  ;;  %v2077_v56 = vrot.slane %v10482_v55, 7 }
 0x285   :  { %8145 = vmatpush3.bf16.msra.mxu1 %v9296_v49 }
 0x286   :  { %2596 = vmatmul.mubr.bf16.gmra.mrb[148].mxu0 %v2249_v62  ;;  %v2174_v22 = vsel %vm301_vm1, %v2171_v45, %v2173_v28  ;;  %v2176_v9 = vsel %vm301_vm1, %v2173_v28, %v10048_v14  ;;  %v2078_v43 = vsel %vm204_vm0, %v2075_v26, %v2077_v56  ;;  %v2080_v54 = vsel %vm204_vm0, %v2077_v56, %v10036_v38  ;;  %v10504_v26 = vld [vmem:[#allocation4 + $0x2] ss:$0 sm:$0xff] }
 0x287   :  { %2603 = vmatprep.mubr.bf16.mxu0 %v2253_v17  ;;  %v2254_v63 = vpack.c.bf16 %v2174_v22, %v2172_v18  ;;  %v7560_v31 = vpack.c.bf16 %v10048_v14, %v2176_v9  ;;  %v2255_v1 = vpack.c.bf16 %v2080_v54, %v2078_v43 }
 0x289   :  { %8950 = vmatprep.mubr.bf16.mxu1 %v2254_v63 }
 0x28b   :  { %8951 = vmatmul.mubr.msk.bf16.gmra.mrb[124].mxu1 %vm9831_vm5, %v7560_v31 }
 0x28e   :  { %2604 = vmatmul.mubr.bf16.gmra.mrb[152].mxu0 %v2252_v51 }
 0x28f   :  { %2611 = vmatprep.mubr.bf16.mxu0 %v2256_v6 }
 0x296   :  { %2612 = vmatmul.mubr.bf16.gmra.mrb[156].mxu0 %v2255_v1 }
 0x2f0   :  { %v8010_v7 = vpop.f32.mrb[96].mxu0 }
 0x2f1   :  { %v8011_v35 = vpop.f32.mrb[97].mxu0 }
 0x2f2   :  { %v8012_v24 = vadd.f32 %v8011_v35, %v8010_v7  ;;  %v8013_v16 = vpop.f32.mrb[98].mxu0 }
 0x2f3   :  { %v8014_v52 = vpop.f32.mrb[99].mxu0 }
 0x2f4   :  { %v8015_v45 = vadd.f32 %v8014_v52, %v8013_v16  ;;  %v2494_v29 = vadd.f32 %v8012_v24, %v10504_v26  ;;  %v9298_v16 = vld [vmem:[#allocation2 + $0x380] sm:$0xff]  }
 0x2f5   :  { %9002 = vmatprep.subr.bf16.mxu1 %v9298_v16 }
 0x2f6   :  { %v2497_v51 = vadd.f32 %v8015_v45, %v10504_v26 }
 0x2f8   :  { %v8016_v62 = vpop.f32.mrb[100].mxu0 }
 0x2f9   :  { %v8017_v28 = vpop.f32.mrb[101].mxu0 }
 0x2fa   :  { %v8018_v17 = vadd.f32 %v8017_v28, %v8016_v62  ;;  %v8019_v18 = vpop.f32.mrb[102].mxu0 }
 0x2fb   :  { %v8020_v22 = vpop.f32.mrb[103].mxu0 }
 0x2fc   :  { %v8021_v9 = vadd.f32 %v8020_v22, %v8019_v18  ;;  %v2502_v63 = vadd.f32 %v8018_v17, %v10504_v26  ;;  %v9302_v18 = vld [vmem:[#allocation2 + $0x340] sm:$0xff]  }
 0x2fd   :  { %8266 = vmatprep.subr.bf16.mxu0 %v9302_v18 }
 0x2fe   :  { %v8924_v34 = vpop.f32.mrb[96].mxu1  ;;  %v2505_v31 = vadd.f32 %v8021_v9, %v10504_v26 }
 0x2ff   :  { %v2663_v40 = vadd.f32 %v8924_v34, %v2502_v63  ;;  %v2654_v13 = vpop.f32.mrb[97].mxu1 }
 0x300   :  { %v2655_v10 = vadd.f32 %v2654_v13, %v2494_v29  ;;  %v8022_v19 = vpop.f32.mrb[104].mxu0  ;;  %v8925_v42 = vpop.f32.mrb[98].mxu1 }
 0x301   :  { %v2783_v49 = vmax.f32 %v2663_v40, 0.0  ;;  %v2666_v6 = vadd.f32 %v8925_v42, %v2505_v31  ;;  %v8023_v56 = vpop.f32.mrb[105].mxu0  ;;  %v2657_v43 = vpop.f32.mrb[99].mxu1 }
 0x302   :  { %v2781_v54 = vmax.f32 %v2655_v10, 0.0  ;;  %v8024_v1 = vadd.f32 %v8023_v56, %v8022_v19  ;;  %v2658_v12 = vadd.f32 %v2657_v43, %v2497_v51  ;;  %v8025_v7 = vpop.f32.mrb[106].mxu0 }
 0x303   :  { %v10510_v35 = vmax.f32 %v2666_v6, 0.0  ;;  %v8026_v24 = vpop.f32.mrb[107].mxu0  ;;  %v2880_v52 = vrot.slane %v2783_v49, 7  ;;  %v2976_v62 = vrot.slane %v2783_v49, 1 }
 0x304   :  { %v2782_v28 = vmax.f32 %v2658_v12, 0.0  ;;  %v8027_v17 = vadd.f32 %v8026_v24, %v8025_v7  ;;  %v2877_v22 = vrot.slane %v2781_v54, 7  ;;  %v2973_v34 = vrot.slane %v2781_v54, 1  ;;  %v9299_v7 = vld [vmem:[#allocation2 + $0x388] sm:$0xff]  }
 0x305   :  { %v11756_v45 = vrot.slane %v10510_v35, 7  ;;  %v2978_v9 = vrot.slane %v10510_v35, 1  ;;  %v3073_v63 = vpack.c.bf16 %v10510_v35, %v2783_v49 }
 0x306   :  { %v2878_v29 = vrot.slane %v2782_v28, 7  ;;  %v2974_v31 = vrot.slane %v2782_v28, 1  ;;  %v3070_v40 = vpack.c.bf16 %v2782_v28, %v2781_v54 }
 0x307   :  { %v2883_v13 = vsel %vm204_vm0, %v2880_v52, %v11756_v45  ;;  %v10521_v10 = vsel %vm301_vm1, %v2976_v62, %v2978_v9 }
 0x308   :  { %v2879_v19 = vsel %vm204_vm0, %v2877_v22, %v2878_v29  ;;  %v8028_v42 = vpop.f32.mrb[108].mxu0  ;;  %3350 = vmatprep.mubr.bf16.mxu1 %v3070_v40  ;;  %v2975_v51 = vsel %vm301_vm1, %v2973_v34, %v2974_v31  ;;  %v2977_v49 = vsel %vm301_vm1, %v2974_v31, %v2976_v62  ;;  %v2881_v6 = vsel %vm204_vm0, %v2878_v29, %v2880_v52  ;;  %v9300_v62 = vld [vmem:[#allocation2 + $0x390] sm:$0xff]  }
 0x309   :  { %v7589_v56 = vpack.c.bf16 %v2879_v19, %v2877_v22  ;;  %v8029_v43 = vpop.f32.mrb[109].mxu0  ;;  %v3071_v54 = vpack.c.bf16 %v2977_v49, %v2975_v51  ;;  %v3072_v12 = vpack.c.bf16 %v2883_v13, %v2881_v6  ;;  %v2510_v22 = vadd.f32 %v8024_v1, %v10504_v26 }
 0x30a   :  { %v8030_v24 = vadd.f32 %v8029_v43, %v8028_v42  ;;  %v8031_v28 = vpop.f32.mrb[110].mxu0  ;;  %v2513_v51 = vadd.f32 %v8027_v17, %v10504_v26 }
 0x30b   :  { %v8032_v18 = vpop.f32.mrb[111].mxu0  ;;  %7590 = vmatmul.mubr.msk.bf16.vlgmr.msra.gmra.mrb[128].mxu1 %vm9570_vm4, %v7589_v56  ;;  %8970 = vmatprep.mubr.bf16.mxu0 %v3071_v54 }
 0x30c   :  { %v8033_v45 = vadd.f32 %v8032_v18, %v8031_v28  ;;  %3358 = vmatprep.mubr.bf16.mxu1 %v3073_v63  ;;  %v2518_v34 = vadd.f32 %v8030_v24, %v10504_v26  ;;  %9003 = vmatpush3.bf16.msra.mxu1 %v9298_v16  ;;  %v9301_v16 = vld [vmem:[#allocation2 + $0x398] sm:$0xff]  }
 0x30d   :  { %9004 = vmatprep.subr.bf16.mxu1 %v9299_v7 }
 0x30e   :  { %v8928_v52 = vpop.f32.mrb[100].mxu1  ;;  %v2521_v29 = vadd.f32 %v8033_v45, %v10504_v26 }
 0x30f   :  { %v2679_v31 = vadd.f32 %v8928_v52, %v2518_v34  ;;  %v2670_v40 = vpop.f32.mrb[101].mxu1 }
 0x310   :  { %v2671_v13 = vadd.f32 %v2670_v40, %v2510_v22  ;;  %v8034_v19 = vpop.f32.mrb[112].mxu0  ;;  %v8929_v42 = vpop.f32.mrb[102].mxu1  ;;  %9005 = vmatpush3.bf16.msra.mxu1 %v9299_v7 }
 0x311   :  { %v2787_v49 = vmax.f32 %v2679_v31, 0.0  ;;  %v2682_v63 = vadd.f32 %v8929_v42, %v2521_v29  ;;  %v8035_v6 = vpop.f32.mrb[113].mxu0  ;;  %v2673_v56 = vpop.f32.mrb[103].mxu1  ;;  %9006 = vmatprep.subr.bf16.mxu1 %v9300_v62 }
 0x312   :  { %v2785_v43 = vmax.f32 %v2671_v13, 0.0  ;;  %v8036_v54 = vadd.f32 %v8035_v6, %v8034_v19  ;;  %v2674_v24 = vadd.f32 %v2673_v56, %v2513_v51  ;;  %v8037_v1 = vpop.f32.mrb[114].mxu0  ;;  %v9303_v51 = vld [vmem:[#allocation2 + $0x300] sm:$0xff]  }
 0x313   :  { %v2888_v28 = vrot.slane %v2787_v49, 7  ;;  %v10533_v45 = vmax.f32 %v2682_v63, 0.0  ;;  %v8038_v18 = vpop.f32.mrb[115].mxu0  ;;  %3359 = vmatmul.mubr.bf16.gmra.mrb[132].mxu1 %v3072_v12  ;;  %v2984_v7 = vrot.slane %v2787_v49, 1 }
 0x314   :  { %v2884_v34 = vrot.slane %v2785_v43, 7  ;;  %v2980_v52 = vrot.slane %v2785_v43, 1  ;;  %v2786_v22 = vmax.f32 %v2674_v24, 0.0  ;;  %v8039_v17 = vadd.f32 %v8038_v18, %v8037_v1  ;;  %9007 = vmatpush3.bf16.msra.mxu1 %v9300_v62  ;;  %v9304_v18 = vld [vmem:[#allocation2 + $0x348] sm:$0xff]  }
 0x315   :  { %v11757_v29 = vrot.slane %v10533_v45, 7  ;;  %v2986_v31 = vrot.slane %v10533_v45, 1  ;;  %v3079_v40 = vpack.c.bf16 %v10533_v45, %v2787_v49  ;;  %9008 = vmatprep.subr.bf16.mxu1 %v9301_v16  ;;  %v11778_v62 = vrot.slane %v10510_v35, 7 }
 0x316   :  { %v2886_v13 = vrot.slane %v2786_v22, 7  ;;  %v2982_v19 = vrot.slane %v2786_v22, 1  ;;  %v3076_v42 = vpack.c.bf16 %v2786_v22, %v2785_v43  ;;  %v2981_v12 = vsel %vm301_vm1, %v2978_v9, %v2980_v52 }
 0x317   :  { %v3074_v63 = vpack.c.bf16 %v2981_v12, %v10521_v10  ;;  %v2885_v6 = vsel %vm204_vm0, %v11778_v62, %v2884_v34  ;;  %v2891_v56 = vsel %vm204_vm0, %v2888_v28, %v11757_v29  ;;  %v10555_v62 = vsel %vm301_vm1, %v2984_v7, %v2986_v31 }
 0x318   :  { %v8040_v49 = vpop.f32.mrb[116].mxu0  ;;  %3366 = vmatprep.mubr.bf16.mxu1 %v3076_v42  ;;  %v2887_v24 = vsel %vm204_vm0, %v2884_v34, %v2886_v13  ;;  %v2983_v43 = vsel %vm301_vm1, %v2980_v52, %v2982_v19  ;;  %v2985_v1 = vsel %vm301_vm1, %v2982_v19, %v2984_v7  ;;  %v2889_v9 = vsel %vm204_vm0, %v2886_v13, %v2888_v28  ;;  %v9306_v42 = vld [vmem:[#allocation2 + $0x3a0] sm:$0xff]   ;;  %v9305_v52 = vld [vmem:[#allocation2 + $0x308] sm:$0xff]   ;;  %v9307_v28 = vld [vmem:[#allocation2 + $0x350] sm:$0xff]  }
 0x319   :  { %v8041_v10 = vpop.f32.mrb[117].mxu0  ;;  %8971 = vmatmul.mubr.bf16.vlgmr.msra.gmra.mrb[160].mxu0 %v3074_v63  ;;  %v3075_v35 = vpack.c.bf16 %v2887_v24, %v2885_v6  ;;  %v3077_v22 = vpack.c.bf16 %v2985_v1, %v2983_v43  ;;  %v3078_v12 = vpack.c.bf16 %v2891_v56, %v2889_v9  ;;  %9009 = vmatpush3.bf16.msra.mxu1 %v9301_v16  ;;  %v9308_v16 = vld [vmem:[#allocation2 + $0x310] sm:$0xff]   ;;  %v9309_v24 = vld [vmem:[#allocation2 + $0x358] sm:$0xff]  }
 0x31a   :  { %v8042_v29 = vadd.f32 %v8041_v10, %v8040_v49  ;;  %v8043_v34 = vpop.f32.mrb[118].mxu0  ;;  %8267 = vmatpush3.bf16.msra.mxu0 %v9303_v51  ;;  %9010 = vmatprep.subr.bf16.mxu1 %v9306_v42  ;;  %v2526_v7 = vadd.f32 %v8036_v54, %v10504_v26 }
 0x31b   :  { %v8044_v19 = vpop.f32.mrb[119].mxu0  ;;  %3367 = vmatmul.mubr.bf16.gmra.mrb[136].mxu1 %v3075_v35  ;;  %8974 = vmatprep.mubr.bf16.mxu0 %v3077_v22 }
 0x31c   :  { %v8045_v13 = vadd.f32 %v8044_v19, %v8043_v34  ;;  %3374 = vmatprep.mubr.bf16.mxu1 %v3079_v40  ;;  %v2534_v63 = vadd.f32 %v8042_v29, %v10504_v26  ;;  %8268 = vmatprep.subr.bf16.mxu0 %v9304_v18  ;;  %v2529_v40 = vadd.f32 %v8039_v17, %v10504_v26 }
 0x31d   :  { %9011 = vmatpush3.bf16.msra.mxu1 %v9306_v42 }
 0x31e   :  { %v8932_v6 = vpop.f32.mrb[104].mxu1  ;;  %v2537_v56 = vadd.f32 %v8045_v13, %v10504_v26  ;;  %8269 = vmatpush3.bf16.msra.mxu0 %v9305_v52 }
 0x31f   :  { %v2695_v51 = vadd.f32 %v8932_v6, %v2534_v63  ;;  %v2686_v49 = vpop.f32.mrb[105].mxu1  ;;  %8270 = vmatprep.subr.bf16.mxu0 %v9307_v28 }
 0x320   :  { %v2687_v43 = vadd.f32 %v2686_v49, %v2526_v7  ;;  %v8046_v1 = vpop.f32.mrb[120].mxu0  ;;  %v8933_v9 = vpop.f32.mrb[106].mxu1 }
 0x321   :  { %v2791_v29 = vmax.f32 %v2695_v51, 0.0  ;;  %v2698_v18 = vadd.f32 %v8933_v9, %v2537_v56  ;;  %v8047_v10 = vpop.f32.mrb[121].mxu0  ;;  %v2689_v35 = vpop.f32.mrb[107].mxu1 }
 0x322   :  { %v2789_v22 = vmax.f32 %v2687_v43, 0.0  ;;  %v8048_v54 = vadd.f32 %v8047_v10, %v8046_v1  ;;  %v2690_v34 = vadd.f32 %v2689_v35, %v2529_v40  ;;  %v8049_v19 = vpop.f32.mrb[122].mxu0  ;;  %8271 = vmatpush3.bf16.msra.mxu0 %v9308_v16 }
 0x323   :  { %v2896_v42 = vrot.slane %v2791_v29, 7  ;;  %v10561_v52 = vmax.f32 %v2698_v18, 0.0  ;;  %v8050_v13 = vpop.f32.mrb[123].mxu0  ;;  %3375 = vmatmul.mubr.bf16.gmra.mrb[140].mxu1 %v3078_v12  ;;  %8272 = vmatprep.subr.bf16.mxu0 %v9309_v24  ;;  %v2992_v17 = vrot.slane %v2791_v29, 1  ;;  %v11779_v24 = vrot.slane %v10533_v45, 7 }
 0x324   :  { %v2892_v28 = vrot.slane %v2789_v22, 7  ;;  %v2988_v63 = vrot.slane %v2789_v22, 1  ;;  %v2790_v6 = vmax.f32 %v2690_v34, 0.0  ;;  %v8051_v7 = vadd.f32 %v8050_v13, %v8049_v19 }
 0x325   :  { %v2898_v56 = vrot.slane %v10561_v52, 7  ;;  %v2994_v51 = vrot.slane %v10561_v52, 1  ;;  %v3085_v49 = vpack.c.bf16 %v10561_v52, %v2791_v29 }
 0x326   :  { %v2894_v43 = vrot.slane %v2790_v6, 7  ;;  %v2990_v1 = vrot.slane %v2790_v6, 1  ;;  %v3082_v16 = vpack.c.bf16 %v2790_v6, %v2789_v22  ;;  %v2989_v9 = vsel %vm301_vm1, %v2986_v31, %v2988_v63 }
 0x327   :  { %v3080_v12 = vpack.c.bf16 %v2989_v9, %v10555_v62  ;;  %v2893_v40 = vsel %vm204_vm0, %v11779_v24, %v2892_v28  ;;  %v2899_v18 = vsel %vm204_vm0, %v2896_v42, %v2898_v56  ;;  %v2995_v45 = vsel %vm301_vm1, %v2992_v17, %v2994_v51 }
 0x328   :  { %v8052_v10 = vpop.f32.mrb[124].mxu0  ;;  %3382 = vmatprep.mubr.bf16.mxu1 %v3082_v16  ;;  %v2895_v35 = vsel %vm204_vm0, %v2892_v28, %v2894_v43  ;;  %v2991_v29 = vsel %vm301_vm1, %v2988_v63, %v2990_v1  ;;  %v2993_v22 = vsel %vm301_vm1, %v2990_v1, %v2992_v17  ;;  %v2897_v34 = vsel %vm204_vm0, %v2894_v43, %v2896_v42 }
 0x329   :  { %v8053_v19 = vpop.f32.mrb[125].mxu0  ;;  %8975 = vmatmul.mubr.bf16.gmra.mrb[164].mxu0 %v3080_v12  ;;  %v3081_v31 = vpack.c.bf16 %v2895_v35, %v2893_v40  ;;  %v3083_v62 = vpack.c.bf16 %v2993_v22, %v2991_v29  ;;  %v3084_v52 = vpack.c.bf16 %v2899_v18, %v2897_v34  ;;  %v2542_v1 = vadd.f32 %v8048_v54, %v10504_v26 }
 0x32a   :  { %v8054_v13 = vadd.f32 %v8053_v19, %v8052_v10  ;;  %v8055_v6 = vpop.f32.mrb[126].mxu0  ;;  %v2545_v40 = vadd.f32 %v8051_v7, %v10504_v26 }
 0x32b   :  { %v8056_v9 = vpop.f32.mrb[127].mxu0  ;;  %3383 = vmatmul.mubr.bf16.gmra.mrb[144].mxu1 %v3081_v31  ;;  %8978 = vmatprep.mubr.bf16.mxu0 %v3083_v62 }
 0x32c   :  { %3390 = vmatprep.mubr.bf16.mxu1 %v3085_v49  ;;  %v2550_v28 = vadd.f32 %v8054_v13, %v10504_v26 }
 0x32e   :  { %v8936_v63 = vpop.f32.mrb[108].mxu1 }
 0x32f   :  { %v2711_v16 = vadd.f32 %v8936_v63, %v2550_v28  ;;  %v2702_v42 = vpop.f32.mrb[109].mxu1 }
 0x330   :  { %v2703_v43 = vadd.f32 %v2702_v42, %v2542_v1  ;;  %v8058_v12 = vpop.f32.mrb[128].mxu0  ;;  %v8937_v24 = vpop.f32.mrb[110].mxu1 }
 0x331   :  { %v10582_v18 = vmax.f32 %v2711_v16, 0.0  ;;  %v8059_v17 = vpop.f32.mrb[129].mxu0  ;;  %v2705_v10 = vpop.f32.mrb[111].mxu1 }
 0x332   :  { %v2793_v35 = vmax.f32 %v2703_v43, 0.0  ;;  %v8060_v29 = vadd.f32 %v8059_v17, %v8058_v12  ;;  %v2706_v22 = vadd.f32 %v2705_v10, %v2545_v40  ;;  %v8061_v49 = vpop.f32.mrb[130].mxu0 }
 0x333   :  { %v2904_v34 = vrot.slane %v10582_v18, 7  ;;  %v8062_v19 = vpop.f32.mrb[131].mxu0  ;;  %3391 = vmatmul.mubr.bf16.gmra.mrb[148].mxu1 %v3084_v52  ;;  %v3000_v13 = vrot.slane %v10582_v18, 1 }
 0x334   :  { %v2900_v54 = vrot.slane %v2793_v35, 7  ;;  %v2996_v31 = vrot.slane %v2793_v35, 1  ;;  %v2794_v62 = vmax.f32 %v2706_v22, 0.0  ;;  %v8063_v6 = vadd.f32 %v8062_v19, %v8061_v49  ;;  %v10597_v22 = vld [vmem:[%s11755_s3 + $0x78] sm:$0xff] }
 0x335   :  { %v2907_v42 = vsel %vm204_vm0, %v2904_v34, %v10036_v38  ;;  %v3091_v49 = vpack.c.bf16 %v10597_v22, %v10582_v18 }
 0x336   :  { %v2902_v9 = vrot.slane %v2794_v62, 7  ;;  %v2998_v7 = vrot.slane %v2794_v62, 1  ;;  %v3088_v28 = vpack.c.bf16 %v2794_v62, %v2793_v35  ;;  %v2997_v63 = vsel %vm301_vm1, %v2994_v51, %v2996_v31 }
 0x337   :  { %v3086_v1 = vpack.c.bf16 %v2997_v63, %v2995_v45  ;;  %v2901_v16 = vsel %vm204_vm0, %v2898_v56, %v2900_v54  ;;  %v2561_v63 = vadd.f32 %v8063_v6, %v10504_v26 }
 0x338   :  { %v8064_v43 = vpop.f32.mrb[132].mxu0  ;;  %3398 = vmatprep.mubr.bf16.mxu1 %v3088_v28  ;;  %v2903_v52 = vsel %vm204_vm0, %v2900_v54, %v2902_v9  ;;  %v2999_v12 = vsel %vm301_vm1, %v2996_v31, %v2998_v7  ;;  %v3001_v24 = vsel %vm301_vm1, %v2998_v7, %v3000_v13  ;;  %v2905_v40 = vsel %vm204_vm0, %v2902_v9, %v2904_v34 }
 0x339   :  { %v8065_v17 = vpop.f32.mrb[133].mxu0  ;;  %8979 = vmatmul.mubr.bf16.gmra.mrb[168].mxu0 %v3086_v1  ;;  %v3087_v10 = vpack.c.bf16 %v2903_v52, %v2901_v16  ;;  %v3089_v51 = vpack.c.bf16 %v3001_v24, %v2999_v12  ;;  %v3090_v45 = vpack.c.bf16 %v2907_v42, %v2905_v40  ;;  %v2558_v31 = vadd.f32 %v8060_v29, %v10504_v26 }
 0x33a   :  { %v8066_v35 = vadd.f32 %v8065_v17, %v8064_v43  ;;  %v8067_v56 = vpop.f32.mrb[134].mxu0 }
 0x33b   :  { %v8068_v19 = vpop.f32.mrb[135].mxu0  ;;  %3399 = vmatmul.mubr.bf16.gmra.mrb[152].mxu1 %v3087_v10  ;;  %8982 = vmatprep.mubr.bf16.mxu0 %v3089_v51 }
 0x33c   :  { %v2566_v34 = vadd.f32 %v8066_v35, %v10504_v26  ;;  %v8069_v54 = vadd.f32 %v8068_v19, %v8067_v56  ;;  %3406 = vmatprep.mubr.bf16.mxu1 %v3091_v49  ;;  %v3003_v56 = vsel %vm301_vm1, %v3000_v13, %v10048_v14 }
 0x33e   :  { %v2569_v62 = vadd.f32 %v8069_v54, %v10504_v26  ;;  %v8940_v9 = vpop.f32.mrb[112].mxu1 }
 0x33f   :  { %v2727_v7 = vadd.f32 %v8940_v9, %v2566_v34  ;;  %v2718_v28 = vpop.f32.mrb[113].mxu1 }
 0x340   :  { %v2719_v1 = vadd.f32 %v2718_v28, %v2558_v31  ;;  %v8070_v16 = vpop.f32.mrb[136].mxu0  ;;  %v8941_v42 = vpop.f32.mrb[114].mxu1 }
 0x341   :  { %v2799_v18 = vmax.f32 %v2727_v7, 0.0  ;;  %v2730_v43 = vadd.f32 %v8941_v42, %v2569_v62  ;;  %v8071_v52 = vpop.f32.mrb[137].mxu0  ;;  %v2721_v12 = vpop.f32.mrb[115].mxu1 }
 0x342   :  { %v2797_v24 = vmax.f32 %v2719_v1, 0.0  ;;  %v8072_v40 = vadd.f32 %v8071_v52, %v8070_v16  ;;  %v2722_v17 = vadd.f32 %v2721_v12, %v2561_v63  ;;  %v8073_v10 = vpop.f32.mrb[138].mxu0 }
 0x343   :  { %v2912_v51 = vrot.slane %v2799_v18, 7  ;;  %v10605_v29 = vmax.f32 %v2730_v43, 0.0  ;;  %v8074_v35 = vpop.f32.mrb[139].mxu0  ;;  %3407 = vmatmul.mubr.bf16.gmra.mrb[156].mxu1 %v3090_v45  ;;  %v3008_v6 = vrot.slane %v2799_v18, 1 }
 0x344   :  { %v2908_v49 = vrot.slane %v2797_v24, 7  ;;  %v3004_v19 = vrot.slane %v2797_v24, 1  ;;  %v2798_v34 = vmax.f32 %v2722_v17, 0.0  ;;  %v8075_v62 = vadd.f32 %v8074_v35, %v8073_v10 }
 0x345   :  { %v2914_v54 = vrot.slane %v10605_v29, 7  ;;  %v3010_v31 = vrot.slane %v10605_v29, 1  ;;  %v3097_v9 = vpack.c.bf16 %v10605_v29, %v2799_v18 }
 0x346   :  { %v2910_v7 = vrot.slane %v2798_v34, 7  ;;  %v3006_v28 = vrot.slane %v2798_v34, 1  ;;  %v3094_v63 = vpack.c.bf16 %v2798_v34, %v2797_v24  ;;  %v3005_v45 = vsel %vm301_vm1, %v10048_v14, %v3004_v19 }
 0x347   :  { %v3092_v1 = vpack.c.bf16 %v3005_v45, %v3003_v56  ;;  %v2909_v13 = vsel %vm204_vm0, %v10036_v38, %v2908_v49  ;;  %v2915_v16 = vsel %vm204_vm0, %v2912_v51, %v2914_v54  ;;  %v3011_v56 = vsel %vm301_vm1, %v3008_v6, %v3010_v31 }
 0x348   :  { %v8076_v42 = vpop.f32.mrb[140].mxu0  ;;  %3414 = vmatprep.mubr.bf16.mxu1 %v3094_v63  ;;  %v2911_v43 = vsel %vm204_vm0, %v2908_v49, %v2910_v7  ;;  %v3007_v18 = vsel %vm301_vm1, %v3004_v19, %v3006_v28  ;;  %v3009_v52 = vsel %vm301_vm1, %v3006_v28, %v3008_v6  ;;  %v2913_v12 = vsel %vm204_vm0, %v2910_v7, %v2912_v51 }
 0x349   :  { %v8077_v24 = vpop.f32.mrb[141].mxu0  ;;  %8983 = vmatmul.mubr.bf16.gmra.mrb[172].mxu0 %v3092_v1  ;;  %v3093_v17 = vpack.c.bf16 %v2911_v43, %v2909_v13  ;;  %v3095_v10 = vpack.c.bf16 %v3009_v52, %v3007_v18  ;;  %v3096_v35 = vpack.c.bf16 %v2915_v16, %v2913_v12  ;;  %v2574_v51 = vadd.f32 %v8072_v40, %v10504_v26 }
 0x34a   :  { %v8078_v34 = vadd.f32 %v8077_v24, %v8076_v42  ;;  %v8079_v45 = vpop.f32.mrb[142].mxu0  ;;  %v2577_v16 = vadd.f32 %v8075_v62, %v10504_v26 }
 0x34b   :  { %v8080_v63 = vpop.f32.mrb[143].mxu0  ;;  %3415 = vmatmul.mubr.bf16.gmra.mrb[160].mxu1 %v3093_v17  ;;  %8986 = vmatprep.mubr.bf16.mxu0 %v3095_v10 }
 0x34c   :  { %v2582_v49 = vadd.f32 %v8078_v34, %v10504_v26  ;;  %v8081_v19 = vadd.f32 %v8080_v63, %v8079_v45  ;;  %3422 = vmatprep.mubr.bf16.mxu1 %v3097_v9 }
 0x34e   :  { %v2585_v7 = vadd.f32 %v8081_v19, %v10504_v26  ;;  %v8944_v28 = vpop.f32.mrb[116].mxu1 }
 0x34f   :  { %v2743_v1 = vadd.f32 %v8944_v28, %v2582_v49  ;;  %v2734_v13 = vpop.f32.mrb[117].mxu1 }
 0x350   :  { %v2735_v43 = vadd.f32 %v2734_v13, %v2574_v51  ;;  %v8945_v6 = vpop.f32.mrb[118].mxu1 }
 0x351   :  { %v2803_v42 = vmax.f32 %v2743_v1, 0.0  ;;  %v8082_v18 = vpop.f32.mrb[144].mxu0  ;;  %v2746_v52 = vadd.f32 %v8945_v6, %v2585_v7  ;;  %v2737_v12 = vpop.f32.mrb[119].mxu1 }
 0x352   :  { %v2801_v24 = vmax.f32 %v2735_v43, 0.0  ;;  %v8083_v17 = vpop.f32.mrb[145].mxu0  ;;  %v2738_v10 = vadd.f32 %v2737_v12, %v2577_v16 }
 0x353   :  { %v2920_v34 = vrot.slane %v2803_v42, 7  ;;  %v10630_v9 = vmax.f32 %v2746_v52, 0.0  ;;  %v8084_v40 = vadd.f32 %v8083_v17, %v8082_v18  ;;  %v8085_v45 = vpop.f32.mrb[146].mxu0  ;;  %3423 = vmatmul.mubr.bf16.gmra.mrb[164].mxu1 %v3096_v35  ;;  %v3016_v63 = vrot.slane %v2803_v42, 1 }
 0x354   :  { %v2916_v49 = vrot.slane %v2801_v24, 7  ;;  %v3012_v19 = vrot.slane %v2801_v24, 1  ;;  %v2802_v28 = vmax.f32 %v2738_v10, 0.0  ;;  %v8086_v62 = vpop.f32.mrb[147].mxu0 }
 0x355   :  { %v2922_v51 = vrot.slane %v10630_v9, 7  ;;  %v3018_v1 = vrot.slane %v10630_v9, 1  ;;  %v2590_v7 = vadd.f32 %v8084_v40, %v10504_v26  ;;  %v8087_v13 = vadd.f32 %v8086_v62, %v8085_v45 }
 0x356   :  { %v2918_v43 = vrot.slane %v2802_v28, 7  ;;  %v3014_v16 = vrot.slane %v2802_v28, 1  ;;  %v8948_v6 = vpop.f32.mrb[120].mxu1  ;;  %v3100_v52 = vpack.c.bf16 %v2802_v28, %v2801_v24  ;;  %v3013_v35 = vsel %vm301_vm1, %v3010_v31, %v3012_v19 }
 0x357   :  { %v2593_v18 = vadd.f32 %v8087_v13, %v10504_v26  ;;  %v2750_v12 = vpop.f32.mrb[121].mxu1  ;;  %v3098_v17 = vpack.c.bf16 %v3013_v35, %v3011_v56  ;;  %v2917_v10 = vsel %vm204_vm0, %v2914_v54, %v2916_v49  ;;  %v3103_v55 = vpack.c.bf16 %v10630_v9, %v2803_v42 }
 0x358   :  { %v2751_v40 = vadd.f32 %v2750_v12, %v2590_v7  ;;  %3430 = vmatprep.mubr.bf16.mxu1 %v3100_v52  ;;  %v8949_v45 = vpop.f32.mrb[122].mxu1  ;;  %v2919_v62 = vsel %vm204_vm0, %v2916_v49, %v2918_v43  ;;  %v3015_v24 = vsel %vm301_vm1, %v3012_v19, %v3014_v16  ;;  %v3017_v28 = vsel %vm301_vm1, %v3014_v16, %v3016_v63 }
 0x359   :  { %v8088_v31 = vpop.f32.mrb[148].mxu0  ;;  %8987 = vmatmul.mubr.bf16.gmra.mrb[176].mxu0 %v3098_v17  ;;  %v2753_v13 = vpop.f32.mrb[123].mxu1  ;;  %v3099_v20 = vpack.c.bf16 %v2919_v62, %v2917_v10  ;;  %v3101_v56 = vpack.c.bf16 %v3017_v28, %v3015_v24  ;;  %v3019_v29 = vsel %vm301_vm1, %v3016_v63, %v3018_v1  ;;  %v2921_v54 = vsel %vm204_vm0, %v2918_v43, %v2920_v34  ;;  %v9310_v24 = vld [vmem:[#allocation2 + $0x318] sm:$0xff]  }
 0x35a   :  { %v2805_v35 = vmax.f32 %v2751_v40, 0.0  ;;  %v8089_v42 = vpop.f32.mrb[149].mxu0  ;;  %v2754_v9 = vadd.f32 %v2753_v13, %v2593_v18  ;;  %v2923_v7 = vsel %vm204_vm0, %v2920_v34, %v2922_v51  ;;  %8273 = vmatpush3.bf16.msra.mxu0 %v9310_v24 }
 0x35b   :  { %v8090_v52 = vadd.f32 %v8089_v42, %v8088_v31  ;;  %v8091_v49 = vpop.f32.mrb[150].mxu0  ;;  %3431 = vmatmul.mubr.bf16.gmra.mrb[168].mxu1 %v3099_v20  ;;  %8990 = vmatprep.mubr.bf16.mxu0 %v3101_v56  ;;  %v3102_v19 = vpack.c.bf16 %v2923_v7, %v2921_v54 }
 0x35c   :  { %v2924_v16 = vrot.slane %v2805_v35, 7  ;;  %v3020_v12 = vrot.slane %v2805_v35, 1  ;;  %v2806_v17 = vmax.f32 %v2754_v9, 0.0  ;;  %v8092_v50 = vpop.f32.mrb[151].mxu0  ;;  %3438 = vmatprep.mubr.bf16.mxu1 %v3103_v55 }
 0x35d   :  { %v2598_v10 = vadd.f32 %v8090_v52, %v10504_v26  ;;  %v8093_v63 = vadd.f32 %v8092_v50, %v8091_v49  ;;  %v9312_v49 = vld [vmem:[#allocation2 + $0x360] sm:$0xff]  }
 0x35e   :  { %v2926_v62 = vrot.slane %v2806_v17, 7  ;;  %v3022_v43 = vrot.slane %v2806_v17, 1  ;;  %v10650_v40 = vpop.f32.mrb[124].mxu1  ;;  %v3021_v18 = vsel %vm301_vm1, %v3018_v1, %v3020_v12  ;;  %v3106_v34 = vpack.c.bf16 %v2806_v17, %v2805_v35  ;;  %8274 = vmatprep.subr.bf16.mxu0 %v9312_v49 }
 0x35f   :  { %v2759_v28 = vadd.f32 %v8948_v6, %v2598_v10  ;;  %v2601_v20 = vadd.f32 %v8093_v63, %v10504_v26  ;;  %v2766_v31 = vpop.f32.mrb[125].mxu1  ;;  %v3104_v13 = vpack.c.bf16 %v3021_v18, %v3019_v29  ;;  %v2925_v56 = vsel %vm204_vm0, %v2922_v51, %v2924_v16  ;;  %v9311_v6 = vld [vmem:[#allocation2 + $0x3a8] sm:$0xff]  }
 0x360   :  { %v8953_v54 = vpop.f32.mrb[126].mxu1  ;;  %v3023_v55 = vsel %vm301_vm1, %v3020_v12, %v3022_v43  ;;  %v2927_v50 = vsel %vm204_vm0, %v2924_v16, %v2926_v62  ;;  %9012 = vmatprep.subr.bf16.mxu1 %v9311_v6 }
 0x361   :  { %v2807_v42 = vmax.f32 %v2759_v28, 0.0  ;;  %v2762_v9 = vadd.f32 %v8949_v45, %v2601_v20  ;;  %v8094_v7 = vpop.f32.mrb[152].mxu0  ;;  %v2769_v52 = vpop.f32.mrb[127].mxu1  ;;  %8991 = vmatmul.mubr.bf16.gmra.mrb[180].mxu0 %v3104_v13  ;;  %v3105_v1 = vpack.c.bf16 %v2927_v50, %v2925_v56  ;;  %9013 = vmatpush3.bf16.msra.mxu1 %v9311_v6  ;;  %v9313_v54 = vld [vmem:[#allocation2 + $0x320] sm:$0xff]  }
 0x362   :  { %v8095_v35 = vpop.f32.mrb[153].mxu0  ;;  %8275 = vmatpush3.bf16.msra.mxu0 %v9313_v54 }
 0x363   :  { %v2808_v17 = vmax.f32 %v2762_v9, 0.0  ;;  %v8096_v10 = vadd.f32 %v8095_v35, %v8094_v7  ;;  %v8097_v29 = vpop.f32.mrb[154].mxu0  ;;  %3439 = vmatmul.mubr.bf16.gmra.mrb[172].mxu1 %v3102_v19  ;;  %v3024_v51 = vrot.slane %v2807_v42, 1  ;;  %v2928_v63 = vrot.slane %v2807_v42, 7 }
 0x364   :  { %v8098_v18 = vpop.f32.mrb[155].mxu0  ;;  %3446 = vmatprep.mubr.bf16.mxu1 %v3106_v34 }
 0x365   :  { %v2606_v16 = vadd.f32 %v8096_v10, %v10504_v26  ;;  %v8099_v12 = vadd.f32 %v8098_v18, %v8097_v29  ;;  %v3025_v45 = vsel %vm301_vm1, %v3022_v43, %v3024_v51  ;;  %v3109_v24 = vpack.c.bf16 %v2808_v17, %v2807_v42 }
 0x366   :  { %v3107_v28 = vpack.c.bf16 %v3025_v45, %v3023_v55  ;;  %v3026_v20 = vrot.slane %v2808_v17, 1  ;;  %v2929_v13 = vsel %vm204_vm0, %v2926_v62, %v2928_v63  ;;  %v2930_v56 = vrot.slane %v2808_v17, 7 }
 0x367   :  { %v2767_v19 = vadd.f32 %v2766_v31, %v2606_v16  ;;  %v2609_v50 = vadd.f32 %v8099_v12, %v10504_v26 }
 0x368   :  { %8994 = vmatprep.mubr.bf16.mxu0 %v3107_v28  ;;  %v3027_v34 = vsel %vm301_vm1, %v3024_v51, %v3026_v20  ;;  %v2931_v9 = vsel %vm204_vm0, %v2928_v63, %v2930_v56 }
 0x369   :  { %v2809_v7 = vmax.f32 %v2767_v19, 0.0  ;;  %v2770_v43 = vadd.f32 %v2769_v52, %v2609_v50  ;;  %v8100_v42 = vpop.f32.mrb[156].mxu0  ;;  %v3108_v35 = vpack.c.bf16 %v2931_v9, %v2929_v13  ;;  %v9314_v50 = vld [vmem:[#allocation2 + $0x368] sm:$0xff]  }
 0x36a   :  { %v8101_v55 = vpop.f32.mrb[157].mxu0  ;;  %8276 = vmatprep.subr.bf16.mxu0 %v9314_v50 }
 0x36b   :  { %v2810_v6 = vmax.f32 %v2770_v43, 0.0  ;;  %v8102_v10 = vadd.f32 %v8101_v55, %v8100_v42  ;;  %v8103_v62 = vpop.f32.mrb[158].mxu0  ;;  %3447 = vmatmul.mubr.bf16.gmra.mrb[176].mxu1 %v3105_v1  ;;  %v3028_v49 = vrot.slane %v2809_v7, 1  ;;  %v2932_v17 = vrot.slane %v2809_v7, 7  ;;  %v9315_v43 = vld [vmem:[#allocation2 + $0x328] sm:$0xff]   ;;  %v9317_v42 = vld [vmem:[#allocation2 + $0x370] sm:$0xff]  }
 0x36c   :  { %v8104_v31 = vpop.f32.mrb[159].mxu0  ;;  %3454 = vmatprep.mubr.bf16.mxu1 %v3109_v24  ;;  %8277 = vmatpush3.bf16.msra.mxu0 %v9315_v43  ;;  %v9316_v55 = vld [vmem:[#allocation2 + $0x3b0] sm:$0xff]   ;;  %v9320_v62 = vld [vmem:[#allocation2 + $0x338] sm:$0xff]  }
 0x36d   :  { %v2614_v29 = vadd.f32 %v8102_v10, %v10504_v26  ;;  %v3029_v51 = vsel %vm301_vm1, %v3026_v20, %v3028_v49  ;;  %v3112_v18 = vpack.c.bf16 %v2810_v6, %v2809_v7  ;;  %v3030_v63 = vrot.slane %v2810_v6, 1  ;;  %v9319_v10 = vld [vmem:[#allocation2 + $0x378] sm:$0xff]   ;;  %8278 = vmatprep.subr.bf16.mxu0 %v9317_v42  ;;  %9014 = vmatprep.subr.bf16.mxu1 %v9316_v55 }
 0x36e   :  { %v3110_v16 = vpack.c.bf16 %v3029_v51, %v3027_v34  ;;  %v2933_v52 = vsel %vm204_vm0, %v2930_v56, %v2932_v17  ;;  %v2934_v12 = vrot.slane %v2810_v6, 7  ;;  %v9318_v6 = vld [vmem:[#allocation2 + $0x330] sm:$0xff]   ;;  %9015 = vmatpush3.bf16.msra.mxu1 %v9316_v55 }
 0x36f   :  { %v2775_v45 = vadd.f32 %v10650_v40, %v2614_v29  ;;  %v3031_v28 = vsel %vm301_vm1, %v3028_v49, %v3030_v63  ;;  %v9321_v49 = vld [vmem:[#allocation2 + $0x3b8] sm:$0xff]  }
 0x370   :  { %8995 = vmatmul.mubr.bf16.gmra.mrb[184].mxu0 %v3110_v16  ;;  %v2935_v1 = vsel %vm204_vm0, %v2932_v17, %v2934_v12  ;;  %9016 = vmatprep.subr.bf16.mxu1 %v9321_v49 }
 0x371   :  { %v2811_v13 = vmax.f32 %v2775_v45, 0.0  ;;  %v3111_v54 = vpack.c.bf16 %v2935_v1, %v2933_v52  ;;  %8279 = vmatpush3.bf16.msra.mxu0 %v9318_v6 }
 0x372   :  { %8280 = vmatprep.subr.bf16.mxu0 %v9319_v10  ;;  %9017 = vmatpush3.bf16.msra.mxu1 %v9321_v49 }
 0x373   :  { %3455 = vmatmul.mubr.bf16.gmra.mrb[180].mxu1 %v3108_v35  ;;  %v3032_v24 = vrot.slane %v2811_v13, 1  ;;  %v2936_v26 = vrot.slane %v2811_v13, 7  ;;  %v3115_v35 = vpack.c.bf16 %v10597_v22, %v2811_v13 }
 0x374   :  { %3462 = vmatprep.mubr.bf16.mxu1 %v3112_v18 }
 0x375   :  { %v3033_v20 = vsel %vm301_vm1, %v3030_v63, %v3032_v24  ;;  %v3035_v19 = vsel %vm301_vm1, %v3032_v24, %v10048_v14  ;;  %v2937_v56 = vsel %vm204_vm0, %v2934_v12, %v2936_v26  ;;  %v2939_v40 = vsel %vm204_vm0, %v2936_v26, %v10036_v38  ;;  %8281 = vmatpush3.bf16.msra.mxu0 %v9320_v62 }
 0x376   :  { %v3113_v34 = vpack.c.bf16 %v3033_v20, %v3031_v28  ;;  %v7592_v9 = vpack.c.bf16 %v10048_v14, %v3035_v19  ;;  %v3114_v7 = vpack.c.bf16 %v2939_v40, %v2937_v56  ;;  %v10679_v28 = vld [vmem:[#allocation4 + $0x3] ss:$0 sm:$0xff] }
 0x378   :  { %8998 = vmatprep.mubr.bf16.mxu0 %v3113_v34 }
 0x379   :  { %8999 = vmatmul.mubr.msk.bf16.gmra.mrb[188].mxu0 %vm9831_vm5, %v7592_v9 }
 0x37b   :  { %3463 = vmatmul.mubr.bf16.gmra.mrb[184].mxu1 %v3111_v54 }
 0x37c   :  { %3470 = vmatprep.mubr.bf16.mxu1 %v3115_v35 }
 0x383   :  { %3471 = vmatmul.mubr.bf16.gmra.mrb[188].mxu1 %v3114_v7 }
 0x3de   :  { %v8146_v17 = vpop.f32.mrb[128].mxu1 }
 0x3df   :  { %v8147_v31 = vpop.f32.mrb[129].mxu1 }
 0x3e0   :  { %v8148_v29 = vadd.f32 %v8147_v31, %v8146_v17  ;;  %v8149_v22 = vpop.f32.mrb[130].mxu1 }
 0x3e1   :  { %v8150_v51 = vpop.f32.mrb[131].mxu1 }
 0x3e2   :  { %v8151_v18 = vadd.f32 %v8150_v51, %v8149_v22  ;;  %v3353_v24 = vadd.f32 %v8148_v29, %v10679_v28 }
 0x3e4   :  { %v3356_v34 = vadd.f32 %v8151_v18, %v10679_v28 }
 0x3e6   :  { %v8152_v63 = vpop.f32.mrb[132].mxu1 }
 0x3e7   :  { %v8153_v16 = vpop.f32.mrb[133].mxu1 }
 0x3e8   :  { %v8154_v52 = vadd.f32 %v8153_v16, %v8152_v63  ;;  %v8155_v12 = vpop.f32.mrb[134].mxu1  ;;  %v9322_v63 = vld [vmem:[#allocation2 + $0x440] sm:$0xff]  }
 0x3e9   :  { %v8156_v45 = vpop.f32.mrb[135].mxu1  ;;  %9050 = vmatprep.subr.bf16.mxu0 %v9322_v63 }
 0x3ea   :  { %v8157_v1 = vadd.f32 %v8156_v45, %v8155_v12  ;;  %v3361_v13 = vadd.f32 %v8154_v52, %v10679_v28 }
 0x3ec   :  { %v8972_v54 = vpop.f32.mrb[160].mxu0  ;;  %v3364_v26 = vadd.f32 %v8157_v1, %v10679_v28 }
 0x3ed   :  { %v3522_v20 = vadd.f32 %v8972_v54, %v3361_v13  ;;  %v3513_v19 = vpop.f32.mrb[161].mxu0 }
 0x3ee   :  { %v3514_v56 = vadd.f32 %v3513_v19, %v3353_v24  ;;  %v8158_v40 = vpop.f32.mrb[136].mxu1  ;;  %v8973_v50 = vpop.f32.mrb[162].mxu0 }
 0x3ef   :  { %v3642_v9 = vadd.f32 %v3522_v20, %v10136_v44  ;;  %v3525_v7 = vadd.f32 %v8973_v50, %v3364_v26  ;;  %v8159_v43 = vpop.f32.mrb[137].mxu1  ;;  %v3516_v42 = vpop.f32.mrb[163].mxu0 }
 0x3f0   :  { %v3640_v35 = vadd.f32 %v3514_v56, %v10138_v8  ;;  %v8160_v55 = vadd.f32 %v8159_v43, %v8158_v40  ;;  %v3517_v6 = vadd.f32 %v3516_v42, %v3356_v34  ;;  %v8161_v10 = vpop.f32.mrb[138].mxu1 }
 0x3f1   :  { %vm3674_vm12 = vcmp.gt.f32.partialorder %v3642_v9, 0.0  ;;  %v3706_v62 = vmul.f32 0.01, %v3642_v9  ;;  %v3643_v49 = vadd.f32 %v3525_v7, %v10144_v33  ;;  %v8162_v17 = vpop.f32.mrb[139].mxu1 }
 0x3f2   :  { %vm3672_vm13 = vcmp.gt.f32.partialorder %v3640_v35, 0.0  ;;  %v3704_v31 = vmul.f32 0.01, %v3640_v35  ;;  %v3641_v29 = vadd.f32 %v3517_v6, %v10140_v47  ;;  %v8163_v22 = vadd.f32 %v8162_v17, %v8161_v10  ;;  %v9326_v47 = vld [vmem:[#allocation2 + $0x400] sm:$0xff]   ;;  %v9323_v6 = vld [vmem:[#allocation2 + $0x448] sm:$0xff]  }
 0x3f3   :  { %v10689_v51 = vsel %vm3674_vm12, %v3642_v9, %v3706_v62  ;;  %vm3675_vm14 = vcmp.gt.f32.partialorder %v3643_v49, 0.0  ;;  %v3707_v44 = vmul.f32 0.01, %v3643_v49  ;;  %8402 = vmatprep.subr.bf16.mxu1 %v9326_v47 }
 0x3f4   :  { %v10691_v18 = vsel %vm3672_vm13, %v3640_v35, %v3704_v31  ;;  %vm3673_vm15 = vcmp.gt.f32.partialorder %v3641_v29, 0.0  ;;  %v3705_v8 = vmul.f32 0.01, %v3641_v29  ;;  %v3931_v45 = vrot.slane %v10689_v51, 1 }
 0x3f5   :  { %v3832_v16 = vrot.slane %v10691_v18, 7  ;;  %v10694_v52 = vsel %vm3675_vm14, %v3643_v49, %v3707_v44  ;;  %v3928_v24 = vrot.slane %v10691_v18, 1  ;;  %v3369_v49 = vadd.f32 %v8160_v55, %v10679_v28  ;;  %v9324_v55 = vld [vmem:[#allocation2 + $0x450] sm:$0xff]  }
 0x3f6   :  { %v10696_v33 = vsel %vm3673_vm15, %v3641_v29, %v3705_v8  ;;  %v8164_v12 = vpop.f32.mrb[140].mxu1  ;;  %v3837_v9 = vrot.slane %v10694_v52, 7  ;;  %v4028_v10 = vpack.c.bf16 %v10694_v52, %v10689_v51  ;;  %v3835_v31 = vrot.slane %v10689_v51, 7 }
 0x3f7   :  { %v3833_v1 = vrot.slane %v10696_v33, 7  ;;  %v8165_v13 = vpop.f32.mrb[141].mxu1  ;;  %v4025_v54 = vpack.c.bf16 %v10696_v33, %v10691_v18  ;;  %v3929_v26 = vrot.slane %v10696_v33, 1  ;;  %v3372_v47 = vadd.f32 %v8163_v22, %v10679_v28 }
 0x3f8   :  { %v8166_v20 = vadd.f32 %v8165_v13, %v8164_v12  ;;  %v8167_v19 = vpop.f32.mrb[142].mxu1 }
 0x3f9   :  { %v3834_v56 = vsel %vm204_vm0, %v3832_v16, %v3833_v1  ;;  %v8168_v40 = vpop.f32.mrb[143].mxu1  ;;  %4305 = vmatprep.mubr.bf16.mxu0 %v4025_v54  ;;  %v3930_v50 = vsel %vm301_vm1, %v3928_v24, %v3929_v26  ;;  %v3932_v34 = vsel %vm301_vm1, %v3929_v26, %v3931_v45  ;;  %v3836_v13 = vsel %vm204_vm0, %v3833_v1, %v3835_v31 }
 0x3fa   :  { %v7621_v7 = vpack.c.bf16 %v3834_v56, %v3832_v16  ;;  %v8169_v43 = vadd.f32 %v8168_v40, %v8167_v19  ;;  %v3377_v42 = vadd.f32 %v8166_v20, %v10679_v28  ;;  %v4026_v35 = vpack.c.bf16 %v3932_v34, %v3930_v50 }
 0x3fb   :  { %v3838_v54 = vsel %vm204_vm0, %v3835_v31, %v3837_v9 }
 0x3fc   :  { %v8976_v62 = vpop.f32.mrb[164].mxu0  ;;  %7622 = vmatmul.mubr.msk.bf16.vlgmr.msra.gmra.mrb[192].mxu0 %vm9570_vm4, %v7621_v7  ;;  %9018 = vmatprep.mubr.bf16.mxu1 %v4026_v35  ;;  %v3380_v17 = vadd.f32 %v8169_v43, %v10679_v28  ;;  %v4027_v7 = vpack.c.bf16 %v3838_v54, %v3836_v13  ;;  %v9327_v13 = vld [vmem:[#allocation2 + $0x3c0] sm:$0xff]  }
 0x3fd   :  { %v3538_v29 = vadd.f32 %v8976_v62, %v3377_v42  ;;  %v3529_v44 = vpop.f32.mrb[165].mxu0  ;;  %4313 = vmatprep.mubr.bf16.mxu0 %v4028_v10  ;;  %9051 = vmatpush3.bf16.msra.mxu0 %v9322_v63  ;;  %v3933_v10 = vrot.slane %v10694_v52, 1  ;;  %v9330_v54 = vld [vmem:[#allocation2 + $0x460] sm:$0xff]  }
 0x3fe   :  { %v3530_v8 = vadd.f32 %v3529_v44, %v3369_v49  ;;  %v8170_v16 = vpop.f32.mrb[144].mxu1  ;;  %v8977_v12 = vpop.f32.mrb[166].mxu0  ;;  %9052 = vmatprep.subr.bf16.mxu0 %v9323_v6 }
 0x3ff   :  { %v3646_v24 = vadd.f32 %v3538_v29, %v10191_v21  ;;  %v3541_v26 = vadd.f32 %v8977_v12, %v3380_v17  ;;  %v8171_v20 = vpop.f32.mrb[145].mxu1  ;;  %v3532_v19 = vpop.f32.mrb[167].mxu0  ;;  %v9325_v21 = vld [vmem:[#allocation2 + $0x458] sm:$0xff]  }
 0x400   :  { %v3644_v63 = vadd.f32 %v3530_v8, %v10187_v60  ;;  %v8172_v56 = vadd.f32 %v8171_v20, %v8170_v16  ;;  %v3533_v40 = vadd.f32 %v3532_v19, %v3372_v47  ;;  %v8173_v50 = vpop.f32.mrb[146].mxu1  ;;  %v3934_v16 = vsel %vm301_vm1, %v3931_v45, %v3933_v10  ;;  %v9328_v19 = vld [vmem:[#allocation2 + $0x408] sm:$0xff]  }
 0x401   :  { %v3710_v34 = vmul.f32 0.01, %v3646_v24  ;;  %v3647_v22 = vadd.f32 %v3541_v26, %v10195_v11  ;;  %v8174_v1 = vpop.f32.mrb[147].mxu1  ;;  %9053 = vmatpush3.bf16.msra.mxu0 %v9323_v6  ;;  %vm3678_vm3 = vcmp.gt.f32.partialorder %v3646_v24, 0.0 }
 0x402   :  { %vm3676_vm2 = vcmp.gt.f32.partialorder %v3644_v63, 0.0  ;;  %v3708_v43 = vmul.f32 0.01, %v3644_v63  ;;  %v3645_v42 = vadd.f32 %v3533_v40, %v10193_v30  ;;  %v10727_v35 = vadd.f32 %v8174_v1, %v8173_v50  ;;  %9054 = vmatprep.subr.bf16.mxu0 %v9324_v55 }
 0x403   :  { %vm3679_vm6 = vcmp.gt.f32.partialorder %v3647_v22, 0.0  ;;  %v3711_v60 = vmul.f32 0.01, %v3647_v22  ;;  %v10734_v30 = vsel %vm3678_vm3, %v3646_v24, %v3710_v34 }
 0x404   :  { %v10730_v62 = vsel %vm3676_vm2, %v3644_v63, %v3708_v43  ;;  %vm3677_vm7 = vcmp.gt.f32.partialorder %v3645_v42, 0.0  ;;  %v3709_v11 = vmul.f32 0.01, %v3645_v42  ;;  %4314 = vmatmul.mubr.bf16.gmra.mrb[196].mxu0 %v4027_v7  ;;  %v3939_v50 = vrot.slane %v10734_v30, 1 }
 0x405   :  { %v3935_v6 = vrot.slane %v10730_v62, 1  ;;  %v3839_v49 = vrot.slane %v10730_v62, 7  ;;  %9055 = vmatpush3.bf16.msra.mxu0 %v9324_v55  ;;  %v10736_v17 = vsel %vm3679_vm6, %v3647_v22, %v3711_v60 }
 0x406   :  { %v10738_v31 = vsel %vm3677_vm7, %v3645_v42, %v3709_v11  ;;  %v8176_v29 = vpop.f32.mrb[148].mxu1  ;;  %9056 = vmatprep.subr.bf16.mxu0 %v9325_v21  ;;  %v3845_v34 = vrot.slane %v10736_v17, 7  ;;  %v3385_v11 = vadd.f32 %v8172_v56, %v10679_v28 }
 0x407   :  { %v8177_v44 = vpop.f32.mrb[149].mxu1  ;;  %v4031_v8 = vpack.c.bf16 %v10738_v31, %v10730_v62  ;;  %v3936_v12 = vsel %vm301_vm1, %v3933_v10, %v3935_v6  ;;  %v3841_v47 = vrot.slane %v10738_v31, 7  ;;  %v3937_v20 = vrot.slane %v10738_v31, 1  ;;  %v9329_v10 = vld [vmem:[#allocation2 + $0x3c8] sm:$0xff]  }
 0x408   :  { %v8178_v55 = vadd.f32 %v8177_v44, %v8176_v29  ;;  %v8179_v24 = vpop.f32.mrb[150].mxu1  ;;  %v4029_v26 = vpack.c.bf16 %v3936_v12, %v3934_v16  ;;  %v3840_v40 = vsel %vm204_vm0, %v3837_v9, %v3839_v49  ;;  %v4034_v9 = vpack.c.bf16 %v10736_v17, %v10734_v30 }
 0x409   :  { %v8180_v63 = vpop.f32.mrb[151].mxu1  ;;  %4321 = vmatprep.mubr.bf16.mxu0 %v4031_v8  ;;  %v3842_v45 = vsel %vm204_vm0, %v3839_v49, %v3841_v47  ;;  %9057 = vmatpush3.bf16.msra.mxu0 %v9325_v21  ;;  %v3938_v43 = vsel %vm301_vm1, %v3935_v6, %v3937_v20  ;;  %v3940_v42 = vsel %vm301_vm1, %v3937_v20, %v3939_v50  ;;  %v3843_v29 = vrot.slane %v10734_v30, 7  ;;  %v9331_v6 = vld [vmem:[#allocation2 + $0x410] sm:$0xff]  }
 0x40a   :  { %v8181_v22 = vadd.f32 %v8180_v63, %v8179_v24  ;;  %9019 = vmatmul.mubr.bf16.vlgmr.msra.gmra.mrb[192].mxu1 %v4029_v26  ;;  %v3393_v1 = vadd.f32 %v8178_v55, %v10679_v28  ;;  %v4030_v7 = vpack.c.bf16 %v3842_v45, %v3840_v40  ;;  %9058 = vmatprep.subr.bf16.mxu0 %v9330_v54 }
 0x40b   :  { %8403 = vmatpush3.bf16.msra.mxu1 %v9327_v13  ;;  %v4032_v21 = vpack.c.bf16 %v3940_v42, %v3938_v43  ;;  %v3388_v55 = vadd.f32 %v10727_v35, %v10679_v28  ;;  %v3844_v24 = vsel %vm204_vm0, %v3841_v47, %v3843_v29  ;;  %v3846_v56 = vsel %vm204_vm0, %v3843_v29, %v3845_v34  ;;  %v9333_v35 = vld [vmem:[#allocation2 + $0x418] sm:$0xff]  }
 0x40c   :  { %v8980_v60 = vpop.f32.mrb[168].mxu0  ;;  %4322 = vmatmul.mubr.bf16.gmra.mrb[200].mxu0 %v4030_v7  ;;  %v3396_v49 = vadd.f32 %v8181_v22, %v10679_v28  ;;  %8404 = vmatprep.subr.bf16.mxu1 %v9328_v19  ;;  %v4033_v42 = vpack.c.bf16 %v3846_v56, %v3844_v24 }
 0x40d   :  { %v3554_v44 = vadd.f32 %v8980_v60, %v3393_v1  ;;  %v3545_v8 = vpop.f32.mrb[169].mxu0  ;;  %4329 = vmatprep.mubr.bf16.mxu0 %v4034_v9  ;;  %9059 = vmatpush3.bf16.msra.mxu0 %v9330_v54  ;;  %v9332_v54 = vld [vmem:[#allocation2 + $0x3d0] sm:$0xff]  }
 0x40e   :  { %9022 = vmatprep.mubr.bf16.mxu1 %v4032_v21  ;;  %v3546_v16 = vadd.f32 %v3545_v8, %v3385_v11  ;;  %v8182_v12 = vpop.f32.mrb[152].mxu1  ;;  %v8981_v13 = vpop.f32.mrb[170].mxu0  ;;  %v9334_v21 = vld [vmem:[#allocation2 + $0x3d8] sm:$0xff]  }
 0x40f   :  { %v3650_v26 = vadd.f32 %v3554_v44, %v10244_v53  ;;  %v3557_v20 = vadd.f32 %v8981_v13, %v3396_v49  ;;  %v8183_v19 = vpop.f32.mrb[153].mxu1  ;;  %v3548_v63 = vpop.f32.mrb[171].mxu0  ;;  %8405 = vmatpush3.bf16.msra.mxu1 %v9329_v10 }
 0x410   :  { %v3648_v40 = vadd.f32 %v3546_v16, %v10241_v5  ;;  %v8184_v45 = vadd.f32 %v8183_v19, %v8182_v12  ;;  %v3549_v22 = vadd.f32 %v3548_v63, %v3388_v55  ;;  %v8185_v1 = vpop.f32.mrb[154].mxu1  ;;  %8406 = vmatprep.subr.bf16.mxu1 %v9331_v6  ;;  %v3941_v5 = vrot.slane %v10736_v17, 1 }
 0x411   :  { %vm3682_vm8 = vcmp.gt.f32.partialorder %v3650_v26, 0.0  ;;  %v3714_v47 = vmul.f32 0.01, %v3650_v26  ;;  %v3651_v7 = vadd.f32 %v3557_v20, %v10250_v25  ;;  %v8186_v43 = vpop.f32.mrb[155].mxu1 }
 0x412   :  { %vm3680_vm9 = vcmp.gt.f32.partialorder %v3648_v40, 0.0  ;;  %v3712_v53 = vmul.f32 0.01, %v3648_v40  ;;  %v3649_v9 = vadd.f32 %v3549_v22, %v10248_v61  ;;  %v8187_v60 = vadd.f32 %v8186_v43, %v8185_v1 }
 0x413   :  { %vm3683_vm10 = vcmp.gt.f32.partialorder %v3651_v7, 0.0  ;;  %v3715_v10 = vmul.f32 0.01, %v3651_v7  ;;  %8407 = vmatpush3.bf16.msra.mxu1 %v9332_v54  ;;  %v10778_v25 = vsel %vm3682_vm8, %v3650_v26, %v3714_v47  ;;  %v3942_v13 = vsel %vm301_vm1, %v3939_v50, %v3941_v5 }
 0x414   :  { %v10775_v11 = vsel %vm3680_vm9, %v3648_v40, %v3712_v53  ;;  %vm3681_vm11 = vcmp.gt.f32.partialorder %v3649_v9, 0.0  ;;  %v3713_v49 = vmul.f32 0.01, %v3649_v9  ;;  %4330 = vmatmul.mubr.bf16.gmra.mrb[204].mxu0 %v4033_v42  ;;  %8408 = vmatprep.subr.bf16.mxu1 %v9333_v35  ;;  %v3947_v63 = vrot.slane %v10778_v25, 1 }
 0x415   :  { %v3943_v29 = vrot.slane %v10775_v11, 1  ;;  %v3847_v61 = vrot.slane %v10775_v11, 7  ;;  %v10782_v6 = vsel %vm3683_vm10, %v3651_v7, %v3715_v10 }
 0x416   :  { %v10784_v44 = vsel %vm3681_vm11, %v3649_v9, %v3713_v49  ;;  %v8188_v8 = vpop.f32.mrb[156].mxu1  ;;  %v3853_v22 = vrot.slane %v10782_v6, 7  ;;  %v4040_v42 = vpack.c.bf16 %v10782_v6, %v10778_v25  ;;  %v3851_v9 = vrot.slane %v10778_v25, 7 }
 0x417   :  { %v8189_v16 = vpop.f32.mrb[157].mxu1  ;;  %v4037_v12 = vpack.c.bf16 %v10784_v44, %v10775_v11  ;;  %v3944_v55 = vsel %vm301_vm1, %v3941_v5, %v3943_v29  ;;  %v3849_v24 = vrot.slane %v10784_v44, 7  ;;  %8409 = vmatpush3.bf16.msra.mxu1 %v9334_v21  ;;  %v3945_v19 = vrot.slane %v10784_v44, 1 }
 0x418   :  { %v8190_v56 = vadd.f32 %v8189_v16, %v8188_v8  ;;  %v8191_v26 = vpop.f32.mrb[158].mxu1  ;;  %v4035_v20 = vpack.c.bf16 %v3944_v55, %v3942_v13  ;;  %v3848_v40 = vsel %vm204_vm0, %v3845_v34, %v3847_v61  ;;  %v3401_v34 = vadd.f32 %v8184_v45, %v10679_v28 }
 0x419   :  { %v8192_v54 = vpop.f32.mrb[159].mxu1  ;;  %4337 = vmatprep.mubr.bf16.mxu0 %v4037_v12  ;;  %v3850_v50 = vsel %vm204_vm0, %v3847_v61, %v3849_v24  ;;  %v3946_v47 = vsel %vm301_vm1, %v3943_v29, %v3945_v19  ;;  %v3948_v7 = vsel %vm301_vm1, %v3945_v19, %v3947_v63  ;;  %v3404_v29 = vadd.f32 %v8187_v60, %v10679_v28 }
 0x41a   :  { %9023 = vmatmul.mubr.bf16.gmra.mrb[196].mxu1 %v4035_v20  ;;  %v3409_v1 = vadd.f32 %v8190_v56, %v10679_v28  ;;  %v4036_v35 = vpack.c.bf16 %v3850_v50, %v3848_v40  ;;  %v4038_v43 = vpack.c.bf16 %v3948_v7, %v3946_v47  ;;  %v3852_v8 = vsel %vm204_vm0, %v3849_v24, %v3851_v9 }
 0x41b   :  { %v3854_v16 = vsel %vm204_vm0, %v3851_v9, %v3853_v22  ;;  %v3949_v24 = vrot.slane %v10782_v6, 1 }
 0x41c   :  { %v8984_v53 = vpop.f32.mrb[172].mxu0  ;;  %4338 = vmatmul.mubr.bf16.gmra.mrb[208].mxu0 %v4036_v35  ;;  %9026 = vmatprep.mubr.bf16.mxu1 %v4038_v43  ;;  %v4039_v40 = vpack.c.bf16 %v3854_v16, %v3852_v8 }
 0x41d   :  { %v3570_v10 = vadd.f32 %v8984_v53, %v3409_v1  ;;  %v3561_v5 = vpop.f32.mrb[173].mxu0  ;;  %4345 = vmatprep.mubr.bf16.mxu0 %v4040_v42 }
 0x41e   :  { %v3562_v21 = vadd.f32 %v3561_v5, %v3401_v34  ;;  %v8194_v49 = vpop.f32.mrb[160].mxu1  ;;  %v8985_v61 = vpop.f32.mrb[174].mxu0  ;;  %v3950_v34 = vsel %vm301_vm1, %v3947_v63, %v3949_v24 }
 0x41f   :  { %v3654_v12 = vadd.f32 %v3570_v10, %v10290_v0  ;;  %v8195_v13 = vpop.f32.mrb[161].mxu1  ;;  %v3564_v55 = vpop.f32.mrb[175].mxu0 }
 0x420   :  { %v3652_v45 = vadd.f32 %v3562_v21, %v10286_v39  ;;  %v8196_v56 = vadd.f32 %v8195_v13, %v8194_v49  ;;  %v3565_v26 = vadd.f32 %v3564_v55, %v3404_v29  ;;  %v8197_v20 = vpop.f32.mrb[162].mxu1 }
 0x421   :  { %v3718_v19 = vmul.f32 0.01, %v3654_v12  ;;  %v8198_v54 = vpop.f32.mrb[163].mxu1  ;;  %vm3686_vm13 = vcmp.gt.f32.partialorder %v3654_v12, 0.0 }
 0x422   :  { %vm3684_vm12 = vcmp.gt.f32.partialorder %v3652_v45, 0.0  ;;  %v3716_v50 = vmul.f32 0.01, %v3652_v45  ;;  %v3653_v60 = vadd.f32 %v3565_v26, %v10292_v58  ;;  %v8199_v1 = vadd.f32 %v8198_v54, %v8197_v20  ;;  %v10837_v20 = vld [vmem:[%s11755_s3 + $0x78] sm:$0xff] }
 0x423   :  { %v10818_v7 = vsel %vm3686_vm13, %v3654_v12, %v3718_v19 }
 0x424   :  { %v10814_v35 = vsel %vm3684_vm12, %v3652_v45, %v3716_v50  ;;  %vm3685_vm14 = vcmp.gt.f32.partialorder %v3653_v60, 0.0  ;;  %v3717_v0 = vmul.f32 0.01, %v3653_v60  ;;  %4346 = vmatmul.mubr.bf16.gmra.mrb[212].mxu0 %v4039_v40  ;;  %v3955_v12 = vrot.slane %v10818_v7, 1 }
 0x425   :  { %v3951_v39 = vrot.slane %v10814_v35, 1  ;;  %v3855_v47 = vrot.slane %v10814_v35, 7  ;;  %v3417_v40 = vadd.f32 %v8196_v56, %v10679_v28 }
 0x426   :  { %v10820_v43 = vsel %vm3685_vm14, %v3653_v60, %v3717_v0  ;;  %v8200_v42 = vpop.f32.mrb[164].mxu1  ;;  %v3859_v60 = vrot.slane %v10818_v7, 7 }
 0x427   :  { %v8201_v53 = vpop.f32.mrb[165].mxu1  ;;  %v4043_v58 = vpack.c.bf16 %v10820_v43, %v10814_v35  ;;  %v3952_v9 = vsel %vm301_vm1, %v3949_v24, %v3951_v39  ;;  %v3857_v10 = vrot.slane %v10820_v43, 7  ;;  %v3953_v61 = vrot.slane %v10820_v43, 1 }
 0x428   :  { %v8202_v5 = vadd.f32 %v8201_v53, %v8200_v42  ;;  %v8203_v21 = vpop.f32.mrb[166].mxu1  ;;  %v4041_v49 = vpack.c.bf16 %v3952_v9, %v3950_v34  ;;  %v3856_v8 = vsel %vm204_vm0, %v3853_v22, %v3855_v47  ;;  %v4046_v22 = vpack.c.bf16 %v10837_v20, %v10818_v7 }
 0x429   :  { %v8204_v29 = vpop.f32.mrb[167].mxu1  ;;  %4353 = vmatprep.mubr.bf16.mxu0 %v4043_v58  ;;  %v3858_v16 = vsel %vm204_vm0, %v3855_v47, %v3857_v10  ;;  %v3954_v45 = vsel %vm301_vm1, %v3951_v39, %v3953_v61  ;;  %v3956_v26 = vsel %vm301_vm1, %v3953_v61, %v3955_v12  ;;  %v3420_v53 = vadd.f32 %v8199_v1, %v10679_v28 }
 0x42a   :  { %v8205_v13 = vadd.f32 %v8204_v29, %v8203_v21  ;;  %9027 = vmatmul.mubr.bf16.gmra.mrb[200].mxu1 %v4041_v49  ;;  %v3425_v63 = vadd.f32 %v8202_v5, %v10679_v28  ;;  %v4042_v55 = vpack.c.bf16 %v3858_v16, %v3856_v8  ;;  %v4044_v54 = vpack.c.bf16 %v3956_v26, %v3954_v45 }
 0x42b   :  { %v3860_v58 = vsel %vm204_vm0, %v3857_v10, %v3859_v60  ;;  %v3862_v8 = vsel %vm204_vm0, %v3859_v60, %v10036_v38 }
 0x42c   :  { %v8988_v19 = vpop.f32.mrb[176].mxu0  ;;  %4354 = vmatmul.mubr.bf16.gmra.mrb[216].mxu0 %v4042_v55  ;;  %v3428_v50 = vadd.f32 %v8205_v13, %v10679_v28  ;;  %9030 = vmatprep.mubr.bf16.mxu1 %v4044_v54 }
 0x42d   :  { %v3586_v24 = vadd.f32 %v8988_v19, %v3425_v63  ;;  %v3577_v0 = vpop.f32.mrb[177].mxu0  ;;  %4361 = vmatprep.mubr.bf16.mxu0 %v4046_v22  ;;  %v4045_v63 = vpack.c.bf16 %v3862_v8, %v3860_v58 }
 0x42e   :  { %v3578_v39 = vadd.f32 %v3577_v0, %v3417_v40  ;;  %v8206_v47 = vpop.f32.mrb[168].mxu1  ;;  %v8989_v42 = vpop.f32.mrb[178].mxu0 }
 0x42f   :  { %v3658_v34 = vadd.f32 %v3586_v24, %v10336_v59  ;;  %v3589_v9 = vadd.f32 %v8989_v42, %v3428_v50  ;;  %v8207_v5 = vpop.f32.mrb[169].mxu1  ;;  %v3580_v56 = vpop.f32.mrb[179].mxu0  ;;  %v3958_v50 = vsel %vm301_vm1, %v3955_v12, %v10048_v14 }
 0x430   :  { %v3656_v21 = vadd.f32 %v3578_v39, %v10332_v57  ;;  %v8208_v49 = vadd.f32 %v8207_v5, %v8206_v47  ;;  %v3581_v61 = vadd.f32 %v3580_v56, %v3420_v53  ;;  %v8209_v29 = vpop.f32.mrb[170].mxu1 }
 0x431   :  { %vm3690_vm15 = vcmp.gt.f32.partialorder %v3658_v34, 0.0  ;;  %v3722_v16 = vmul.f32 0.01, %v3658_v34  ;;  %v3659_v13 = vadd.f32 %v3589_v9, %v10340_v23  ;;  %v8210_v1 = vpop.f32.mrb[171].mxu1 }
 0x432   :  { %vm3688_vm2 = vcmp.gt.f32.partialorder %v3656_v21, 0.0  ;;  %v3720_v10 = vmul.f32 0.01, %v3656_v21  ;;  %v3657_v59 = vadd.f32 %v3581_v61, %v10338_v15  ;;  %v8211_v55 = vadd.f32 %v8210_v1, %v8209_v29 }
 0x433   :  { %v10852_v45 = vsel %vm3690_vm15, %v3658_v34, %v3722_v16  ;;  %vm3691_vm3 = vcmp.gt.f32.partialorder %v3659_v13, 0.0  ;;  %v3723_v57 = vmul.f32 0.01, %v3659_v13  ;;  %v3433_v54 = vadd.f32 %v8208_v49, %v10679_v28 }
 0x434   :  { %v10854_v26 = vsel %vm3688_vm2, %v3656_v21, %v3720_v10  ;;  %vm3689_vm6 = vcmp.gt.f32.partialorder %v3657_v59, 0.0  ;;  %v3721_v22 = vmul.f32 0.01, %v3657_v59  ;;  %4362 = vmatmul.mubr.bf16.gmra.mrb[220].mxu0 %v4045_v63  ;;  %v8992_v19 = vpop.f32.mrb[180].mxu0  ;;  %v3436_v42 = vadd.f32 %v8211_v55, %v10679_v28 }
 0x435   :  { %v10857_v23 = vsel %vm3691_vm3, %v3659_v13, %v3723_v57  ;;  %v3593_v40 = vpop.f32.mrb[181].mxu0  ;;  %v3959_v15 = vrot.slane %v10854_v26, 1  ;;  %v3863_v60 = vrot.slane %v10854_v26, 7  ;;  %v3963_v53 = vrot.slane %v10852_v45, 1 }
 0x436   :  { %v10863_v24 = vsel %vm3689_vm6, %v3657_v59, %v3721_v22  ;;  %v8212_v0 = vpop.f32.mrb[172].mxu1  ;;  %v3594_v39 = vadd.f32 %v3593_v40, %v3433_v54  ;;  %v8993_v47 = vpop.f32.mrb[182].mxu0  ;;  %v4052_v56 = vpack.c.bf16 %v10857_v23, %v10852_v45  ;;  %v3965_v10 = vrot.slane %v10857_v23, 1 }
 0x437   :  { %v8213_v58 = vpop.f32.mrb[173].mxu1  ;;  %v3596_v34 = vpop.f32.mrb[183].mxu0  ;;  %v4049_v9 = vpack.c.bf16 %v10863_v24, %v10854_v26  ;;  %v3960_v12 = vsel %vm301_vm1, %v10048_v14, %v3959_v15  ;;  %v3865_v5 = vrot.slane %v10863_v24, 7  ;;  %v3864_v13 = vsel %vm204_vm0, %v10036_v38, %v3863_v60 }
 0x438   :  { %v3660_v21 = vadd.f32 %v3594_v39, %v10381_v41  ;;  %v8214_v49 = vadd.f32 %v8213_v58, %v8212_v0  ;;  %v8215_v61 = vpop.f32.mrb[174].mxu1  ;;  %v3597_v29 = vadd.f32 %v3596_v34, %v3436_v42  ;;  %v4047_v8 = vpack.c.bf16 %v3960_v12, %v3958_v50 }
 0x439   :  { %v8216_v16 = vpop.f32.mrb[175].mxu1  ;;  %4369 = vmatprep.mubr.bf16.mxu0 %v4049_v9  ;;  %v3866_v1 = vsel %vm204_vm0, %v3863_v60, %v3865_v5  ;;  %v3961_v63 = vrot.slane %v10863_v24, 1  ;;  %v3869_v12 = vrot.slane %v10857_v23, 7 }
 0x43a   :  { %vm3692_vm7 = vcmp.gt.f32.partialorder %v3660_v21, 0.0  ;;  %v3724_v59 = vmul.f32 0.01, %v3660_v21  ;;  %v3441_v55 = vadd.f32 %v8214_v49, %v10679_v28  ;;  %v3661_v41 = vadd.f32 %v3597_v29, %v10387_v37  ;;  %9031 = vmatmul.mubr.bf16.gmra.mrb[204].mxu1 %v4047_v8 }
 0x43b   :  { %v8217_v57 = vadd.f32 %v8216_v16, %v8215_v61  ;;  %v4048_v22 = vpack.c.bf16 %v3866_v1, %v3864_v13  ;;  %v3962_v54 = vsel %vm301_vm1, %v3959_v15, %v3961_v63  ;;  %v3964_v40 = vsel %vm301_vm1, %v3961_v63, %v3963_v53 }
 0x43c   :  { %v10884_v50 = vsel %vm3692_vm7, %v3660_v21, %v3724_v59  ;;  %v3602_v60 = vadd.f32 %v8992_v19, %v3441_v55  ;;  %vm3693_vm8 = vcmp.gt.f32.partialorder %v3661_v41, 0.0  ;;  %v3725_v0 = vmul.f32 0.01, %v3661_v41 }
 0x43d   :  { %v3444_v39 = vadd.f32 %v8217_v57, %v10679_v28  ;;  %4370 = vmatmul.mubr.bf16.gmra.mrb[224].mxu0 %v4048_v22  ;;  %v4050_v42 = vpack.c.bf16 %v3964_v40, %v3962_v54  ;;  %v3967_v58 = vrot.slane %v10884_v50, 1  ;;  %v3867_v37 = vrot.slane %v10852_v45, 7 }
 0x43e   :  { %v3662_v34 = vadd.f32 %v3602_v60, %v10385_v2  ;;  %v10890_v9 = vsel %vm3693_vm8, %v3661_v41, %v3725_v0  ;;  %4377 = vmatprep.mubr.bf16.mxu0 %v4052_v56  ;;  %v8218_v15 = vpop.f32.mrb[176].mxu1  ;;  %v3966_v49 = vsel %vm301_vm1, %v3963_v53, %v3965_v10  ;;  %v3871_v60 = vrot.slane %v10884_v50, 7 }
 0x43f   :  { %v3605_v21 = vadd.f32 %v8993_v47, %v3444_v39  ;;  %9034 = vmatprep.mubr.bf16.mxu1 %v4050_v42  ;;  %v8219_v19 = vpop.f32.mrb[177].mxu1  ;;  %v3968_v61 = vsel %vm301_vm1, %v3965_v10, %v3967_v58  ;;  %v3868_v29 = vsel %vm204_vm0, %v3865_v5, %v3867_v37  ;;  %v3870_v63 = vsel %vm204_vm0, %v3867_v37, %v3869_v12 }
 0x440   :  { %vm3694_vm9 = vcmp.gt.f32.partialorder %v3662_v34, 0.0  ;;  %v3726_v8 = vmul.f32 0.01, %v3662_v34  ;;  %v8220_v16 = vadd.f32 %v8219_v19, %v8218_v15  ;;  %v8221_v13 = vpop.f32.mrb[178].mxu1  ;;  %v4053_v2 = vpack.c.bf16 %v3968_v61, %v3966_v49 }
 0x441   :  { %v3663_v1 = vadd.f32 %v3605_v21, %v10389_v46  ;;  %v8222_v56 = vpop.f32.mrb[179].mxu1  ;;  %v3969_v47 = vrot.slane %v10890_v9, 1  ;;  %v4051_v10 = vpack.c.bf16 %v3870_v63, %v3868_v29  ;;  %v3873_v22 = vrot.slane %v10890_v9, 7 }
 0x442   :  { %v10899_v59 = vsel %vm3694_vm9, %v3662_v34, %v3726_v8  ;;  %v8223_v55 = vadd.f32 %v8222_v56, %v8221_v13  ;;  %v3449_v53 = vadd.f32 %v8220_v16, %v10679_v28  ;;  %9035 = vmatmul.mubr.bf16.gmra.mrb[208].mxu1 %v4053_v2  ;;  %v4055_v40 = vpack.c.bf16 %v10890_v9, %v10884_v50 }
 0x443   :  { %v3727_v5 = vmul.f32 0.01, %v3663_v1  ;;  %v8996_v41 = vpop.f32.mrb[184].mxu0  ;;  %v3971_v57 = vrot.slane %v10899_v59, 1  ;;  %vm3695_vm10 = vcmp.gt.f32.partialorder %v3663_v1, 0.0  ;;  %v3970_v42 = vsel %vm301_vm1, %v3967_v58, %v3969_v47 }
 0x444   :  { %v3609_v46 = vpop.f32.mrb[185].mxu0  ;;  %v3452_v54 = vadd.f32 %v8223_v55, %v10679_v28  ;;  %v3874_v8 = vsel %vm204_vm0, %v3871_v60, %v3873_v22  ;;  %v3872_v58 = vsel %vm204_vm0, %v3869_v12, %v3871_v60 }
 0x445   :  { %v3610_v0 = vadd.f32 %v3609_v46, %v3449_v53  ;;  %v8997_v39 = vpop.f32.mrb[186].mxu0  ;;  %4378 = vmatmul.mubr.bf16.gmra.mrb[228].mxu0 %v4051_v10  ;;  %v3972_v37 = vsel %vm301_vm1, %v3969_v47, %v3971_v57  ;;  %v10910_v19 = vsel %vm3695_vm10, %v3663_v1, %v3727_v5  ;;  %v4054_v55 = vpack.c.bf16 %v3874_v8, %v3872_v58 }
 0x446   :  { %v3612_v34 = vpop.f32.mrb[187].mxu0  ;;  %4385 = vmatprep.mubr.bf16.mxu0 %v4055_v40  ;;  %v8224_v15 = vpop.f32.mrb[180].mxu1  ;;  %v4056_v21 = vpack.c.bf16 %v3972_v37, %v3970_v42  ;;  %v3973_v1 = vrot.slane %v10910_v19, 1  ;;  %v3877_v5 = vrot.slane %v10910_v19, 7  ;;  %v3875_v42 = vrot.slane %v10899_v59, 7 }
 0x447   :  { %v3664_v49 = vadd.f32 %v3610_v0, %v10433_v36  ;;  %v3613_v61 = vadd.f32 %v3612_v34, %v3452_v54  ;;  %v8225_v29 = vpop.f32.mrb[181].mxu1 }
 0x448   :  { %v8226_v16 = vadd.f32 %v8225_v29, %v8224_v15  ;;  %v8227_v13 = vpop.f32.mrb[182].mxu1  ;;  %9038 = vmatprep.mubr.bf16.mxu1 %v4056_v21  ;;  %v3974_v0 = vsel %vm301_vm1, %v3971_v57, %v3973_v1  ;;  %v9335_v57 = vld [vmem:[#allocation2 + $0x468] sm:$0xff]  }
 0x449   :  { %vm3696_vm11 = vcmp.gt.f32.partialorder %v3664_v49, 0.0  ;;  %v3728_v2 = vmul.f32 0.01, %v3664_v49  ;;  %v3665_v56 = vadd.f32 %v3613_v61, %v10440_v32  ;;  %v8228_v63 = vpop.f32.mrb[183].mxu1  ;;  %v4058_v32 = vpack.c.bf16 %v10910_v19, %v10899_v59  ;;  %9060 = vmatprep.subr.bf16.mxu0 %v9335_v57 }
 0x44a   :  { %v3457_v36 = vadd.f32 %v8226_v16, %v10679_v28  ;;  %v8229_v47 = vadd.f32 %v8228_v63, %v8227_v13  ;;  %v3878_v16 = vsel %vm204_vm0, %v3875_v42, %v3877_v5  ;;  %9061 = vmatpush3.bf16.msra.mxu0 %v9335_v57 }
 0x44b   :  { %v10920_v53 = vsel %vm3696_vm11, %v3664_v49, %v3728_v2  ;;  %vm3697_vm12 = vcmp.gt.f32.partialorder %v3665_v56, 0.0  ;;  %v3729_v10 = vmul.f32 0.01, %v3665_v56 }
 0x44c   :  { %v3618_v46 = vadd.f32 %v8996_v41, %v3457_v36  ;;  %v3460_v12 = vadd.f32 %v8229_v47, %v10679_v28  ;;  %v10924_v54 = vpop.f32.mrb[188].mxu0  ;;  %v3975_v40 = vrot.slane %v10920_v53, 1 }
 0x44d   :  { %v3625_v60 = vpop.f32.mrb[189].mxu0  ;;  %4386 = vmatmul.mubr.bf16.gmra.mrb[232].mxu0 %v4054_v55  ;;  %v10931_v37 = vsel %vm3697_vm12, %v3665_v56, %v3729_v10  ;;  %v3876_v56 = vsel %vm204_vm0, %v3873_v22, %v3875_v42 }
 0x44e   :  { %v3666_v34 = vadd.f32 %v3618_v46, %v10429_v27  ;;  %v3621_v41 = vadd.f32 %v8997_v39, %v3460_v12  ;;  %v9001_v15 = vpop.f32.mrb[190].mxu0  ;;  %4393 = vmatprep.mubr.bf16.mxu0 %v4058_v32  ;;  %v8230_v21 = vpop.f32.mrb[184].mxu1  ;;  %v3976_v49 = vsel %vm301_vm1, %v3973_v1, %v3975_v40  ;;  %v3977_v63 = vrot.slane %v10931_v37, 1  ;;  %v9336_v12 = vld [vmem:[#allocation2 + $0x420] sm:$0xff]  }
 0x44f   :  { %v3628_v61 = vpop.f32.mrb[191].mxu0  ;;  %v8231_v29 = vpop.f32.mrb[185].mxu1  ;;  %v4059_v8 = vpack.c.bf16 %v3976_v49, %v3974_v0  ;;  %v4057_v10 = vpack.c.bf16 %v3878_v16, %v3876_v56  ;;  %v3881_v46 = vrot.slane %v10931_v37, 7  ;;  %v9337_v32 = vld [vmem:[#allocation2 + $0x3e0] sm:$0xff]   ;;  %v4061_v42 = vpack.c.bf16 %v10931_v37, %v10920_v53  ;;  %8410 = vmatprep.subr.bf16.mxu1 %v9336_v12  ;;  %v11781_v49 = vld [vmem:[#allocation8_spill] sm:$0xff] }
 0x450   :  { %vm3698_vm13 = vcmp.gt.f32.partialorder %v3666_v34, 0.0  ;;  %v3730_v13 = vmul.f32 0.01, %v3666_v34  ;;  %v3667_v58 = vadd.f32 %v3621_v41, %v10443_v4  ;;  %v8232_v2 = vadd.f32 %v8231_v29, %v8230_v21  ;;  %v8233_v27 = vpop.f32.mrb[186].mxu1  ;;  %8411 = vmatpush3.bf16.msra.mxu1 %v9337_v32  ;;  %v9338_v32 = vld [vmem:[#allocation2 + $0x428] sm:$0xff]  }
 0x451   :  { %9039 = vmatmul.mubr.bf16.gmra.mrb[212].mxu1 %v4059_v8  ;;  %v8234_v39 = vpop.f32.mrb[187].mxu1  ;;  %v3879_v15 = vrot.slane %v10920_v53, 7  ;;  %8412 = vmatprep.subr.bf16.mxu1 %v9338_v32  ;;  %v9342_v32 = vld [vmem:[#allocation2 + $0x3f0] sm:$0xff]  }
 0x452   :  { %v10943_v1 = vsel %vm3698_vm13, %v3666_v34, %v3730_v13  ;;  %v3731_v36 = vmul.f32 0.01, %v3667_v58  ;;  %v3465_v47 = vadd.f32 %v8232_v2, %v10679_v28  ;;  %v8235_v55 = vadd.f32 %v8234_v39, %v8233_v27 }
 0x453   :  { %v3979_v4 = vrot.slane %v10943_v1, 1  ;;  %vm3699_vm14 = vcmp.gt.f32.partialorder %v3667_v58, 0.0  ;;  %v3978_v34 = vsel %vm301_vm1, %v3975_v40, %v3977_v63  ;;  %v3882_v13 = vsel %vm204_vm0, %v3879_v15, %v3881_v46  ;;  %v11782_v40 = vld [vmem:[#allocation9_spill] sm:$0xff] }
 0x454   :  { %v3626_v0 = vadd.f32 %v3625_v60, %v3465_v47  ;;  %v3468_v22 = vadd.f32 %v8235_v55, %v10679_v28  ;;  %v10954_v21 = vsel %vm3699_vm14, %v3667_v58, %v3731_v36  ;;  %v3880_v55 = vsel %vm204_vm0, %v3877_v5, %v3879_v15  ;;  %v11784_v5 = vld [vmem:[#allocation10_spill] sm:$0xff] }
 0x455   :  { %4394 = vmatmul.mubr.bf16.gmra.mrb[236].mxu0 %v4057_v10  ;;  %v3980_v41 = vsel %vm301_vm1, %v3977_v63, %v3979_v4  ;;  %11780 = vst [vmem:[#allocation11_spill] sm:$0xff] %v10954_v21  ;;  %v3981_v63 = vrot.slane %v10954_v21, 1  ;;  %v4060_v10 = vpack.c.bf16 %v3882_v13, %v3880_v55 }
 0x456   :  { %v3668_v29 = vadd.f32 %v3626_v0, %v11781_v49  ;;  %v3629_v8 = vadd.f32 %v3628_v61, %v3468_v22  ;;  %4401 = vmatprep.mubr.bf16.mxu0 %v4061_v42  ;;  %v8236_v60 = vpop.f32.mrb[188].mxu1  ;;  %v4062_v16 = vpack.c.bf16 %v3980_v41, %v3978_v34  ;;  %v9339_v0 = vld [vmem:[#allocation2 + $0x3e8] sm:$0xff]   ;;  %v4064_v42 = vpack.c.bf16 %v10954_v21, %v10943_v1 }
 0x457   :  { %v8237_v57 = vpop.f32.mrb[189].mxu1  ;;  %v3885_v34 = vrot.slane %v10954_v21, 7  ;;  %8413 = vmatpush3.bf16.msra.mxu1 %v9339_v0  ;;  %v9343_v0 = vld [vmem:[#allocation2 + $0x438] sm:$0xff]  }
 0x458   :  { %vm3700_vm15 = vcmp.gt.f32.partialorder %v3668_v29, 0.0  ;;  %v3732_v2 = vmul.f32 0.01, %v3668_v29  ;;  %v3669_v27 = vadd.f32 %v3629_v8, %v11782_v40  ;;  %v8238_v39 = vadd.f32 %v8237_v57, %v8236_v60  ;;  %v8239_v56 = vpop.f32.mrb[190].mxu1  ;;  %9042 = vmatprep.mubr.bf16.mxu1 %v4062_v16 }
 0x459   :  { %v8240_v58 = vpop.f32.mrb[191].mxu1 }
 0x45a   :  { %v10960_v36 = vsel %vm3700_vm15, %v3668_v29, %v3732_v2  ;;  %v3733_v61 = vmul.f32 0.01, %v3669_v27  ;;  %v3473_v47 = vadd.f32 %v8238_v39, %v10679_v28  ;;  %vm3701_vm2 = vcmp.gt.f32.partialorder %v3669_v27, 0.0 }
 0x45b   :  { %11783 = vst [vmem:[#allocation8_spill] sm:$0xff] %v10960_v36  ;;  %v3983_v12 = vrot.slane %v10960_v36, 1  ;;  %v3982_v28 = vsel %vm301_vm1, %v3979_v4, %v3981_v63  ;;  %v3883_v29 = vrot.slane %v10943_v1, 7 }
 0x45c   :  { %v3634_v22 = vadd.f32 %v10924_v54, %v3473_v47  ;;  %v10975_v8 = vsel %vm3701_vm2, %v3669_v27, %v3733_v61  ;;  %v3887_v61 = vrot.slane %v10960_v36, 7  ;;  %v9340_v47 = vld [vmem:[#allocation2 + $0x470] sm:$0xff]  }
 0x45d   :  { %4402 = vmatmul.mubr.bf16.gmra.mrb[240].mxu0 %v4060_v10  ;;  %v3984_v41 = vsel %vm301_vm1, %v3981_v63, %v3983_v12  ;;  %11785 = vst [vmem:[#allocation9_spill] sm:$0xff] %v10975_v8  ;;  %v3886_v60 = vsel %vm204_vm0, %v3883_v29, %v3885_v34  ;;  %v3985_v16 = vrot.slane %v10975_v8, 1  ;;  %v3884_v57 = vsel %vm204_vm0, %v3881_v46, %v3883_v29  ;;  %v9341_v10 = vld [vmem:[#allocation2 + $0x430] sm:$0xff]  }
 0x45e   :  { %v3670_v15 = vadd.f32 %v3634_v22, %v11784_v5  ;;  %4409 = vmatprep.mubr.bf16.mxu0 %v4064_v42  ;;  %v4065_v49 = vpack.c.bf16 %v3984_v41, %v3982_v28  ;;  %v4063_v13 = vpack.c.bf16 %v3886_v60, %v3884_v57  ;;  %v4067_v40 = vpack.c.bf16 %v10975_v8, %v10960_v36  ;;  %v9344_v42 = vld [vmem:[#allocation2 + $0x3f8] sm:$0xff]  }
 0x45f   :  { %v3889_v27 = vrot.slane %v10975_v8, 7  ;;  %v3986_v39 = vsel %vm301_vm1, %v3983_v12, %v3985_v16  ;;  %9062 = vmatprep.subr.bf16.mxu0 %v9340_v47  ;;  %v3888_v12 = vsel %vm204_vm0, %v3885_v34, %v3887_v61  ;;  %8414 = vmatprep.subr.bf16.mxu1 %v9341_v10  ;;  %v9345_v34 = vld [vmem:[#allocation2 + $0x478] sm:$0xff]  }
 0x460   :  { %vm3702_vm3 = vcmp.gt.f32.partialorder %v3670_v15, 0.0  ;;  %v3734_v54 = vmul.f32 0.01, %v3670_v15  ;;  %9043 = vmatmul.mubr.bf16.gmra.mrb[216].mxu1 %v4065_v49  ;;  %9063 = vmatpush3.bf16.msra.mxu0 %v9340_v47 }
 0x461   :  { %v3890_v55 = vsel %vm204_vm0, %v3887_v61, %v3889_v27  ;;  %8415 = vmatpush3.bf16.msra.mxu1 %v9342_v32  ;;  %9064 = vmatprep.subr.bf16.mxu0 %v9345_v34 }
 0x462   :  { %v10979_v4 = vsel %vm3702_vm3, %v3670_v15, %v3734_v54  ;;  %v4066_v22 = vpack.c.bf16 %v3890_v55, %v3888_v12  ;;  %8416 = vmatprep.subr.bf16.mxu1 %v9343_v0 }
 0x463   :  { %11786 = vst [vmem:[#allocation10_spill] sm:$0xff] %v10979_v4  ;;  %v3987_v2 = vrot.slane %v10979_v4, 1  ;;  %v4070_v28 = vpack.c.bf16 %v10837_v20, %v10979_v4  ;;  %v3891_v41 = vrot.slane %v10979_v4, 7 }
 0x464   :  { %9065 = vmatpush3.bf16.msra.mxu0 %v9345_v34 }
 0x465   :  { %4410 = vmatmul.mubr.bf16.gmra.mrb[244].mxu0 %v4063_v13  ;;  %v3988_v56 = vsel %vm301_vm1, %v3985_v16, %v3987_v2  ;;  %v3990_v58 = vsel %vm301_vm1, %v3987_v2, %v10048_v14  ;;  %8417 = vmatpush3.bf16.msra.mxu1 %v9344_v42  ;;  %v3892_v5 = vsel %vm204_vm0, %v3889_v27, %v3891_v41  ;;  %v11002_v27 = vld [vmem:[#allocation4 + $0x4] ss:$0 sm:$0xff] }
 0x466   :  { %4417 = vmatprep.mubr.bf16.mxu0 %v4067_v40  ;;  %v4068_v63 = vpack.c.bf16 %v3988_v56, %v3986_v39  ;;  %v7624_v46 = vpack.c.bf16 %v10048_v14, %v3990_v58  ;;  %v3894_v15 = vsel %vm204_vm0, %v3891_v41, %v10036_v38 }
 0x467   :  { %v4069_v49 = vpack.c.bf16 %v3894_v15, %v3892_v5 }
 0x468   :  { %9046 = vmatprep.mubr.bf16.mxu1 %v4068_v63 }
 0x469   :  { %9047 = vmatmul.mubr.msk.bf16.gmra.mrb[220].mxu1 %vm9831_vm5, %v7624_v46 }
 0x46d   :  { %4418 = vmatmul.mubr.bf16.gmra.mrb[248].mxu0 %v4066_v22 }
 0x46e   :  { %4425 = vmatprep.mubr.bf16.mxu0 %v4070_v28 }
 0x475   :  { %4426 = vmatmul.mubr.bf16.gmra.mrb[252].mxu0 %v4069_v49 }
 0x4cf   :  { %v8282_v29 = vpop.f32.mrb[192].mxu0 }
 0x4d0   :  { %v8283_v54 = vpop.f32.mrb[193].mxu0 }
 0x4d1   :  { %v8284_v60 = vadd.f32 %v8283_v54, %v8282_v29  ;;  %v8285_v20 = vpop.f32.mrb[194].mxu0 }
 0x4d2   :  { %v8286_v16 = vpop.f32.mrb[195].mxu0 }
 0x4d3   :  { %v8287_v57 = vadd.f32 %v8286_v16, %v8285_v20  ;;  %v4308_v61 = vadd.f32 %v8284_v60, %v11002_v27  ;;  %v9346_v20 = vld [vmem:[#allocation2 + $0x500] sm:$0xff]  }
 0x4d4   :  { %9098 = vmatprep.subr.bf16.mxu1 %v9346_v20 }
 0x4d5   :  { %v4311_v22 = vadd.f32 %v8287_v57, %v11002_v27 }
 0x4d7   :  { %v8288_v13 = vpop.f32.mrb[196].mxu0 }
 0x4d8   :  { %v8289_v2 = vpop.f32.mrb[197].mxu0 }
 0x4d9   :  { %v8290_v40 = vadd.f32 %v8289_v2, %v8288_v13  ;;  %v8291_v39 = vpop.f32.mrb[198].mxu0 }
 0x4da   :  { %v8292_v56 = vpop.f32.mrb[199].mxu0 }
 0x4db   :  { %v8293_v58 = vadd.f32 %v8292_v56, %v8291_v39  ;;  %v4316_v63 = vadd.f32 %v8290_v40, %v11002_v27  ;;  %v9350_v39 = vld [vmem:[#allocation2 + $0x4c0] sm:$0xff]  }
 0x4dc   :  { %8538 = vmatprep.subr.bf16.mxu0 %v9350_v39 }
 0x4dd   :  { %v9020_v46 = vpop.f32.mrb[192].mxu1  ;;  %v4319_v47 = vadd.f32 %v8293_v58, %v11002_v27 }
 0x4de   :  { %v4477_v55 = vadd.f32 %v9020_v46, %v4316_v63  ;;  %v4468_v10 = vpop.f32.mrb[193].mxu1 }
 0x4df   :  { %v4469_v32 = vadd.f32 %v4468_v10, %v4308_v61  ;;  %v8294_v0 = vpop.f32.mrb[200].mxu0  ;;  %v9021_v12 = vpop.f32.mrb[194].mxu1 }
 0x4e0   :  { %v4597_v42 = vmax.f32 %v4477_v55, 0.0  ;;  %v4480_v28 = vadd.f32 %v9021_v12, %v4319_v47  ;;  %v8295_v41 = vpop.f32.mrb[201].mxu0  ;;  %v4471_v5 = vpop.f32.mrb[195].mxu1 }
 0x4e1   :  { %v4595_v15 = vmax.f32 %v4469_v32, 0.0  ;;  %v8296_v49 = vadd.f32 %v8295_v41, %v8294_v0  ;;  %v4472_v34 = vadd.f32 %v4471_v5, %v4311_v22  ;;  %v8297_v29 = vpop.f32.mrb[202].mxu0 }
 0x4e2   :  { %v11008_v54 = vmax.f32 %v4480_v28, 0.0  ;;  %v8298_v60 = vpop.f32.mrb[203].mxu0  ;;  %v4694_v16 = vrot.slane %v4597_v42, 7  ;;  %v4790_v13 = vrot.slane %v4597_v42, 1 }
 0x4e3   :  { %v4596_v2 = vmax.f32 %v4472_v34, 0.0  ;;  %v8299_v40 = vadd.f32 %v8298_v60, %v8297_v29  ;;  %v4691_v56 = vrot.slane %v4595_v15, 7  ;;  %v4787_v46 = vrot.slane %v4595_v15, 1  ;;  %v9347_v29 = vld [vmem:[#allocation2 + $0x508] sm:$0xff]  }
 0x4e4   :  { %v11761_v57 = vrot.slane %v11008_v54, 7  ;;  %v4792_v58 = vrot.slane %v11008_v54, 1  ;;  %v4887_v63 = vpack.c.bf16 %v11008_v54, %v4597_v42 }
 0x4e5   :  { %v4692_v61 = vrot.slane %v4596_v2, 7  ;;  %v4788_v47 = vrot.slane %v4596_v2, 1  ;;  %v4884_v55 = vpack.c.bf16 %v4596_v2, %v4595_v15 }
 0x4e6   :  { %v11016_v10 = vsel %vm301_vm1, %v4790_v13, %v4792_v58  ;;  %v4697_v32 = vsel %vm204_vm0, %v4694_v16, %v11761_v57 }
 0x4e7   :  { %v4693_v0 = vsel %vm204_vm0, %v4691_v56, %v4692_v61  ;;  %v8300_v12 = vpop.f32.mrb[204].mxu0  ;;  %5164 = vmatprep.mubr.bf16.mxu1 %v4884_v55  ;;  %v4789_v22 = vsel %vm301_vm1, %v4787_v46, %v4788_v47  ;;  %v4791_v42 = vsel %vm301_vm1, %v4788_v47, %v4790_v13  ;;  %v4695_v28 = vsel %vm204_vm0, %v4692_v61, %v4694_v16  ;;  %v9348_v13 = vld [vmem:[#allocation2 + $0x510] sm:$0xff]  }
 0x4e8   :  { %v7653_v41 = vpack.c.bf16 %v4693_v0, %v4691_v56  ;;  %v8301_v5 = vpop.f32.mrb[205].mxu0  ;;  %v4885_v15 = vpack.c.bf16 %v4791_v42, %v4789_v22  ;;  %v4886_v34 = vpack.c.bf16 %v4697_v32, %v4695_v28  ;;  %v4324_v56 = vadd.f32 %v8296_v49, %v11002_v27 }
 0x4e9   :  { %v8302_v60 = vadd.f32 %v8301_v5, %v8300_v12  ;;  %v8303_v2 = vpop.f32.mrb[206].mxu0  ;;  %v4327_v22 = vadd.f32 %v8299_v40, %v11002_v27 }
 0x4ea   :  { %v8304_v39 = vpop.f32.mrb[207].mxu0  ;;  %7654 = vmatmul.mubr.msk.bf16.vlgmr.msra.gmra.mrb[224].mxu1 %vm9570_vm4, %v7653_v41  ;;  %9066 = vmatprep.mubr.bf16.mxu0 %v4885_v15 }
 0x4eb   :  { %v8305_v57 = vadd.f32 %v8304_v39, %v8303_v2  ;;  %5172 = vmatprep.mubr.bf16.mxu1 %v4887_v63  ;;  %v4332_v46 = vadd.f32 %v8302_v60, %v11002_v27  ;;  %9099 = vmatpush3.bf16.msra.mxu1 %v9346_v20  ;;  %v9349_v20 = vld [vmem:[#allocation2 + $0x518] sm:$0xff]  }
 0x4ec   :  { %9100 = vmatprep.subr.bf16.mxu1 %v9347_v29 }
 0x4ed   :  { %v9024_v16 = vpop.f32.mrb[196].mxu1  ;;  %v4335_v61 = vadd.f32 %v8305_v57, %v11002_v27 }
 0x4ee   :  { %v4493_v47 = vadd.f32 %v9024_v16, %v4332_v46  ;;  %v4484_v55 = vpop.f32.mrb[197].mxu1 }
 0x4ef   :  { %v4485_v32 = vadd.f32 %v4484_v55, %v4324_v56  ;;  %v8306_v0 = vpop.f32.mrb[208].mxu0  ;;  %v9025_v12 = vpop.f32.mrb[198].mxu1  ;;  %9101 = vmatpush3.bf16.msra.mxu1 %v9347_v29 }
 0x4f0   :  { %v4601_v42 = vmax.f32 %v4493_v47, 0.0  ;;  %v4496_v63 = vadd.f32 %v9025_v12, %v4335_v61  ;;  %v8307_v28 = vpop.f32.mrb[209].mxu0  ;;  %v4487_v41 = vpop.f32.mrb[199].mxu1  ;;  %9102 = vmatprep.subr.bf16.mxu1 %v9348_v13 }
 0x4f1   :  { %v4599_v5 = vmax.f32 %v4485_v32, 0.0  ;;  %v8308_v15 = vadd.f32 %v8307_v28, %v8306_v0  ;;  %v4488_v60 = vadd.f32 %v4487_v41, %v4327_v22  ;;  %v8309_v49 = vpop.f32.mrb[210].mxu0  ;;  %v9351_v22 = vld [vmem:[#allocation2 + $0x480] sm:$0xff]   ;;  %v11787_v41 = vrot.slane %v11008_v54, 7 }
 0x4f2   :  { %v4702_v2 = vrot.slane %v4601_v42, 7  ;;  %v11031_v57 = vmax.f32 %v4496_v63, 0.0  ;;  %v8310_v39 = vpop.f32.mrb[211].mxu0  ;;  %5173 = vmatmul.mubr.bf16.gmra.mrb[228].mxu1 %v4886_v34  ;;  %v4798_v29 = vrot.slane %v4601_v42, 1  ;;  %v9352_v63 = vld [vmem:[#allocation2 + $0x520] sm:$0xff]  }
 0x4f3   :  { %v4698_v46 = vrot.slane %v4599_v5, 7  ;;  %v4794_v16 = vrot.slane %v4599_v5, 1  ;;  %v4600_v56 = vmax.f32 %v4488_v60, 0.0  ;;  %v8311_v40 = vadd.f32 %v8310_v39, %v8309_v49  ;;  %9103 = vmatpush3.bf16.msra.mxu1 %v9348_v13 }
 0x4f4   :  { %v4704_v61 = vrot.slane %v11031_v57, 7  ;;  %v11762_v47 = vrot.slane %v11031_v57, 1  ;;  %v4893_v55 = vpack.c.bf16 %v11031_v57, %v4601_v42  ;;  %9104 = vmatprep.subr.bf16.mxu1 %v9349_v20 }
 0x4f5   :  { %v4795_v32 = vsel %vm301_vm1, %v4792_v58, %v4794_v16  ;;  %v4700_v0 = vrot.slane %v4600_v56, 7  ;;  %v4796_v12 = vrot.slane %v4600_v56, 1  ;;  %v4890_v34 = vpack.c.bf16 %v4600_v56, %v4599_v5 }
 0x4f6   :  { %v4888_v28 = vpack.c.bf16 %v4795_v32, %v11016_v10  ;;  %v11043_v13 = vsel %vm301_vm1, %v4798_v29, %v11762_v47  ;;  %v4699_v42 = vsel %vm204_vm0, %v11787_v41, %v4698_v46  ;;  %v9353_v10 = vld [vmem:[#allocation2 + $0x4c8] sm:$0xff]   ;;  %v4705_v54 = vsel %vm204_vm0, %v4702_v2, %v4704_v61 }
 0x4f7   :  { %v8312_v60 = vpop.f32.mrb[212].mxu0  ;;  %5180 = vmatprep.mubr.bf16.mxu1 %v4890_v34  ;;  %v4701_v58 = vsel %vm204_vm0, %v4698_v46, %v4700_v0  ;;  %v4797_v49 = vsel %vm301_vm1, %v4794_v16, %v4796_v12  ;;  %v4799_v5 = vsel %vm301_vm1, %v4796_v12, %v4798_v29  ;;  %v4703_v39 = vsel %vm204_vm0, %v4700_v0, %v4702_v2  ;;  %v9354_v46 = vld [vmem:[#allocation2 + $0x488] sm:$0xff]   ;;  %v9355_v0 = vld [vmem:[#allocation2 + $0x4d0] sm:$0xff]  }
 0x4f8   :  { %v8313_v56 = vpop.f32.mrb[213].mxu0  ;;  %9067 = vmatmul.mubr.bf16.vlgmr.msra.gmra.mrb[0].mxu0 %v4888_v28  ;;  %v4889_v32 = vpack.c.bf16 %v4701_v58, %v4699_v42  ;;  %v4891_v47 = vpack.c.bf16 %v4799_v5, %v4797_v49  ;;  %9105 = vmatpush3.bf16.msra.mxu1 %v9349_v20  ;;  %v4892_v4 = vpack.c.bf16 %v4705_v54, %v4703_v39  ;;  %v9357_v16 = vld [vmem:[#allocation2 + $0x528] sm:$0xff]   ;;  %v9358_v49 = vld [vmem:[#allocation2 + $0x4d8] sm:$0xff]  }
 0x4f9   :  { %v8314_v41 = vadd.f32 %v8313_v56, %v8312_v60  ;;  %v8315_v34 = vpop.f32.mrb[214].mxu0  ;;  %8539 = vmatpush3.bf16.msra.mxu0 %v9351_v22  ;;  %9106 = vmatprep.subr.bf16.mxu1 %v9352_v63  ;;  %v4340_v20 = vadd.f32 %v8308_v15, %v11002_v27  ;;  %v9356_v22 = vld [vmem:[#allocation2 + $0x490] sm:$0xff]  }
 0x4fa   :  { %v8316_v29 = vpop.f32.mrb[215].mxu0  ;;  %5181 = vmatmul.mubr.bf16.gmra.mrb[232].mxu1 %v4889_v32  ;;  %9070 = vmatprep.mubr.bf16.mxu0 %v4891_v47 }
 0x4fb   :  { %v8317_v12 = vadd.f32 %v8316_v29, %v8315_v34  ;;  %5188 = vmatprep.mubr.bf16.mxu1 %v4893_v55  ;;  %v4348_v28 = vadd.f32 %v8314_v41, %v11002_v27  ;;  %8540 = vmatprep.subr.bf16.mxu0 %v9353_v10  ;;  %v4343_v55 = vadd.f32 %v8311_v40, %v11002_v27 }
 0x4fc   :  { %9107 = vmatpush3.bf16.msra.mxu1 %v9352_v63 }
 0x4fd   :  { %v9028_v42 = vpop.f32.mrb[200].mxu1  ;;  %v4351_v2 = vadd.f32 %v8317_v12, %v11002_v27  ;;  %8541 = vmatpush3.bf16.msra.mxu0 %v9354_v46  ;;  %9108 = vmatprep.subr.bf16.mxu1 %v9357_v16 }
 0x4fe   :  { %v4509_v60 = vadd.f32 %v9028_v42, %v4348_v28  ;;  %v4500_v58 = vpop.f32.mrb[201].mxu1  ;;  %8542 = vmatprep.subr.bf16.mxu0 %v9355_v0 }
 0x4ff   :  { %v4501_v47 = vadd.f32 %v4500_v58, %v4340_v20  ;;  %v8318_v5 = vpop.f32.mrb[216].mxu0  ;;  %v9029_v39 = vpop.f32.mrb[202].mxu1  ;;  %v11788_v58 = vrot.slane %v11031_v57, 1 }
 0x500   :  { %v4605_v56 = vmax.f32 %v4509_v60, 0.0  ;;  %v4512_v10 = vadd.f32 %v9029_v39, %v4351_v2  ;;  %v8319_v63 = vpop.f32.mrb[217].mxu0  ;;  %v4503_v32 = vpop.f32.mrb[203].mxu1  ;;  %9109 = vmatpush3.bf16.msra.mxu1 %v9357_v16 }
 0x501   :  { %v4603_v15 = vmax.f32 %v4501_v47, 0.0  ;;  %v8320_v54 = vadd.f32 %v8319_v63, %v8318_v5  ;;  %v4504_v41 = vadd.f32 %v4503_v32, %v4343_v55  ;;  %v8321_v34 = vpop.f32.mrb[218].mxu0  ;;  %8543 = vmatpush3.bf16.msra.mxu0 %v9356_v22 }
 0x502   :  { %v4710_v46 = vrot.slane %v4605_v56, 7  ;;  %v11059_v29 = vmax.f32 %v4512_v10, 0.0  ;;  %v8322_v0 = vpop.f32.mrb[219].mxu0  ;;  %5189 = vmatmul.mubr.bf16.gmra.mrb[236].mxu1 %v4892_v4  ;;  %8544 = vmatprep.subr.bf16.mxu0 %v9358_v49  ;;  %v4806_v20 = vrot.slane %v4605_v56, 1 }
 0x503   :  { %v4706_v12 = vrot.slane %v4603_v15, 7  ;;  %v4802_v28 = vrot.slane %v4603_v15, 1  ;;  %v4604_v42 = vmax.f32 %v4504_v41, 0.0  ;;  %v8323_v40 = vadd.f32 %v8322_v0, %v8321_v34 }
 0x504   :  { %v4712_v2 = vrot.slane %v11059_v29, 7  ;;  %v4808_v16 = vrot.slane %v11059_v29, 1  ;;  %v4899_v60 = vpack.c.bf16 %v11059_v29, %v4605_v56 }
 0x505   :  { %v4803_v22 = vsel %vm301_vm1, %v11788_v58, %v4802_v28  ;;  %v4708_v47 = vrot.slane %v4604_v42, 7  ;;  %v4804_v5 = vrot.slane %v4604_v42, 1  ;;  %v4896_v39 = vpack.c.bf16 %v4604_v42, %v4603_v15 }
 0x506   :  { %v4894_v4 = vpack.c.bf16 %v4803_v22, %v11043_v13  ;;  %v4809_v49 = vsel %vm301_vm1, %v4806_v20, %v4808_v16  ;;  %v4707_v55 = vsel %vm204_vm0, %v4704_v61, %v4706_v12  ;;  %v4713_v29 = vsel %vm204_vm0, %v4710_v46, %v4712_v2 }
 0x507   :  { %v8324_v10 = vpop.f32.mrb[220].mxu0  ;;  %5196 = vmatprep.mubr.bf16.mxu1 %v4896_v39  ;;  %v4709_v63 = vsel %vm204_vm0, %v4706_v12, %v4708_v47  ;;  %v4805_v56 = vsel %vm301_vm1, %v4802_v28, %v4804_v5  ;;  %v4807_v32 = vsel %vm301_vm1, %v4804_v5, %v4806_v20  ;;  %v4711_v41 = vsel %vm204_vm0, %v4708_v47, %v4710_v46 }
 0x508   :  { %v8325_v34 = vpop.f32.mrb[221].mxu0  ;;  %9071 = vmatmul.mubr.bf16.gmra.mrb[4].mxu0 %v4894_v4  ;;  %v4895_v15 = vpack.c.bf16 %v4709_v63, %v4707_v55  ;;  %v4897_v13 = vpack.c.bf16 %v4807_v32, %v4805_v56  ;;  %v4898_v42 = vpack.c.bf16 %v4713_v29, %v4711_v41  ;;  %v4356_v20 = vadd.f32 %v8320_v54, %v11002_v27 }
 0x509   :  { %v8326_v0 = vadd.f32 %v8325_v34, %v8324_v10  ;;  %v8327_v57 = vpop.f32.mrb[222].mxu0  ;;  %v4359_v39 = vadd.f32 %v8323_v40, %v11002_v27 }
 0x50a   :  { %v8328_v61 = vpop.f32.mrb[223].mxu0  ;;  %5197 = vmatmul.mubr.bf16.gmra.mrb[240].mxu1 %v4895_v15  ;;  %9074 = vmatprep.mubr.bf16.mxu0 %v4897_v13 }
 0x50b   :  { %5204 = vmatprep.mubr.bf16.mxu1 %v4899_v60  ;;  %v4364_v12 = vadd.f32 %v8326_v0, %v11002_v27 }
 0x50d   :  { %v9032_v28 = vpop.f32.mrb[204].mxu1 }
 0x50e   :  { %v4525_v58 = vadd.f32 %v9032_v28, %v4364_v12  ;;  %v4516_v22 = vpop.f32.mrb[205].mxu1 }
 0x50f   :  { %v4517_v47 = vadd.f32 %v4516_v22, %v4356_v20  ;;  %v9033_v5 = vpop.f32.mrb[206].mxu1 }
 0x510   :  { %v4609_v4 = vmax.f32 %v4525_v58, 0.0  ;;  %v8330_v46 = vpop.f32.mrb[224].mxu0  ;;  %v4519_v55 = vpop.f32.mrb[207].mxu1 }
 0x511   :  { %v4607_v10 = vmax.f32 %v4517_v47, 0.0  ;;  %v8331_v63 = vpop.f32.mrb[225].mxu0  ;;  %v4520_v56 = vadd.f32 %v4519_v55, %v4359_v39 }
 0x512   :  { %v8332_v32 = vadd.f32 %v8331_v63, %v8330_v46  ;;  %v8333_v41 = vpop.f32.mrb[226].mxu0  ;;  %5205 = vmatmul.mubr.bf16.gmra.mrb[244].mxu1 %v4898_v42  ;;  %v4718_v54 = vrot.slane %v4609_v4, 7  ;;  %v4814_v29 = vrot.slane %v4609_v4, 1 }
 0x513   :  { %v4714_v60 = vrot.slane %v4607_v10, 7  ;;  %v4810_v34 = vrot.slane %v4607_v10, 1  ;;  %v4608_v15 = vmax.f32 %v4520_v56, 0.0  ;;  %v8334_v13 = vpop.f32.mrb[227].mxu0 }
 0x514   :  { %v8335_v0 = vadd.f32 %v8334_v13, %v8333_v41  ;;  %v4372_v57 = vadd.f32 %v8332_v32, %v11002_v27  ;;  %v4721_v41 = vsel %vm204_vm0, %v4718_v54, %v10036_v38 }
 0x515   :  { %v4811_v40 = vsel %vm301_vm1, %v4808_v16, %v4810_v34  ;;  %v4716_v61 = vrot.slane %v4608_v15, 7  ;;  %v4812_v12 = vrot.slane %v4608_v15, 1  ;;  %v9036_v28 = vpop.f32.mrb[208].mxu1  ;;  %v4902_v20 = vpack.c.bf16 %v4608_v15, %v4607_v10 }
 0x516   :  { %v4900_v58 = vpack.c.bf16 %v4811_v40, %v4809_v49  ;;  %v4532_v22 = vpop.f32.mrb[209].mxu1  ;;  %v4375_v47 = vadd.f32 %v8335_v0, %v11002_v27  ;;  %v4715_v42 = vsel %vm204_vm0, %v4712_v2, %v4714_v60 }
 0x517   :  { %v4533_v5 = vadd.f32 %v4532_v22, %v4372_v57  ;;  %5212 = vmatprep.mubr.bf16.mxu1 %v4902_v20  ;;  %v9037_v39 = vpop.f32.mrb[210].mxu1  ;;  %v4717_v46 = vsel %vm204_vm0, %v4714_v60, %v4716_v61  ;;  %v4813_v55 = vsel %vm301_vm1, %v4810_v34, %v4812_v12  ;;  %v4815_v63 = vsel %vm301_vm1, %v4812_v12, %v4814_v29  ;;  %v11093_v60 = vld [vmem:[%s11755_s3 + $0x78] sm:$0xff] }
 0x518   :  { %v8336_v16 = vpop.f32.mrb[228].mxu0  ;;  %9075 = vmatmul.mubr.bf16.gmra.mrb[8].mxu0 %v4900_v58  ;;  %v4535_v56 = vpop.f32.mrb[211].mxu1  ;;  %v4901_v32 = vpack.c.bf16 %v4717_v46, %v4715_v42  ;;  %v4903_v10 = vpack.c.bf16 %v4815_v63, %v4813_v55  ;;  %v4719_v49 = vsel %vm204_vm0, %v4716_v61, %v4718_v54  ;;  %v4905_v34 = vpack.c.bf16 %v11093_v60, %v4609_v4 }
 0x519   :  { %v4611_v2 = vmax.f32 %v4533_v5, 0.0  ;;  %v8337_v15 = vpop.f32.mrb[229].mxu0  ;;  %v4536_v13 = vadd.f32 %v4535_v56, %v4375_v47  ;;  %v4904_v0 = vpack.c.bf16 %v4721_v41, %v4719_v49  ;;  %v4817_v47 = vsel %vm301_vm1, %v4814_v29, %v10048_v14 }
 0x51a   :  { %v8338_v57 = vadd.f32 %v8337_v15, %v8336_v16  ;;  %v8339_v40 = vpop.f32.mrb[230].mxu0  ;;  %5213 = vmatmul.mubr.bf16.gmra.mrb[248].mxu1 %v4901_v32  ;;  %9078 = vmatprep.mubr.bf16.mxu0 %v4903_v10 }
 0x51b   :  { %v4722_v12 = vrot.slane %v4611_v2, 7  ;;  %v4818_v61 = vrot.slane %v4611_v2, 1  ;;  %v4612_v20 = vmax.f32 %v4536_v13, 0.0  ;;  %v8340_v58 = vpop.f32.mrb[231].mxu0  ;;  %5220 = vmatprep.mubr.bf16.mxu1 %v4905_v34 }
 0x51c   :  { %v4380_v54 = vadd.f32 %v8338_v57, %v11002_v27  ;;  %v8341_v22 = vadd.f32 %v8340_v58, %v8339_v40 }
 0x51d   :  { %v4819_v42 = vsel %vm301_vm1, %v10048_v14, %v4818_v61  ;;  %v4724_v4 = vrot.slane %v4612_v20, 7  ;;  %v4820_v5 = vrot.slane %v4612_v20, 1  ;;  %v4908_v16 = vpack.c.bf16 %v4612_v20, %v4611_v2 }
 0x51e   :  { %v4906_v46 = vpack.c.bf16 %v4819_v42, %v4817_v47  ;;  %v4541_v55 = vadd.f32 %v9036_v28, %v4380_v54  ;;  %v4383_v63 = vadd.f32 %v8341_v22, %v11002_v27  ;;  %v4723_v56 = vsel %vm204_vm0, %v10036_v38, %v4722_v12 }
 0x51f   :  { %v4725_v32 = vsel %vm204_vm0, %v4722_v12, %v4724_v4  ;;  %v4821_v10 = vsel %vm301_vm1, %v4818_v61, %v4820_v5 }
 0x520   :  { %v4613_v49 = vmax.f32 %v4541_v55, 0.0  ;;  %v4907_v41 = vpack.c.bf16 %v4725_v32, %v4723_v56  ;;  %v4544_v29 = vadd.f32 %v9037_v39, %v4383_v63  ;;  %v8342_v15 = vpop.f32.mrb[232].mxu0  ;;  %9079 = vmatmul.mubr.bf16.gmra.mrb[12].mxu0 %v4906_v46 }
 0x521   :  { %v8343_v13 = vpop.f32.mrb[233].mxu0 }
 0x522   :  { %v4726_v34 = vrot.slane %v4613_v49, 7  ;;  %v4614_v57 = vmax.f32 %v4544_v29, 0.0  ;;  %v8344_v40 = vadd.f32 %v8343_v13, %v8342_v15  ;;  %v8345_v28 = vpop.f32.mrb[234].mxu0  ;;  %5221 = vmatmul.mubr.bf16.gmra.mrb[252].mxu1 %v4904_v0  ;;  %v4822_v58 = vrot.slane %v4613_v49, 1 }
 0x523   :  { %v8346_v2 = vpop.f32.mrb[235].mxu0  ;;  %5228 = vmatprep.mubr.bf16.mxu1 %v4908_v16 }
 0x524   :  { %v4727_v20 = vsel %vm204_vm0, %v4724_v4, %v4726_v34  ;;  %v4728_v54 = vrot.slane %v4614_v57, 7  ;;  %v4824_v12 = vrot.slane %v4614_v57, 1  ;;  %v8347_v22 = vadd.f32 %v8346_v2, %v8345_v28  ;;  %v9040_v61 = vpop.f32.mrb[212].mxu1 }
 0x525   :  { %v4388_v47 = vadd.f32 %v8344_v40, %v11002_v27  ;;  %v4548_v39 = vpop.f32.mrb[213].mxu1  ;;  %v4823_v42 = vsel %vm301_vm1, %v4820_v5, %v4822_v58  ;;  %v4911_v46 = vpack.c.bf16 %v4614_v57, %v4613_v49 }
 0x526   :  { %v4729_v55 = vsel %vm204_vm0, %v4726_v34, %v4728_v54  ;;  %v9041_v63 = vpop.f32.mrb[214].mxu1  ;;  %v4391_v0 = vadd.f32 %v8347_v22, %v11002_v27  ;;  %v4825_v56 = vsel %vm301_vm1, %v4822_v58, %v4824_v12  ;;  %v4909_v16 = vpack.c.bf16 %v4823_v42, %v4821_v10 }
 0x527   :  { %v4910_v32 = vpack.c.bf16 %v4729_v55, %v4727_v20  ;;  %v4549_v4 = vadd.f32 %v4548_v39, %v4388_v47  ;;  %v4551_v29 = vpop.f32.mrb[215].mxu1 }
 0x528   :  { %v4552_v15 = vadd.f32 %v4551_v29, %v4391_v0  ;;  %9082 = vmatprep.mubr.bf16.mxu0 %v4909_v16  ;;  %v8348_v13 = vpop.f32.mrb[236].mxu0 }
 0x529   :  { %v4615_v28 = vmax.f32 %v4549_v4, 0.0  ;;  %v8349_v40 = vpop.f32.mrb[237].mxu0 }
 0x52a   :  { %v4616_v2 = vmax.f32 %v4552_v15, 0.0  ;;  %v8350_v8 = vadd.f32 %v8349_v40, %v8348_v13  ;;  %v8351_v5 = vpop.f32.mrb[238].mxu0  ;;  %5229 = vmatmul.mubr.bf16.gmra.mrb[0].mxu1 %v4907_v41 }
 0x52b   :  { %v4730_v49 = vrot.slane %v4615_v28, 7  ;;  %v4826_v34 = vrot.slane %v4615_v28, 1  ;;  %v8352_v57 = vpop.f32.mrb[239].mxu0  ;;  %5236 = vmatprep.mubr.bf16.mxu1 %v4911_v46 }
 0x52c   :  { %v4732_v22 = vrot.slane %v4616_v2, 7  ;;  %v4828_v36 = vrot.slane %v4616_v2, 1  ;;  %v4396_v10 = vadd.f32 %v8350_v8, %v11002_v27  ;;  %v8353_v58 = vadd.f32 %v8352_v57, %v8351_v5 }
 0x52d   :  { %v4731_v20 = vsel %vm204_vm0, %v4728_v54, %v4730_v49  ;;  %v4827_v47 = vsel %vm301_vm1, %v4824_v12, %v4826_v34  ;;  %v4914_v39 = vpack.c.bf16 %v4616_v2, %v4615_v28 }
 0x52e   :  { %v4733_v42 = vsel %vm204_vm0, %v4730_v49, %v4732_v22  ;;  %v4912_v55 = vpack.c.bf16 %v4827_v47, %v4825_v56  ;;  %v4557_v0 = vadd.f32 %v9040_v61, %v4396_v10  ;;  %v4399_v41 = vadd.f32 %v8353_v58, %v11002_v27 }
 0x52f   :  { %v4913_v16 = vpack.c.bf16 %v4733_v42, %v4731_v20  ;;  %v4829_v4 = vsel %vm301_vm1, %v4826_v34, %v4828_v36 }
 0x530   :  { %v4617_v46 = vmax.f32 %v4557_v0, 0.0  ;;  %v4560_v29 = vadd.f32 %v9041_v63, %v4399_v41  ;;  %9083 = vmatmul.mubr.bf16.gmra.mrb[16].mxu0 %v4912_v55  ;;  %v8354_v15 = vpop.f32.mrb[240].mxu0 }
 0x531   :  { %v8355_v8 = vpop.f32.mrb[241].mxu0 }
 0x532   :  { %v4734_v13 = vrot.slane %v4617_v46, 7  ;;  %v4618_v40 = vmax.f32 %v4560_v29, 0.0  ;;  %v8356_v54 = vadd.f32 %v8355_v8, %v8354_v15  ;;  %v8357_v5 = vpop.f32.mrb[242].mxu0  ;;  %5237 = vmatmul.mubr.bf16.gmra.mrb[4].mxu1 %v4910_v32  ;;  %v4830_v12 = vrot.slane %v4617_v46, 1 }
 0x533   :  { %v8358_v28 = vpop.f32.mrb[243].mxu0  ;;  %v9044_v2 = vpop.f32.mrb[216].mxu1  ;;  %5244 = vmatprep.mubr.bf16.mxu1 %v4914_v39 }
 0x534   :  { %v4735_v61 = vsel %vm204_vm0, %v4732_v22, %v4734_v13  ;;  %v4736_v56 = vrot.slane %v4618_v40, 7  ;;  %v4832_v49 = vrot.slane %v4618_v40, 1  ;;  %v8359_v57 = vadd.f32 %v8358_v28, %v8357_v5  ;;  %v4564_v34 = vpop.f32.mrb[217].mxu1 }
 0x535   :  { %v4404_v63 = vadd.f32 %v8356_v54, %v11002_v27  ;;  %v9045_v10 = vpop.f32.mrb[218].mxu1  ;;  %v4831_v58 = vsel %vm301_vm1, %v4828_v36, %v4830_v12  ;;  %v4917_v20 = vpack.c.bf16 %v4618_v40, %v4617_v46 }
 0x536   :  { %v4737_v47 = vsel %vm204_vm0, %v4734_v13, %v4736_v56  ;;  %v4407_v32 = vadd.f32 %v8359_v57, %v11002_v27  ;;  %v4567_v42 = vpop.f32.mrb[219].mxu1  ;;  %v4833_v55 = vsel %vm301_vm1, %v4830_v12, %v4832_v49  ;;  %v4915_v39 = vpack.c.bf16 %v4831_v58, %v4829_v4 }
 0x537   :  { %v4916_v0 = vpack.c.bf16 %v4737_v47, %v4735_v61  ;;  %v4565_v22 = vadd.f32 %v4564_v34, %v4404_v63 }
 0x538   :  { %v4568_v41 = vadd.f32 %v4567_v42, %v4407_v32  ;;  %9086 = vmatprep.mubr.bf16.mxu0 %v4915_v39  ;;  %v8360_v29 = vpop.f32.mrb[244].mxu0  ;;  %v9359_v32 = vld [vmem:[#allocation2 + $0x498] sm:$0xff]  }
 0x539   :  { %v4619_v15 = vmax.f32 %v4565_v22, 0.0  ;;  %v8361_v8 = vpop.f32.mrb[245].mxu0  ;;  %8545 = vmatpush3.bf16.msra.mxu0 %v9359_v32 }
 0x53a   :  { %v4620_v54 = vmax.f32 %v4568_v41, 0.0  ;;  %v8362_v5 = vadd.f32 %v8361_v8, %v8360_v29  ;;  %v8363_v28 = vpop.f32.mrb[246].mxu0  ;;  %5245 = vmatmul.mubr.bf16.gmra.mrb[8].mxu1 %v4913_v16 }
 0x53b   :  { %v4738_v36 = vrot.slane %v4619_v15, 7  ;;  %v4834_v46 = vrot.slane %v4619_v15, 1  ;;  %v8364_v13 = vpop.f32.mrb[247].mxu0  ;;  %5252 = vmatprep.mubr.bf16.mxu1 %v4917_v20 }
 0x53c   :  { %v4740_v40 = vrot.slane %v4620_v54, 7  ;;  %v4836_v57 = vrot.slane %v4620_v54, 1  ;;  %v4412_v12 = vadd.f32 %v8362_v5, %v11002_v27  ;;  %v8365_v4 = vadd.f32 %v8364_v13, %v8363_v28  ;;  %v11125_v61 = vpop.f32.mrb[220].mxu1  ;;  %v9360_v13 = vld [vmem:[#allocation2 + $0x4e0] sm:$0xff]  }
 0x53d   :  { %v4739_v34 = vsel %vm204_vm0, %v4736_v56, %v4738_v36  ;;  %v4835_v63 = vsel %vm301_vm1, %v4832_v49, %v4834_v46  ;;  %v4580_v58 = vpop.f32.mrb[221].mxu1  ;;  %v4920_v47 = vpack.c.bf16 %v4620_v54, %v4619_v15  ;;  %8546 = vmatprep.subr.bf16.mxu0 %v9360_v13 }
 0x53e   :  { %v4741_v16 = vsel %vm204_vm0, %v4738_v36, %v4740_v40  ;;  %v4918_v42 = vpack.c.bf16 %v4835_v63, %v4833_v55  ;;  %v4573_v39 = vadd.f32 %v9044_v2, %v4412_v12  ;;  %v4415_v20 = vadd.f32 %v8365_v4, %v11002_v27  ;;  %v9049_v22 = vpop.f32.mrb[222].mxu1 }
 0x53f   :  { %v4919_v41 = vpack.c.bf16 %v4741_v16, %v4739_v34  ;;  %v4583_v29 = vpop.f32.mrb[223].mxu1  ;;  %v4837_v8 = vsel %vm301_vm1, %v4834_v46, %v4836_v57  ;;  %v9361_v16 = vld [vmem:[#allocation2 + $0x4a0] sm:$0xff]  }
 0x540   :  { %v4621_v5 = vmax.f32 %v4573_v39, 0.0  ;;  %v4576_v28 = vadd.f32 %v9045_v10, %v4415_v20  ;;  %9087 = vmatmul.mubr.bf16.gmra.mrb[20].mxu0 %v4918_v42  ;;  %v8366_v56 = vpop.f32.mrb[248].mxu0 }
 0x541   :  { %v8367_v49 = vpop.f32.mrb[249].mxu0  ;;  %8547 = vmatpush3.bf16.msra.mxu0 %v9361_v16 }
 0x542   :  { %v4742_v15 = vrot.slane %v4621_v5, 7  ;;  %v4622_v54 = vmax.f32 %v4576_v28, 0.0  ;;  %v8368_v21 = vadd.f32 %v8367_v49, %v8366_v56  ;;  %v8369_v36 = vpop.f32.mrb[250].mxu0  ;;  %5253 = vmatmul.mubr.bf16.gmra.mrb[12].mxu1 %v4916_v0  ;;  %v4838_v2 = vrot.slane %v4621_v5, 1  ;;  %v9362_v49 = vld [vmem:[#allocation2 + $0x530] sm:$0xff]  }
 0x543   :  { %v8370_v55 = vpop.f32.mrb[251].mxu0  ;;  %5260 = vmatprep.mubr.bf16.mxu1 %v4920_v47  ;;  %9110 = vmatprep.subr.bf16.mxu1 %v9362_v49 }
 0x544   :  { %v4743_v12 = vsel %vm204_vm0, %v4740_v40, %v4742_v15  ;;  %v4744_v4 = vrot.slane %v4622_v54, 7  ;;  %v4840_v46 = vrot.slane %v4622_v54, 1  ;;  %v4420_v34 = vadd.f32 %v8368_v21, %v11002_v27  ;;  %9111 = vmatpush3.bf16.msra.mxu1 %v9362_v49  ;;  %v9367_v49 = vld [vmem:[#allocation2 + $0x4f8] sm:$0xff]  }
 0x545   :  { %v8371_v10 = vadd.f32 %v8370_v55, %v8369_v36  ;;  %v4839_v63 = vsel %vm301_vm1, %v4836_v57, %v4838_v2  ;;  %v4923_v32 = vpack.c.bf16 %v4622_v54, %v4621_v5 }
 0x546   :  { %v4745_v42 = vsel %vm204_vm0, %v4742_v15, %v4744_v4  ;;  %v4581_v39 = vadd.f32 %v4580_v58, %v4420_v34  ;;  %v4841_v0 = vsel %vm301_vm1, %v4838_v2, %v4840_v46  ;;  %v4921_v20 = vpack.c.bf16 %v4839_v63, %v4837_v8 }
 0x547   :  { %v4922_v22 = vpack.c.bf16 %v4745_v42, %v4743_v12  ;;  %v4423_v47 = vadd.f32 %v8371_v10, %v11002_v27 }
 0x548   :  { %v4623_v40 = vmax.f32 %v4581_v39, 0.0  ;;  %9090 = vmatprep.mubr.bf16.mxu0 %v4921_v20  ;;  %v8372_v28 = vpop.f32.mrb[252].mxu0 }
 0x549   :  { %v4584_v56 = vadd.f32 %v4583_v29, %v4423_v47  ;;  %v8373_v21 = vpop.f32.mrb[253].mxu0 }
 0x54a   :  { %v4746_v13 = vrot.slane %v4623_v40, 7  ;;  %v4842_v57 = vrot.slane %v4623_v40, 1  ;;  %v8374_v5 = vadd.f32 %v8373_v21, %v8372_v28  ;;  %v8375_v54 = vpop.f32.mrb[254].mxu0  ;;  %5261 = vmatmul.mubr.bf16.gmra.mrb[16].mxu1 %v4919_v41  ;;  %v9366_v21 = vld [vmem:[#allocation2 + $0x4b0] sm:$0xff]  }
 0x54b   :  { %v4624_v15 = vmax.f32 %v4584_v56, 0.0  ;;  %v8376_v58 = vpop.f32.mrb[255].mxu0  ;;  %5268 = vmatprep.mubr.bf16.mxu1 %v4923_v32  ;;  %v9365_v56 = vld [vmem:[#allocation2 + $0x4f0] sm:$0xff]  }
 0x54c   :  { %v4747_v8 = vsel %vm204_vm0, %v4744_v4, %v4746_v13  ;;  %v4843_v36 = vsel %vm301_vm1, %v4840_v46, %v4842_v57  ;;  %v4428_v2 = vadd.f32 %v8374_v5, %v11002_v27 }
 0x54d   :  { %v4748_v55 = vrot.slane %v4624_v15, 7  ;;  %v4924_v29 = vpack.c.bf16 %v4843_v36, %v4841_v0  ;;  %v4926_v12 = vpack.c.bf16 %v4624_v15, %v4623_v40  ;;  %v4844_v34 = vrot.slane %v4624_v15, 1  ;;  %v9363_v0 = vld [vmem:[#allocation2 + $0x4e8] sm:$0xff]  }
 0x54e   :  { %v4589_v10 = vadd.f32 %v11125_v61, %v4428_v2  ;;  %8548 = vmatprep.subr.bf16.mxu0 %v9363_v0 }
 0x54f   :  { %v4749_v63 = vsel %vm204_vm0, %v4746_v13, %v4748_v55  ;;  %9091 = vmatmul.mubr.bf16.gmra.mrb[24].mxu0 %v4924_v29  ;;  %v4845_v41 = vsel %vm301_vm1, %v4842_v57, %v4844_v34  ;;  %v9369_v13 = vld [vmem:[#allocation2 + $0x538] sm:$0xff]  }
 0x550   :  { %v4925_v32 = vpack.c.bf16 %v4749_v63, %v4747_v8  ;;  %v4625_v16 = vmax.f32 %v4589_v10, 0.0  ;;  %9112 = vmatprep.subr.bf16.mxu1 %v9369_v13  ;;  %v9368_v57 = vld [vmem:[#allocation2 + $0x4b8] sm:$0xff]  }
 0x551   :  { %9113 = vmatpush3.bf16.msra.mxu1 %v9369_v13 }
 0x552   :  { %v4750_v42 = vrot.slane %v4625_v16, 7  ;;  %5269 = vmatmul.mubr.bf16.gmra.mrb[20].mxu1 %v4922_v22  ;;  %v4846_v4 = vrot.slane %v4625_v16, 1  ;;  %v9364_v22 = vld [vmem:[#allocation2 + $0x4a8] sm:$0xff]   ;;  %v4929_v28 = vpack.c.bf16 %v11093_v60, %v4625_v16 }
 0x553   :  { %5276 = vmatprep.mubr.bf16.mxu1 %v4926_v12  ;;  %8549 = vmatpush3.bf16.msra.mxu0 %v9364_v22 }
 0x554   :  { %v4751_v27 = vsel %vm204_vm0, %v4748_v55, %v4750_v42  ;;  %v4753_v46 = vsel %vm204_vm0, %v4750_v42, %v10036_v38  ;;  %v4847_v39 = vsel %vm301_vm1, %v4844_v34, %v4846_v4  ;;  %v4849_v61 = vsel %vm301_vm1, %v4846_v4, %v10048_v14  ;;  %8550 = vmatprep.subr.bf16.mxu0 %v9365_v56  ;;  %v11154_v34 = vld [vmem:[#allocation4 + $0x5] ss:$0 sm:$0xff] }
 0x555   :  { %v4928_v20 = vpack.c.bf16 %v4753_v46, %v4751_v27  ;;  %v4927_v47 = vpack.c.bf16 %v4847_v39, %v4845_v41  ;;  %v7656_v40 = vpack.c.bf16 %v10048_v14, %v4849_v61 }
 0x557   :  { %9094 = vmatprep.mubr.bf16.mxu0 %v4927_v47  ;;  %8551 = vmatpush3.bf16.msra.mxu0 %v9366_v21 }
 0x558   :  { %9095 = vmatmul.mubr.msk.bf16.gmra.mrb[28].mxu0 %vm9831_vm5, %v7656_v40  ;;  %8552 = vmatprep.subr.bf16.mxu0 %v9367_v49 }
 0x55a   :  { %5277 = vmatmul.mubr.bf16.gmra.mrb[24].mxu1 %v4925_v32 }
 0x55b   :  { %5284 = vmatprep.mubr.bf16.mxu1 %v4929_v28  ;;  %8553 = vmatpush3.bf16.msra.mxu0 %v9368_v57 }
 0x562   :  { %5285 = vmatmul.mubr.bf16.gmra.mrb[28].mxu1 %v4928_v20 }
 0x5bd   :  { %v8418_v5 = vpop.f32.mrb[224].mxu1 }
 0x5be   :  { %v8419_v54 = vpop.f32.mrb[225].mxu1 }
 0x5bf   :  { %v8420_v15 = vadd.f32 %v8419_v54, %v8418_v5  ;;  %v8421_v58 = vpop.f32.mrb[226].mxu1 }
 0x5c0   :  { %v8422_v60 = vpop.f32.mrb[227].mxu1 }
 0x5c1   :  { %v8423_v8 = vadd.f32 %v8422_v60, %v8421_v58  ;;  %v5167_v32 = vadd.f32 %v8420_v15, %v11154_v34 }
 0x5c3   :  { %v5170_v61 = vadd.f32 %v8423_v8, %v11154_v34  ;;  %v9370_v8 = vld [vmem:[#allocation2 + $0x580] sm:$0xff]  }
 0x5c4   :  { %8674 = vmatprep.subr.bf16.mxu1 %v9370_v8 }
 0x5c5   :  { %v8424_v36 = vpop.f32.mrb[228].mxu1 }
 0x5c6   :  { %v8425_v2 = vpop.f32.mrb[229].mxu1 }
 0x5c7   :  { %v8426_v55 = vadd.f32 %v8425_v2, %v8424_v36  ;;  %v8427_v29 = vpop.f32.mrb[230].mxu1  ;;  %v9372_v36 = vld [vmem:[#allocation2 + $0x5c0] sm:$0xff]  }
 0x5c8   :  { %v8428_v12 = vpop.f32.mrb[231].mxu1  ;;  %9146 = vmatprep.subr.bf16.mxu0 %v9372_v36 }
 0x5c9   :  { %v8429_v10 = vadd.f32 %v8428_v12, %v8427_v29  ;;  %v5175_v63 = vadd.f32 %v8426_v55, %v11154_v34 }
 0x5cb   :  { %v9068_v41 = vpop.f32.mrb[0].mxu0  ;;  %v5178_v16 = vadd.f32 %v8429_v10, %v11154_v34 }
 0x5cc   :  { %v5336_v42 = vadd.f32 %v9068_v41, %v5175_v63  ;;  %v5327_v4 = vpop.f32.mrb[1].mxu0 }
 0x5cd   :  { %v5328_v27 = vadd.f32 %v5327_v4, %v5167_v32  ;;  %v8430_v46 = vpop.f32.mrb[232].mxu1  ;;  %v9069_v39 = vpop.f32.mrb[2].mxu0 }
 0x5ce   :  { %v5456_v0 = vadd.f32 %v5336_v42, %v10689_v51  ;;  %v5339_v20 = vadd.f32 %v9069_v39, %v5178_v16  ;;  %v8431_v47 = vpop.f32.mrb[233].mxu1  ;;  %v5330_v40 = vpop.f32.mrb[3].mxu0 }
 0x5cf   :  { %v5454_v22 = vadd.f32 %v5328_v27, %v10691_v18  ;;  %v8432_v28 = vadd.f32 %v8431_v47, %v8430_v46  ;;  %v5331_v56 = vadd.f32 %v5330_v40, %v5170_v61  ;;  %v8433_v21 = vpop.f32.mrb[234].mxu1 }
 0x5d0   :  { %vm5488_vm6 = vcmp.gt.f32.partialorder %v5456_v0, 0.0  ;;  %v5520_v49 = vmul.f32 0.01, %v5456_v0  ;;  %v5457_v13 = vadd.f32 %v5339_v20, %v10694_v52  ;;  %v8434_v57 = vpop.f32.mrb[235].mxu1 }
 0x5d1   :  { %vm5486_vm7 = vcmp.gt.f32.partialorder %v5454_v22, 0.0  ;;  %v5518_v5 = vmul.f32 0.01, %v5454_v22  ;;  %v5455_v54 = vadd.f32 %v5331_v56, %v10696_v33  ;;  %v8435_v15 = vadd.f32 %v8434_v57, %v8433_v21  ;;  %v9377_v56 = vld [vmem:[#allocation2 + $0x5c8] sm:$0xff]  }
 0x5d2   :  { %vm5489_vm8 = vcmp.gt.f32.partialorder %v5457_v13, 0.0  ;;  %v5521_v51 = vmul.f32 0.01, %v5457_v13  ;;  %v11164_v58 = vsel %vm5488_vm6, %v5456_v0, %v5520_v49 }
 0x5d3   :  { %v11166_v60 = vsel %vm5486_vm7, %v5454_v22, %v5518_v5  ;;  %vm5487_vm9 = vcmp.gt.f32.partialorder %v5455_v54, 0.0  ;;  %v5519_v18 = vmul.f32 0.01, %v5455_v54  ;;  %v5745_v32 = vrot.slane %v11164_v58, 1 }
 0x5d4   :  { %v5646_v2 = vrot.slane %v11166_v60, 7  ;;  %v11169_v55 = vsel %vm5489_vm8, %v5457_v13, %v5521_v51  ;;  %v5742_v33 = vrot.slane %v11166_v60, 1  ;;  %v5649_v21 = vrot.slane %v11164_v58, 7 }
 0x5d5   :  { %v11171_v52 = vsel %vm5487_vm9, %v5455_v54, %v5519_v18  ;;  %v8436_v29 = vpop.f32.mrb[236].mxu1  ;;  %v5651_v61 = vrot.slane %v11169_v55, 7  ;;  %v5842_v22 = vpack.c.bf16 %v11169_v55, %v11164_v58  ;;  %v5183_v13 = vadd.f32 %v8432_v28, %v11154_v34 }
 0x5d6   :  { %v5647_v12 = vrot.slane %v11171_v52, 7  ;;  %v8437_v10 = vpop.f32.mrb[237].mxu1  ;;  %v5839_v63 = vpack.c.bf16 %v11171_v52, %v11166_v60  ;;  %v5743_v41 = vrot.slane %v11171_v52, 1 }
 0x5d7   :  { %v8438_v16 = vadd.f32 %v8437_v10, %v8436_v29  ;;  %v8439_v42 = vpop.f32.mrb[238].mxu1  ;;  %v5652_v51 = vsel %vm204_vm0, %v5649_v21, %v5651_v61 }
 0x5d8   :  { %v5648_v4 = vsel %vm204_vm0, %v5646_v2, %v5647_v12  ;;  %v8440_v27 = vpop.f32.mrb[239].mxu1  ;;  %6119 = vmatprep.mubr.bf16.mxu0 %v5839_v63  ;;  %v5744_v46 = vsel %vm301_vm1, %v5742_v33, %v5743_v41  ;;  %v5746_v39 = vsel %vm301_vm1, %v5743_v41, %v5745_v32  ;;  %v5650_v18 = vsel %vm204_vm0, %v5647_v12, %v5649_v21 }
 0x5d9   :  { %v7685_v0 = vpack.c.bf16 %v5648_v4, %v5646_v2  ;;  %v8441_v20 = vadd.f32 %v8440_v27, %v8439_v42  ;;  %v5191_v47 = vadd.f32 %v8438_v16, %v11154_v34  ;;  %v5840_v40 = vpack.c.bf16 %v5746_v39, %v5744_v46  ;;  %v9382_v16 = vld [vmem:[#allocation2 + $0x5d0] sm:$0xff]  }
 0x5da   :  { %v5186_v33 = vadd.f32 %v8435_v15, %v11154_v34  ;;  %v5747_v12 = vrot.slane %v11169_v55, 1  ;;  %v5841_v39 = vpack.c.bf16 %v5652_v51, %v5650_v18 }
 0x5db   :  { %v9072_v49 = vpop.f32.mrb[4].mxu0  ;;  %7686 = vmatmul.mubr.msk.bf16.vlgmr.msra.gmra.mrb[32].mxu0 %vm9570_vm4, %v7685_v0  ;;  %v5194_v57 = vadd.f32 %v8441_v20, %v11154_v34  ;;  %9114 = vmatprep.mubr.bf16.mxu1 %v5840_v40 }
 0x5dc   :  { %v5352_v5 = vadd.f32 %v9072_v49, %v5191_v47  ;;  %v5343_v54 = vpop.f32.mrb[5].mxu0  ;;  %6127 = vmatprep.mubr.bf16.mxu0 %v5842_v22  ;;  %9147 = vmatpush3.bf16.msra.mxu0 %v9372_v36 }
 0x5dd   :  { %v5344_v8 = vadd.f32 %v5343_v54, %v5183_v13  ;;  %v8442_v2 = vpop.f32.mrb[240].mxu1  ;;  %v9073_v29 = vpop.f32.mrb[6].mxu0  ;;  %9148 = vmatprep.subr.bf16.mxu0 %v9377_v56 }
 0x5de   :  { %v5460_v28 = vadd.f32 %v5352_v5, %v10734_v30  ;;  %v5355_v10 = vadd.f32 %v9073_v29, %v5194_v57  ;;  %v8443_v63 = vpop.f32.mrb[241].mxu1  ;;  %v5346_v41 = vpop.f32.mrb[7].mxu0 }
 0x5df   :  { %v5458_v42 = vadd.f32 %v5344_v8, %v10730_v62  ;;  %v8444_v4 = vadd.f32 %v8443_v63, %v8442_v2  ;;  %v5347_v27 = vadd.f32 %v5346_v41, %v5186_v33  ;;  %v8445_v46 = vpop.f32.mrb[242].mxu1  ;;  %v9371_v8 = vld [vmem:[#allocation2 + $0x540] sm:$0xff]  }
 0x5e0   :  { %v5524_v0 = vmul.f32 0.01, %v5460_v28  ;;  %v5461_v20 = vadd.f32 %v5355_v10, %v10736_v17  ;;  %v8446_v15 = vpop.f32.mrb[243].mxu1  ;;  %9149 = vmatpush3.bf16.msra.mxu0 %v9377_v56  ;;  %vm5492_vm11 = vcmp.gt.f32.partialorder %v5460_v28, 0.0 }
 0x5e1   :  { %vm5490_vm10 = vcmp.gt.f32.partialorder %v5458_v42, 0.0  ;;  %v5522_v36 = vmul.f32 0.01, %v5458_v42  ;;  %v5459_v30 = vadd.f32 %v5347_v27, %v10738_v31  ;;  %v8447_v47 = vadd.f32 %v8446_v15, %v8445_v46  ;;  %9150 = vmatprep.subr.bf16.mxu0 %v9382_v16 }
 0x5e2   :  { %v5525_v40 = vmul.f32 0.01, %v5461_v20  ;;  %vm5493_vm12 = vcmp.gt.f32.partialorder %v5461_v20, 0.0  ;;  %v11207_v49 = vsel %vm5492_vm11, %v5460_v28, %v5524_v0  ;;  %v5748_v31 = vsel %vm301_vm1, %v5745_v32, %v5747_v12  ;;  %v9373_v28 = vld [vmem:[#allocation2 + $0x588] sm:$0xff]  }
 0x5e3   :  { %v11203_v62 = vsel %vm5490_vm10, %v5458_v42, %v5522_v36  ;;  %vm5491_vm13 = vcmp.gt.f32.partialorder %v5459_v30, 0.0  ;;  %v5523_v22 = vmul.f32 0.01, %v5459_v30  ;;  %6128 = vmatmul.mubr.bf16.gmra.mrb[36].mxu0 %v5841_v39  ;;  %v5657_v15 = vrot.slane %v11207_v49, 7 }
 0x5e4   :  { %v5653_v21 = vrot.slane %v11203_v62, 7  ;;  %v5749_v17 = vrot.slane %v11203_v62, 1  ;;  %9151 = vmatpush3.bf16.msra.mxu0 %v9382_v16  ;;  %v11215_v5 = vsel %vm5493_vm12, %v5461_v20, %v5525_v40  ;;  %v5753_v16 = vrot.slane %v11207_v49, 1  ;;  %v9374_v20 = vld [vmem:[#allocation2 + $0x548] sm:$0xff]  }
 0x5e5   :  { %v11212_v56 = vsel %vm5491_vm13, %v5459_v30, %v5523_v22  ;;  %v8448_v13 = vpop.f32.mrb[244].mxu1  ;;  %v5659_v42 = vrot.slane %v11215_v5, 7  ;;  %v5199_v40 = vadd.f32 %v8444_v4, %v11154_v34 }
 0x5e6   :  { %v5750_v57 = vsel %vm301_vm1, %v5747_v12, %v5749_v17  ;;  %v5655_v54 = vrot.slane %v11212_v56, 7  ;;  %v8449_v51 = vpop.f32.mrb[245].mxu1  ;;  %v5845_v18 = vpack.c.bf16 %v11212_v56, %v11203_v62  ;;  %v5751_v32 = vrot.slane %v11212_v56, 1 }
 0x5e7   :  { %v5843_v2 = vpack.c.bf16 %v5750_v57, %v5748_v31  ;;  %v8450_v29 = vadd.f32 %v8449_v51, %v8448_v13  ;;  %v8451_v33 = vpop.f32.mrb[246].mxu1  ;;  %v5654_v10 = vsel %vm204_vm0, %v5651_v61, %v5653_v21  ;;  %v5848_v61 = vpack.c.bf16 %v11215_v5, %v11207_v49 }
 0x5e8   :  { %v5656_v63 = vsel %vm204_vm0, %v5653_v21, %v5655_v54  ;;  %v8452_v41 = vpop.f32.mrb[247].mxu1  ;;  %6135 = vmatprep.mubr.bf16.mxu0 %v5845_v18  ;;  %v5752_v39 = vsel %vm301_vm1, %v5749_v17, %v5751_v32  ;;  %v5754_v0 = vsel %vm301_vm1, %v5751_v32, %v5753_v16  ;;  %v9375_v21 = vld [vmem:[#allocation2 + $0x590] sm:$0xff]   ;;  %v5660_v13 = vsel %vm204_vm0, %v5657_v15, %v5659_v42 }
 0x5e9   :  { %v5844_v27 = vpack.c.bf16 %v5656_v63, %v5654_v10  ;;  %v8453_v46 = vadd.f32 %v8452_v41, %v8451_v33  ;;  %9115 = vmatmul.mubr.bf16.vlgmr.msra.gmra.mrb[32].mxu1 %v5843_v2  ;;  %v5207_v12 = vadd.f32 %v8450_v29, %v11154_v34  ;;  %v5846_v30 = vpack.c.bf16 %v5754_v0, %v5752_v39 }
 0x5ea   :  { %8675 = vmatpush3.bf16.msra.mxu1 %v9371_v8  ;;  %v5658_v57 = vsel %vm204_vm0, %v5655_v54, %v5657_v15  ;;  %v5202_v2 = vadd.f32 %v8447_v47, %v11154_v34  ;;  %v9378_v54 = vld [vmem:[#allocation2 + $0x598] sm:$0xff]  }
 0x5eb   :  { %v9076_v36 = vpop.f32.mrb[8].mxu0  ;;  %6136 = vmatmul.mubr.bf16.gmra.mrb[40].mxu0 %v5844_v27  ;;  %v5210_v22 = vadd.f32 %v8453_v46, %v11154_v34  ;;  %8676 = vmatprep.subr.bf16.mxu1 %v9373_v28  ;;  %v9376_v28 = vld [vmem:[#allocation2 + $0x550] sm:$0xff]   ;;  %v5755_v46 = vrot.slane %v11215_v5, 1 }
 0x5ec   :  { %v5368_v17 = vadd.f32 %v9076_v36, %v5207_v12  ;;  %v5359_v31 = vpop.f32.mrb[9].mxu0  ;;  %6143 = vmatprep.mubr.bf16.mxu0 %v5848_v61  ;;  %9118 = vmatprep.mubr.bf16.mxu1 %v5846_v30  ;;  %v5847_v12 = vpack.c.bf16 %v5660_v13, %v5658_v57 }
 0x5ed   :  { %v5360_v51 = vadd.f32 %v5359_v31, %v5199_v40  ;;  %v8454_v18 = vpop.f32.mrb[248].mxu1  ;;  %v9077_v8 = vpop.f32.mrb[10].mxu0  ;;  %v5756_v31 = vsel %vm301_vm1, %v5753_v16, %v5755_v46  ;;  %v9381_v16 = vld [vmem:[#allocation2 + $0x560] sm:$0xff]  }
 0x5ee   :  { %v5464_v4 = vadd.f32 %v5368_v17, %v10778_v25  ;;  %v5371_v29 = vadd.f32 %v9077_v8, %v5210_v22  ;;  %v8455_v33 = vpop.f32.mrb[249].mxu1  ;;  %v5362_v32 = vpop.f32.mrb[11].mxu0  ;;  %8677 = vmatpush3.bf16.msra.mxu1 %v9374_v20 }
 0x5ef   :  { %v5462_v10 = vadd.f32 %v5360_v51, %v10775_v11  ;;  %v8456_v63 = vadd.f32 %v8455_v33, %v8454_v18  ;;  %v5363_v41 = vadd.f32 %v5362_v32, %v5202_v2  ;;  %v8457_v27 = vpop.f32.mrb[250].mxu1  ;;  %8678 = vmatprep.subr.bf16.mxu1 %v9375_v21  ;;  %v9379_v11 = vld [vmem:[#allocation2 + $0x558] sm:$0xff]  }
 0x5f0   :  { %v5465_v39 = vadd.f32 %v5371_v29, %v10782_v6  ;;  %v8458_v47 = vpop.f32.mrb[251].mxu1  ;;  %v5528_v20 = vmul.f32 0.01, %v5464_v4  ;;  %v9380_v6 = vld [vmem:[#allocation2 + $0x5a0] sm:$0xff]   ;;  %vm5496_vm3 = vcmp.gt.f32.partialorder %v5464_v4, 0.0 }
 0x5f1   :  { %vm5494_vm14 = vcmp.gt.f32.partialorder %v5462_v10, 0.0  ;;  %v5526_v25 = vmul.f32 0.01, %v5462_v10  ;;  %v5463_v0 = vadd.f32 %v5363_v41, %v10784_v44  ;;  %v8459_v61 = vadd.f32 %v8458_v47, %v8457_v27 }
 0x5f2   :  { %vm5497_vm15 = vcmp.gt.f32.partialorder %v5465_v39, 0.0  ;;  %v5529_v15 = vmul.f32 0.01, %v5465_v39  ;;  %8679 = vmatpush3.bf16.msra.mxu1 %v9376_v28  ;;  %v5215_v22 = vadd.f32 %v8456_v63, %v11154_v34  ;;  %v11266_v63 = vsel %vm5496_vm3, %v5464_v4, %v5528_v20 }
 0x5f3   :  { %v11247_v36 = vsel %vm5494_vm14, %v5462_v10, %v5526_v25  ;;  %vm5495_vm2 = vcmp.gt.f32.partialorder %v5463_v0, 0.0  ;;  %v5527_v30 = vmul.f32 0.01, %v5463_v0  ;;  %6144 = vmatmul.mubr.bf16.gmra.mrb[44].mxu0 %v5847_v12  ;;  %v9080_v40 = vpop.f32.mrb[12].mxu0  ;;  %8680 = vmatprep.subr.bf16.mxu1 %v9378_v54  ;;  %v5218_v32 = vadd.f32 %v8459_v61, %v11154_v34 }
 0x5f4   :  { %v5661_v21 = vrot.slane %v11247_v36, 7  ;;  %v5757_v44 = vrot.slane %v11247_v36, 1  ;;  %v5375_v17 = vpop.f32.mrb[13].mxu0  ;;  %v11256_v13 = vsel %vm5497_vm15, %v5465_v39, %v5529_v15 }
 0x5f5   :  { %v11258_v57 = vsel %vm5495_vm2, %v5463_v0, %v5527_v30  ;;  %v8460_v51 = vpop.f32.mrb[252].mxu1  ;;  %v5376_v18 = vadd.f32 %v5375_v17, %v5215_v22  ;;  %v9081_v8 = vpop.f32.mrb[14].mxu0  ;;  %v5667_v4 = vrot.slane %v11256_v13, 7  ;;  %v5763_v15 = vrot.slane %v11256_v13, 1 }
 0x5f6   :  { %v5758_v2 = vsel %vm301_vm1, %v5755_v46, %v5757_v44  ;;  %v5663_v29 = vrot.slane %v11258_v57, 7  ;;  %v8461_v33 = vpop.f32.mrb[253].mxu1  ;;  %v5378_v28 = vpop.f32.mrb[15].mxu0  ;;  %v5851_v10 = vpack.c.bf16 %v11258_v57, %v11247_v36  ;;  %8681 = vmatpush3.bf16.msra.mxu1 %v9379_v11  ;;  %v5662_v46 = vsel %vm204_vm0, %v5659_v42, %v5661_v21 }
 0x5f7   :  { %v5849_v41 = vpack.c.bf16 %v5758_v2, %v5756_v31  ;;  %v5466_v27 = vadd.f32 %v5376_v18, %v10814_v35  ;;  %v8462_v54 = vadd.f32 %v8461_v33, %v8460_v51  ;;  %v8463_v12 = vpop.f32.mrb[254].mxu1  ;;  %8682 = vmatprep.subr.bf16.mxu1 %v9380_v6  ;;  %v5379_v47 = vadd.f32 %v5378_v28, %v5218_v32 }
 0x5f8   :  { %v5664_v39 = vsel %vm204_vm0, %v5661_v21, %v5663_v29  ;;  %v8464_v25 = vpop.f32.mrb[255].mxu1  ;;  %6151 = vmatprep.mubr.bf16.mxu0 %v5851_v10  ;;  %v5759_v0 = vrot.slane %v11258_v57, 1  ;;  %v5665_v35 = vrot.slane %v11266_v63, 7  ;;  %v5761_v6 = vrot.slane %v11266_v63, 1 }
 0x5f9   :  { %v5850_v61 = vpack.c.bf16 %v5664_v39, %v5662_v46  ;;  %vm5498_vm6 = vcmp.gt.f32.partialorder %v5466_v27, 0.0  ;;  %v5530_v20 = vmul.f32 0.01, %v5466_v27  ;;  %9119 = vmatmul.mubr.bf16.gmra.mrb[36].mxu1 %v5849_v41  ;;  %v5223_v11 = vadd.f32 %v8462_v54, %v11154_v34 }
 0x5fa   :  { %v5467_v42 = vadd.f32 %v5379_v47, %v10820_v43  ;;  %8683 = vmatpush3.bf16.msra.mxu1 %v9381_v16  ;;  %v5760_v22 = vsel %vm301_vm1, %v5757_v44, %v5759_v0  ;;  %v5854_v21 = vpack.c.bf16 %v11256_v13, %v11266_v63  ;;  %v5668_v51 = vsel %vm204_vm0, %v5665_v35, %v5667_v4 }
 0x5fb   :  { %v11279_v30 = vsel %vm5498_vm6, %v5466_v27, %v5530_v20  ;;  %6152 = vmatmul.mubr.bf16.gmra.mrb[48].mxu0 %v5850_v61  ;;  %v5384_v31 = vadd.f32 %v9080_v40, %v5223_v11  ;;  %v5666_v18 = vsel %vm204_vm0, %v5663_v29, %v5665_v35  ;;  %v5762_v8 = vsel %vm301_vm1, %v5759_v0, %v5761_v6 }
 0x5fc   :  { %v5765_v17 = vrot.slane %v11279_v30, 1  ;;  %vm5499_vm7 = vcmp.gt.f32.partialorder %v5467_v42, 0.0  ;;  %v5531_v43 = vmul.f32 0.01, %v5467_v42  ;;  %6159 = vmatprep.mubr.bf16.mxu0 %v5854_v21  ;;  %v5764_v32 = vsel %vm301_vm1, %v5761_v6, %v5763_v15 }
 0x5fd   :  { %v8466_v2 = vpop.f32.mrb[0].mxu1  ;;  %v5468_v33 = vadd.f32 %v5384_v31, %v10818_v7  ;;  %v5852_v28 = vpack.c.bf16 %v5762_v8, %v5760_v22  ;;  %v5853_v12 = vpack.c.bf16 %v5668_v51, %v5666_v18  ;;  %v5669_v7 = vrot.slane %v11279_v30, 7 }
 0x5fe   :  { %v5766_v44 = vsel %vm301_vm1, %v5763_v15, %v5765_v17  ;;  %v8467_v10 = vpop.f32.mrb[1].mxu1  ;;  %v11292_v16 = vsel %vm5499_vm7, %v5467_v42, %v5531_v43 }
 0x5ff   :  { %v5855_v40 = vpack.c.bf16 %v5766_v44, %v5764_v32  ;;  %v8468_v41 = vadd.f32 %v8467_v10, %v8466_v2  ;;  %v8469_v27 = vpop.f32.mrb[2].mxu1  ;;  %vm5500_vm8 = vcmp.gt.f32.partialorder %v5468_v33, 0.0  ;;  %v5532_v29 = vmul.f32 0.01, %v5468_v33  ;;  %9122 = vmatprep.mubr.bf16.mxu1 %v5852_v28 }
 0x600   :  { %v8470_v54 = vpop.f32.mrb[3].mxu1  ;;  %v5671_v46 = vrot.slane %v11292_v16, 7  ;;  %v5857_v0 = vpack.c.bf16 %v11292_v16, %v11279_v30  ;;  %v5767_v61 = vrot.slane %v11292_v16, 1  ;;  %v5670_v31 = vsel %vm204_vm0, %v5667_v4, %v5669_v7 }
 0x601   :  { %v8471_v39 = vadd.f32 %v8470_v54, %v8469_v27  ;;  %v5231_v47 = vadd.f32 %v8468_v41, %v11154_v34  ;;  %9123 = vmatmul.mubr.bf16.gmra.mrb[40].mxu1 %v5855_v40  ;;  %v11297_v25 = vsel %vm5500_vm8, %v5468_v33, %v5532_v29 }
 0x602   :  { %v5769_v11 = vrot.slane %v11297_v25, 1  ;;  %v5672_v42 = vsel %vm204_vm0, %v5669_v7, %v5671_v46  ;;  %v5768_v43 = vsel %vm301_vm1, %v5765_v17, %v5767_v61  ;;  %v5673_v10 = vrot.slane %v11297_v25, 7 }
 0x603   :  { %v9084_v20 = vpop.f32.mrb[16].mxu0  ;;  %6160 = vmatmul.mubr.bf16.gmra.mrb[52].mxu0 %v5853_v12  ;;  %v5234_v35 = vadd.f32 %v8471_v39, %v11154_v34  ;;  %v5856_v40 = vpack.c.bf16 %v5672_v42, %v5670_v31 }
 0x604   :  { %v5391_v15 = vpop.f32.mrb[17].mxu0  ;;  %6167 = vmatprep.mubr.bf16.mxu0 %v5857_v0  ;;  %v5770_v8 = vsel %vm301_vm1, %v5767_v61, %v5769_v11  ;;  %v5674_v0 = vsel %vm204_vm0, %v5671_v46, %v5673_v10  ;;  %v5676_v61 = vsel %vm204_vm0, %v5673_v10, %v10036_v38 }
 0x605   :  { %v5392_v22 = vadd.f32 %v5391_v15, %v5231_v47  ;;  %v9085_v6 = vpop.f32.mrb[18].mxu0  ;;  %v8472_v21 = vpop.f32.mrb[4].mxu1  ;;  %v5858_v28 = vpack.c.bf16 %v5770_v8, %v5768_v43  ;;  %v5859_v8 = vpack.c.bf16 %v5676_v61, %v5674_v0 }
 0x606   :  { %v5394_v51 = vpop.f32.mrb[19].mxu0  ;;  %v8473_v18 = vpop.f32.mrb[5].mxu1 }
 0x607   :  { %v5470_v2 = vadd.f32 %v5392_v22, %v10854_v26  ;;  %v5395_v44 = vadd.f32 %v5394_v51, %v5234_v35  ;;  %v8474_v33 = vadd.f32 %v8473_v18, %v8472_v21  ;;  %v8475_v32 = vpop.f32.mrb[6].mxu1  ;;  %9126 = vmatprep.mubr.bf16.mxu1 %v5858_v28  ;;  %v11315_v26 = vld [vmem:[%s11755_s3 + $0x78] sm:$0xff] }
 0x608   :  { %v8476_v41 = vpop.f32.mrb[7].mxu1  ;;  %v5860_v54 = vpack.c.bf16 %v11315_v26, %v11297_v25 }
 0x609   :  { %vm5502_vm9 = vcmp.gt.f32.partialorder %v5470_v2, 0.0  ;;  %v5534_v27 = vmul.f32 0.01, %v5470_v2  ;;  %v5471_v4 = vadd.f32 %v5395_v44, %v10863_v24  ;;  %v5239_v29 = vadd.f32 %v8474_v33, %v11154_v34 }
 0x60a   :  { %v8477_v17 = vadd.f32 %v8476_v41, %v8475_v32 }
 0x60b   :  { %v11319_v12 = vsel %vm5502_vm9, %v5470_v2, %v5534_v27  ;;  %vm5503_vm10 = vcmp.gt.f32.partialorder %v5471_v4, 0.0  ;;  %v5535_v39 = vmul.f32 0.01, %v5471_v4  ;;  %v5400_v47 = vadd.f32 %v9084_v20, %v5239_v29  ;;  %6168 = vmatmul.mubr.bf16.gmra.mrb[56].mxu0 %v5856_v40 }
 0x60c   :  { %v5773_v24 = vrot.slane %v11319_v12, 1  ;;  %v5242_v7 = vadd.f32 %v8477_v17, %v11154_v34  ;;  %6175 = vmatprep.mubr.bf16.mxu0 %v5860_v54  ;;  %v5772_v20 = vsel %vm301_vm1, %v5769_v11, %v10048_v14 }
 0x60d   :  { %v11326_v35 = vsel %vm5503_vm10, %v5471_v4, %v5535_v39  ;;  %v5472_v15 = vadd.f32 %v5400_v47, %v10852_v45  ;;  %v8478_v42 = vpop.f32.mrb[8].mxu1 }
 0x60e   :  { %v5774_v22 = vsel %vm301_vm1, %v10048_v14, %v5773_v24  ;;  %v5403_v21 = vadd.f32 %v9085_v6, %v5242_v7  ;;  %v8479_v31 = vpop.f32.mrb[9].mxu1  ;;  %v5775_v45 = vrot.slane %v11326_v35, 1  ;;  %v5679_v33 = vrot.slane %v11326_v35, 7 }
 0x60f   :  { %vm5504_vm11 = vcmp.gt.f32.partialorder %v5472_v15, 0.0  ;;  %v5536_v51 = vmul.f32 0.01, %v5472_v15  ;;  %v5861_v18 = vpack.c.bf16 %v5774_v22, %v5772_v20  ;;  %v8480_v46 = vadd.f32 %v8479_v31, %v8478_v42  ;;  %v8481_v43 = vpop.f32.mrb[10].mxu1 }
 0x610   :  { %v5473_v2 = vadd.f32 %v5403_v21, %v10857_v23  ;;  %v8482_v44 = vpop.f32.mrb[11].mxu1  ;;  %v5677_v6 = vrot.slane %v11319_v12, 7  ;;  %v5863_v10 = vpack.c.bf16 %v11326_v35, %v11319_v12  ;;  %v5776_v29 = vsel %vm301_vm1, %v5773_v24, %v5775_v45 }
 0x611   :  { %v11336_v32 = vsel %vm5504_vm11, %v5472_v15, %v5536_v51  ;;  %9127 = vmatmul.mubr.bf16.gmra.mrb[44].mxu1 %v5861_v18  ;;  %v8483_v28 = vadd.f32 %v8482_v44, %v8481_v43  ;;  %v5247_v11 = vadd.f32 %v8480_v46, %v11154_v34 }
 0x612   :  { %v5777_v40 = vrot.slane %v11336_v32, 1  ;;  %v5537_v41 = vmul.f32 0.01, %v5473_v2  ;;  %vm5505_vm12 = vcmp.gt.f32.partialorder %v5473_v2, 0.0  ;;  %v5680_v54 = vsel %vm204_vm0, %v5677_v6, %v5679_v33 }
 0x613   :  { %v9088_v23 = vpop.f32.mrb[20].mxu0  ;;  %6176 = vmatmul.mubr.bf16.gmra.mrb[60].mxu0 %v5859_v8  ;;  %v5250_v27 = vadd.f32 %v8483_v28, %v11154_v34  ;;  %v5678_v61 = vsel %vm204_vm0, %v10036_v38, %v5677_v6 }
 0x614   :  { %v5407_v4 = vpop.f32.mrb[21].mxu0  ;;  %6183 = vmatprep.mubr.bf16.mxu0 %v5863_v10  ;;  %v5778_v17 = vsel %vm301_vm1, %v5775_v45, %v5777_v40  ;;  %v11352_v31 = vsel %vm5505_vm12, %v5473_v2, %v5537_v41  ;;  %v5862_v51 = vpack.c.bf16 %v5680_v54, %v5678_v61  ;;  %v5681_v10 = vrot.slane %v11336_v32, 7 }
 0x615   :  { %v5408_v39 = vadd.f32 %v5407_v4, %v5247_v11  ;;  %v9089_v47 = vpop.f32.mrb[22].mxu0  ;;  %v8484_v7 = vpop.f32.mrb[12].mxu1  ;;  %v5864_v0 = vpack.c.bf16 %v5778_v17, %v5776_v29  ;;  %v5683_v45 = vrot.slane %v11352_v31, 7  ;;  %v5779_v28 = vrot.slane %v11352_v31, 1 }
 0x616   :  { %v5410_v15 = vpop.f32.mrb[23].mxu0  ;;  %v8485_v42 = vpop.f32.mrb[13].mxu1 }
 0x617   :  { %v5474_v22 = vadd.f32 %v5408_v39, %v10884_v50  ;;  %v5411_v20 = vadd.f32 %v5410_v15, %v5250_v27  ;;  %v8486_v24 = vadd.f32 %v8485_v42, %v8484_v7  ;;  %v8487_v21 = vpop.f32.mrb[14].mxu1  ;;  %9130 = vmatprep.mubr.bf16.mxu1 %v5864_v0  ;;  %v5866_v50 = vpack.c.bf16 %v11352_v31, %v11336_v32 }
 0x618   :  { %v8488_v18 = vpop.f32.mrb[15].mxu1  ;;  %v5684_v54 = vsel %vm204_vm0, %v5681_v10, %v5683_v45  ;;  %v5780_v39 = vsel %vm301_vm1, %v5777_v40, %v5779_v28 }
 0x619   :  { %vm5506_vm13 = vcmp.gt.f32.partialorder %v5474_v22, 0.0  ;;  %v5538_v46 = vmul.f32 0.01, %v5474_v22  ;;  %v5475_v43 = vadd.f32 %v5411_v20, %v10890_v9  ;;  %v5255_v8 = vadd.f32 %v8486_v24, %v11154_v34 }
 0x61a   :  { %v8489_v44 = vadd.f32 %v8488_v18, %v8487_v21 }
 0x61b   :  { %v11360_v11 = vsel %vm5506_vm13, %v5474_v22, %v5538_v46  ;;  %vm5507_vm14 = vcmp.gt.f32.partialorder %v5475_v43, 0.0  ;;  %v5539_v2 = vmul.f32 0.01, %v5475_v43  ;;  %v5416_v6 = vadd.f32 %v9088_v23, %v5255_v8  ;;  %6184 = vmatmul.mubr.bf16.gmra.mrb[64].mxu0 %v5862_v51 }
 0x61c   :  { %v5781_v9 = vrot.slane %v11360_v11, 1  ;;  %v5258_v41 = vadd.f32 %v8489_v44, %v11154_v34  ;;  %6191 = vmatprep.mubr.bf16.mxu0 %v5866_v50 }
 0x61d   :  { %v11365_v27 = vsel %vm5507_vm14, %v5475_v43, %v5539_v2  ;;  %v5476_v4 = vadd.f32 %v5416_v6, %v10899_v59  ;;  %v8490_v29 = vpop.f32.mrb[16].mxu1  ;;  %v5682_v59 = vsel %vm204_vm0, %v5679_v33, %v5681_v10 }
 0x61e   :  { %v5419_v17 = vadd.f32 %v9089_v47, %v5258_v41  ;;  %v5782_v23 = vsel %vm301_vm1, %v5779_v28, %v5781_v9  ;;  %v8491_v7 = vpop.f32.mrb[17].mxu1  ;;  %v5783_v47 = vrot.slane %v11365_v27, 1  ;;  %v5865_v40 = vpack.c.bf16 %v5684_v54, %v5682_v59 }
 0x61f   :  { %vm5508_vm15 = vcmp.gt.f32.partialorder %v5476_v4, 0.0  ;;  %v5540_v0 = vmul.f32 0.01, %v5476_v4  ;;  %v5867_v61 = vpack.c.bf16 %v5782_v23, %v5780_v39  ;;  %v8492_v15 = vadd.f32 %v8491_v7, %v8490_v29  ;;  %v8493_v42 = vpop.f32.mrb[18].mxu1 }
 0x620   :  { %v5477_v22 = vadd.f32 %v5419_v17, %v10910_v19  ;;  %v8494_v20 = vpop.f32.mrb[19].mxu1  ;;  %v5687_v18 = vrot.slane %v11365_v27, 7  ;;  %v5869_v19 = vpack.c.bf16 %v11365_v27, %v11360_v11  ;;  %v5685_v28 = vrot.slane %v11360_v11, 7 }
 0x621   :  { %v11376_v24 = vsel %vm5508_vm15, %v5476_v4, %v5540_v0  ;;  %9131 = vmatmul.mubr.bf16.gmra.mrb[48].mxu1 %v5867_v61  ;;  %v8495_v21 = vadd.f32 %v8494_v20, %v8493_v42  ;;  %v5263_v51 = vadd.f32 %v8492_v15, %v11154_v34  ;;  %v5784_v6 = vsel %vm301_vm1, %v5781_v9, %v5783_v47 }
 0x622   :  { %v5541_v46 = vmul.f32 0.01, %v5477_v22  ;;  %v9092_v43 = vpop.f32.mrb[24].mxu0  ;;  %v5785_v8 = vrot.slane %v11376_v24, 1  ;;  %vm5509_vm2 = vcmp.gt.f32.partialorder %v5477_v22, 0.0  ;;  %v5688_v17 = vsel %vm204_vm0, %v5685_v28, %v5687_v18 }
 0x623   :  { %v5423_v33 = vpop.f32.mrb[25].mxu0  ;;  %6192 = vmatmul.mubr.bf16.gmra.mrb[68].mxu0 %v5865_v40  ;;  %v5266_v44 = vadd.f32 %v8495_v21, %v11154_v34  ;;  %v5686_v9 = vsel %vm204_vm0, %v5683_v45, %v5685_v28 }
 0x624   :  { %v5424_v50 = vadd.f32 %v5423_v33, %v5263_v51  ;;  %v9093_v2 = vpop.f32.mrb[26].mxu0  ;;  %6199 = vmatprep.mubr.bf16.mxu0 %v5869_v19  ;;  %v5786_v10 = vsel %vm301_vm1, %v5783_v47, %v5785_v8  ;;  %v11391_v7 = vsel %vm5509_vm2, %v5477_v22, %v5541_v46  ;;  %v5868_v20 = vpack.c.bf16 %v5688_v17, %v5686_v9 }
 0x625   :  { %v5426_v41 = vpop.f32.mrb[27].mxu0  ;;  %v8496_v4 = vpop.f32.mrb[20].mxu1  ;;  %v5870_v29 = vpack.c.bf16 %v5786_v10, %v5784_v6  ;;  %v5872_v51 = vpack.c.bf16 %v11391_v7, %v11376_v24  ;;  %v5787_v33 = vrot.slane %v11391_v7, 1 }
 0x626   :  { %v5478_v54 = vadd.f32 %v5424_v50, %v10920_v53  ;;  %v5427_v39 = vadd.f32 %v5426_v41, %v5266_v44  ;;  %v8497_v23 = vpop.f32.mrb[21].mxu1  ;;  %v5691_v53 = vrot.slane %v11391_v7, 7  ;;  %v5689_v44 = vrot.slane %v11376_v24, 7 }
 0x627   :  { %v8498_v0 = vadd.f32 %v8497_v23, %v8496_v4  ;;  %v8499_v61 = vpop.f32.mrb[22].mxu1  ;;  %9134 = vmatprep.mubr.bf16.mxu1 %v5870_v29  ;;  %v11789_v23 = vld [vmem:[#allocation11_spill] sm:$0xff] }
 0x628   :  { %vm5510_vm3 = vcmp.gt.f32.partialorder %v5478_v54, 0.0  ;;  %v5542_v15 = vmul.f32 0.01, %v5478_v54  ;;  %v5479_v42 = vadd.f32 %v5427_v39, %v10931_v37  ;;  %v8500_v59 = vpop.f32.mrb[23].mxu1 }
 0x629   :  { %v5271_v47 = vadd.f32 %v8498_v0, %v11154_v34  ;;  %v8501_v40 = vadd.f32 %v8500_v59, %v8499_v61  ;;  %v5788_v61 = vsel %vm301_vm1, %v5785_v8, %v5787_v33 }
 0x62a   :  { %v11397_v21 = vsel %vm5510_vm3, %v5478_v54, %v5542_v15  ;;  %vm5511_vm6 = vcmp.gt.f32.partialorder %v5479_v42, 0.0  ;;  %v5543_v22 = vmul.f32 0.01, %v5479_v42 }
 0x62b   :  { %v5789_v45 = vrot.slane %v11397_v21, 1  ;;  %v5432_v46 = vadd.f32 %v9092_v43, %v5271_v47  ;;  %v5274_v19 = vadd.f32 %v8501_v40, %v11154_v34  ;;  %v11403_v37 = vpop.f32.mrb[28].mxu0  ;;  %6200 = vmatmul.mubr.bf16.gmra.mrb[72].mxu0 %v5868_v20  ;;  %v5692_v43 = vsel %vm204_vm0, %v5689_v44, %v5691_v53  ;;  %v9383_v20 = vld [vmem:[#allocation2 + $0x5a8] sm:$0xff]  }
 0x62c   :  { %v5439_v28 = vpop.f32.mrb[29].mxu0  ;;  %6207 = vmatprep.mubr.bf16.mxu0 %v5872_v51  ;;  %v11407_v50 = vsel %vm5511_vm6, %v5479_v42, %v5543_v22  ;;  %8684 = vmatprep.subr.bf16.mxu1 %v9383_v20  ;;  %v9385_v20 = vld [vmem:[#allocation2 + $0x5b0] sm:$0xff]  }
 0x62d   :  { %v5480_v6 = vadd.f32 %v5432_v46, %v10943_v1  ;;  %v5435_v10 = vadd.f32 %v9093_v2, %v5274_v19  ;;  %v9097_v41 = vpop.f32.mrb[30].mxu0  ;;  %v8502_v4 = vpop.f32.mrb[24].mxu1  ;;  %v5790_v29 = vsel %vm301_vm1, %v5787_v33, %v5789_v45  ;;  %v5690_v1 = vsel %vm204_vm0, %v5687_v18, %v5689_v44  ;;  %v9384_v33 = vld [vmem:[#allocation2 + $0x568] sm:$0xff]  }
 0x62e   :  { %v5442_v17 = vpop.f32.mrb[31].mxu0  ;;  %v8503_v54 = vpop.f32.mrb[25].mxu1  ;;  %v5873_v2 = vpack.c.bf16 %v5790_v29, %v5788_v61  ;;  %v5791_v59 = vrot.slane %v11407_v50, 1  ;;  %v5695_v47 = vrot.slane %v11407_v50, 7  ;;  %v5871_v22 = vpack.c.bf16 %v5692_v43, %v5690_v1  ;;  %8685 = vmatpush3.bf16.msra.mxu1 %v9384_v33 }
 0x62f   :  { %vm5512_vm7 = vcmp.gt.f32.partialorder %v5480_v6, 0.0  ;;  %v5544_v39 = vmul.f32 0.01, %v5480_v6  ;;  %v5481_v0 = vadd.f32 %v5435_v10, %v11789_v23  ;;  %v8505_v9 = vpop.f32.mrb[26].mxu1  ;;  %v8504_v15 = vadd.f32 %v8503_v54, %v8502_v4  ;;  %v11790_v23 = vld [vmem:[#allocation8_spill] sm:$0xff]  ;;  %8686 = vmatprep.subr.bf16.mxu1 %v9385_v20 }
 0x630   :  { %v8506_v42 = vpop.f32.mrb[27].mxu1  ;;  %9135 = vmatmul.mubr.bf16.gmra.mrb[52].mxu1 %v5873_v2  ;;  %v5875_v19 = vpack.c.bf16 %v11407_v50, %v11397_v21  ;;  %v5792_v41 = vsel %vm301_vm1, %v5789_v45, %v5791_v59  ;;  %v11792_v2 = vld [vmem:[#allocation9_spill] sm:$0xff] }
 0x631   :  { %v11421_v40 = vsel %vm5512_vm7, %v5480_v6, %v5544_v39  ;;  %v8507_v51 = vadd.f32 %v8506_v42, %v8505_v9  ;;  %v5545_v46 = vmul.f32 0.01, %v5481_v0  ;;  %v5279_v8 = vadd.f32 %v8504_v15, %v11154_v34 }
 0x632   :  { %v5793_v18 = vrot.slane %v11421_v40, 1  ;;  %vm5513_vm8 = vcmp.gt.f32.partialorder %v5481_v0, 0.0  ;;  %v5693_v6 = vrot.slane %v11397_v21, 7 }
 0x633   :  { %v5282_v44 = vadd.f32 %v8507_v51, %v11154_v34  ;;  %6208 = vmatmul.mubr.bf16.gmra.mrb[76].mxu0 %v5871_v22  ;;  %v5440_v10 = vadd.f32 %v5439_v28, %v5279_v8  ;;  %v11435_v1 = vsel %vm5513_vm8, %v5481_v0, %v5545_v46 }
 0x634   :  { %6215 = vmatprep.mubr.bf16.mxu0 %v5875_v19  ;;  %v5794_v4 = vsel %vm301_vm1, %v5791_v59, %v5793_v18  ;;  %v5696_v39 = vsel %vm204_vm0, %v5693_v6, %v5695_v47  ;;  %11791 = vst [vmem:[#allocation11_spill] sm:$0xff] %v11435_v1  ;;  %v5694_v45 = vsel %vm204_vm0, %v5691_v53, %v5693_v6  ;;  %v5795_v0 = vrot.slane %v11435_v1, 1  ;;  %v9386_v53 = vld [vmem:[#allocation2 + $0x570] sm:$0xff]  }
 0x635   :  { %v5443_v43 = vadd.f32 %v5442_v17, %v5282_v44  ;;  %v8508_v29 = vpop.f32.mrb[28].mxu1  ;;  %v5876_v54 = vpack.c.bf16 %v5794_v4, %v5792_v41  ;;  %v5482_v61 = vadd.f32 %v5440_v10, %v11790_v23  ;;  %v5874_v22 = vpack.c.bf16 %v5696_v39, %v5694_v45  ;;  %v9387_v44 = vld [vmem:[#allocation2 + $0x5d8] sm:$0xff]   ;;  %8687 = vmatpush3.bf16.msra.mxu1 %v9386_v53  ;;  %v9390_v53 = vld [vmem:[#allocation2 + $0x5e0] sm:$0xff]  }
 0x636   :  { %v8509_v9 = vpop.f32.mrb[29].mxu1  ;;  %v5699_v19 = vrot.slane %v11435_v1, 7  ;;  %v5878_v33 = vpack.c.bf16 %v11435_v1, %v11421_v40  ;;  %v11794_v41 = vld [vmem:[#allocation10_spill] sm:$0xff]  ;;  %9152 = vmatprep.subr.bf16.mxu0 %v9387_v44 }
 0x637   :  { %v5483_v28 = vadd.f32 %v5443_v43, %v11792_v2  ;;  %v8510_v15 = vadd.f32 %v8509_v9, %v8508_v29  ;;  %v8511_v42 = vpop.f32.mrb[30].mxu1  ;;  %9138 = vmatprep.mubr.bf16.mxu1 %v5876_v54  ;;  %vm5514_vm9 = vcmp.gt.f32.partialorder %v5482_v61, 0.0  ;;  %v5546_v17 = vmul.f32 0.01, %v5482_v61  ;;  %9153 = vmatpush3.bf16.msra.mxu0 %v9387_v44 }
 0x638   :  { %v8512_v59 = vpop.f32.mrb[31].mxu1  ;;  %v5796_v43 = vsel %vm301_vm1, %v5793_v18, %v5795_v0  ;;  %9154 = vmatprep.subr.bf16.mxu0 %v9390_v53 }
 0x639   :  { %v5547_v51 = vmul.f32 0.01, %v5483_v28  ;;  %v5287_v8 = vadd.f32 %v8510_v15, %v11154_v34  ;;  %v11443_v46 = vsel %vm5514_vm9, %v5482_v61, %v5546_v17  ;;  %vm5515_vm10 = vcmp.gt.f32.partialorder %v5483_v28, 0.0 }
 0x63a   :  { %11793 = vst [vmem:[#allocation8_spill] sm:$0xff] %v11443_v46  ;;  %v5797_v6 = vrot.slane %v11443_v46, 1  ;;  %v5697_v34 = vrot.slane %v11421_v40, 7  ;;  %v5701_v45 = vrot.slane %v11443_v46, 7 }
 0x63b   :  { %v5448_v10 = vadd.f32 %v11403_v37, %v5287_v8  ;;  %6216 = vmatmul.mubr.bf16.gmra.mrb[80].mxu0 %v5874_v22  ;;  %v11454_v54 = vsel %vm5515_vm10, %v5483_v28, %v5547_v51  ;;  %v9388_v8 = vld [vmem:[#allocation2 + $0x5b8] sm:$0xff]  }
 0x63c   :  { %6223 = vmatprep.mubr.bf16.mxu0 %v5878_v33  ;;  %v5798_v29 = vsel %vm301_vm1, %v5795_v0, %v5797_v6  ;;  %11795 = vst [vmem:[#allocation9_spill] sm:$0xff] %v11454_v54  ;;  %v5700_v39 = vsel %vm204_vm0, %v5697_v34, %v5699_v19  ;;  %v5698_v61 = vsel %vm204_vm0, %v5695_v47, %v5697_v34  ;;  %v5799_v9 = vrot.slane %v11454_v54, 1  ;;  %v9389_v0 = vld [vmem:[#allocation2 + $0x578] sm:$0xff]   ;;  %v9391_v34 = vld [vmem:[#allocation2 + $0x5e8] sm:$0xff]  }
 0x63d   :  { %v5484_v4 = vadd.f32 %v5448_v10, %v11794_v41  ;;  %v5879_v23 = vpack.c.bf16 %v5798_v29, %v5796_v43  ;;  %v5877_v18 = vpack.c.bf16 %v5700_v39, %v5698_v61  ;;  %v5703_v28 = vrot.slane %v11454_v54, 7  ;;  %8688 = vmatprep.subr.bf16.mxu1 %v9388_v8  ;;  %9155 = vmatpush3.bf16.msra.mxu0 %v9390_v53  ;;  %v9392_v43 = vld [vmem:[#allocation2 + $0x5f0] sm:$0xff]   ;;  %v9393_v29 = vld [vmem:[#allocation2 + $0x5f8] sm:$0xff]  }
 0x63e   :  { %v5881_v15 = vpack.c.bf16 %v11454_v54, %v11443_v46  ;;  %v5800_v17 = vsel %vm301_vm1, %v5797_v6, %v5799_v9  ;;  %v5702_v33 = vsel %vm204_vm0, %v5699_v19, %v5701_v45  ;;  %8689 = vmatpush3.bf16.msra.mxu1 %v9389_v0  ;;  %9156 = vmatprep.subr.bf16.mxu0 %v9391_v34 }
 0x63f   :  { %vm5516_vm11 = vcmp.gt.f32.partialorder %v5484_v4, 0.0  ;;  %v5548_v37 = vmul.f32 0.01, %v5484_v4  ;;  %9139 = vmatmul.mubr.bf16.gmra.mrb[56].mxu1 %v5879_v23  ;;  %v5704_v51 = vsel %vm204_vm0, %v5701_v45, %v5703_v28 }
 0x640   :  { %v5880_v44 = vpack.c.bf16 %v5704_v51, %v5702_v33 }
 0x641   :  { %v11461_v2 = vsel %vm5516_vm11, %v5484_v4, %v5548_v37  ;;  %9157 = vmatpush3.bf16.msra.mxu0 %v9391_v34 }
 0x642   :  { %11796 = vst [vmem:[#allocation10_spill] sm:$0xff] %v11461_v2  ;;  %v5801_v42 = vrot.slane %v11461_v2, 1  ;;  %v5705_v6 = vrot.slane %v11461_v2, 7  ;;  %v5884_v10 = vpack.c.bf16 %v11315_v26, %v11461_v2  ;;  %9158 = vmatprep.subr.bf16.mxu0 %v9392_v43 }
 0x643   :  { %6224 = vmatmul.mubr.bf16.gmra.mrb[84].mxu0 %v5877_v18 }
 0x644   :  { %6231 = vmatprep.mubr.bf16.mxu0 %v5881_v15  ;;  %v5802_v47 = vsel %vm301_vm1, %v5799_v9, %v5801_v42  ;;  %v5804_v59 = vsel %vm301_vm1, %v5801_v42, %v10048_v14  ;;  %v5706_v19 = vsel %vm204_vm0, %v5703_v28, %v5705_v6  ;;  %v5708_v41 = vsel %vm204_vm0, %v5705_v6, %v10036_v38 }
 0x645   :  { %v5882_v20 = vpack.c.bf16 %v5802_v47, %v5800_v17  ;;  %v7688_v22 = vpack.c.bf16 %v10048_v14, %v5804_v59  ;;  %v5883_v4 = vpack.c.bf16 %v5708_v41, %v5706_v19  ;;  %9159 = vmatpush3.bf16.msra.mxu0 %v9392_v43  ;;  %v11483_v47 = vld [vmem:[#allocation4 + $0x6] ss:$0 sm:$0xff] }
 0x646   :  { %9160 = vmatprep.subr.bf16.mxu0 %v9393_v29 }
 0x647   :  { %9142 = vmatprep.mubr.bf16.mxu1 %v5882_v20 }
 0x648   :  { %9143 = vmatmul.mubr.msk.bf16.gmra.mrb[60].mxu1 %vm9831_vm5, %v7688_v22 }
 0x649   :  { %9161 = vmatpush3.bf16.msra.mxu0 %v9393_v29 }
 0x64b   :  { %6232 = vmatmul.mubr.bf16.gmra.mrb[88].mxu0 %v5880_v44 }
 0x64c   :  { %6239 = vmatprep.mubr.bf16.mxu0 %v5884_v10 }
 0x653   :  { %6240 = vmatmul.mubr.bf16.gmra.mrb[92].mxu0 %v5883_v4 }
 0x6ae   :  { %v8554_v39 = vpop.f32.mrb[32].mxu0 }
 0x6af   :  { %v8555_v23 = vpop.f32.mrb[33].mxu0 }
 0x6b0   :  { %v8556_v37 = vadd.f32 %v8555_v23, %v8554_v39  ;;  %v8557_v61 = vpop.f32.mrb[34].mxu0 }
 0x6b1   :  { %v8558_v9 = vpop.f32.mrb[35].mxu0 }
 0x6b2   :  { %v8559_v18 = vadd.f32 %v8558_v9, %v8557_v61  ;;  %v6122_v51 = vadd.f32 %v8556_v37, %v11483_v47 }
 0x6b4   :  { %v6125_v10 = vadd.f32 %v8559_v18, %v11483_v47 }
 0x6b6   :  { %v8560_v15 = vpop.f32.mrb[36].mxu0 }
 0x6b7   :  { %v8561_v28 = vpop.f32.mrb[37].mxu0 }
 0x6b8   :  { %v8562_v42 = vadd.f32 %v8561_v28, %v8560_v15  ;;  %v8563_v45 = vpop.f32.mrb[38].mxu0 }
 0x6b9   :  { %v8564_v17 = vpop.f32.mrb[39].mxu0 }
 0x6ba   :  { %v8565_v59 = vadd.f32 %v8564_v17, %v8563_v45  ;;  %v6130_v20 = vadd.f32 %v8562_v42, %v11483_v47 }
 0x6bc   :  { %v9116_v22 = vpop.f32.mrb[32].mxu1  ;;  %v6133_v8 = vadd.f32 %v8565_v59, %v11483_v47 }
 0x6bd   :  { %v6291_v0 = vadd.f32 %v9116_v22, %v6130_v20  ;;  %v6282_v33 = vpop.f32.mrb[33].mxu1 }
 0x6be   :  { %v6283_v53 = vadd.f32 %v6282_v33, %v6122_v51  ;;  %v8566_v44 = vpop.f32.mrb[40].mxu0  ;;  %v9117_v6 = vpop.f32.mrb[34].mxu1 }
 0x6bf   :  { %v6411_v34 = vmax.f32 %v6291_v0, 0.0  ;;  %v6294_v19 = vadd.f32 %v9117_v6, %v6133_v8  ;;  %v8567_v41 = vpop.f32.mrb[41].mxu0  ;;  %v6285_v4 = vpop.f32.mrb[35].mxu1 }
 0x6c0   :  { %v6409_v43 = vmax.f32 %v6283_v53, 0.0  ;;  %v8568_v29 = vadd.f32 %v8567_v41, %v8566_v44  ;;  %v6286_v39 = vadd.f32 %v6285_v4, %v6125_v10  ;;  %v8569_v23 = vpop.f32.mrb[42].mxu0 }
 0x6c1   :  { %v11489_v61 = vmax.f32 %v6294_v19, 0.0  ;;  %v8570_v37 = vpop.f32.mrb[43].mxu0  ;;  %v6508_v9 = vrot.slane %v6411_v34, 7  ;;  %v6604_v15 = vrot.slane %v6411_v34, 1 }
 0x6c2   :  { %v6410_v28 = vmax.f32 %v6286_v39, 0.0  ;;  %v8571_v42 = vadd.f32 %v8570_v37, %v8569_v23  ;;  %v6505_v45 = vrot.slane %v6409_v43, 7  ;;  %v6601_v20 = vrot.slane %v6409_v43, 1 }
 0x6c3   :  { %v6510_v17 = vrot.slane %v11489_v61, 7  ;;  %v6606_v18 = vrot.slane %v11489_v61, 1  ;;  %v6701_v59 = vpack.c.bf16 %v11489_v61, %v6411_v34 }
 0x6c4   :  { %v6506_v22 = vrot.slane %v6410_v28, 7  ;;  %v6602_v51 = vrot.slane %v6410_v28, 1  ;;  %v6698_v8 = vpack.c.bf16 %v6410_v28, %v6409_v43 }
 0x6c5   :  { %v6511_v0 = vsel %vm204_vm0, %v6508_v9, %v6510_v17  ;;  %v11496_v33 = vsel %vm301_vm1, %v6604_v15, %v6606_v18 }
 0x6c6   :  { %v6507_v53 = vsel %vm204_vm0, %v6505_v45, %v6506_v22  ;;  %v6509_v44 = vsel %vm204_vm0, %v6506_v22, %v6508_v9  ;;  %v8572_v6 = vpop.f32.mrb[44].mxu0  ;;  %6978 = vmatprep.mubr.bf16.mxu1 %v6698_v8  ;;  %v6603_v10 = vsel %vm301_vm1, %v6601_v20, %v6602_v51  ;;  %v6605_v19 = vsel %vm301_vm1, %v6602_v51, %v6604_v15 }
 0x6c7   :  { %v6700_v34 = vpack.c.bf16 %v6511_v0, %v6509_v44  ;;  %v7717_v41 = vpack.c.bf16 %v6507_v53, %v6505_v45  ;;  %v8573_v4 = vpop.f32.mrb[45].mxu0  ;;  %v6699_v39 = vpack.c.bf16 %v6605_v19, %v6603_v10  ;;  %v6138_v20 = vadd.f32 %v8568_v29, %v11483_v47 }
 0x6c8   :  { %v8574_v43 = vadd.f32 %v8573_v4, %v8572_v6  ;;  %v8575_v23 = vpop.f32.mrb[46].mxu0  ;;  %v6141_v53 = vadd.f32 %v8571_v42, %v11483_v47 }
 0x6c9   :  { %v8576_v61 = vpop.f32.mrb[47].mxu0  ;;  %7718 = vmatmul.mubr.msk.bf16.vlgmr.msra.gmra.mrb[64].mxu1 %vm9570_vm4, %v7717_v41  ;;  %9162 = vmatprep.mubr.bf16.mxu0 %v6699_v39 }
 0x6ca   :  { %v8577_v37 = vadd.f32 %v8576_v61, %v8575_v23  ;;  %6986 = vmatprep.mubr.bf16.mxu1 %v6701_v59  ;;  %v6146_v9 = vadd.f32 %v8574_v43, %v11483_v47 }
 0x6cc   :  { %v9120_v28 = vpop.f32.mrb[36].mxu1  ;;  %v6149_v15 = vadd.f32 %v8577_v37, %v11483_v47 }
 0x6cd   :  { %v6307_v22 = vadd.f32 %v9120_v28, %v6146_v9  ;;  %v6298_v45 = vpop.f32.mrb[37].mxu1 }
 0x6ce   :  { %v6299_v51 = vadd.f32 %v6298_v45, %v6138_v20  ;;  %v8578_v8 = vpop.f32.mrb[48].mxu0  ;;  %v9121_v0 = vpop.f32.mrb[38].mxu1 }
 0x6cf   :  { %v6415_v44 = vmax.f32 %v6307_v22, 0.0  ;;  %v6310_v48 = vadd.f32 %v9121_v0, %v6149_v15  ;;  %v8579_v6 = vpop.f32.mrb[49].mxu0  ;;  %v6301_v10 = vpop.f32.mrb[39].mxu1 }
 0x6d0   :  { %v6413_v19 = vmax.f32 %v6299_v51, 0.0  ;;  %v8580_v59 = vadd.f32 %v8579_v6, %v8578_v8  ;;  %v6302_v41 = vadd.f32 %v6301_v10, %v6141_v53  ;;  %v8581_v4 = vpop.f32.mrb[50].mxu0 }
 0x6d1   :  { %v6516_v39 = vrot.slane %v6415_v44, 7  ;;  %v6612_v43 = vrot.slane %v6415_v44, 1  ;;  %v6416_v29 = vmax.f32 %v6310_v48, 0.0  ;;  %v8582_v23 = vpop.f32.mrb[51].mxu0  ;;  %6987 = vmatmul.mubr.bf16.gmra.mrb[68].mxu1 %v6700_v34 }
 0x6d2   :  { %v6512_v61 = vrot.slane %v6413_v19, 7  ;;  %v6608_v37 = vrot.slane %v6413_v19, 1  ;;  %v6414_v9 = vmax.f32 %v6302_v41, 0.0  ;;  %v8583_v28 = vadd.f32 %v8582_v23, %v8581_v4 }
 0x6d3   :  { %v6518_v20 = vrot.slane %v6416_v29, 7  ;;  %v6614_v45 = vrot.slane %v6416_v29, 1  ;;  %v6154_v42 = vadd.f32 %v8580_v59, %v11483_v47  ;;  %v6707_v15 = vpack.c.bf16 %v6416_v29, %v6415_v44 }
 0x6d4   :  { %v6513_v22 = vsel %vm204_vm0, %v6510_v17, %v6512_v61  ;;  %v6609_v51 = vsel %vm301_vm1, %v6606_v18, %v6608_v37  ;;  %v6514_v8 = vrot.slane %v6414_v9, 7  ;;  %v6610_v0 = vrot.slane %v6414_v9, 1  ;;  %v9124_v53 = vpop.f32.mrb[40].mxu1 }
 0x6d5   :  { %v6702_v48 = vpack.c.bf16 %v6609_v51, %v11496_v33  ;;  %v6519_v34 = vsel %vm204_vm0, %v6516_v39, %v6518_v20  ;;  %v6615_v6 = vsel %vm301_vm1, %v6612_v43, %v6614_v45  ;;  %v6314_v10 = vpop.f32.mrb[41].mxu1  ;;  %v6704_v41 = vpack.c.bf16 %v6414_v9, %v6413_v19 }
 0x6d6   :  { %v6515_v4 = vsel %vm204_vm0, %v6512_v61, %v6514_v8  ;;  %v6517_v59 = vsel %vm204_vm0, %v6514_v8, %v6516_v39  ;;  %v8584_v44 = vpop.f32.mrb[52].mxu0  ;;  %v6315_v29 = vadd.f32 %v6314_v10, %v6154_v42  ;;  %v9125_v17 = vpop.f32.mrb[42].mxu1  ;;  %v6157_v18 = vadd.f32 %v8583_v28, %v11483_v47 }
 0x6d7   :  { %v6703_v23 = vpack.c.bf16 %v6515_v4, %v6513_v22  ;;  %v6706_v2 = vpack.c.bf16 %v6519_v34, %v6517_v59  ;;  %6994 = vmatprep.mubr.bf16.mxu1 %v6704_v41  ;;  %v8585_v54 = vpop.f32.mrb[53].mxu0  ;;  %9163 = vmatmul.mubr.bf16.vlgmr.msra.gmra.mrb[96].mxu0 %v6702_v48  ;;  %v6317_v33 = vpop.f32.mrb[43].mxu1  ;;  %v6611_v51 = vsel %vm301_vm1, %v6608_v37, %v6610_v0 }
 0x6d8   :  { %v6417_v46 = vmax.f32 %v6315_v29, 0.0  ;;  %v8586_v1 = vadd.f32 %v8585_v54, %v8584_v44  ;;  %v8587_v19 = vpop.f32.mrb[54].mxu0  ;;  %v6318_v9 = vadd.f32 %v6317_v33, %v6157_v18  ;;  %v6613_v61 = vsel %vm301_vm1, %v6610_v0, %v6612_v43 }
 0x6d9   :  { %v8588_v39 = vpop.f32.mrb[55].mxu0  ;;  %6995 = vmatmul.mubr.bf16.gmra.mrb[72].mxu1 %v6703_v23  ;;  %v6705_v42 = vpack.c.bf16 %v6613_v61, %v6611_v51 }
 0x6da   :  { %v6520_v8 = vrot.slane %v6417_v46, 7  ;;  %v6616_v10 = vrot.slane %v6417_v46, 1  ;;  %v6162_v28 = vadd.f32 %v8586_v1, %v11483_v47  ;;  %v6418_v22 = vmax.f32 %v6318_v9, 0.0  ;;  %7002 = vmatprep.mubr.bf16.mxu1 %v6707_v15 }
 0x6db   :  { %v8589_v34 = vadd.f32 %v8588_v39, %v8587_v19  ;;  %9166 = vmatprep.mubr.bf16.mxu0 %v6705_v42 }
 0x6dc   :  { %v6521_v48 = vsel %vm204_vm0, %v6518_v20, %v6520_v8  ;;  %v6617_v37 = vsel %vm301_vm1, %v6614_v45, %v6616_v10  ;;  %v6323_v54 = vadd.f32 %v9124_v53, %v6162_v28  ;;  %v6522_v41 = vrot.slane %v6418_v22, 7 }
 0x6dd   :  { %v6708_v4 = vpack.c.bf16 %v6617_v37, %v6615_v6  ;;  %v6618_v59 = vrot.slane %v6418_v22, 1  ;;  %v6165_v43 = vadd.f32 %v8589_v34, %v11483_v47  ;;  %v6710_v0 = vpack.c.bf16 %v6418_v22, %v6417_v46 }
 0x6de   :  { %v6419_v44 = vmax.f32 %v6323_v54, 0.0  ;;  %v6523_v29 = vsel %vm204_vm0, %v6520_v8, %v6522_v41  ;;  %v8590_v18 = vpop.f32.mrb[56].mxu0 }
 0x6df   :  { %v6709_v1 = vpack.c.bf16 %v6523_v29, %v6521_v48  ;;  %v6326_v23 = vadd.f32 %v9125_v17, %v6165_v43  ;;  %v8591_v15 = vpop.f32.mrb[57].mxu0  ;;  %9167 = vmatmul.mubr.bf16.gmra.mrb[100].mxu0 %v6708_v4  ;;  %v6619_v33 = vsel %vm301_vm1, %v6616_v10, %v6618_v59 }
 0x6e0   :  { %v6524_v20 = vrot.slane %v6419_v44, 7  ;;  %v8592_v51 = vadd.f32 %v8591_v15, %v8590_v18  ;;  %v8593_v45 = vpop.f32.mrb[58].mxu0  ;;  %v6620_v53 = vrot.slane %v6419_v44, 1 }
 0x6e1   :  { %v6420_v19 = vmax.f32 %v6326_v23, 0.0  ;;  %v8594_v6 = vpop.f32.mrb[59].mxu0  ;;  %7003 = vmatmul.mubr.bf16.gmra.mrb[76].mxu1 %v6706_v2 }
 0x6e2   :  { %v6525_v9 = vsel %vm204_vm0, %v6522_v41, %v6524_v20  ;;  %v8595_v46 = vadd.f32 %v8594_v6, %v8593_v45  ;;  %7010 = vmatprep.mubr.bf16.mxu1 %v6710_v0  ;;  %v6170_v61 = vadd.f32 %v8592_v51, %v11483_v47  ;;  %v6621_v39 = vsel %vm301_vm1, %v6618_v59, %v6620_v53 }
 0x6e3   :  { %v6526_v17 = vrot.slane %v6420_v19, 7  ;;  %v6622_v42 = vrot.slane %v6420_v19, 1  ;;  %v6711_v8 = vpack.c.bf16 %v6621_v39, %v6619_v33  ;;  %v6713_v28 = vpack.c.bf16 %v6420_v19, %v6419_v44 }
 0x6e4   :  { %v9128_v10 = vpop.f32.mrb[44].mxu1  ;;  %v6173_v22 = vadd.f32 %v8595_v46, %v11483_v47 }
 0x6e5   :  { %v6527_v34 = vsel %vm204_vm0, %v6524_v20, %v6526_v17  ;;  %v6330_v48 = vpop.f32.mrb[45].mxu1  ;;  %v6623_v2 = vsel %vm301_vm1, %v6620_v53, %v6622_v42  ;;  %9170 = vmatprep.mubr.bf16.mxu0 %v6711_v8 }
 0x6e6   :  { %v6712_v37 = vpack.c.bf16 %v6527_v34, %v6525_v9  ;;  %v6331_v54 = vadd.f32 %v6330_v48, %v6170_v61  ;;  %v9129_v41 = vpop.f32.mrb[46].mxu1  ;;  %v8596_v4 = vpop.f32.mrb[60].mxu0 }
 0x6e7   :  { %v6333_v43 = vpop.f32.mrb[47].mxu1  ;;  %v8597_v0 = vpop.f32.mrb[61].mxu0 }
 0x6e8   :  { %v6421_v59 = vmax.f32 %v6331_v54, 0.0  ;;  %v6334_v29 = vadd.f32 %v6333_v43, %v6173_v22  ;;  %v8598_v18 = vadd.f32 %v8597_v0, %v8596_v4  ;;  %v8599_v23 = vpop.f32.mrb[62].mxu0 }
 0x6e9   :  { %v8600_v44 = vpop.f32.mrb[63].mxu0  ;;  %7011 = vmatmul.mubr.bf16.gmra.mrb[80].mxu1 %v6709_v1 }
 0x6ea   :  { %v6528_v15 = vrot.slane %v6421_v59, 7  ;;  %v6624_v33 = vrot.slane %v6421_v59, 1  ;;  %v6422_v51 = vmax.f32 %v6334_v29, 0.0  ;;  %v6178_v20 = vadd.f32 %v8598_v18, %v11483_v47  ;;  %7018 = vmatprep.mubr.bf16.mxu1 %v6713_v28 }
 0x6ec   :  { %v6529_v45 = vsel %vm204_vm0, %v6526_v17, %v6528_v15  ;;  %v6625_v53 = vsel %vm301_vm1, %v6622_v42, %v6624_v33  ;;  %v6530_v19 = vrot.slane %v6422_v51, 7  ;;  %v6626_v6 = vrot.slane %v6422_v51, 1 }
 0x6ed   :  { %v6714_v9 = vpack.c.bf16 %v6625_v53, %v6623_v2  ;;  %v6339_v46 = vadd.f32 %v9128_v10, %v6178_v20  ;;  %v6716_v61 = vpack.c.bf16 %v6422_v51, %v6421_v59 }
 0x6ee   :  { %v6531_v39 = vsel %vm204_vm0, %v6528_v15, %v6530_v19  ;;  %v8602_v8 = vpop.f32.mrb[64].mxu0  ;;  %v6627_v1 = vsel %vm301_vm1, %v6624_v33, %v6626_v6 }
 0x6ef   :  { %v6715_v22 = vpack.c.bf16 %v6531_v39, %v6529_v45  ;;  %v6423_v34 = vmax.f32 %v6339_v46, 0.0  ;;  %9171 = vmatmul.mubr.bf16.gmra.mrb[104].mxu0 %v6714_v9  ;;  %v8603_v48 = vpop.f32.mrb[65].mxu0 }
 0x6f0   :  { %v8604_v54 = vadd.f32 %v8603_v48, %v8602_v8  ;;  %v8605_v28 = vpop.f32.mrb[66].mxu0 }
 0x6f1   :  { %v6532_v41 = vrot.slane %v6423_v34, 7  ;;  %v8606_v17 = vpop.f32.mrb[67].mxu0  ;;  %7019 = vmatmul.mubr.bf16.gmra.mrb[84].mxu1 %v6712_v37  ;;  %v6628_v42 = vrot.slane %v6423_v34, 1  ;;  %v6719_v46 = vpack.c.bf16 %v11315_v26, %v6423_v34 }
 0x6f2   :  { %v8607_v4 = vadd.f32 %v8606_v17, %v8605_v28  ;;  %7026 = vmatprep.mubr.bf16.mxu1 %v6716_v61  ;;  %v6186_v10 = vadd.f32 %v8604_v54, %v11483_v47 }
 0x6f3   :  { %v6533_v2 = vsel %vm204_vm0, %v6530_v19, %v6532_v41  ;;  %v6535_v43 = vsel %vm204_vm0, %v6532_v41, %v10036_v38  ;;  %v6629_v0 = vsel %vm301_vm1, %v6626_v6, %v6628_v42  ;;  %v6631_v17 = vsel %vm301_vm1, %v6628_v42, %v10048_v14 }
 0x6f4   :  { %v6718_v59 = vpack.c.bf16 %v6535_v43, %v6533_v2  ;;  %v9132_v29 = vpop.f32.mrb[48].mxu1  ;;  %v6189_v18 = vadd.f32 %v8607_v4, %v11483_v47  ;;  %v6717_v23 = vpack.c.bf16 %v6629_v0, %v6627_v1 }
 0x6f5   :  { %v6346_v44 = vpop.f32.mrb[49].mxu1 }
 0x6f6   :  { %v6347_v15 = vadd.f32 %v6346_v44, %v6186_v10  ;;  %v9133_v37 = vpop.f32.mrb[50].mxu1  ;;  %9174 = vmatprep.mubr.bf16.mxu0 %v6717_v23  ;;  %v8608_v33 = vpop.f32.mrb[68].mxu0 }
 0x6f7   :  { %v6349_v51 = vpop.f32.mrb[51].mxu1  ;;  %v8609_v20 = vpop.f32.mrb[69].mxu0 }
 0x6f8   :  { %v6425_v45 = vmax.f32 %v6347_v15, 0.0  ;;  %v6350_v53 = vadd.f32 %v6349_v51, %v6189_v18  ;;  %v8610_v19 = vadd.f32 %v8609_v20, %v8608_v33  ;;  %v8611_v9 = vpop.f32.mrb[70].mxu0 }
 0x6f9   :  { %v8612_v61 = vpop.f32.mrb[71].mxu0  ;;  %7027 = vmatmul.mubr.bf16.gmra.mrb[88].mxu1 %v6715_v22 }
 0x6fa   :  { %v6536_v6 = vrot.slane %v6425_v45, 7  ;;  %v6632_v39 = vrot.slane %v6425_v45, 1  ;;  %v6426_v8 = vmax.f32 %v6350_v53, 0.0  ;;  %v6194_v1 = vadd.f32 %v8610_v19, %v11483_v47  ;;  %7034 = vmatprep.mubr.bf16.mxu1 %v6719_v46 }
 0x6fb   :  { %v8613_v48 = vadd.f32 %v8612_v61, %v8611_v9 }
 0x6fc   :  { %v6633_v54 = vsel %vm301_vm1, %v10048_v14, %v6632_v39  ;;  %v6538_v28 = vrot.slane %v6426_v8, 7  ;;  %v6634_v41 = vrot.slane %v6426_v8, 1  ;;  %v6355_v10 = vadd.f32 %v9132_v29, %v6194_v1 }
 0x6fd   :  { %v6720_v4 = vpack.c.bf16 %v6633_v54, %v6631_v17  ;;  %v6197_v26 = vadd.f32 %v8613_v48, %v11483_v47  ;;  %v6722_v22 = vpack.c.bf16 %v6426_v8, %v6425_v45  ;;  %v6537_v34 = vsel %vm204_vm0, %v10036_v38, %v6536_v6 }
 0x6fe   :  { %v6539_v2 = vsel %vm204_vm0, %v6536_v6, %v6538_v28  ;;  %v8614_v43 = vpop.f32.mrb[72].mxu0  ;;  %v6635_v0 = vsel %vm301_vm1, %v6632_v39, %v6634_v41  ;;  %v6427_v23 = vmax.f32 %v6355_v10, 0.0 }
 0x6ff   :  { %v6721_v18 = vpack.c.bf16 %v6539_v2, %v6537_v34  ;;  %v6358_v44 = vadd.f32 %v9133_v37, %v6197_v26  ;;  %9175 = vmatmul.mubr.bf16.gmra.mrb[108].mxu0 %v6720_v4  ;;  %v8615_v15 = vpop.f32.mrb[73].mxu0 }
 0x700   :  { %v8616_v33 = vadd.f32 %v8615_v15, %v8614_v43  ;;  %v8617_v42 = vpop.f32.mrb[74].mxu0  ;;  %v6540_v51 = vrot.slane %v6427_v23, 7  ;;  %v6636_v45 = vrot.slane %v6427_v23, 1 }
 0x701   :  { %v6428_v29 = vmax.f32 %v6358_v44, 0.0  ;;  %v8618_v20 = vpop.f32.mrb[75].mxu0  ;;  %7035 = vmatmul.mubr.bf16.gmra.mrb[92].mxu1 %v6718_v59 }
 0x702   :  { %v8619_v53 = vadd.f32 %v8618_v20, %v8617_v42  ;;  %7042 = vmatprep.mubr.bf16.mxu1 %v6722_v22  ;;  %v6202_v19 = vadd.f32 %v8616_v33, %v11483_v47  ;;  %v6541_v9 = vsel %vm204_vm0, %v6538_v28, %v6540_v51  ;;  %v6637_v6 = vsel %vm301_vm1, %v6634_v41, %v6636_v45 }
 0x703   :  { %v6542_v46 = vrot.slane %v6428_v29, 7  ;;  %v6638_v61 = vrot.slane %v6428_v29, 1  ;;  %v6723_v37 = vpack.c.bf16 %v6637_v6, %v6635_v0  ;;  %v6725_v39 = vpack.c.bf16 %v6428_v29, %v6427_v23  ;;  %v9136_v1 = vpop.f32.mrb[52].mxu1 }
 0x704   :  { %v6205_v48 = vadd.f32 %v8619_v53, %v11483_v47  ;;  %v6362_v17 = vpop.f32.mrb[53].mxu1 }
 0x705   :  { %v6543_v8 = vsel %vm204_vm0, %v6540_v51, %v6542_v46  ;;  %v6639_v59 = vsel %vm301_vm1, %v6636_v45, %v6638_v61  ;;  %9178 = vmatprep.mubr.bf16.mxu0 %v6723_v37  ;;  %v6363_v10 = vadd.f32 %v6362_v17, %v6202_v19  ;;  %v9137_v26 = vpop.f32.mrb[54].mxu1 }
 0x706   :  { %v6724_v54 = vpack.c.bf16 %v6543_v8, %v6541_v9  ;;  %v8620_v4 = vpop.f32.mrb[76].mxu0  ;;  %v6365_v22 = vpop.f32.mrb[55].mxu1 }
 0x707   :  { %v8621_v28 = vpop.f32.mrb[77].mxu0  ;;  %v6429_v41 = vmax.f32 %v6363_v10, 0.0  ;;  %v6366_v43 = vadd.f32 %v6365_v22, %v6205_v48 }
 0x708   :  { %v8622_v34 = vadd.f32 %v8621_v28, %v8620_v4  ;;  %v8623_v2 = vpop.f32.mrb[78].mxu0 }
 0x709   :  { %v8624_v0 = vpop.f32.mrb[79].mxu0  ;;  %7043 = vmatmul.mubr.bf16.gmra.mrb[96].mxu1 %v6721_v18  ;;  %v6544_v15 = vrot.slane %v6429_v41, 7  ;;  %v6640_v33 = vrot.slane %v6429_v41, 1  ;;  %v6430_v42 = vmax.f32 %v6366_v43, 0.0 }
 0x70a   :  { %v6210_v23 = vadd.f32 %v8622_v34, %v11483_v47  ;;  %v8625_v44 = vadd.f32 %v8624_v0, %v8623_v2  ;;  %7050 = vmatprep.mubr.bf16.mxu1 %v6725_v39 }
 0x70b   :  { %v6545_v20 = vsel %vm204_vm0, %v6542_v46, %v6544_v15  ;;  %v6641_v45 = vsel %vm301_vm1, %v6638_v61, %v6640_v33  ;;  %v6546_v53 = vrot.slane %v6430_v42, 7  ;;  %v6642_v19 = vrot.slane %v6430_v42, 1 }
 0x70c   :  { %v6371_v51 = vadd.f32 %v9136_v1, %v6210_v23  ;;  %v6213_v29 = vadd.f32 %v8625_v44, %v11483_v47  ;;  %v6726_v9 = vpack.c.bf16 %v6641_v45, %v6639_v59  ;;  %v6728_v8 = vpack.c.bf16 %v6430_v42, %v6429_v41 }
 0x70d   :  { %v6547_v48 = vsel %vm204_vm0, %v6544_v15, %v6546_v53  ;;  %v6643_v17 = vsel %vm301_vm1, %v6640_v33, %v6642_v19 }
 0x70e   :  { %v6431_v6 = vmax.f32 %v6371_v51, 0.0  ;;  %v6374_v37 = vadd.f32 %v9137_v26, %v6213_v29  ;;  %v8626_v18 = vpop.f32.mrb[80].mxu0  ;;  %v6727_v4 = vpack.c.bf16 %v6547_v48, %v6545_v20  ;;  %9179 = vmatmul.mubr.bf16.gmra.mrb[112].mxu0 %v6726_v9 }
 0x70f   :  { %v8627_v39 = vpop.f32.mrb[81].mxu0 }
 0x710   :  { %v6548_v1 = vrot.slane %v6431_v6, 7  ;;  %v6432_v10 = vmax.f32 %v6374_v37, 0.0  ;;  %v8628_v28 = vadd.f32 %v8627_v39, %v8626_v18  ;;  %v8629_v46 = vpop.f32.mrb[82].mxu0  ;;  %v6644_v61 = vrot.slane %v6431_v6, 1 }
 0x711   :  { %v8630_v22 = vpop.f32.mrb[83].mxu0  ;;  %7051 = vmatmul.mubr.bf16.gmra.mrb[100].mxu1 %v6724_v54 }
 0x712   :  { %v6549_v59 = vsel %vm204_vm0, %v6546_v53, %v6548_v1  ;;  %v6550_v34 = vrot.slane %v6432_v10, 7  ;;  %v6646_v26 = vrot.slane %v6432_v10, 1  ;;  %v8631_v2 = vadd.f32 %v8630_v22, %v8629_v46  ;;  %7058 = vmatprep.mubr.bf16.mxu1 %v6728_v8  ;;  %v9140_v41 = vpop.f32.mrb[56].mxu1 }
 0x713   :  { %v6218_v43 = vadd.f32 %v8628_v28, %v11483_v47  ;;  %v6645_v0 = vsel %vm301_vm1, %v6642_v19, %v6644_v61  ;;  %v6731_v23 = vpack.c.bf16 %v6432_v10, %v6431_v6  ;;  %v6378_v15 = vpop.f32.mrb[57].mxu1 }
 0x714   :  { %v6551_v44 = vsel %vm204_vm0, %v6548_v1, %v6550_v34  ;;  %v6221_v33 = vadd.f32 %v8631_v2, %v11483_v47  ;;  %v6647_v54 = vsel %vm301_vm1, %v6644_v61, %v6646_v26  ;;  %v6729_v42 = vpack.c.bf16 %v6645_v0, %v6643_v17  ;;  %v9141_v20 = vpop.f32.mrb[58].mxu1 }
 0x715   :  { %v6730_v51 = vpack.c.bf16 %v6551_v44, %v6549_v59  ;;  %v6379_v29 = vadd.f32 %v6378_v15, %v6218_v43  ;;  %v6381_v45 = vpop.f32.mrb[59].mxu1 }
 0x716   :  { %9182 = vmatprep.mubr.bf16.mxu0 %v6729_v42  ;;  %v8632_v53 = vpop.f32.mrb[84].mxu0  ;;  %v6382_v37 = vadd.f32 %v6381_v45, %v6221_v33 }
 0x717   :  { %v6433_v9 = vmax.f32 %v6379_v29, 0.0  ;;  %v8633_v18 = vpop.f32.mrb[85].mxu0 }
 0x718   :  { %v8634_v8 = vadd.f32 %v8633_v18, %v8632_v53  ;;  %v8635_v19 = vpop.f32.mrb[86].mxu0  ;;  %v6434_v39 = vmax.f32 %v6382_v37, 0.0 }
 0x719   :  { %v6552_v6 = vrot.slane %v6433_v9, 7  ;;  %v6648_v48 = vrot.slane %v6433_v9, 1  ;;  %v8636_v1 = vpop.f32.mrb[87].mxu0  ;;  %7059 = vmatmul.mubr.bf16.gmra.mrb[104].mxu1 %v6727_v4 }
 0x71a   :  { %v6226_v10 = vadd.f32 %v8634_v8, %v11483_v47  ;;  %v8637_v28 = vadd.f32 %v8636_v1, %v8635_v19  ;;  %7066 = vmatprep.mubr.bf16.mxu1 %v6731_v23  ;;  %v6554_v22 = vrot.slane %v6434_v39, 7  ;;  %v6650_v61 = vrot.slane %v6434_v39, 1 }
 0x71b   :  { %v6553_v17 = vsel %vm204_vm0, %v6550_v34, %v6552_v6  ;;  %v6649_v46 = vsel %vm301_vm1, %v6646_v26, %v6648_v48  ;;  %v9144_v59 = vpop.f32.mrb[60].mxu1  ;;  %v6734_v15 = vpack.c.bf16 %v6434_v39, %v6433_v9 }
 0x71c   :  { %v6732_v2 = vpack.c.bf16 %v6649_v46, %v6647_v54  ;;  %v6387_v43 = vadd.f32 %v9140_v41, %v6226_v10  ;;  %v6229_v0 = vadd.f32 %v8637_v28, %v11483_v47  ;;  %v6394_v44 = vpop.f32.mrb[61].mxu1  ;;  %v6555_v33 = vsel %vm204_vm0, %v6552_v6, %v6554_v22 }
 0x71d   :  { %v9145_v4 = vpop.f32.mrb[62].mxu1  ;;  %v6651_v42 = vsel %vm301_vm1, %v6648_v48, %v6650_v61  ;;  %v6733_v29 = vpack.c.bf16 %v6555_v33, %v6553_v17 }
 0x71e   :  { %v6435_v23 = vmax.f32 %v6387_v43, 0.0  ;;  %v6390_v45 = vadd.f32 %v9141_v20, %v6229_v0  ;;  %9183 = vmatmul.mubr.bf16.gmra.mrb[116].mxu0 %v6732_v2  ;;  %v8638_v34 = vpop.f32.mrb[88].mxu0  ;;  %v6397_v26 = vpop.f32.mrb[63].mxu1 }
 0x71f   :  { %v8639_v53 = vpop.f32.mrb[89].mxu0 }
 0x720   :  { %v6556_v37 = vrot.slane %v6435_v23, 7  ;;  %v6436_v18 = vmax.f32 %v6390_v45, 0.0  ;;  %v8640_v54 = vadd.f32 %v8639_v53, %v8638_v34  ;;  %v8641_v41 = vpop.f32.mrb[90].mxu0  ;;  %v6652_v8 = vrot.slane %v6435_v23, 1 }
 0x721   :  { %v8642_v19 = vpop.f32.mrb[91].mxu0  ;;  %7067 = vmatmul.mubr.bf16.gmra.mrb[108].mxu1 %v6730_v51 }
 0x722   :  { %v6557_v9 = vsel %vm204_vm0, %v6554_v22, %v6556_v37  ;;  %v6558_v6 = vrot.slane %v6436_v18, 7  ;;  %v6654_v39 = vrot.slane %v6436_v18, 1  ;;  %v6234_v48 = vadd.f32 %v8640_v54, %v11483_v47  ;;  %7074 = vmatprep.mubr.bf16.mxu1 %v6734_v15 }
 0x723   :  { %v8643_v1 = vadd.f32 %v8642_v19, %v8641_v41  ;;  %v6653_v20 = vsel %vm301_vm1, %v6650_v61, %v6652_v8  ;;  %v6737_v10 = vpack.c.bf16 %v6436_v18, %v6435_v23 }
 0x724   :  { %v6559_v28 = vsel %vm204_vm0, %v6556_v37, %v6558_v6  ;;  %v6395_v17 = vadd.f32 %v6394_v44, %v6234_v48  ;;  %v6655_v46 = vsel %vm301_vm1, %v6652_v8, %v6654_v39  ;;  %v6735_v2 = vpack.c.bf16 %v6653_v20, %v6651_v42 }
 0x725   :  { %v6736_v43 = vpack.c.bf16 %v6559_v28, %v6557_v9  ;;  %v6237_v51 = vadd.f32 %v8643_v1, %v11483_v47 }
 0x726   :  { %v6437_v0 = vmax.f32 %v6395_v17, 0.0  ;;  %9186 = vmatprep.mubr.bf16.mxu0 %v6735_v2  ;;  %v8644_v22 = vpop.f32.mrb[92].mxu0 }
 0x727   :  { %v6398_v33 = vadd.f32 %v6397_v26, %v6237_v51  ;;  %v8645_v4 = vpop.f32.mrb[93].mxu0 }
 0x728   :  { %v6560_v45 = vrot.slane %v6437_v0, 7  ;;  %v6656_v15 = vrot.slane %v6437_v0, 1  ;;  %v8646_v34 = vadd.f32 %v8645_v4, %v8644_v22  ;;  %v8647_v53 = vpop.f32.mrb[94].mxu0 }
 0x729   :  { %v6438_v61 = vmax.f32 %v6398_v33, 0.0  ;;  %v8648_v23 = vpop.f32.mrb[95].mxu0  ;;  %7075 = vmatmul.mubr.bf16.gmra.mrb[112].mxu1 %v6733_v29 }
 0x72a   :  { %v6561_v44 = vsel %vm204_vm0, %v6558_v6, %v6560_v45  ;;  %v6657_v37 = vsel %vm301_vm1, %v6654_v39, %v6656_v15  ;;  %v6242_v42 = vadd.f32 %v8646_v34, %v11483_v47  ;;  %7082 = vmatprep.mubr.bf16.mxu1 %v6737_v10  ;;  %v11600_v34 = vld [vmem:[#allocation4 + $0x7] ss:$0 sm:$0xff] }
 0x72b   :  { %v6562_v18 = vrot.slane %v6438_v61, 7  ;;  %v6738_v54 = vpack.c.bf16 %v6657_v37, %v6655_v46  ;;  %v6740_v41 = vpack.c.bf16 %v6438_v61, %v6437_v0  ;;  %v6658_v8 = vrot.slane %v6438_v61, 1  ;;  %v9429_v46 = vld [vmem:[%s11755_s3 + $0x78] sm:$0xff] }
 0x72c   :  { %v6403_v26 = vadd.f32 %v9144_v59, %v6242_v42 }
 0x72d   :  { %v6563_v19 = vsel %vm204_vm0, %v6560_v45, %v6562_v18  ;;  %9187 = vmatmul.mubr.bf16.gmra.mrb[120].mxu0 %v6738_v54  ;;  %v6659_v9 = vsel %vm301_vm1, %v6656_v15, %v6658_v8 }
 0x72e   :  { %v6739_v48 = vpack.c.bf16 %v6563_v19, %v6561_v44  ;;  %v6439_v1 = vmax.f32 %v6403_v26, 0.0 }
 0x730   :  { %v6564_v29 = vrot.slane %v6439_v1, 7  ;;  %v6660_v20 = vrot.slane %v6439_v1, 1  ;;  %v6743_v2 = vpack.c.bf16 %v9429_v46, %v6439_v1 }
 0x731   :  { %7083 = vmatmul.mubr.bf16.gmra.mrb[116].mxu1 %v6736_v43 }
 0x732   :  { %v6565_v6 = vsel %vm204_vm0, %v6562_v18, %v6564_v29  ;;  %v6567_v47 = vsel %vm204_vm0, %v6564_v29, %v10036_v38  ;;  %7090 = vmatprep.mubr.bf16.mxu1 %v6740_v41  ;;  %v6661_v39 = vsel %vm301_vm1, %v6658_v8, %v6660_v20  ;;  %v6663_v59 = vsel %vm301_vm1, %v6660_v20, %v10048_v14 }
 0x733   :  { %v6742_v10 = vpack.c.bf16 %v6567_v47, %v6565_v6  ;;  %v6741_v28 = vpack.c.bf16 %v6661_v39, %v6659_v9  ;;  %v7720_v17 = vpack.c.bf16 %v10048_v14, %v6663_v59 }
 0x735   :  { %9190 = vmatprep.mubr.bf16.mxu0 %v6741_v28 }
 0x736   :  { %9191 = vmatmul.mubr.msk.bf16.gmra.mrb[124].mxu0 %vm9831_vm5, %v7720_v17 }
 0x739   :  { %7091 = vmatmul.mubr.bf16.gmra.mrb[120].mxu1 %v6739_v48 }
 0x73a   :  { %7098 = vmatprep.mubr.bf16.mxu1 %v6743_v2 }
 0x741   :  { %7099 = vmatmul.mubr.bf16.gmra.mrb[124].mxu1 %v6742_v10 }
 0x79c   :  { %v8690_v38 = vpop.f32.mrb[64].mxu1 }
 0x79d   :  { %v8691_v43 = vpop.f32.mrb[65].mxu1 }
 0x79e   :  { %v8692_v51 = vadd.f32 %v8691_v43, %v8690_v38  ;;  %v8693_v0 = vpop.f32.mrb[66].mxu1 }
 0x79f   :  { %v8694_v22 = vpop.f32.mrb[67].mxu1 }
 0x7a0   :  { %v8695_v33 = vadd.f32 %v8694_v22, %v8693_v0  ;;  %v6981_v44 = vadd.f32 %v8692_v51, %v11600_v34 }
 0x7a2   :  { %v6984_v26 = vadd.f32 %v8695_v33, %v11600_v34 }
 0x7a4   :  { %v8696_v4 = vpop.f32.mrb[68].mxu1 }
 0x7a5   :  { %v8697_v14 = vpop.f32.mrb[69].mxu1 }
 0x7a6   :  { %v8698_v45 = vadd.f32 %v8697_v14, %v8696_v4  ;;  %v8699_v15 = vpop.f32.mrb[70].mxu1 }
 0x7a7   :  { %v8700_v3 = vpop.f32.mrb[71].mxu1 }
 0x7a8   :  { %v8701_v53 = vadd.f32 %v8700_v3, %v8699_v15  ;;  %v6989_v61 = vadd.f32 %v8698_v45, %v11600_v34 }
 0x7aa   :  { %v9164_v23 = vpop.f32.mrb[96].mxu0  ;;  %v6992_v37 = vadd.f32 %v8701_v53, %v11600_v34 }
 0x7ab   :  { %v7150_v42 = vadd.f32 %v9164_v23, %v6989_v61  ;;  %v7141_v18 = vpop.f32.mrb[97].mxu0 }
 0x7ac   :  { %v7142_v54 = vadd.f32 %v7141_v18, %v6981_v44  ;;  %v8702_v41 = vpop.f32.mrb[72].mxu1  ;;  %v9165_v8 = vpop.f32.mrb[98].mxu0 }
 0x7ad   :  { %v7270_v19 = vadd.f32 %v7150_v42, %v11164_v58  ;;  %v7153_v9 = vadd.f32 %v9165_v8, %v6992_v37  ;;  %v8703_v48 = vpop.f32.mrb[73].mxu1  ;;  %v7144_v1 = vpop.f32.mrb[99].mxu0 }
 0x7ae   :  { %v7268_v29 = vadd.f32 %v7142_v54, %v11166_v60  ;;  %v8704_v20 = vadd.f32 %v8703_v48, %v8702_v41  ;;  %v7145_v6 = vadd.f32 %v7144_v1, %v6984_v26  ;;  %v8705_v47 = vpop.f32.mrb[74].mxu1 }
 0x7af   :  { %vm7302_vm0 = vcmp.gt.f32.partialorder %v7270_v19, 0.0  ;;  %v7334_v39 = vmul.f32 0.01, %v7270_v19  ;;  %v7271_v59 = vadd.f32 %v7153_v9, %v11169_v55  ;;  %v8706_v10 = vpop.f32.mrb[75].mxu1 }
 0x7b0   :  { %vm7300_vm1 = vcmp.gt.f32.partialorder %v7268_v29, 0.0  ;;  %v7332_v28 = vmul.f32 0.01, %v7268_v29  ;;  %v7269_v17 = vadd.f32 %v7145_v6, %v11171_v52  ;;  %v8707_v46 = vadd.f32 %v8706_v10, %v8705_v47 }
 0x7b1   :  { %v7366_v2 = vsel %vm7302_vm0, %v7270_v19, %v7334_v39  ;;  %vm7303_vm4 = vcmp.gt.f32.partialorder %v7271_v59, 0.0  ;;  %v7335_v58 = vmul.f32 0.01, %v7271_v59  ;;  %v6997_v51 = vadd.f32 %v8704_v20, %v11600_v34 }
 0x7b2   :  { %7430 = vst [vmem:[%s11755_s3 + $0x10] sm:$0xff] %v7366_v2  ;;  %v7364_v60 = vsel %vm7300_vm1, %v7268_v29, %v7332_v28  ;;  %vm7301_vm5 = vcmp.gt.f32.partialorder %v7269_v17, 0.0  ;;  %v7333_v38 = vmul.f32 0.01, %v7269_v17  ;;  %v9168_v43 = vpop.f32.mrb[100].mxu0  ;;  %v7000_v14 = vadd.f32 %v8707_v46, %v11600_v34 }
 0x7b3   :  { %7428 = vst [vmem:[%s11755_s3] sm:$0xff] %v7364_v60  ;;  %v7367_v55 = vsel %vm7303_vm4, %v7271_v59, %v7335_v58  ;;  %v7157_v52 = vpop.f32.mrb[101].mxu0 }
 0x7b4   :  { %7431 = vst [vmem:[%s11755_s3 + $0x18] sm:$0xff] %v7367_v55  ;;  %v7365_v0 = vsel %vm7301_vm5, %v7269_v17, %v7333_v38  ;;  %v8708_v22 = vpop.f32.mrb[76].mxu1  ;;  %v7158_v33 = vadd.f32 %v7157_v52, %v6997_v51  ;;  %v9169_v4 = vpop.f32.mrb[102].mxu0 }
 0x7b5   :  { %7429 = vst [vmem:[%s11755_s3 + $0x8] sm:$0xff] %v7365_v0  ;;  %v8709_v45 = vpop.f32.mrb[77].mxu1  ;;  %v7160_v15 = vpop.f32.mrb[103].mxu0 }
 0x7b6   :  { %v7272_v3 = vadd.f32 %v7158_v33, %v11203_v62  ;;  %v8710_v53 = vadd.f32 %v8709_v45, %v8708_v22  ;;  %v8711_v61 = vpop.f32.mrb[78].mxu1  ;;  %v7161_v23 = vadd.f32 %v7160_v15, %v7000_v14 }
 0x7b7   :  { %v8712_v44 = vpop.f32.mrb[79].mxu1 }
 0x7b8   :  { %vm7304_vm12 = vcmp.gt.f32.partialorder %v7272_v3, 0.0  ;;  %v7336_v37 = vmul.f32 0.01, %v7272_v3  ;;  %v7005_v42 = vadd.f32 %v8710_v53, %v11600_v34  ;;  %v7273_v18 = vadd.f32 %v7161_v23, %v11212_v56 }
 0x7b9   :  { %v8713_v54 = vadd.f32 %v8712_v44, %v8711_v61 }
 0x7ba   :  { %v7368_v41 = vsel %vm7304_vm12, %v7272_v3, %v7336_v37  ;;  %v7166_v8 = vadd.f32 %v9168_v43, %v7005_v42  ;;  %vm7305_vm13 = vcmp.gt.f32.partialorder %v7273_v18, 0.0  ;;  %v7337_v26 = vmul.f32 0.01, %v7273_v18 }
 0x7bb   :  { %7432 = vst [vmem:[%s11755_s3 + $0x20] sm:$0xff] %v7368_v41  ;;  %v7008_v62 = vadd.f32 %v8713_v54, %v11600_v34 }
 0x7bc   :  { %v7274_v19 = vadd.f32 %v7166_v8, %v11207_v49  ;;  %v7369_v9 = vsel %vm7305_vm13, %v7273_v18, %v7337_v26  ;;  %v8714_v48 = vpop.f32.mrb[80].mxu1 }
 0x7bd   :  { %7433 = vst [vmem:[%s11755_s3 + $0x28] sm:$0xff] %v7369_v9  ;;  %v7169_v56 = vadd.f32 %v9169_v4, %v7008_v62  ;;  %v8715_v1 = vpop.f32.mrb[81].mxu1 }
 0x7be   :  { %vm7306_vm14 = vcmp.gt.f32.partialorder %v7274_v19, 0.0  ;;  %v7338_v29 = vmul.f32 0.01, %v7274_v19  ;;  %v8716_v20 = vadd.f32 %v8715_v1, %v8714_v48  ;;  %v8717_v6 = vpop.f32.mrb[82].mxu1 }
 0x7bf   :  { %v7275_v47 = vadd.f32 %v7169_v56, %v11215_v5  ;;  %v8718_v39 = vpop.f32.mrb[83].mxu1 }
 0x7c0   :  { %v7370_v59 = vsel %vm7306_vm14, %v7274_v19, %v7338_v29  ;;  %v8719_v10 = vadd.f32 %v8718_v39, %v8717_v6  ;;  %v7013_v28 = vadd.f32 %v8716_v20, %v11600_v34 }
 0x7c1   :  { %7434 = vst [vmem:[%s11755_s3 + $0x30] sm:$0xff] %v7370_v59  ;;  %vm7307_vm15 = vcmp.gt.f32.partialorder %v7275_v47, 0.0  ;;  %v7339_v49 = vmul.f32 0.01, %v7275_v47 }
 0x7c2   :  { %v9172_v17 = vpop.f32.mrb[104].mxu0  ;;  %v7016_v46 = vadd.f32 %v8719_v10, %v11600_v34 }
 0x7c3   :  { %v7371_v2 = vsel %vm7307_vm15, %v7275_v47, %v7339_v49  ;;  %v7173_v58 = vpop.f32.mrb[105].mxu0 }
 0x7c4   :  { %7435 = vst [vmem:[%s11755_s3 + $0x38] sm:$0xff] %v7371_v2  ;;  %v7174_v5 = vadd.f32 %v7173_v58, %v7013_v28  ;;  %v9173_v60 = vpop.f32.mrb[106].mxu0  ;;  %v8720_v38 = vpop.f32.mrb[84].mxu1 }
 0x7c5   :  { %v7176_v43 = vpop.f32.mrb[107].mxu0  ;;  %v8721_v51 = vpop.f32.mrb[85].mxu1 }
 0x7c6   :  { %v7276_v55 = vadd.f32 %v7174_v5, %v11247_v36  ;;  %v7177_v52 = vadd.f32 %v7176_v43, %v7016_v46  ;;  %v8722_v0 = vadd.f32 %v8721_v51, %v8720_v38  ;;  %v8723_v22 = vpop.f32.mrb[86].mxu1 }
 0x7c7   :  { %v8724_v33 = vpop.f32.mrb[87].mxu1 }
 0x7c8   :  { %vm7308_vm2 = vcmp.gt.f32.partialorder %v7276_v55, 0.0  ;;  %v7340_v4 = vmul.f32 0.01, %v7276_v55  ;;  %v7277_v14 = vadd.f32 %v7177_v52, %v11258_v57  ;;  %v7021_v45 = vadd.f32 %v8722_v0, %v11600_v34 }
 0x7c9   :  { %v8725_v15 = vadd.f32 %v8724_v33, %v8723_v22 }
 0x7ca   :  { %v7372_v3 = vsel %vm7308_vm2, %v7276_v55, %v7340_v4  ;;  %vm7309_vm3 = vcmp.gt.f32.partialorder %v7277_v14, 0.0  ;;  %v7341_v53 = vmul.f32 0.01, %v7277_v14  ;;  %v7182_v61 = vadd.f32 %v9172_v17, %v7021_v45 }
 0x7cb   :  { %7436 = vst [vmem:[%s11755_s3 + $0x40] sm:$0xff] %v7372_v3  ;;  %v7024_v36 = vadd.f32 %v8725_v15, %v11600_v34 }
 0x7cc   :  { %v7373_v23 = vsel %vm7309_vm3, %v7277_v14, %v7341_v53  ;;  %v7278_v44 = vadd.f32 %v7182_v61, %v11266_v63  ;;  %v8726_v37 = vpop.f32.mrb[88].mxu1 }
 0x7cd   :  { %7437 = vst [vmem:[%s11755_s3 + $0x48] sm:$0xff] %v7373_v23  ;;  %v7185_v57 = vadd.f32 %v9173_v60, %v7024_v36  ;;  %v8727_v42 = vpop.f32.mrb[89].mxu1 }
 0x7ce   :  { %vm7310_vm6 = vcmp.gt.f32.partialorder %v7278_v44, 0.0  ;;  %v7342_v18 = vmul.f32 0.01, %v7278_v44  ;;  %v8728_v54 = vadd.f32 %v8727_v42, %v8726_v37  ;;  %v8729_v41 = vpop.f32.mrb[90].mxu1 }
 0x7cf   :  { %v7279_v8 = vadd.f32 %v7185_v57, %v11256_v13  ;;  %v8730_v26 = vpop.f32.mrb[91].mxu1 }
 0x7d0   :  { %v7374_v62 = vsel %vm7310_vm6, %v7278_v44, %v7342_v18  ;;  %v8731_v19 = vadd.f32 %v8730_v26, %v8729_v41  ;;  %v7029_v9 = vadd.f32 %v8728_v54, %v11600_v34 }
 0x7d1   :  { %7438 = vst [vmem:[%s11755_s3 + $0x50] sm:$0xff] %v7374_v62  ;;  %vm7311_vm7 = vcmp.gt.f32.partialorder %v7279_v8, 0.0  ;;  %v7343_v63 = vmul.f32 0.01, %v7279_v8 }
 0x7d2   :  { %v9176_v48 = vpop.f32.mrb[108].mxu0  ;;  %v7032_v56 = vadd.f32 %v8731_v19, %v11600_v34 }
 0x7d3   :  { %v7375_v1 = vsel %vm7311_vm7, %v7279_v8, %v7343_v63  ;;  %v7189_v29 = vpop.f32.mrb[109].mxu0 }
 0x7d4   :  { %7439 = vst [vmem:[%s11755_s3 + $0x58] sm:$0xff] %v7375_v1  ;;  %v7190_v13 = vadd.f32 %v7189_v29, %v7029_v9  ;;  %v9177_v20 = vpop.f32.mrb[110].mxu0  ;;  %v8732_v6 = vpop.f32.mrb[92].mxu1 }
 0x7d5   :  { %v7192_v47 = vpop.f32.mrb[111].mxu0  ;;  %v8733_v39 = vpop.f32.mrb[93].mxu1 }
 0x7d6   :  { %v7280_v59 = vadd.f32 %v7190_v13, %v11279_v30  ;;  %v7193_v10 = vadd.f32 %v7192_v47, %v7032_v56  ;;  %v8734_v28 = vadd.f32 %v8733_v39, %v8732_v6  ;;  %v8735_v49 = vpop.f32.mrb[94].mxu1 }
 0x7d7   :  { %v8736_v17 = vpop.f32.mrb[95].mxu1 }
 0x7d8   :  { %vm7312_vm8 = vcmp.gt.f32.partialorder %v7280_v59, 0.0  ;;  %v7344_v46 = vmul.f32 0.01, %v7280_v59  ;;  %v7281_v2 = vadd.f32 %v7193_v10, %v11292_v16  ;;  %v7037_v58 = vadd.f32 %v8734_v28, %v11600_v34 }
 0x7da   :  { %v7376_v5 = vsel %vm7312_vm8, %v7280_v59, %v7344_v46  ;;  %vm7313_vm9 = vcmp.gt.f32.partialorder %v7281_v2, 0.0  ;;  %v7345_v60 = vmul.f32 0.01, %v7281_v2  ;;  %v7198_v38 = vadd.f32 %v9176_v48, %v7037_v58 }
 0x7db   :  { %7440 = vst [vmem:[%s11755_s3 + $0x60] sm:$0xff] %v7376_v5 }
 0x7dc   :  { %v7377_v43 = vsel %vm7313_vm9, %v7281_v2, %v7345_v60  ;;  %v7282_v30 = vadd.f32 %v7198_v38, %v11297_v25  ;;  %v8738_v51 = vpop.f32.mrb[96].mxu1 }
 0x7dd   :  { %7441 = vst [vmem:[%s11755_s3 + $0x68] sm:$0xff] %v7377_v43  ;;  %v8739_v55 = vpop.f32.mrb[97].mxu1 }
 0x7de   :  { %vm7314_vm10 = vcmp.gt.f32.partialorder %v7282_v30, 0.0  ;;  %v7346_v16 = vmul.f32 0.01, %v7282_v30  ;;  %v8740_v52 = vadd.f32 %v8739_v55, %v8738_v51  ;;  %v8741_v0 = vpop.f32.mrb[98].mxu1 }
 0x7df   :  { %v8742_v22 = vpop.f32.mrb[99].mxu1 }
 0x7e0   :  { %v7378_v33 = vsel %vm7314_vm10, %v7282_v30, %v7346_v16  ;;  %v8743_v4 = vadd.f32 %v8742_v22, %v8741_v0  ;;  %v7045_v14 = vadd.f32 %v8740_v52, %v11600_v34 }
 0x7e1   :  { %7442 = vst [vmem:[%s11755_s3 + $0x70] sm:$0xff] %v7378_v33  ;;  %v9180_v25 = vpop.f32.mrb[112].mxu0 }
 0x7e2   :  { %v7048_v45 = vadd.f32 %v8743_v4, %v11600_v34  ;;  %v7205_v15 = vpop.f32.mrb[113].mxu0 }
 0x7e3   :  { %v7206_v53 = vadd.f32 %v7205_v15, %v7045_v14  ;;  %v9181_v61 = vpop.f32.mrb[114].mxu0 }
 0x7e4   :  { %v8744_v3 = vpop.f32.mrb[100].mxu1  ;;  %v7208_v23 = vpop.f32.mrb[115].mxu0 }
 0x7e5   :  { %v8745_v36 = vpop.f32.mrb[101].mxu1  ;;  %v7284_v57 = vadd.f32 %v7206_v53, %v11319_v12  ;;  %v7209_v42 = vadd.f32 %v7208_v23, %v7048_v45 }
 0x7e6   :  { %v8746_v44 = vadd.f32 %v8745_v36, %v8744_v3  ;;  %v8747_v37 = vpop.f32.mrb[102].mxu1 }
 0x7e7   :  { %v8748_v18 = vpop.f32.mrb[103].mxu1  ;;  %vm7316_vm11 = vcmp.gt.f32.partialorder %v7284_v57, 0.0  ;;  %v7348_v8 = vmul.f32 0.01, %v7284_v57  ;;  %v7285_v26 = vadd.f32 %v7209_v42, %v11326_v35 }
 0x7e8   :  { %v7053_v54 = vadd.f32 %v8746_v44, %v11600_v34  ;;  %v8749_v41 = vadd.f32 %v8748_v18, %v8747_v37 }
 0x7e9   :  { %v7380_v9 = vsel %vm7316_vm11, %v7284_v57, %v7348_v8  ;;  %vm7317_vm0 = vcmp.gt.f32.partialorder %v7285_v26, 0.0  ;;  %v7349_v63 = vmul.f32 0.01, %v7285_v26 }
 0x7ea   :  { %v7214_v62 = vadd.f32 %v9180_v25, %v7053_v54  ;;  %v7056_v19 = vadd.f32 %v8749_v41, %v11600_v34  ;;  %7444 = vst [vmem:[%s11755_s3 + $0x80] sm:$0xff] %v7380_v9 }
 0x7eb   :  { %v7381_v1 = vsel %vm7317_vm0, %v7285_v26, %v7349_v63 }
 0x7ec   :  { %v7286_v12 = vadd.f32 %v7214_v62, %v11336_v32  ;;  %v7217_v48 = vadd.f32 %v9181_v61, %v7056_v19  ;;  %v8750_v56 = vpop.f32.mrb[104].mxu1  ;;  %7445 = vst [vmem:[%s11755_s3 + $0x88] sm:$0xff] %v7381_v1 }
 0x7ed   :  { %v8751_v29 = vpop.f32.mrb[105].mxu1 }
 0x7ee   :  { %vm7318_vm1 = vcmp.gt.f32.partialorder %v7286_v12, 0.0  ;;  %v7350_v35 = vmul.f32 0.01, %v7286_v12  ;;  %v7287_v13 = vadd.f32 %v7217_v48, %v11352_v31  ;;  %v8752_v20 = vadd.f32 %v8751_v29, %v8750_v56  ;;  %v8753_v6 = vpop.f32.mrb[106].mxu1 }
 0x7ef   :  { %v8754_v47 = vpop.f32.mrb[107].mxu1 }
 0x7f0   :  { %v7382_v39 = vsel %vm7318_vm1, %v7286_v12, %v7350_v35  ;;  %vm7319_vm4 = vcmp.gt.f32.partialorder %v7287_v13, 0.0  ;;  %v7351_v59 = vmul.f32 0.01, %v7287_v13  ;;  %v8755_v10 = vadd.f32 %v8754_v47, %v8753_v6 }
 0x7f1   :  { %7446 = vst [vmem:[%s11755_s3 + $0x90] sm:$0xff] %v7382_v39  ;;  %v9184_v32 = vpop.f32.mrb[116].mxu0  ;;  %v7061_v28 = vadd.f32 %v8752_v20, %v11600_v34 }
 0x7f2   :  { %v7383_v49 = vsel %vm7319_vm4, %v7287_v13, %v7351_v59  ;;  %v7221_v17 = vpop.f32.mrb[117].mxu0  ;;  %v7064_v46 = vadd.f32 %v8755_v10, %v11600_v34 }
 0x7f3   :  { %7447 = vst [vmem:[%s11755_s3 + $0x98] sm:$0xff] %v7383_v49  ;;  %v7222_v31 = vadd.f32 %v7221_v17, %v7061_v28  ;;  %v9185_v2 = vpop.f32.mrb[118].mxu0 }
 0x7f4   :  { %v7224_v58 = vpop.f32.mrb[119].mxu0  ;;  %v8756_v5 = vpop.f32.mrb[108].mxu1 }
 0x7f5   :  { %v7288_v60 = vadd.f32 %v7222_v31, %v11360_v11  ;;  %v7225_v38 = vadd.f32 %v7224_v58, %v7064_v46  ;;  %v8757_v43 = vpop.f32.mrb[109].mxu1  ;;  %v11797_v58 = vld [vmem:[#allocation11_spill] sm:$0xff] }
 0x7f6   :  { %v8758_v30 = vadd.f32 %v8757_v43, %v8756_v5  ;;  %v8759_v51 = vpop.f32.mrb[110].mxu1 }
 0x7f7   :  { %vm7320_vm5 = vcmp.gt.f32.partialorder %v7288_v60, 0.0  ;;  %v7352_v55 = vmul.f32 0.01, %v7288_v60  ;;  %v7289_v16 = vadd.f32 %v7225_v38, %v11365_v27  ;;  %v8760_v52 = vpop.f32.mrb[111].mxu1 }
 0x7f8   :  { %v7069_v0 = vadd.f32 %v8758_v30, %v11600_v34  ;;  %v8761_v22 = vadd.f32 %v8760_v52, %v8759_v51 }
 0x7f9   :  { %v7384_v33 = vsel %vm7320_vm5, %v7288_v60, %v7352_v55  ;;  %vm7321_vm12 = vcmp.gt.f32.partialorder %v7289_v16, 0.0  ;;  %v7353_v4 = vmul.f32 0.01, %v7289_v16 }
 0x7fa   :  { %7448 = vst [vmem:[%s11755_s3 + $0xa0] sm:$0xff] %v7384_v33  ;;  %v7230_v11 = vadd.f32 %v9184_v32, %v7069_v0  ;;  %v7072_v14 = vadd.f32 %v8761_v22, %v11600_v34  ;;  %v11798_v22 = vld [vmem:[#allocation8_spill] sm:$0xff] }
 0x7fb   :  { %v7385_v25 = vsel %vm7321_vm12, %v7289_v16, %v7353_v4 }
 0x7fc   :  { %7449 = vst [vmem:[%s11755_s3 + $0xa8] sm:$0xff] %v7385_v25  ;;  %v7290_v27 = vadd.f32 %v7230_v11, %v11376_v24  ;;  %v7233_v45 = vadd.f32 %v9185_v2, %v7072_v14  ;;  %v8762_v15 = vpop.f32.mrb[112].mxu1 }
 0x7fd   :  { %v8763_v3 = vpop.f32.mrb[113].mxu1 }
 0x7fe   :  { %vm7322_vm13 = vcmp.gt.f32.partialorder %v7290_v27, 0.0  ;;  %v7354_v53 = vmul.f32 0.01, %v7290_v27  ;;  %v7291_v61 = vadd.f32 %v7233_v45, %v11391_v7  ;;  %v8764_v36 = vadd.f32 %v8763_v3, %v8762_v15  ;;  %v8765_v23 = vpop.f32.mrb[114].mxu1  ;;  %v11799_v15 = vld [vmem:[#allocation9_spill] sm:$0xff] }
 0x7ff   :  { %v8766_v44 = vpop.f32.mrb[115].mxu1 }
 0x800   :  { %v7386_v37 = vsel %vm7322_vm13, %v7290_v27, %v7354_v53  ;;  %vm7323_vm14 = vcmp.gt.f32.partialorder %v7291_v61, 0.0  ;;  %v7355_v57 = vmul.f32 0.01, %v7291_v61  ;;  %v8767_v42 = vadd.f32 %v8766_v44, %v8765_v23  ;;  %v9188_v18 = vpop.f32.mrb[120].mxu0 }
 0x801   :  { %7450 = vst [vmem:[%s11755_s3 + $0xb0] sm:$0xff] %v7386_v37  ;;  %v7077_v24 = vadd.f32 %v8764_v36, %v11600_v34  ;;  %v7237_v54 = vpop.f32.mrb[121].mxu0 }
 0x802   :  { %v7387_v41 = vsel %vm7323_vm14, %v7291_v61, %v7355_v57  ;;  %v9189_v8 = vpop.f32.mrb[122].mxu0  ;;  %v7080_v26 = vadd.f32 %v8767_v42, %v11600_v34  ;;  %v11800_v57 = vld [vmem:[#allocation10_spill] sm:$0xff] }
 0x803   :  { %7451 = vst [vmem:[%s11755_s3 + $0xb8] sm:$0xff] %v7387_v41  ;;  %v7238_v7 = vadd.f32 %v7237_v54, %v7077_v24  ;;  %v7240_v62 = vpop.f32.mrb[123].mxu0 }
 0x804   :  { %v7241_v19 = vadd.f32 %v7240_v62, %v7080_v26  ;;  %v8768_v9 = vpop.f32.mrb[116].mxu1 }
 0x805   :  { %v7292_v63 = vadd.f32 %v7238_v7, %v11397_v21  ;;  %v8769_v12 = vpop.f32.mrb[117].mxu1 }
 0x806   :  { %v7293_v48 = vadd.f32 %v7241_v19, %v11407_v50  ;;  %v8770_v56 = vadd.f32 %v8769_v12, %v8768_v9  ;;  %v8771_v1 = vpop.f32.mrb[118].mxu1 }
 0x807   :  { %vm7324_vm15 = vcmp.gt.f32.partialorder %v7292_v63, 0.0  ;;  %v7356_v29 = vmul.f32 0.01, %v7292_v63  ;;  %v8772_v35 = vpop.f32.mrb[119].mxu1 }
 0x808   :  { %vm7325_vm2 = vcmp.gt.f32.partialorder %v7293_v48, 0.0  ;;  %v7357_v13 = vmul.f32 0.01, %v7293_v48  ;;  %v7085_v20 = vadd.f32 %v8770_v56, %v11600_v34  ;;  %v8773_v6 = vadd.f32 %v8772_v35, %v8771_v1 }
 0x809   :  { %v7388_v47 = vsel %vm7324_vm15, %v7292_v63, %v7356_v29  ;;  %v9192_v39 = vpop.f32.mrb[124].mxu0 }
 0x80a   :  { %7452 = vst [vmem:[%s11755_s3 + $0xc0] sm:$0xff] %v7388_v47  ;;  %v7389_v21 = vsel %vm7325_vm2, %v7293_v48, %v7357_v13  ;;  %v7246_v59 = vadd.f32 %v9188_v18, %v7085_v20  ;;  %v7088_v50 = vadd.f32 %v8773_v6, %v11600_v34  ;;  %v7253_v10 = vpop.f32.mrb[125].mxu0 }
 0x80b   :  { %7453 = vst [vmem:[%s11755_s3 + $0xc8] sm:$0xff] %v7389_v21  ;;  %v9193_v32 = vpop.f32.mrb[126].mxu0 }
 0x80c   :  { %v7294_v28 = vadd.f32 %v7246_v59, %v11421_v40  ;;  %v7249_v49 = vadd.f32 %v9189_v8, %v7088_v50  ;;  %v8774_v17 = vpop.f32.mrb[120].mxu1  ;;  %v7256_v46 = vpop.f32.mrb[127].mxu0 }
 0x80d   :  { %v8775_v31 = vpop.f32.mrb[121].mxu1 }
 0x80e   :  { %vm7326_vm3 = vcmp.gt.f32.partialorder %v7294_v28, 0.0  ;;  %v7358_v2 = vmul.f32 0.01, %v7294_v28  ;;  %v7295_v5 = vadd.f32 %v7249_v49, %v11797_v58  ;;  %v8776_v60 = vadd.f32 %v8775_v31, %v8774_v17  ;;  %v8777_v38 = vpop.f32.mrb[122].mxu1 }
 0x80f   :  { %v8778_v43 = vpop.f32.mrb[123].mxu1 }
 0x810   :  { %v7390_v30 = vsel %vm7326_vm3, %v7294_v28, %v7358_v2  ;;  %vm7327_vm6 = vcmp.gt.f32.partialorder %v7295_v5, 0.0  ;;  %v7359_v51 = vmul.f32 0.01, %v7295_v5  ;;  %v7093_v55 = vadd.f32 %v8776_v60, %v11600_v34 }
 0x811   :  { %7454 = vst [vmem:[%s11755_s3 + $0xd0] sm:$0xff] %v7390_v30  ;;  %v8779_v40 = vadd.f32 %v8778_v43, %v8777_v38 }
 0x812   :  { %v7391_v16 = vsel %vm7327_vm6, %v7295_v5, %v7359_v51  ;;  %v7254_v52 = vadd.f32 %v7253_v10, %v7093_v55 }
 0x813   :  { %7455 = vst [vmem:[%s11755_s3 + $0xd8] sm:$0xff] %v7391_v16  ;;  %v7096_v0 = vadd.f32 %v8779_v40, %v11600_v34 }
 0x814   :  { %v7296_v33 = vadd.f32 %v7254_v52, %v11798_v22  ;;  %v8780_v4 = vpop.f32.mrb[124].mxu1 }
 0x815   :  { %v7257_v11 = vadd.f32 %v7256_v46, %v7096_v0  ;;  %v8781_v14 = vpop.f32.mrb[125].mxu1 }
 0x816   :  { %vm7328_vm7 = vcmp.gt.f32.partialorder %v7296_v33, 0.0  ;;  %v7360_v25 = vmul.f32 0.01, %v7296_v33  ;;  %v8782_v27 = vadd.f32 %v8781_v14, %v8780_v4  ;;  %v8783_v45 = vpop.f32.mrb[126].mxu1 }
 0x817   :  { %v7297_v3 = vadd.f32 %v7257_v11, %v11799_v15  ;;  %v8784_v53 = vpop.f32.mrb[127].mxu1 }
 0x818   :  { %v7392_v61 = vsel %vm7328_vm7, %v7296_v33, %v7360_v25  ;;  %v7101_v36 = vadd.f32 %v8782_v27, %v11600_v34 }
 0x819   :  { %7456 = vst [vmem:[%s11755_s3 + $0xe0] sm:$0xff] %v7392_v61  ;;  %vm7329_vm8 = vcmp.gt.f32.partialorder %v7297_v3, 0.0  ;;  %v7361_v23 = vmul.f32 0.01, %v7297_v3 }
 0x81a   :  { %v7262_v44 = vadd.f32 %v9192_v39, %v7101_v36 }
 0x81b   :  { %v7393_v37 = vsel %vm7329_vm8, %v7297_v3, %v7361_v23 }
 0x81c   :  { %7457 = vst [vmem:[%s11755_s3 + $0xe8] sm:$0xff] %v7393_v37  ;;  %v7298_v42 = vadd.f32 %v7262_v44, %v11800_v57 }
 0x81e   :  { %vm7330_vm9 = vcmp.gt.f32.partialorder %v7298_v42, 0.0  ;;  %v7362_v18 = vmul.f32 0.01, %v7298_v42 }
 0x820   :  { %v7394_v24 = vsel %vm7330_vm9, %v7298_v42, %v7362_v18 }
 0x821   :  { %7458 = vst [vmem:[%s11755_s3 + $0xf0] sm:$0xff] %v7394_v24 }
 0x822   :  { %7464 = vsyncpa [#allocation3], 1 }
 0x823   :  { %7465 = vsyncpa [#allocation5], 1 }

// kernel: forward.3
= control target key start
LH: loop header
LB: loop body
LE: loop exit
PB: predicated region body
PF: predicated region fallthrough
CT: control target
= control target key end

     0   :  { %s12193_s0 = inlined_call_operand.vmem [shape: bf16[2,14848], index: 0, kind: input, shape index: {}]   ;;  %s12194_s1 = inlined_call_operand.hbm [shape: bf16[14848,1024], index: 1, kind: input, shape index: {}]   ;;  %s12195_s2 = inlined_call_operand.hbm [shape: f32[1,1024], index: 2, kind: input, shape index: {}]   ;;  %s12196_s3 = inlined_call_operand.hbm [shape: f32[1024,128], index: 3, kind: input, shape index: {}]   ;;  %s12197_s4 = inlined_call_operand.vmem [shape: f32[2,2,128], index: 4, kind: output, shape index: {}]  }
   0x1   :  { %12206 = sst [smem:[#allocation16_spill]] %s12195_s2 }
   0x2   :  { %9 = vsyncpa [#allocation4], 0 }
   0x3   :  { %11 = vsyncpa [#allocation4 + $0x1], 0 }
   0x4   :  { %12 = vsyncpa [#allocation6], 0 }
   0x5   :  { %14 = vsyncpa [#allocation6 + $0x1], 0  ;;  %s10718_s15 = smov 0   ;;  %s10720_s16 = smov 0  }
   0x6   :  { %s10722_s17 = smov 0   ;;  %s10724_s18 = smov 0  }
   0x7   :  { %s10726_s19 = smov 0   ;;  %s10728_s20 = smov 0  }
   0x8   :  { %s10730_s21 = smov 0   ;;  %s10732_s22 = smov 0  }
   0x9   :  { %s10734_s23 = smov 0   ;;  %s10736_s24 = smov 0  }
   0xa   :  { %s10738_s25 = smov 0  }
   0xb LB: > { %12207 = sst [smem:[#allocation10_spill]] %s10647_s17  ;;  %s12198_s26 = sadd.s32 4294967295, %s10679_s25   ;;  %s10679_s25 = sphi %s10738_s25, %s20_s25   ;;  %s10675_s24 = sphi %s10736_s24, %s12242_s24   ;;  %s10671_s23 = sphi %s10734_s23, %s12241_s23   ;;  %s10667_s22 = sphi %s10732_s22, %s12240_s22   ;;  %s10663_s21 = sphi %s10730_s21, %s12239_s21   ;;  %s10659_s20 = sphi %s10728_s20, %s12232_s20   ;;  %s10655_s19 = sphi %s10726_s19, %s12238_s19   ;;  %s10651_s18 = sphi %s10724_s18, %s12237_s18   ;;  %s10647_s17 = sphi %s10722_s17, %s12230_s17   ;;  %s10643_s16 = sphi %s10720_s16, %s12236_s16   ;;  %s10639_s15 = sphi %s10718_s15, %s12235_s15  }
   0xc   : > { %12208 = sst [smem:[#allocation11_spill]] %s10659_s20  ;;  %s29_s27 = sadd.s32 1, %s10671_s23 }
   0xd   : > { %p30_p0 = scmp.ge.s32.totalorder %s29_s27, 4  ;;  %s32_s28 = sadd.s32 1, %s10675_s24 }
   0xe   : > { %s67_s29 = sadd.s32 1, %s10659_s20  ;;  %p74_p1 = scmp.ne.s32.totalorder %s10659_s20, %s10655_s19 }
   0xf   : > { %s12244_s27 = smov (%p30_p0, %s29_s27), 0  ;;  %s12246_s28 = smov (!%p30_p0, %s32_s28), %s10675_s24 }
  0x10   : > { %12209 = sst [smem:[#allocation12_spill]] %s12244_s27  ;;  %s62_s30 = ssub.s32 %s10671_s23, %s12244_s27 }
  0x11   : > { %p75_p2 = scmp.eq.s32.totalorder %s10679_s25, 0  ;;  %p34_p3 = scmp.ge.s32.totalorder %s12246_s28, 2 }
  0x12   : > { %p80_p4 = scmp.ne.s32.totalorder %s10655_s19, %s10651_s18  ;;  %p10792_p6 = scmp.eq.s32.totalorder %s12198_s26, 0 }
  0x13   : > { %p10786_p5 = por %p75_p2, %p74_p1  ;;  %s12248_s28 = smov (%p34_p3, %s12246_s28), 0 }
  0x14   : > { %12212 = sst [smem:[#allocation13_spill]] %s12248_s28  ;;  %p10800_p7 = por %p10792_p6, %p80_p4 }
  0x15   : > { %s93_s8 = sadd.s32 1, %s10647_s17  ;;  %s63_s9 = ssub.s32 %s10675_s24, %s12248_s28 }
  0x16   : > { %s12213_s7 = scalar_select %p10800_p7, 1, 0 }
  0x17   : > { %p100_p8 = scmp.ne.s32.totalorder %s10647_s17, %s10643_s16  ;;  %s64_s10 = sor.u32 %s63_s9, %s62_s30 }
  0x18   : > { %p91_p9 = scmp.eq.s32.totalorder %s63_s9, 0  ;;  %p65_p10 = scmp.eq.s32.totalorder %s64_s10, 0 }
  0x19   : > { %p10811_p11 = por %p100_p8, %p75_p2  ;;  %p106_p12 = scmp.ne.s32.totalorder %s10643_s16, %s10639_s15 }
  0x1a   : > { %s10816_s12 = scalar_select %p91_p9, %s10647_s17, %s93_s8  }
  0x1b   : > { %s10819_s13 = scalar_select %p65_p10, %s10659_s20, %s67_s29  }
  0x1c   : > { %12215 = sst [smem:[#allocation14_spill]] %s10816_s12  ;;  %p8999_p13 = scmp.lt.s32.totalorder %s10679_s25, 8 }
  0x1d   : > { %12216 = sst [smem:[#allocation15_spill]] %s10819_s13  ;;  %s214_s14 = sand.u32 1, %s10679_s25  }
  0x1e   : > { %p10827_p0 = por %p106_p12, %p10792_p6  ;;  %p10833_p1 = pnand %p8999_p13, %p10786_p5 }
  0x1f   : > { %s216_s9 = sand.u32 1, %s10647_s17   ;;  %s8733_s8 = sshll.u32 %s10675_s24, 6 }
  0x20   : > { %s12217_s18 = scalar_select %p10827_p0, 1, 0 }
  0x21   : > { %s7790_s10 = sshll.u32 %s216_s9, 2  ;;  %s12219_s2 = sld [smem:[#allocation16_spill]] }
  0x22   : > { %s218_s15 = scalar_lea.vmem [#allocation5], %s7790_s10  ;;  %p10848_p2 = pnand %p8999_p13, %p10811_p11 }
  0x23   : > { %s226_s6 = sshll.u32 %s218_s15, 4  ;;  %s10852_s27 = sshll.u32 %s216_s9, 9  ;;  %s10844_s6 = int_to_ptr.vmem [resolvable:$true] %s226_s6 }
  0x24   : > { %s10855_s26 = scalar_lea.sflag [#allocation6], %s214_s14  ;;  %p12205_p5 = pneg %p10848_p2 }
  0x27   : > { %s10842_s29 = scalar_lea.hbm %s12219_s2, %s8733_s8  ;;  %s10500_s8 = scalar_lea.hbm %s12219_s2, 128 }
  0x28   : > { %s10495_s28 = scalar_lea.hbm %s10842_s29, 64  ;;  %p10501_p9 = scmp.lt.u32.totalorder %s10842_s29, %s12219_s2 }
  0x29   : > { %p10496_p4 = scmp.ne.s32.totalorder %s10842_s29, %s10495_s28  ;;  %p10502_p10 = scmp.lt.u32.totalorder %s10500_s8, %s10495_s28 }
  0x2a   : > { %p10504_p12 = scmp.lt.u32.totalorder %s10495_s28, %s10842_s29 }
  0x2b   : > { %p10498_p6 = pnand %p12205_p5, %p10496_p4  ;;  %p10503_p11 = por %p10502_p10, %p10501_p9 }
  0x2d   : > { %p10499_p8 = pneg %p10498_p6  ;;  %p10505_p13 = por %p10504_p12, %p10503_p11 }
  0x2f   : > { %p10506_p3 = pnand %p10505_p13, %p10499_p8 }
  0x31   : > { %10509 = shalt.err (!%p10506_p3)
}
  0x32   : > { %s10510_s14 = scalar_lea.vmem %s10844_s6, 64  ;;  %s10681_s9 = smov [#allocation5]  }
  0x33   : > { %p10511_p4 = scmp.ne.s32.totalorder %s10844_s6, %s10510_s14  ;;  %s10515_s11 = sshll.u32 %s10681_s9, 4  ;;  %s10516_s11 = int_to_ptr.vmem [resolvable:$false] %s10515_s11 }
  0x34   : > { %s10517_s13 = scalar_lea.vmem %s10516_s11, 128  ;;  %p10518_p7 = scmp.lt.s32.totalorder %s10844_s6, %s10516_s11 }
  0x35   : > { %p10513_p6 = pnand %p10511_p4, %p12205_p5  ;;  %p10519_p9 = scmp.lt.s32.totalorder %s10517_s13, %s10510_s14 }
  0x37   : > { %p10514_p0 = pneg %p10513_p6  ;;  %p10520_p10 = por %p10519_p9, %p10518_p7 }
  0x39   : > { %p10521_p11 = pnand %p10520_p10, %p10514_p0 }
  0x3b   : > { %10524 = shalt.err (!%p10521_p11)
}
  0x3c   : > { %8995 = dma.hbm_to_vmem [thread:$0]  (!%p10848_p2), %s10842_s29, 64, %s10844_s6, %s10855_s26  }
  0x3d   : > { %s237_s28 = scalar_lea.vmem [#allocation7], %s10852_s27  ;;  %p252_p3 = scmp.lt.s32.totalorder %s10679_s25, 9 }
  0x3e   : > { %s244_s10 = sshll.u32 %s237_s28, 4  ;;  %p12221_p7 = scmp.ge.s32.totalorder %s10679_s25, 1  ;;  %s10885_s10 = int_to_ptr.vmem [resolvable:$true] %s244_s10 }
  0x3f   : > { %s190_s15 = sand.u32 1, %s10659_s20   ;;  %s7787_s14 = sshll.u32 %s10675_s24, 2 }
  0x40   : > { %p10889_p0 = pnand %p12221_p7, %p252_p3  ;;  %s8981_s9 = smul.u32 7424, %s190_s15 }
  0x41   : > { %s8732_s11 = smul.u32 3712, %s10671_s23  ;;  %s10903_s17 = scalar_lea.sflag [#allocation4], %s190_s15 }
  0x42   : > { %s12222_s8 = scalar_select %p10889_p0, 1, 0 }
  0x43   : > { %s201_s13 = sadd.s32 %s8732_s11, %s7787_s14  ;;  %s194_s2 = scalar_lea.vmem [#allocation3], %s8981_s9 }
  0x44   : > { %s204_s12 = sshll.u32 %s194_s2, 4  ;;  %s7789_s29 = sshll.u32 %s201_s13, 6  ;;  %s10896_s12 = int_to_ptr.vmem [resolvable:$true] %s204_s12 }
  0x45   : > { %s10901_s28 = scalar_lea.hbm %s12194_s1, %s7789_s29  ;;  %p10527_p12 = pneg %p10833_p1 }
  0x46   : > { %s10525_s20 = scalar_lea.hbm %s10901_s28, 118784  ;;  %s10530_s9 = scalar_lea.hbm %s12194_s1, 950272 }
  0x47   : > { %p10526_p8 = scmp.ne.s32.totalorder %s10901_s28, %s10525_s20  ;;  %p10531_p6 = scmp.lt.u32.totalorder %s10901_s28, %s12194_s1 }
  0x48   : > { %p10532_p9 = scmp.lt.u32.totalorder %s10530_s9, %s10525_s20  ;;  %p10534_p11 = scmp.lt.u32.totalorder %s10525_s20, %s10901_s28 }
  0x49   : > { %p10528_p13 = pnand %p10527_p12, %p10526_p8 }
  0x4a   : > { %p10533_p10 = por %p10532_p9, %p10531_p6 }
  0x4b   : > { %p10529_p4 = pneg %p10528_p13 }
  0x4c   : > { %p10535_p3 = por %p10534_p11, %p10533_p10 }
  0x4e   : > { %p10536_p7 = pnand %p10535_p3, %p10529_p4 }
  0x50   : > { %10539 = shalt.err (!%p10536_p7)
}
  0x51   : > { %s10540_s15 = scalar_lea.vmem %s10896_s12, 118784  ;;  %s10682_s29 = smov [#allocation3]  }
  0x52   : > { %p10541_p8 = scmp.ne.s32.totalorder %s10896_s12, %s10540_s15  ;;  %s10545_s27 = sshll.u32 %s10682_s29, 4  ;;  %s10546_s27 = int_to_ptr.vmem [resolvable:$false] %s10545_s27 }
  0x53   : > { %s10547_s6 = scalar_lea.vmem %s10546_s27, 237568  ;;  %p10548_p0 = scmp.lt.s32.totalorder %s10896_s12, %s10546_s27 }
  0x54   : > { %p10543_p13 = pnand %p10541_p8, %p10527_p12  ;;  %p10549_p6 = scmp.lt.s32.totalorder %s10547_s6, %s10540_s15 }
  0x56   : > { %p10544_p5 = pneg %p10543_p13  ;;  %p10550_p9 = por %p10549_p6, %p10548_p0 }
  0x58   : > { %p10551_p10 = pnand %p10550_p9, %p10544_p5 }
  0x5a   : > { %10554 = shalt.err (!%p10551_p10)
}
  0x5b   : > { %s10683_s20 = smov 512   ;;  %s10684_s2 = smov 256  }
  0x5c   : > { %s10685_s14 = smov 16   ;;  %s8734_s9 = sshll.u32 %s10675_s24, 13 }
  0x5d   : > { %8992 = dma.hbm_to_vmem [thread:$0]  (!%p10833_p1), %s10901_s28, 118784, %s10896_s12, %s10903_s17, %s10683_s20, %s10684_s2, %s10685_s14  }
  0x5e   : > { %s10935_s29 = scalar_lea.hbm %s12196_s3, %s8734_s9  ;;  %p12223_p0 = pneg %p10848_p2 }
  0x5f   : > { %s10555_s15 = scalar_lea.hbm %s10935_s29, 8192  ;;  %s10560_s17 = scalar_lea.hbm %s12196_s3, 16384 }
  0x60   : > { %p10556_p5 = scmp.ne.s32.totalorder %s10935_s29, %s10555_s15  ;;  %p10561_p1 = scmp.lt.u32.totalorder %s10935_s29, %s12196_s3 }
  0x61   : > { %p10562_p11 = scmp.lt.u32.totalorder %s10560_s17, %s10555_s15  ;;  %p10564_p7 = scmp.lt.u32.totalorder %s10555_s15, %s10935_s29 }
  0x62   : > { %p10558_p12 = pnand %p10556_p5, %p12223_p0 }
  0x63   : > { %p10563_p3 = por %p10562_p11, %p10561_p1 }
  0x64   : > { %p10559_p4 = pneg %p10558_p12 }
  0x65   : > { %p10565_p8 = por %p10564_p7, %p10563_p3 }
  0x67   : > { %p10566_p13 = pnand %p10565_p8, %p10559_p4 }
  0x69   : > { %10569 = shalt.err (!%p10566_p13)
}
  0x6a   : > { %s10570_s28 = scalar_lea.vmem %s10885_s10, 8192  ;;  %p12224_p9 = pmov %p12223_p0 }
  0x6b   : > { %p10571_p6 = scmp.ne.s32.totalorder %s10885_s10, %s10570_s28  ;;  %s10686_s20 = smov [#allocation7]  }
  0x6c   : > { %s10575_s2 = sshll.u32 %s10686_s20, 4  ;;  %s10576_s2 = int_to_ptr.vmem [resolvable:$false] %s10575_s2 }
  0x6d   : > { %p10573_p10 = pnand %p10571_p6, %p12224_p9  ;;  %s10577_s14 = scalar_lea.vmem %s10576_s2, 16384 }
  0x6e   : > { %p10578_p0 = scmp.lt.s32.totalorder %s10885_s10, %s10576_s2  ;;  %p10579_p12 = scmp.lt.s32.totalorder %s10577_s14, %s10570_s28 }
  0x6f   : > { %p10574_p5 = pneg %p10573_p10 }
  0x70   : > { %p10580_p1 = por %p10579_p12, %p10578_p0 }
  0x72   : > { %p10581_p11 = pnand %p10580_p1, %p10574_p5 }
  0x74   : > { %10584 = shalt.err (!%p10581_p11)
}
  0x75   : > { %s10687_s9 = smov 128   ;;  %s10688_s11 = smov 8  }
  0x76   : > { %8998 = dma.hbm_to_vmem [thread:$0]  (!%p10848_p2), %s10935_s29, 8192, %s10885_s10, %s10855_s26, %s10687_s9, %s10687_s9, %s10688_s11  }
  0x77   : > { %p12225_p4 = scmp.ne.s32.totalorder %s12222_s8, 0 }
  0x78   : > { %s258_s13 = sand.u32 (!%p12225_p4), 1, %s10655_s19   ;;  %p12226_p3 = scmp.ne.s32.totalorder (!%p12225_p4), %s12213_s7, 0 }
  0x79   : > { %256 = sbr.rel (%p12225_p4) target bundleno = 1533 (0x5fd), region = 36  ;;  %s259_s27 = scalar_lea.sflag (!%p12225_p4), [#allocation4], %s258_s13 }
  0x7a   : > { %s8982_s15 = smul.u32 (!%p12225_p4), 7424, %s258_s13 }
  0x7c   : > { %s10964_s6 = scalar_lea.vmem (!%p12225_p4), [#allocation3], %s8982_s15 }
  0x80   : > { %10630 = dma.done.wait (%p12226_p3), %s259_s27, 118784  }
  0x81   : > { %10632 = vsyncadd (%p12226_p3), %s259_s27, 4294848512  ;;  %s12227_s17 = sadd.s32 4294967295, %s10679_s25   ;;  %s269_s26 = sand.u32 1, %s10643_s16  }
  0x82   : > { %s267_s5 = sand.u32 1, %s12227_s17   ;;  %s10973_s10 = sshll.u32 %s269_s26, 2 }
  0x83   : > { %s268_s8 = scalar_lea.sflag [#allocation6], %s267_s5  ;;  %s271_s29 = scalar_lea.vmem [#allocation5], %s10973_s10 }
  0x84   : > { %p12228_p2 = scmp.ne.s32.totalorder %s12217_s18, 0 }
  0x86   : > { %10634 = dma.done.wait (%p12228_p2), %s268_s8, 8256  }
  0x87   : > { %10636 = vsyncadd (%p12228_p2), %s268_s8, 4294959040  ;;  %s7798_s7 = sshll.u32 %s269_s26, 9  ;;  %s318_s12 = smul.u32 29, %s10663_s21 }
  0x88   : > { %p327_p7 = scmp.lt.s32.totalorder %s10667_s22, 1  ;;  %s10993_s11 = scalar_lea.vmem [#allocation7], %s7798_s7 }
  0x89   : > { %p319_p8 = scmp.lt.s32.totalorder %s318_s12, 115  ;;  %p7800_p13 = scmp.ne.s32.totalorder %s10663_s21, 0 }
  0x8a   : > { %s12250_s22 = smov (!%p327_p7, %s10667_s22), 1  ;;  %v10689_v0 = vmov (!%p7800_p13), 0.0  }
  0x8b   : > { %s12252_s12 = smov (!%p319_p8, %s318_s12), 115  ;;  %s7799_s30 = sshll.u32 %s12250_s22, 1  ;;  %336 = vst [vmem:[#allocation2] sm:$0xff] (!%p7800_p13), %v10689_v0 }
  0x8c   : > { %s10986_s2 = scalar_lea.vmem %s12193_s0, %s12252_s12  ;;  %s10991_s18 = scalar_lea.vmem %s12197_s4, %s7799_s30 }
  0x8d   : > { %335 = sbr.rel (%p7800_p13) target bundleno = 148 (0x94), region = 52 }
  0x94 PF: > { %v9097_v1 = vld [vmem:[%s10964_s6 + $0x4] ss:$16 sps:$4 sm:$0xff]   ;;  %v9099_v2 = vld [vmem:[%s10964_s6 + $0xc] ss:$16 sps:$4 sm:$0xff]   ;;  %v9101_v3 = vld [vmem:[%s10964_s6] ss:$16 sps:$4 sm:$0xff]   ;;  %v1278_v39 = vlaneseq }
  0x95   : > { %6129 = vmatprep.subr.bf16.mxu0 %v9097_v1  ;;  %v9102_v4 = vld [vmem:[%s10964_s6 + $0x8] ss:$16 sps:$4 sm:$0xff]   ;;  %6744 = vmatprep.subr.bf16.mxu1 %v9099_v2  ;;  %v9103_v5 = vld [vmem:[%s10964_s6 + $0x24] ss:$16 sps:$4 sm:$0xff]   ;;  %v9105_v6 = vld [vmem:[%s10964_s6 + $0x2c] ss:$16 sps:$4 sm:$0xff]  }
  0x96   : > { %6130 = vmatpush1.bf16.msra.mxu0 %v9101_v3  ;;  %6745 = vmatpush1.bf16.msra.mxu1 %v9102_v4  ;;  %v9107_v7 = vld [vmem:[%s10964_s6 + $0x20] ss:$16 sps:$4 sm:$0xff]   ;;  %v9108_v8 = vld [vmem:[%s10964_s6 + $0x28] ss:$16 sps:$4 sm:$0xff]   ;;  %v9109_v9 = vld [vmem:[%s10964_s6 + $0x44] ss:$16 sps:$4 sm:$0xff]  }
  0x97   : > { %6131 = vmatprep.subr.bf16.mxu0 %v9103_v5  ;;  %6746 = vmatprep.subr.bf16.mxu1 %v9105_v6  ;;  %v9111_v10 = vld [vmem:[%s10964_s6 + $0x4c] ss:$16 sps:$4 sm:$0xff]   ;;  %v9113_v11 = vld [vmem:[%s10964_s6 + $0x40] ss:$16 sps:$4 sm:$0xff]   ;;  %v9114_v12 = vld [vmem:[%s10964_s6 + $0x48] ss:$16 sps:$4 sm:$0xff]  }
  0x98   : > { %v9115_v13 = vld [vmem:[%s10964_s6 + $0x64] ss:$16 sps:$4 sm:$0xff]   ;;  %v9117_v14 = vld [vmem:[%s10964_s6 + $0x6c] ss:$16 sps:$4 sm:$0xff]   ;;  %v9119_v15 = vld [vmem:[%s10964_s6 + $0x60] ss:$16 sps:$4 sm:$0xff]  }
  0x99   : > { %v9120_v16 = vld [vmem:[%s10964_s6 + $0x68] ss:$16 sps:$4 sm:$0xff]   ;;  %v9121_v17 = vld [vmem:[%s10964_s6 + $0x84] ss:$16 sps:$4 sm:$0xff]   ;;  %v9123_v18 = vld [vmem:[%s10964_s6 + $0x8c] ss:$16 sps:$4 sm:$0xff]  }
  0x9a   : > { %6132 = vmatpush1.bf16.msra.mxu0 %v9107_v7  ;;  %6747 = vmatpush1.bf16.msra.mxu1 %v9108_v8  ;;  %v9125_v19 = vld [vmem:[%s10964_s6 + $0x80] ss:$16 sps:$4 sm:$0xff]   ;;  %v9126_v20 = vld [vmem:[%s10964_s6 + $0x88] ss:$16 sps:$4 sm:$0xff]   ;;  %v9127_v21 = vld [vmem:[%s10964_s6 + $0xa4] ss:$16 sps:$4 sm:$0xff]  }
  0x9b   : > { %6133 = vmatprep.subr.bf16.mxu0 %v9109_v9  ;;  %6748 = vmatprep.subr.bf16.mxu1 %v9111_v10  ;;  %v9129_v22 = vld [vmem:[%s10964_s6 + $0xac] ss:$16 sps:$4 sm:$0xff]   ;;  %v9131_v23 = vld [vmem:[%s10964_s6 + $0xa0] ss:$16 sps:$4 sm:$0xff]   ;;  %v9132_v24 = vld [vmem:[%s10964_s6 + $0xa8] ss:$16 sps:$4 sm:$0xff]  }
  0x9c   : > { %v9133_v25 = vld [vmem:[%s10964_s6 + $0xc4] ss:$16 sps:$4 sm:$0xff]   ;;  %v9135_v26 = vld [vmem:[%s10964_s6 + $0xcc] ss:$16 sps:$4 sm:$0xff]   ;;  %v9137_v27 = vld [vmem:[%s10964_s6 + $0xc0] ss:$16 sps:$4 sm:$0xff]  }
  0x9d   : > { %v9138_v28 = vld [vmem:[%s10964_s6 + $0xc8] ss:$16 sps:$4 sm:$0xff]   ;;  %v9139_v29 = vld [vmem:[%s10964_s6 + $0xe4] ss:$16 sps:$4 sm:$0xff]   ;;  %v9141_v30 = vld [vmem:[%s10964_s6 + $0xec] ss:$16 sps:$4 sm:$0xff]  }
  0x9e   : > { %6134 = vmatpush1.bf16.msra.mxu0 %v9113_v11  ;;  %6749 = vmatpush1.bf16.msra.mxu1 %v9114_v12  ;;  %v9143_v31 = vld [vmem:[%s10964_s6 + $0xe0] ss:$16 sps:$4 sm:$0xff]   ;;  %v9144_v32 = vld [vmem:[%s10964_s6 + $0xe8] ss:$16 sps:$4 sm:$0xff]   ;;  %v9145_v33 = vld [vmem:[%s10964_s6 + $0x104] ss:$16 sps:$4 sm:$0xff]  }
  0x9f   : > { %6135 = vmatprep.subr.bf16.mxu0 %v9115_v13  ;;  %6750 = vmatprep.subr.bf16.mxu1 %v9117_v14  ;;  %v9147_v34 = vld [vmem:[%s10964_s6 + $0x10c] ss:$16 sps:$4 sm:$0xff]   ;;  %v9149_v35 = vld [vmem:[%s10964_s6 + $0x100] ss:$16 sps:$4 sm:$0xff]   ;;  %v9150_v36 = vld [vmem:[%s10964_s6 + $0x108] ss:$16 sps:$4 sm:$0xff]  }
  0xa0   : > { %v10690_v37 = vmov 1966171168   ;;  %v9151_v40 = vld [vmem:[%s10964_s6 + $0x124] ss:$16 sps:$4 sm:$0xff]   ;;  %v9153_v41 = vld [vmem:[%s10964_s6 + $0x12c] ss:$16 sps:$4 sm:$0xff]  }
  0xa1   : > { %v1276_v38 = vunpack.c.l.s4 %v10690_v37  ;;  %v9155_v42 = vld [vmem:[%s10964_s6 + $0x120] ss:$16 sps:$4 sm:$0xff]   ;;  %v11035_v44 = vshrl.u32 %v1278_v39, 7  ;;  %v9156_v45 = vld [vmem:[%s10964_s6 + $0x128] ss:$16 sps:$4 sm:$0xff]   ;;  %p8729_p6 = scmp.ne.s32.totalorder %s10663_s21, 3 }
  0xa2   : > { %6136 = vmatpush1.bf16.msra.mxu0 %v9119_v15  ;;  %6751 = vmatpush1.bf16.msra.mxu1 %v9120_v16  ;;  %v9157_v46 = vld [vmem:[%s10964_s6 + $0x144] ss:$16 sps:$4 sm:$0xff]   ;;  %v9159_v47 = vld [vmem:[%s10964_s6 + $0x14c] ss:$16 sps:$4 sm:$0xff]   ;;  %v9161_v48 = vld [vmem:[%s10964_s6 + $0x140] ss:$16 sps:$4 sm:$0xff]  }
  0xa3   : > { %6137 = vmatprep.subr.bf16.mxu0 %v9121_v17  ;;  %6752 = vmatprep.subr.bf16.mxu1 %v9123_v18  ;;  %v1277_v43 = vunpack.c.0.s8 %v1276_v38  ;;  %v9162_v49 = vld [vmem:[%s10964_s6 + $0x148] ss:$16 sps:$4 sm:$0xff]   ;;  %v9163_v51 = vld [vmem:[%s10964_s6 + $0x164] ss:$16 sps:$4 sm:$0xff]   ;;  %v9165_v52 = vld [vmem:[%s10964_s6 + $0x16c] ss:$16 sps:$4 sm:$0xff]  }
  0xa4   : > { %v11048_v53 = vld [vmem:[%s10986_s2] sm:$0xff]  ;;  %v9167_v54 = vld [vmem:[%s10964_s6 + $0x160] ss:$16 sps:$4 sm:$0xff]   ;;  %v9169_v57 = vld [vmem:[%s10964_s6 + $0x184] ss:$16 sps:$4 sm:$0xff]  }
  0xa5   : > { %v11043_v50 = vsub.s32 %v1277_v43, %v11035_v44  ;;  %v9168_v56 = vld [vmem:[%s10964_s6 + $0x168] ss:$16 sps:$4 sm:$0xff]   ;;  %v9171_v58 = vld [vmem:[%s10964_s6 + $0x18c] ss:$16 sps:$4 sm:$0xff]   ;;  %v9173_v60 = vld [vmem:[%s10964_s6 + $0x180] ss:$16 sps:$4 sm:$0xff]  }
  0xa6   : > { %6138 = vmatpush1.bf16.msra.mxu0 %v9125_v19  ;;  %6753 = vmatpush1.bf16.msra.mxu1 %v9126_v20  ;;  %v9174_v62 = vld [vmem:[%s10964_s6 + $0x188] ss:$16 sps:$4 sm:$0xff]   ;;  %v9175_v63 = vld [vmem:[%s10964_s6 + $0x1a4] ss:$16 sps:$4 sm:$0xff]   ;;  %v9177_v0 = vld [vmem:[%s10964_s6 + $0x1ac] ss:$16 sps:$4 sm:$0xff]  }
  0xa7   : > { %6139 = vmatprep.subr.bf16.mxu0 %v9127_v21  ;;  %6754 = vmatprep.subr.bf16.mxu1 %v9129_v22  ;;  %v1281_v55 = vrot.slane %v11048_v53, %v11043_v50  ;;  %v9179_v1 = vld [vmem:[%s10964_s6 + $0x1a0] ss:$16 sps:$4 sm:$0xff]   ;;  %v9180_v2 = vld [vmem:[%s10964_s6 + $0x1a8] ss:$16 sps:$4 sm:$0xff]   ;;  %v9181_v3 = vld [vmem:[%s10964_s6 + $0x1c4] ss:$16 sps:$4 sm:$0xff]  }
  0xa8   : > { %v9183_v4 = vld [vmem:[%s10964_s6 + $0x1cc] ss:$16 sps:$4 sm:$0xff]   ;;  %v9185_v5 = vld [vmem:[%s10964_s6 + $0x1c0] ss:$16 sps:$4 sm:$0xff]   ;;  %v9186_v6 = vld [vmem:[%s10964_s6 + $0x1c8] ss:$16 sps:$4 sm:$0xff]  }
  0xa9   : > { %v1289_v59 = vcombine.high %v1281_v55, %v1281_v55  ;;  %v9187_v7 = vld [vmem:[%s10964_s6 + $0x1e4] ss:$16 sps:$4 sm:$0xff]   ;;  %v9189_v8 = vld [vmem:[%s10964_s6 + $0x1ec] ss:$16 sps:$4 sm:$0xff]   ;;  %v9191_v9 = vld [vmem:[%s10964_s6 + $0x1e0] ss:$16 sps:$4 sm:$0xff]   ;;  %v11075_v14 = vrot.slane %v1281_v55, %v11043_v50 }
  0xaa   : > { %6140 = vmatpush1.bf16.msra.mxu0 %v9131_v23  ;;  %6755 = vmatpush1.bf16.msra.mxu1 %v9132_v24  ;;  %v9192_v10 = vld [vmem:[%s10964_s6 + $0x1e8] ss:$16 sps:$4 sm:$0xff]   ;;  %v9195_v11 = vld [vmem:[%s10964_s6 + $0x204] ss:$16 sps:$4 sm:$0xff]   ;;  %v9198_v12 = vld [vmem:[%s10964_s6 + $0x20c] ss:$16 sps:$4 sm:$0xff]  }
  0xab   : > { %6141 = vmatprep.subr.bf16.mxu0 %v9133_v25  ;;  %6756 = vmatprep.subr.bf16.mxu1 %v9135_v26  ;;  %v1311_v61 = vrot.slane %v1289_v59, %v11043_v50  ;;  %v9193_v13 = vld [vmem:[%s10964_s6 + $0x200] ss:$16 sps:$4 sm:$0xff]   ;;  %v9196_v15 = vld [vmem:[%s10964_s6 + $0x208] ss:$16 sps:$4 sm:$0xff]   ;;  %v9201_v16 = vld [vmem:[%s10964_s6 + $0x224] ss:$16 sps:$4 sm:$0xff]  }
  0xac   : > { %v9204_v17 = vld [vmem:[%s10964_s6 + $0x22c] ss:$16 sps:$4 sm:$0xff]   ;;  %v9199_v19 = vld [vmem:[%s10964_s6 + $0x220] ss:$16 sps:$4 sm:$0xff]   ;;  %v9202_v20 = vld [vmem:[%s10964_s6 + $0x228] ss:$16 sps:$4 sm:$0xff]  }
  0xad   : > { %6161 = vmatprep.mubr.bf16.mxu0 %v1311_v61  ;;  %6776 = vmatprep.mubr.bf16.mxu1 %v1311_v61  ;;  %v1321_v18 = vcombine.high %v1311_v61, %v1311_v61  ;;  %v9207_v21 = vld [vmem:[%s10964_s6 + $0x244] ss:$16 sps:$4 sm:$0xff]   ;;  %v9210_v22 = vld [vmem:[%s10964_s6 + $0x24c] ss:$16 sps:$4 sm:$0xff]   ;;  %v9205_v23 = vld [vmem:[%s10964_s6 + $0x240] ss:$16 sps:$4 sm:$0xff]  }
  0xae   : > { %6142 = vmatpush1.bf16.msra.mxu0 %v9137_v27  ;;  %6757 = vmatpush1.bf16.msra.mxu1 %v9138_v28  ;;  %v9208_v24 = vld [vmem:[%s10964_s6 + $0x248] ss:$16 sps:$4 sm:$0xff]   ;;  %v9213_v25 = vld [vmem:[%s10964_s6 + $0x264] ss:$16 sps:$4 sm:$0xff]   ;;  %v9216_v26 = vld [vmem:[%s10964_s6 + $0x26c] ss:$16 sps:$4 sm:$0xff]  }
  0xaf   : > { %6143 = vmatprep.subr.bf16.mxu0 %v9139_v29  ;;  %6758 = vmatprep.subr.bf16.mxu1 %v9141_v30  ;;  %v9211_v27 = vld [vmem:[%s10964_s6 + $0x260] ss:$16 sps:$4 sm:$0xff]   ;;  %v9214_v28 = vld [vmem:[%s10964_s6 + $0x268] ss:$16 sps:$4 sm:$0xff]   ;;  %v9219_v29 = vld [vmem:[%s10964_s6 + $0x284] ss:$16 sps:$4 sm:$0xff]  }
  0xb0   : > { %v9222_v30 = vld [vmem:[%s10964_s6 + $0x28c] ss:$16 sps:$4 sm:$0xff]   ;;  %v9231_v37 = vld [vmem:[%s10964_s6 + $0x2c4] ss:$16 sps:$4 sm:$0xff]   ;;  %v9229_v39 = vld [vmem:[%s10964_s6 + $0x2c0] ss:$16 sps:$4 sm:$0xff]  }
  0xb1   : > { %v9234_v38 = vld [vmem:[%s10964_s6 + $0x2cc] ss:$16 sps:$4 sm:$0xff]   ;;  %v9235_v43 = vld [vmem:[%s10964_s6 + $0x2e0] ss:$16 sps:$4 sm:$0xff]   ;;  %v9250_v55 = vld [vmem:[%s10964_s6 + $0x328] ss:$16 sps:$4 sm:$0xff]  }
  0xb2   : > { %6144 = vmatpush1.bf16.msra.mxu0 %v9143_v31  ;;  %6759 = vmatpush1.bf16.msra.mxu1 %v9144_v32  ;;  %v9217_v31 = vld [vmem:[%s10964_s6 + $0x280] ss:$16 sps:$4 sm:$0xff]   ;;  %v9220_v32 = vld [vmem:[%s10964_s6 + $0x288] ss:$16 sps:$4 sm:$0xff]   ;;  %v9264_v61 = vld [vmem:[%s10964_s6 + $0x36c] ss:$16 sps:$4 sm:$0xff]  }
  0xb3   : > { %6145 = vmatprep.subr.bf16.mxu0 %v9145_v33  ;;  %6760 = vmatprep.subr.bf16.mxu1 %v9147_v34  ;;  %v9225_v33 = vld [vmem:[%s10964_s6 + $0x2a4] ss:$16 sps:$4 sm:$0xff]   ;;  %v9228_v34 = vld [vmem:[%s10964_s6 + $0x2ac] ss:$16 sps:$4 sm:$0xff]   ;;  %v9256_v59 = vld [vmem:[%s10964_s6 + $0x348] ss:$16 sps:$4 sm:$0xff]  }
  0xb6   : > { %6146 = vmatpush1.bf16.msra.mxu0 %v9149_v35  ;;  %6761 = vmatpush1.bf16.msra.mxu1 %v9150_v36  ;;  %v9223_v35 = vld [vmem:[%s10964_s6 + $0x2a0] ss:$16 sps:$4 sm:$0xff]   ;;  %v9226_v36 = vld [vmem:[%s10964_s6 + $0x2a8] ss:$16 sps:$4 sm:$0xff]  }
  0xb7   : > { %6147 = vmatprep.subr.bf16.mxu0 %v9151_v40  ;;  %6762 = vmatprep.subr.bf16.mxu1 %v9153_v41  ;;  %v9232_v40 = vld [vmem:[%s10964_s6 + $0x2c8] ss:$16 sps:$4 sm:$0xff]   ;;  %v9237_v41 = vld [vmem:[%s10964_s6 + $0x2e4] ss:$16 sps:$4 sm:$0xff]  }
  0xba   : > { %6148 = vmatpush1.bf16.msra.mxu0 %v9155_v42  ;;  %6763 = vmatpush1.bf16.msra.mxu1 %v9156_v45  ;;  %v9240_v42 = vld [vmem:[%s10964_s6 + $0x2ec] ss:$16 sps:$4 sm:$0xff]   ;;  %v9238_v45 = vld [vmem:[%s10964_s6 + $0x2e8] ss:$16 sps:$4 sm:$0xff]  }
  0xbb   : > { %6149 = vmatprep.subr.bf16.mxu0 %v9157_v46  ;;  %6764 = vmatprep.subr.bf16.mxu1 %v9159_v47  ;;  %v9243_v46 = vld [vmem:[%s10964_s6 + $0x304] ss:$16 sps:$4 sm:$0xff]   ;;  %v9246_v47 = vld [vmem:[%s10964_s6 + $0x30c] ss:$16 sps:$4 sm:$0xff]  }
  0xbe   : > { %6150 = vmatpush1.bf16.msra.mxu0 %v9161_v48  ;;  %6765 = vmatpush1.bf16.msra.mxu1 %v9162_v49  ;;  %v9241_v48 = vld [vmem:[%s10964_s6 + $0x300] ss:$16 sps:$4 sm:$0xff]   ;;  %v9244_v49 = vld [vmem:[%s10964_s6 + $0x308] ss:$16 sps:$4 sm:$0xff]  }
  0xbf   : > { %6151 = vmatprep.subr.bf16.mxu0 %v9163_v51  ;;  %6766 = vmatprep.subr.bf16.mxu1 %v9165_v52  ;;  %v9249_v51 = vld [vmem:[%s10964_s6 + $0x324] ss:$16 sps:$4 sm:$0xff]   ;;  %v9252_v52 = vld [vmem:[%s10964_s6 + $0x32c] ss:$16 sps:$4 sm:$0xff]  }
  0xc2   : > { %6152 = vmatpush1.bf16.msra.mxu0 %v9167_v54  ;;  %6767 = vmatpush1.bf16.msra.mxu1 %v9168_v56  ;;  %v9247_v54 = vld [vmem:[%s10964_s6 + $0x320] ss:$16 sps:$4 sm:$0xff]   ;;  %v9255_v56 = vld [vmem:[%s10964_s6 + $0x344] ss:$16 sps:$4 sm:$0xff]  }
  0xc3   : > { %6153 = vmatprep.subr.bf16.mxu0 %v9169_v57  ;;  %6768 = vmatprep.subr.bf16.mxu1 %v9171_v58  ;;  %v9258_v57 = vld [vmem:[%s10964_s6 + $0x34c] ss:$16 sps:$4 sm:$0xff]   ;;  %v9253_v58 = vld [vmem:[%s10964_s6 + $0x340] ss:$16 sps:$4 sm:$0xff]  }
  0xc6   : > { %6154 = vmatpush1.bf16.msra.mxu0 %v9173_v60  ;;  %6769 = vmatpush1.bf16.msra.mxu1 %v9174_v62  ;;  %v9261_v60 = vld [vmem:[%s10964_s6 + $0x364] ss:$16 sps:$4 sm:$0xff]   ;;  %v9259_v62 = vld [vmem:[%s10964_s6 + $0x360] ss:$16 sps:$4 sm:$0xff]  }
  0xc7   : > { %6155 = vmatprep.subr.bf16.mxu0 %v9175_v63  ;;  %6770 = vmatprep.subr.bf16.mxu1 %v9177_v0  ;;  %v9262_v63 = vld [vmem:[%s10964_s6 + $0x368] ss:$16 sps:$4 sm:$0xff]   ;;  %v9267_v0 = vld [vmem:[%s10964_s6 + $0x384] ss:$16 sps:$4 sm:$0xff]  }
  0xca   : > { %6156 = vmatpush1.bf16.msra.mxu0 %v9179_v1  ;;  %6771 = vmatpush1.bf16.msra.mxu1 %v9180_v2  ;;  %v9270_v1 = vld [vmem:[%s10964_s6 + $0x38c] ss:$16 sps:$4 sm:$0xff]   ;;  %v9265_v2 = vld [vmem:[%s10964_s6 + $0x380] ss:$16 sps:$4 sm:$0xff]  }
  0xcb   : > { %6157 = vmatprep.subr.bf16.mxu0 %v9181_v3  ;;  %6772 = vmatprep.subr.bf16.mxu1 %v9183_v4  ;;  %v9268_v3 = vld [vmem:[%s10964_s6 + $0x388] ss:$16 sps:$4 sm:$0xff]   ;;  %v9273_v4 = vld [vmem:[%s10964_s6 + $0x3a4] ss:$16 sps:$4 sm:$0xff]  }
  0xce   : > { %6158 = vmatpush1.bf16.msra.mxu0 %v9185_v5  ;;  %6773 = vmatpush1.bf16.msra.mxu1 %v9186_v6  ;;  %v9276_v5 = vld [vmem:[%s10964_s6 + $0x3ac] ss:$16 sps:$4 sm:$0xff]   ;;  %v9271_v6 = vld [vmem:[%s10964_s6 + $0x3a0] ss:$16 sps:$4 sm:$0xff]  }
  0xcf   : > { %6159 = vmatprep.subr.bf16.mxu0 %v9187_v7  ;;  %6774 = vmatprep.subr.bf16.mxu1 %v9189_v8  ;;  %v9274_v7 = vld [vmem:[%s10964_s6 + $0x3a8] ss:$16 sps:$4 sm:$0xff]   ;;  %v9279_v8 = vld [vmem:[%s10964_s6 + $0x3c4] ss:$16 sps:$4 sm:$0xff]  }
  0xd2   : > { %6160 = vmatpush1.bf16.msra.mxu0 %v9191_v9  ;;  %6775 = vmatpush1.bf16.msra.mxu1 %v9192_v10  ;;  %v9282_v9 = vld [vmem:[%s10964_s6 + $0x3cc] ss:$16 sps:$4 sm:$0xff]   ;;  %v1274_v10 = vcombine.high %v11048_v53, %v11048_v53  ;;  %v9286_v53 = vld [vmem:[%s10964_s6 + $0x3e8] ss:$16 sps:$4 sm:$0xff]  }
  0xd3   : > { %6170 = vmatprep.subr.bf16.mxu0 %v9195_v11  ;;  %6785 = vmatprep.subr.bf16.mxu1 %v9198_v12  ;;  %v9277_v11 = vld [vmem:[%s10964_s6 + $0x3c0] ss:$16 sps:$4 sm:$0xff]   ;;  %v9280_v12 = vld [vmem:[%s10964_s6 + $0x3c8] ss:$16 sps:$4 sm:$0xff]  }
  0xd5   : > { %6162 = vmatmul.mubr.bf16.vlgmr.msra.gmra.mrb[0].mxu0 %v11075_v14  ;;  %6777 = vmatmul.mubr.bf16.vlgmr.msra.gmra.mrb[0].mxu1 %v11075_v14 }
  0xd6   : > { %6171 = vmatpush1.bf16.msra.mxu0 %v9193_v13  ;;  %6786 = vmatpush1.bf16.msra.mxu1 %v9196_v15  ;;  %v9285_v13 = vld [vmem:[%s10964_s6 + $0x3e4] ss:$16 sps:$4 sm:$0xff]   ;;  %v9288_v15 = vld [vmem:[%s10964_s6 + $0x3ec] ss:$16 sps:$4 sm:$0xff]  }
  0xd7   : > { %6172 = vmatprep.subr.bf16.mxu0 %v9201_v16  ;;  %6787 = vmatprep.subr.bf16.mxu1 %v9204_v17  ;;  %v11141_v16 = vrot.slane %v1274_v10, %v11043_v50  ;;  %v9283_v17 = vld [vmem:[%s10964_s6 + $0x3e0] ss:$16 sps:$4 sm:$0xff]   ;;  %v9364_v10 = vld [vmem:[%s10964_s6 + $0x588] ss:$16 sps:$4 sm:$0xff]  }
  0xd8   : > { %6202 = vmatprep.mubr.bf16.mxu0 %v1321_v18  ;;  %6817 = vmatprep.mubr.bf16.mxu1 %v1321_v18  ;;  %v9291_v18 = vld [vmem:[%s10964_s6 + $0x404] ss:$16 sps:$4 sm:$0xff]  }
  0xda   : > { %6173 = vmatpush1.bf16.msra.mxu0 %v9199_v19  ;;  %6788 = vmatpush1.bf16.msra.mxu1 %v9202_v20  ;;  %v9294_v19 = vld [vmem:[%s10964_s6 + $0x40c] ss:$16 sps:$4 sm:$0xff]   ;;  %v1290_v20 = vcombine.high %v11141_v16, %v11141_v16 }
  0xdb   : > { %6174 = vmatprep.subr.bf16.mxu0 %v9207_v21  ;;  %6789 = vmatprep.subr.bf16.mxu1 %v9210_v22  ;;  %v9289_v21 = vld [vmem:[%s10964_s6 + $0x400] ss:$16 sps:$4 sm:$0xff]   ;;  %v1319_v22 = vcombine.high %v11075_v14, %v11075_v14  ;;  %v9298_v14 = vld [vmem:[%s10964_s6 + $0x428] ss:$16 sps:$4 sm:$0xff]  }
  0xde   : > { %6175 = vmatpush1.bf16.msra.mxu0 %v9205_v23  ;;  %6790 = vmatpush1.bf16.msra.mxu1 %v9208_v24  ;;  %v9292_v23 = vld [vmem:[%s10964_s6 + $0x408] ss:$16 sps:$4 sm:$0xff]   ;;  %v9297_v24 = vld [vmem:[%s10964_s6 + $0x424] ss:$16 sps:$4 sm:$0xff]  }
  0xdf   : > { %6176 = vmatprep.subr.bf16.mxu0 %v9213_v25  ;;  %6791 = vmatprep.subr.bf16.mxu1 %v9216_v26  ;;  %v9300_v25 = vld [vmem:[%s10964_s6 + $0x42c] ss:$16 sps:$4 sm:$0xff]   ;;  %v11156_v26 = vrot.slane %v1290_v20, %v11043_v50  ;;  %v9381_v20 = vld [vmem:[%s10964_s6 + $0x5e4] ss:$16 sps:$4 sm:$0xff]  }
  0xe2   : > { %6177 = vmatpush1.bf16.msra.mxu0 %v9211_v27  ;;  %6792 = vmatpush1.bf16.msra.mxu1 %v9214_v28  ;;  %v9295_v27 = vld [vmem:[%s10964_s6 + $0x420] ss:$16 sps:$4 sm:$0xff]   ;;  %v9303_v28 = vld [vmem:[%s10964_s6 + $0x444] ss:$16 sps:$4 sm:$0xff]  }
  0xe3   : > { %6178 = vmatprep.subr.bf16.mxu0 %v9219_v29  ;;  %6793 = vmatprep.subr.bf16.mxu1 %v9222_v30  ;;  %v9306_v29 = vld [vmem:[%s10964_s6 + $0x44c] ss:$16 sps:$4 sm:$0xff]   ;;  %v9301_v30 = vld [vmem:[%s10964_s6 + $0x440] ss:$16 sps:$4 sm:$0xff]  }
  0xe6   : > { %6179 = vmatpush1.bf16.msra.mxu0 %v9217_v31  ;;  %6794 = vmatpush1.bf16.msra.mxu1 %v9220_v32  ;;  %v9304_v31 = vld [vmem:[%s10964_s6 + $0x448] ss:$16 sps:$4 sm:$0xff]   ;;  %v9309_v32 = vld [vmem:[%s10964_s6 + $0x464] ss:$16 sps:$4 sm:$0xff]  }
  0xe7   : > { %6180 = vmatprep.subr.bf16.mxu0 %v9225_v33  ;;  %6795 = vmatprep.subr.bf16.mxu1 %v9228_v34  ;;  %v9312_v33 = vld [vmem:[%s10964_s6 + $0x46c] ss:$16 sps:$4 sm:$0xff]   ;;  %v9307_v34 = vld [vmem:[%s10964_s6 + $0x460] ss:$16 sps:$4 sm:$0xff]  }
  0xea   : > { %6181 = vmatpush1.bf16.msra.mxu0 %v9223_v35  ;;  %6796 = vmatpush1.bf16.msra.mxu1 %v9226_v36  ;;  %v9310_v35 = vld [vmem:[%s10964_s6 + $0x468] ss:$16 sps:$4 sm:$0xff]   ;;  %v9315_v36 = vld [vmem:[%s10964_s6 + $0x484] ss:$16 sps:$4 sm:$0xff]  }
  0xeb   : > { %6182 = vmatprep.subr.bf16.mxu0 %v9231_v37  ;;  %6797 = vmatprep.subr.bf16.mxu1 %v9234_v38  ;;  %v9318_v37 = vld [vmem:[%s10964_s6 + $0x48c] ss:$16 sps:$4 sm:$0xff]   ;;  %v9313_v38 = vld [vmem:[%s10964_s6 + $0x480] ss:$16 sps:$4 sm:$0xff]  }
  0xee   : > { %6183 = vmatpush1.bf16.msra.mxu0 %v9229_v39  ;;  %6798 = vmatpush1.bf16.msra.mxu1 %v9232_v40  ;;  %v9316_v39 = vld [vmem:[%s10964_s6 + $0x488] ss:$16 sps:$4 sm:$0xff]   ;;  %v9321_v40 = vld [vmem:[%s10964_s6 + $0x4a4] ss:$16 sps:$4 sm:$0xff]  }
  0xef   : > { %6184 = vmatprep.subr.bf16.mxu0 %v9237_v41  ;;  %6799 = vmatprep.subr.bf16.mxu1 %v9240_v42  ;;  %v9324_v41 = vld [vmem:[%s10964_s6 + $0x4ac] ss:$16 sps:$4 sm:$0xff]   ;;  %v9319_v42 = vld [vmem:[%s10964_s6 + $0x4a0] ss:$16 sps:$4 sm:$0xff]  }
  0xf2   : > { %6185 = vmatpush1.bf16.msra.mxu0 %v9235_v43  ;;  %6800 = vmatpush1.bf16.msra.mxu1 %v9238_v45  ;;  %v9322_v43 = vld [vmem:[%s10964_s6 + $0x4a8] ss:$16 sps:$4 sm:$0xff]   ;;  %v9327_v45 = vld [vmem:[%s10964_s6 + $0x4c4] ss:$16 sps:$4 sm:$0xff]  }
  0xf3   : > { %6186 = vmatprep.subr.bf16.mxu0 %v9243_v46  ;;  %6801 = vmatprep.subr.bf16.mxu1 %v9246_v47  ;;  %v9330_v46 = vld [vmem:[%s10964_s6 + $0x4cc] ss:$16 sps:$4 sm:$0xff]   ;;  %v9325_v47 = vld [vmem:[%s10964_s6 + $0x4c0] ss:$16 sps:$4 sm:$0xff]  }
  0xf6   : > { %6187 = vmatpush1.bf16.msra.mxu0 %v9241_v48  ;;  %6802 = vmatpush1.bf16.msra.mxu1 %v9244_v49  ;;  %v9328_v48 = vld [vmem:[%s10964_s6 + $0x4c8] ss:$16 sps:$4 sm:$0xff]   ;;  %v9333_v49 = vld [vmem:[%s10964_s6 + $0x4e4] ss:$16 sps:$4 sm:$0xff]  }
  0xf7   : > { %6188 = vmatprep.subr.bf16.mxu0 %v9249_v51  ;;  %6803 = vmatprep.subr.bf16.mxu1 %v9252_v52  ;;  %v9336_v51 = vld [vmem:[%s10964_s6 + $0x4ec] ss:$16 sps:$4 sm:$0xff]   ;;  %v9331_v52 = vld [vmem:[%s10964_s6 + $0x4e0] ss:$16 sps:$4 sm:$0xff]  }
  0xfa   : > { %6189 = vmatpush1.bf16.msra.mxu0 %v9247_v54  ;;  %6804 = vmatpush1.bf16.msra.mxu1 %v9250_v55  ;;  %v9334_v54 = vld [vmem:[%s10964_s6 + $0x4e8] ss:$16 sps:$4 sm:$0xff]   ;;  %v9339_v55 = vld [vmem:[%s10964_s6 + $0x504] ss:$16 sps:$4 sm:$0xff]  }
  0xfb   : > { %6190 = vmatprep.subr.bf16.mxu0 %v9255_v56  ;;  %6805 = vmatprep.subr.bf16.mxu1 %v9258_v57  ;;  %v9342_v56 = vld [vmem:[%s10964_s6 + $0x50c] ss:$16 sps:$4 sm:$0xff]   ;;  %v9337_v57 = vld [vmem:[%s10964_s6 + $0x500] ss:$16 sps:$4 sm:$0xff]  }
  0xfe   : > { %6191 = vmatpush1.bf16.msra.mxu0 %v9253_v58  ;;  %6806 = vmatpush1.bf16.msra.mxu1 %v9256_v59  ;;  %v9340_v58 = vld [vmem:[%s10964_s6 + $0x508] ss:$16 sps:$4 sm:$0xff]   ;;  %v9345_v59 = vld [vmem:[%s10964_s6 + $0x524] ss:$16 sps:$4 sm:$0xff]  }
  0xff   : > { %6192 = vmatprep.subr.bf16.mxu0 %v9261_v60  ;;  %6807 = vmatprep.subr.bf16.mxu1 %v9264_v61  ;;  %v9348_v60 = vld [vmem:[%s10964_s6 + $0x52c] ss:$16 sps:$4 sm:$0xff]   ;;  %v9343_v61 = vld [vmem:[%s10964_s6 + $0x520] ss:$16 sps:$4 sm:$0xff]  }
 0x102   : > { %6193 = vmatpush1.bf16.msra.mxu0 %v9259_v62  ;;  %6808 = vmatpush1.bf16.msra.mxu1 %v9262_v63  ;;  %v9346_v62 = vld [vmem:[%s10964_s6 + $0x528] ss:$16 sps:$4 sm:$0xff]   ;;  %v9351_v63 = vld [vmem:[%s10964_s6 + $0x544] ss:$16 sps:$4 sm:$0xff]  }
 0x103   : > { %6194 = vmatprep.subr.bf16.mxu0 %v9267_v0  ;;  %6809 = vmatprep.subr.bf16.mxu1 %v9270_v1  ;;  %v9354_v0 = vld [vmem:[%s10964_s6 + $0x54c] ss:$16 sps:$4 sm:$0xff]   ;;  %v9349_v1 = vld [vmem:[%s10964_s6 + $0x540] ss:$16 sps:$4 sm:$0xff]  }
 0x106   : > { %6195 = vmatpush1.bf16.msra.mxu0 %v9265_v2  ;;  %6810 = vmatpush1.bf16.msra.mxu1 %v9268_v3  ;;  %v9352_v2 = vld [vmem:[%s10964_s6 + $0x548] ss:$16 sps:$4 sm:$0xff]   ;;  %v9357_v3 = vld [vmem:[%s10964_s6 + $0x564] ss:$16 sps:$4 sm:$0xff]  }
 0x107   : > { %6196 = vmatprep.subr.bf16.mxu0 %v9273_v4  ;;  %6811 = vmatprep.subr.bf16.mxu1 %v9276_v5  ;;  %v9360_v4 = vld [vmem:[%s10964_s6 + $0x56c] ss:$16 sps:$4 sm:$0xff]   ;;  %v9355_v5 = vld [vmem:[%s10964_s6 + $0x560] ss:$16 sps:$4 sm:$0xff]  }
 0x10a   : > { %6197 = vmatpush1.bf16.msra.mxu0 %v9271_v6  ;;  %6812 = vmatpush1.bf16.msra.mxu1 %v9274_v7  ;;  %v9358_v6 = vld [vmem:[%s10964_s6 + $0x568] ss:$16 sps:$4 sm:$0xff]   ;;  %v9363_v7 = vld [vmem:[%s10964_s6 + $0x584] ss:$16 sps:$4 sm:$0xff]  }
 0x10b   : > { %6198 = vmatprep.subr.bf16.mxu0 %v9279_v8  ;;  %6813 = vmatprep.subr.bf16.mxu1 %v9282_v9  ;;  %v9366_v8 = vld [vmem:[%s10964_s6 + $0x58c] ss:$16 sps:$4 sm:$0xff]   ;;  %v9361_v9 = vld [vmem:[%s10964_s6 + $0x580] ss:$16 sps:$4 sm:$0xff]  }
 0x10e   : > { %6199 = vmatpush1.bf16.msra.mxu0 %v9277_v11  ;;  %6814 = vmatpush1.bf16.msra.mxu1 %v9280_v12  ;;  %v9369_v11 = vld [vmem:[%s10964_s6 + $0x5a4] ss:$16 sps:$4 sm:$0xff]   ;;  %v9372_v12 = vld [vmem:[%s10964_s6 + $0x5ac] ss:$16 sps:$4 sm:$0xff]  }
 0x10f   : > { %6200 = vmatprep.subr.bf16.mxu0 %v9285_v13  ;;  %6815 = vmatprep.subr.bf16.mxu1 %v9288_v15  ;;  %v9367_v13 = vld [vmem:[%s10964_s6 + $0x5a0] ss:$16 sps:$4 sm:$0xff]   ;;  %v9370_v15 = vld [vmem:[%s10964_s6 + $0x5a8] ss:$16 sps:$4 sm:$0xff]  }
 0x112   : > { %6201 = vmatpush1.bf16.msra.mxu0 %v9283_v17  ;;  %6816 = vmatpush1.bf16.msra.mxu1 %v9286_v53  ;;  %v9375_v17 = vld [vmem:[%s10964_s6 + $0x5c4] ss:$16 sps:$4 sm:$0xff]   ;;  %v9378_v53 = vld [vmem:[%s10964_s6 + $0x5cc] ss:$16 sps:$4 sm:$0xff]  }
 0x113   : > { %6211 = vmatprep.subr.bf16.mxu0 %v9291_v18  ;;  %6826 = vmatprep.subr.bf16.mxu1 %v9294_v19  ;;  %v9373_v18 = vld [vmem:[%s10964_s6 + $0x5c0] ss:$16 sps:$4 sm:$0xff]   ;;  %v9376_v19 = vld [vmem:[%s10964_s6 + $0x5c8] ss:$16 sps:$4 sm:$0xff]  }
 0x115   : > { %6203 = vmatmul.mubr.bf16.vlgmr.msra.gmra.mrb[0].mxu0 %v1319_v22  ;;  %6818 = vmatmul.mubr.bf16.vlgmr.msra.gmra.mrb[0].mxu1 %v1319_v22  ;;  %v9379_v22 = vld [vmem:[%s10964_s6 + $0x5e0] ss:$16 sps:$4 sm:$0xff]  }
 0x116   : > { %6212 = vmatpush1.bf16.msra.mxu0 %v9289_v21  ;;  %6827 = vmatpush1.bf16.msra.mxu1 %v9292_v23  ;;  %v9384_v21 = vld [vmem:[%s10964_s6 + $0x5ec] ss:$16 sps:$4 sm:$0xff]   ;;  %v9382_v23 = vld [vmem:[%s10964_s6 + $0x5e8] ss:$16 sps:$4 sm:$0xff]  }
 0x117   : > { %6213 = vmatprep.subr.bf16.mxu0 %v9297_v24  ;;  %6828 = vmatprep.subr.bf16.mxu1 %v9300_v25  ;;  %v9388_v24 = vld [vmem:[%s10964_s6 + $0x604] ss:$16 sps:$4 sm:$0xff]   ;;  %v9391_v25 = vld [vmem:[%s10964_s6 + $0x60c] ss:$16 sps:$4 sm:$0xff]  }
 0x118   : > { %6243 = vmatprep.mubr.bf16.mxu0 %v11156_v26  ;;  %6858 = vmatprep.mubr.bf16.mxu1 %v11156_v26 }
 0x11a   : > { %6214 = vmatpush1.bf16.msra.mxu0 %v9295_v27  ;;  %6829 = vmatpush1.bf16.msra.mxu1 %v9298_v14  ;;  %v9386_v27 = vld [vmem:[%s10964_s6 + $0x600] ss:$16 sps:$4 sm:$0xff]   ;;  %v11223_v14 = vrot.slane %v11141_v16, %v11043_v50 }
 0x11b   : > { %6215 = vmatprep.subr.bf16.mxu0 %v9303_v28  ;;  %6830 = vmatprep.subr.bf16.mxu1 %v9306_v29  ;;  %v9389_v28 = vld [vmem:[%s10964_s6 + $0x608] ss:$16 sps:$4 sm:$0xff]   ;;  %v9394_v29 = vld [vmem:[%s10964_s6 + $0x624] ss:$16 sps:$4 sm:$0xff]   ;;  %v9392_v16 = vld [vmem:[%s10964_s6 + $0x620] ss:$16 sps:$4 sm:$0xff]  }
 0x11e   : > { %6216 = vmatpush1.bf16.msra.mxu0 %v9301_v30  ;;  %6831 = vmatpush1.bf16.msra.mxu1 %v9304_v31  ;;  %v9397_v30 = vld [vmem:[%s10964_s6 + $0x62c] ss:$16 sps:$4 sm:$0xff]   ;;  %v1322_v31 = vcombine.high %v11156_v26, %v11156_v26  ;;  %v9398_v26 = vld [vmem:[%s10964_s6 + $0x640] ss:$16 sps:$4 sm:$0xff]  }
 0x11f   : > { %6217 = vmatprep.subr.bf16.mxu0 %v9309_v32  ;;  %6832 = vmatprep.subr.bf16.mxu1 %v9312_v33  ;;  %v9395_v32 = vld [vmem:[%s10964_s6 + $0x628] ss:$16 sps:$4 sm:$0xff]   ;;  %v9400_v33 = vld [vmem:[%s10964_s6 + $0x644] ss:$16 sps:$4 sm:$0xff]  }
 0x122   : > { %6218 = vmatpush1.bf16.msra.mxu0 %v9307_v34  ;;  %6833 = vmatpush1.bf16.msra.mxu1 %v9310_v35  ;;  %v9403_v34 = vld [vmem:[%s10964_s6 + $0x64c] ss:$16 sps:$4 sm:$0xff]   ;;  %v9401_v35 = vld [vmem:[%s10964_s6 + $0x648] ss:$16 sps:$4 sm:$0xff]  }
 0x123   : > { %6219 = vmatprep.subr.bf16.mxu0 %v9315_v36  ;;  %6834 = vmatprep.subr.bf16.mxu1 %v9318_v37  ;;  %v9406_v36 = vld [vmem:[%s10964_s6 + $0x664] ss:$16 sps:$4 sm:$0xff]   ;;  %v9409_v37 = vld [vmem:[%s10964_s6 + $0x66c] ss:$16 sps:$4 sm:$0xff]  }
 0x126   : > { %6220 = vmatpush1.bf16.msra.mxu0 %v9313_v38  ;;  %6835 = vmatpush1.bf16.msra.mxu1 %v9316_v39  ;;  %v9404_v38 = vld [vmem:[%s10964_s6 + $0x660] ss:$16 sps:$4 sm:$0xff]   ;;  %v9407_v39 = vld [vmem:[%s10964_s6 + $0x668] ss:$16 sps:$4 sm:$0xff]  }
 0x127   : > { %6221 = vmatprep.subr.bf16.mxu0 %v9321_v40  ;;  %6836 = vmatprep.subr.bf16.mxu1 %v9324_v41  ;;  %v9412_v40 = vld [vmem:[%s10964_s6 + $0x684] ss:$16 sps:$4 sm:$0xff]   ;;  %v9415_v41 = vld [vmem:[%s10964_s6 + $0x68c] ss:$16 sps:$4 sm:$0xff]  }
 0x12a   : > { %6222 = vmatpush1.bf16.msra.mxu0 %v9319_v42  ;;  %6837 = vmatpush1.bf16.msra.mxu1 %v9322_v43  ;;  %v9410_v42 = vld [vmem:[%s10964_s6 + $0x680] ss:$16 sps:$4 sm:$0xff]   ;;  %v9413_v43 = vld [vmem:[%s10964_s6 + $0x688] ss:$16 sps:$4 sm:$0xff]  }
 0x12b   : > { %6223 = vmatprep.subr.bf16.mxu0 %v9327_v45  ;;  %6838 = vmatprep.subr.bf16.mxu1 %v9330_v46  ;;  %v9418_v45 = vld [vmem:[%s10964_s6 + $0x6a4] ss:$16 sps:$4 sm:$0xff]   ;;  %v9421_v46 = vld [vmem:[%s10964_s6 + $0x6ac] ss:$16 sps:$4 sm:$0xff]  }
 0x12e   : > { %6224 = vmatpush1.bf16.msra.mxu0 %v9325_v47  ;;  %6839 = vmatpush1.bf16.msra.mxu1 %v9328_v48  ;;  %v9416_v47 = vld [vmem:[%s10964_s6 + $0x6a0] ss:$16 sps:$4 sm:$0xff]   ;;  %v9419_v48 = vld [vmem:[%s10964_s6 + $0x6a8] ss:$16 sps:$4 sm:$0xff]  }
 0x12f   : > { %6225 = vmatprep.subr.bf16.mxu0 %v9333_v49  ;;  %6840 = vmatprep.subr.bf16.mxu1 %v9336_v51  ;;  %v9424_v49 = vld [vmem:[%s10964_s6 + $0x6c4] ss:$16 sps:$4 sm:$0xff]   ;;  %v9427_v51 = vld [vmem:[%s10964_s6 + $0x6cc] ss:$16 sps:$4 sm:$0xff]  }
 0x132   : > { %6226 = vmatpush1.bf16.msra.mxu0 %v9331_v52  ;;  %6841 = vmatpush1.bf16.msra.mxu1 %v9334_v54  ;;  %v9422_v52 = vld [vmem:[%s10964_s6 + $0x6c0] ss:$16 sps:$4 sm:$0xff]   ;;  %v9425_v54 = vld [vmem:[%s10964_s6 + $0x6c8] ss:$16 sps:$4 sm:$0xff]  }
 0x133   : > { %6227 = vmatprep.subr.bf16.mxu0 %v9339_v55  ;;  %6842 = vmatprep.subr.bf16.mxu1 %v9342_v56  ;;  %v9430_v55 = vld [vmem:[%s10964_s6 + $0x6e4] ss:$16 sps:$4 sm:$0xff]   ;;  %v9433_v56 = vld [vmem:[%s10964_s6 + $0x6ec] ss:$16 sps:$4 sm:$0xff]  }
 0x136   : > { %6228 = vmatpush1.bf16.msra.mxu0 %v9337_v57  ;;  %6843 = vmatpush1.bf16.msra.mxu1 %v9340_v58  ;;  %v9428_v57 = vld [vmem:[%s10964_s6 + $0x6e0] ss:$16 sps:$4 sm:$0xff]   ;;  %v9431_v58 = vld [vmem:[%s10964_s6 + $0x6e8] ss:$16 sps:$4 sm:$0xff]  }
 0x137   : > { %6229 = vmatprep.subr.bf16.mxu0 %v9345_v59  ;;  %6844 = vmatprep.subr.bf16.mxu1 %v9348_v60  ;;  %v9436_v59 = vld [vmem:[%s10964_s6 + $0x704] ss:$16 sps:$4 sm:$0xff]   ;;  %v9439_v60 = vld [vmem:[%s10964_s6 + $0x70c] ss:$16 sps:$4 sm:$0xff]  }
 0x13a   : > { %6230 = vmatpush1.bf16.msra.mxu0 %v9343_v61  ;;  %6845 = vmatpush1.bf16.msra.mxu1 %v9346_v62  ;;  %v9434_v61 = vld [vmem:[%s10964_s6 + $0x700] ss:$16 sps:$4 sm:$0xff]   ;;  %v9437_v62 = vld [vmem:[%s10964_s6 + $0x708] ss:$16 sps:$4 sm:$0xff]  }
 0x13b   : > { %6231 = vmatprep.subr.bf16.mxu0 %v9351_v63  ;;  %6846 = vmatprep.subr.bf16.mxu1 %v9354_v0  ;;  %v9442_v63 = vld [vmem:[%s10964_s6 + $0x724] ss:$16 sps:$4 sm:$0xff]   ;;  %v9445_v0 = vld [vmem:[%s10964_s6 + $0x72c] ss:$16 sps:$4 sm:$0xff]  }
 0x13e   : > { %6232 = vmatpush1.bf16.msra.mxu0 %v9349_v1  ;;  %6847 = vmatpush1.bf16.msra.mxu1 %v9352_v2  ;;  %v9440_v1 = vld [vmem:[%s10964_s6 + $0x720] ss:$16 sps:$4 sm:$0xff]   ;;  %v9443_v2 = vld [vmem:[%s10964_s6 + $0x728] ss:$16 sps:$4 sm:$0xff]  }
 0x13f   : > { %6233 = vmatprep.subr.bf16.mxu0 %v9357_v3  ;;  %6848 = vmatprep.subr.bf16.mxu1 %v9360_v4  ;;  %v9448_v3 = vld [vmem:[%s10964_s6 + $0x744] ss:$16 sps:$4 sm:$0xff]   ;;  %v9451_v4 = vld [vmem:[%s10964_s6 + $0x74c] ss:$16 sps:$4 sm:$0xff]  }
 0x142   : > { %6234 = vmatpush1.bf16.msra.mxu0 %v9355_v5  ;;  %6849 = vmatpush1.bf16.msra.mxu1 %v9358_v6  ;;  %v9446_v5 = vld [vmem:[%s10964_s6 + $0x740] ss:$16 sps:$4 sm:$0xff]   ;;  %v9449_v6 = vld [vmem:[%s10964_s6 + $0x748] ss:$16 sps:$4 sm:$0xff]  }
 0x143   : > { %6235 = vmatprep.subr.bf16.mxu0 %v9363_v7  ;;  %6850 = vmatprep.subr.bf16.mxu1 %v9366_v8  ;;  %v9454_v7 = vld [vmem:[%s10964_s6 + $0x764] ss:$16 sps:$4 sm:$0xff]   ;;  %v9457_v8 = vld [vmem:[%s10964_s6 + $0x76c] ss:$16 sps:$4 sm:$0xff]  }
 0x146   : > { %6236 = vmatpush1.bf16.msra.mxu0 %v9361_v9  ;;  %6851 = vmatpush1.bf16.msra.mxu1 %v9364_v10  ;;  %v9452_v9 = vld [vmem:[%s10964_s6 + $0x760] ss:$16 sps:$4 sm:$0xff]   ;;  %v9455_v10 = vld [vmem:[%s10964_s6 + $0x768] ss:$16 sps:$4 sm:$0xff]  }
 0x147   : > { %6237 = vmatprep.subr.bf16.mxu0 %v9369_v11  ;;  %6852 = vmatprep.subr.bf16.mxu1 %v9372_v12  ;;  %v9460_v11 = vld [vmem:[%s10964_s6 + $0x784] ss:$16 sps:$4 sm:$0xff]   ;;  %v9463_v12 = vld [vmem:[%s10964_s6 + $0x78c] ss:$16 sps:$4 sm:$0xff]  }
 0x14a   : > { %6238 = vmatpush1.bf16.msra.mxu0 %v9367_v13  ;;  %6853 = vmatpush1.bf16.msra.mxu1 %v9370_v15  ;;  %v9458_v13 = vld [vmem:[%s10964_s6 + $0x780] ss:$16 sps:$4 sm:$0xff]   ;;  %v9461_v15 = vld [vmem:[%s10964_s6 + $0x788] ss:$16 sps:$4 sm:$0xff]  }
 0x14b   : > { %6239 = vmatprep.subr.bf16.mxu0 %v9375_v17  ;;  %6854 = vmatprep.subr.bf16.mxu1 %v9378_v53  ;;  %v9466_v17 = vld [vmem:[%s10964_s6 + $0x7a4] ss:$16 sps:$4 sm:$0xff]   ;;  %v9469_v53 = vld [vmem:[%s10964_s6 + $0x7ac] ss:$16 sps:$4 sm:$0xff]  }
 0x14e   : > { %6240 = vmatpush1.bf16.msra.mxu0 %v9373_v18  ;;  %6855 = vmatpush1.bf16.msra.mxu1 %v9376_v19  ;;  %v9464_v18 = vld [vmem:[%s10964_s6 + $0x7a0] ss:$16 sps:$4 sm:$0xff]   ;;  %v9467_v19 = vld [vmem:[%s10964_s6 + $0x7a8] ss:$16 sps:$4 sm:$0xff]  }
 0x14f   : > { %6241 = vmatprep.subr.bf16.mxu0 %v9381_v20  ;;  %6856 = vmatprep.subr.bf16.mxu1 %v9384_v21  ;;  %v9472_v20 = vld [vmem:[%s10964_s6 + $0x7c4] ss:$16 sps:$4 sm:$0xff]   ;;  %v9475_v21 = vld [vmem:[%s10964_s6 + $0x7cc] ss:$16 sps:$4 sm:$0xff]  }
 0x152   : > { %6242 = vmatpush1.bf16.msra.mxu0 %v9379_v22  ;;  %6857 = vmatpush1.bf16.msra.mxu1 %v9382_v23  ;;  %v11285_v22 = vld.sshfl [vmem:[%s10986_s2 + $0x8] sm:$0xff pattern:$0x75316420] }
 0x153   : > { %6252 = vmatprep.subr.bf16.mxu0 %v9388_v24  ;;  %6867 = vmatprep.subr.bf16.mxu1 %v9391_v25  ;;  %v9470_v23 = vld [vmem:[%s10964_s6 + $0x7c0] ss:$16 sps:$4 sm:$0xff]   ;;  %v9473_v24 = vld [vmem:[%s10964_s6 + $0x7c8] ss:$16 sps:$4 sm:$0xff]   ;;  %v9478_v25 = vld [vmem:[%s10964_s6 + $0x7e4] ss:$16 sps:$4 sm:$0xff]  }
 0x155   : > { %6244 = vmatmul.mubr.bf16.vlgmr.msra.gmra.mrb[0].mxu0 %v11223_v14  ;;  %6859 = vmatmul.mubr.bf16.vlgmr.msra.gmra.mrb[0].mxu1 %v11223_v14 }
 0x156   : > { %6253 = vmatpush1.bf16.msra.mxu0 %v9386_v27  ;;  %6868 = vmatpush1.bf16.msra.mxu1 %v9389_v28  ;;  %v9481_v27 = vld [vmem:[%s10964_s6 + $0x7ec] ss:$16 sps:$4 sm:$0xff]   ;;  %v9476_v28 = vld [vmem:[%s10964_s6 + $0x7e0] ss:$16 sps:$4 sm:$0xff]  }
 0x157   : > { %6254 = vmatprep.subr.bf16.mxu0 %v9394_v29  ;;  %6869 = vmatprep.subr.bf16.mxu1 %v9397_v30  ;;  %v9479_v29 = vld [vmem:[%s10964_s6 + $0x7e8] ss:$16 sps:$4 sm:$0xff]   ;;  %v9484_v30 = vld [vmem:[%s10964_s6 + $0x804] ss:$16 sps:$4 sm:$0xff]  }
 0x158   : > { %6284 = vmatprep.mubr.bf16.mxu0 %v1322_v31  ;;  %6899 = vmatprep.mubr.bf16.mxu1 %v1322_v31  ;;  %v9487_v31 = vld [vmem:[%s10964_s6 + $0x80c] ss:$16 sps:$4 sm:$0xff]  }
 0x15a   : > { %6255 = vmatpush1.bf16.msra.mxu0 %v9392_v16  ;;  %6870 = vmatpush1.bf16.msra.mxu1 %v9395_v32  ;;  %v1338_v16 = vcombine.high %v11285_v22, %v11285_v22  ;;  %v1320_v32 = vcombine.high %v11223_v14, %v11223_v14  ;;  %v9488_v14 = vld [vmem:[%s10964_s6 + $0x820] ss:$16 sps:$4 sm:$0xff]  }
 0x15b   : > { %6256 = vmatprep.subr.bf16.mxu0 %v9400_v33  ;;  %6871 = vmatprep.subr.bf16.mxu1 %v9403_v34  ;;  %v9482_v33 = vld [vmem:[%s10964_s6 + $0x800] ss:$16 sps:$4 sm:$0xff]   ;;  %v9485_v34 = vld [vmem:[%s10964_s6 + $0x808] ss:$16 sps:$4 sm:$0xff]  }
 0x15e   : > { %6257 = vmatpush1.bf16.msra.mxu0 %v9398_v26  ;;  %6872 = vmatpush1.bf16.msra.mxu1 %v9401_v35  ;;  %v9490_v26 = vld [vmem:[%s10964_s6 + $0x824] ss:$16 sps:$4 sm:$0xff]   ;;  %v9493_v35 = vld [vmem:[%s10964_s6 + $0x82c] ss:$16 sps:$4 sm:$0xff]  }
 0x15f   : > { %6258 = vmatprep.subr.bf16.mxu0 %v9406_v36  ;;  %6873 = vmatprep.subr.bf16.mxu1 %v9409_v37  ;;  %v11304_v36 = vrot.slane %v1338_v16, %v11043_v50  ;;  %v9491_v37 = vld [vmem:[%s10964_s6 + $0x828] ss:$16 sps:$4 sm:$0xff]   ;;  %v9574_v16 = vld [vmem:[%s10964_s6 + $0x9e4] ss:$16 sps:$4 sm:$0xff]  }
 0x162   : > { %6259 = vmatpush1.bf16.msra.mxu0 %v9404_v38  ;;  %6874 = vmatpush1.bf16.msra.mxu1 %v9407_v39  ;;  %v9496_v38 = vld [vmem:[%s10964_s6 + $0x844] ss:$16 sps:$4 sm:$0xff]   ;;  %v9499_v39 = vld [vmem:[%s10964_s6 + $0x84c] ss:$16 sps:$4 sm:$0xff]  }
 0x163   : > { %6260 = vmatprep.subr.bf16.mxu0 %v9412_v40  ;;  %6875 = vmatprep.subr.bf16.mxu1 %v9415_v41  ;;  %v9494_v40 = vld [vmem:[%s10964_s6 + $0x840] ss:$16 sps:$4 sm:$0xff]   ;;  %v9497_v41 = vld [vmem:[%s10964_s6 + $0x848] ss:$16 sps:$4 sm:$0xff]  }
 0x166   : > { %6261 = vmatpush1.bf16.msra.mxu0 %v9410_v42  ;;  %6876 = vmatpush1.bf16.msra.mxu1 %v9413_v43  ;;  %v9502_v42 = vld [vmem:[%s10964_s6 + $0x864] ss:$16 sps:$4 sm:$0xff]   ;;  %v9505_v43 = vld [vmem:[%s10964_s6 + $0x86c] ss:$16 sps:$4 sm:$0xff]  }
 0x167   : > { %6262 = vmatprep.subr.bf16.mxu0 %v9418_v45  ;;  %6877 = vmatprep.subr.bf16.mxu1 %v9421_v46  ;;  %v9500_v45 = vld [vmem:[%s10964_s6 + $0x860] ss:$16 sps:$4 sm:$0xff]   ;;  %v9503_v46 = vld [vmem:[%s10964_s6 + $0x868] ss:$16 sps:$4 sm:$0xff]  }
 0x16a   : > { %6263 = vmatpush1.bf16.msra.mxu0 %v9416_v47  ;;  %6878 = vmatpush1.bf16.msra.mxu1 %v9419_v48  ;;  %v9508_v47 = vld [vmem:[%s10964_s6 + $0x884] ss:$16 sps:$4 sm:$0xff]   ;;  %v9511_v48 = vld [vmem:[%s10964_s6 + $0x88c] ss:$16 sps:$4 sm:$0xff]  }
 0x16b   : > { %6264 = vmatprep.subr.bf16.mxu0 %v9424_v49  ;;  %6879 = vmatprep.subr.bf16.mxu1 %v9427_v51  ;;  %v9506_v49 = vld [vmem:[%s10964_s6 + $0x880] ss:$16 sps:$4 sm:$0xff]   ;;  %v9509_v51 = vld [vmem:[%s10964_s6 + $0x888] ss:$16 sps:$4 sm:$0xff]  }
 0x16e   : > { %6265 = vmatpush1.bf16.msra.mxu0 %v9422_v52  ;;  %6880 = vmatpush1.bf16.msra.mxu1 %v9425_v54  ;;  %v9514_v52 = vld [vmem:[%s10964_s6 + $0x8a4] ss:$16 sps:$4 sm:$0xff]   ;;  %v9517_v54 = vld [vmem:[%s10964_s6 + $0x8ac] ss:$16 sps:$4 sm:$0xff]  }
 0x16f   : > { %6266 = vmatprep.subr.bf16.mxu0 %v9430_v55  ;;  %6881 = vmatprep.subr.bf16.mxu1 %v9433_v56  ;;  %v9512_v55 = vld [vmem:[%s10964_s6 + $0x8a0] ss:$16 sps:$4 sm:$0xff]   ;;  %v9515_v56 = vld [vmem:[%s10964_s6 + $0x8a8] ss:$16 sps:$4 sm:$0xff]  }
 0x172   : > { %6267 = vmatpush1.bf16.msra.mxu0 %v9428_v57  ;;  %6882 = vmatpush1.bf16.msra.mxu1 %v9431_v58  ;;  %v9520_v57 = vld [vmem:[%s10964_s6 + $0x8c4] ss:$16 sps:$4 sm:$0xff]   ;;  %v9523_v58 = vld [vmem:[%s10964_s6 + $0x8cc] ss:$16 sps:$4 sm:$0xff]  }
 0x173   : > { %6268 = vmatprep.subr.bf16.mxu0 %v9436_v59  ;;  %6883 = vmatprep.subr.bf16.mxu1 %v9439_v60  ;;  %v9518_v59 = vld [vmem:[%s10964_s6 + $0x8c0] ss:$16 sps:$4 sm:$0xff]   ;;  %v9521_v60 = vld [vmem:[%s10964_s6 + $0x8c8] ss:$16 sps:$4 sm:$0xff]  }
 0x176   : > { %6269 = vmatpush1.bf16.msra.mxu0 %v9434_v61  ;;  %6884 = vmatpush1.bf16.msra.mxu1 %v9437_v62  ;;  %v9526_v61 = vld [vmem:[%s10964_s6 + $0x8e4] ss:$16 sps:$4 sm:$0xff]   ;;  %v9529_v62 = vld [vmem:[%s10964_s6 + $0x8ec] ss:$16 sps:$4 sm:$0xff]  }
 0x177   : > { %6270 = vmatprep.subr.bf16.mxu0 %v9442_v63  ;;  %6885 = vmatprep.subr.bf16.mxu1 %v9445_v0  ;;  %v9524_v63 = vld [vmem:[%s10964_s6 + $0x8e0] ss:$16 sps:$4 sm:$0xff]   ;;  %v9527_v0 = vld [vmem:[%s10964_s6 + $0x8e8] ss:$16 sps:$4 sm:$0xff]  }
 0x17a   : > { %6271 = vmatpush1.bf16.msra.mxu0 %v9440_v1  ;;  %6886 = vmatpush1.bf16.msra.mxu1 %v9443_v2  ;;  %v9532_v1 = vld [vmem:[%s10964_s6 + $0x904] ss:$16 sps:$4 sm:$0xff]   ;;  %v9535_v2 = vld [vmem:[%s10964_s6 + $0x90c] ss:$16 sps:$4 sm:$0xff]  }
 0x17b   : > { %6272 = vmatprep.subr.bf16.mxu0 %v9448_v3  ;;  %6887 = vmatprep.subr.bf16.mxu1 %v9451_v4  ;;  %v9530_v3 = vld [vmem:[%s10964_s6 + $0x900] ss:$16 sps:$4 sm:$0xff]   ;;  %v9533_v4 = vld [vmem:[%s10964_s6 + $0x908] ss:$16 sps:$4 sm:$0xff]  }
 0x17e   : > { %6273 = vmatpush1.bf16.msra.mxu0 %v9446_v5  ;;  %6888 = vmatpush1.bf16.msra.mxu1 %v9449_v6  ;;  %v9538_v5 = vld [vmem:[%s10964_s6 + $0x924] ss:$16 sps:$4 sm:$0xff]   ;;  %v9541_v6 = vld [vmem:[%s10964_s6 + $0x92c] ss:$16 sps:$4 sm:$0xff]  }
 0x17f   : > { %6274 = vmatprep.subr.bf16.mxu0 %v9454_v7  ;;  %6889 = vmatprep.subr.bf16.mxu1 %v9457_v8  ;;  %v9536_v7 = vld [vmem:[%s10964_s6 + $0x920] ss:$16 sps:$4 sm:$0xff]   ;;  %v9539_v8 = vld [vmem:[%s10964_s6 + $0x928] ss:$16 sps:$4 sm:$0xff]  }
 0x182   : > { %6275 = vmatpush1.bf16.msra.mxu0 %v9452_v9  ;;  %6890 = vmatpush1.bf16.msra.mxu1 %v9455_v10  ;;  %v9544_v9 = vld [vmem:[%s10964_s6 + $0x944] ss:$16 sps:$4 sm:$0xff]   ;;  %v9547_v10 = vld [vmem:[%s10964_s6 + $0x94c] ss:$16 sps:$4 sm:$0xff]  }
 0x183   : > { %6276 = vmatprep.subr.bf16.mxu0 %v9460_v11  ;;  %6891 = vmatprep.subr.bf16.mxu1 %v9463_v12  ;;  %v9542_v11 = vld [vmem:[%s10964_s6 + $0x940] ss:$16 sps:$4 sm:$0xff]   ;;  %v9545_v12 = vld [vmem:[%s10964_s6 + $0x948] ss:$16 sps:$4 sm:$0xff]  }
 0x186   : > { %6277 = vmatpush1.bf16.msra.mxu0 %v9458_v13  ;;  %6892 = vmatpush1.bf16.msra.mxu1 %v9461_v15  ;;  %v9550_v13 = vld [vmem:[%s10964_s6 + $0x964] ss:$16 sps:$4 sm:$0xff]   ;;  %v9553_v15 = vld [vmem:[%s10964_s6 + $0x96c] ss:$16 sps:$4 sm:$0xff]  }
 0x187   : > { %6278 = vmatprep.subr.bf16.mxu0 %v9466_v17  ;;  %6893 = vmatprep.subr.bf16.mxu1 %v9469_v53  ;;  %v9548_v17 = vld [vmem:[%s10964_s6 + $0x960] ss:$16 sps:$4 sm:$0xff]   ;;  %v9551_v53 = vld [vmem:[%s10964_s6 + $0x968] ss:$16 sps:$4 sm:$0xff]  }
 0x18a   : > { %6279 = vmatpush1.bf16.msra.mxu0 %v9464_v18  ;;  %6894 = vmatpush1.bf16.msra.mxu1 %v9467_v19  ;;  %v9556_v18 = vld [vmem:[%s10964_s6 + $0x984] ss:$16 sps:$4 sm:$0xff]   ;;  %v9559_v19 = vld [vmem:[%s10964_s6 + $0x98c] ss:$16 sps:$4 sm:$0xff]  }
 0x18b   : > { %6280 = vmatprep.subr.bf16.mxu0 %v9472_v20  ;;  %6895 = vmatprep.subr.bf16.mxu1 %v9475_v21  ;;  %v9554_v20 = vld [vmem:[%s10964_s6 + $0x980] ss:$16 sps:$4 sm:$0xff]   ;;  %v9557_v21 = vld [vmem:[%s10964_s6 + $0x988] ss:$16 sps:$4 sm:$0xff]  }
 0x18e   : > { %6281 = vmatpush1.bf16.msra.mxu0 %v9470_v23  ;;  %6896 = vmatpush1.bf16.msra.mxu1 %v9473_v24  ;;  %v9562_v23 = vld [vmem:[%s10964_s6 + $0x9a4] ss:$16 sps:$4 sm:$0xff]   ;;  %v9565_v24 = vld [vmem:[%s10964_s6 + $0x9ac] ss:$16 sps:$4 sm:$0xff]  }
 0x18f   : > { %6282 = vmatprep.subr.bf16.mxu0 %v9478_v25  ;;  %6897 = vmatprep.subr.bf16.mxu1 %v9481_v27  ;;  %v9560_v25 = vld [vmem:[%s10964_s6 + $0x9a0] ss:$16 sps:$4 sm:$0xff]   ;;  %v9563_v27 = vld [vmem:[%s10964_s6 + $0x9a8] ss:$16 sps:$4 sm:$0xff]  }
 0x192   : > { %6283 = vmatpush1.bf16.msra.mxu0 %v9476_v28  ;;  %6898 = vmatpush1.bf16.msra.mxu1 %v9479_v29  ;;  %v9568_v28 = vld [vmem:[%s10964_s6 + $0x9c4] ss:$16 sps:$4 sm:$0xff]   ;;  %v9571_v29 = vld [vmem:[%s10964_s6 + $0x9cc] ss:$16 sps:$4 sm:$0xff]  }
 0x193   : > { %6293 = vmatprep.subr.bf16.mxu0 %v9484_v30  ;;  %6908 = vmatprep.subr.bf16.mxu1 %v9487_v31  ;;  %v9566_v30 = vld [vmem:[%s10964_s6 + $0x9c0] ss:$16 sps:$4 sm:$0xff]   ;;  %v9569_v31 = vld [vmem:[%s10964_s6 + $0x9c8] ss:$16 sps:$4 sm:$0xff]  }
 0x195   : > { %6285 = vmatmul.mubr.bf16.vlgmr.msra.gmra.mrb[0].mxu0 %v1320_v32  ;;  %6900 = vmatmul.mubr.bf16.vlgmr.msra.gmra.mrb[0].mxu1 %v1320_v32  ;;  %v9577_v32 = vld [vmem:[%s10964_s6 + $0x9ec] ss:$16 sps:$4 sm:$0xff]  }
 0x196   : > { %6294 = vmatpush1.bf16.msra.mxu0 %v9482_v33  ;;  %6909 = vmatpush1.bf16.msra.mxu1 %v9485_v34  ;;  %v9572_v33 = vld [vmem:[%s10964_s6 + $0x9e0] ss:$16 sps:$4 sm:$0xff]   ;;  %v9575_v34 = vld [vmem:[%s10964_s6 + $0x9e8] ss:$16 sps:$4 sm:$0xff]  }
 0x197   : > { %6295 = vmatprep.subr.bf16.mxu0 %v9490_v26  ;;  %6910 = vmatprep.subr.bf16.mxu1 %v9493_v35  ;;  %v9580_v26 = vld [vmem:[%s10964_s6 + $0xa04] ss:$16 sps:$4 sm:$0xff]   ;;  %v9583_v35 = vld [vmem:[%s10964_s6 + $0xa0c] ss:$16 sps:$4 sm:$0xff]  }
 0x198   : > { %6325 = vmatprep.mubr.bf16.mxu0 %v11304_v36  ;;  %6940 = vmatprep.mubr.bf16.mxu1 %v11304_v36 }
 0x19a   : > { %6296 = vmatpush1.bf16.msra.mxu0 %v9488_v14  ;;  %6911 = vmatpush1.bf16.msra.mxu1 %v9491_v37  ;;  %v11370_v14 = vrot.slane %v11285_v22, %v11043_v50  ;;  %v9578_v37 = vld [vmem:[%s10964_s6 + $0xa00] ss:$16 sps:$4 sm:$0xff]  }
 0x19b   : > { %6297 = vmatprep.subr.bf16.mxu0 %v9496_v38  ;;  %6912 = vmatprep.subr.bf16.mxu1 %v9499_v39  ;;  %v9581_v38 = vld [vmem:[%s10964_s6 + $0xa08] ss:$16 sps:$4 sm:$0xff]   ;;  %v9586_v39 = vld [vmem:[%s10964_s6 + $0xa24] ss:$16 sps:$4 sm:$0xff]   ;;  %v9584_v22 = vld [vmem:[%s10964_s6 + $0xa20] ss:$16 sps:$4 sm:$0xff]  }
 0x19e   : > { %6298 = vmatpush1.bf16.msra.mxu0 %v9494_v40  ;;  %6913 = vmatpush1.bf16.msra.mxu1 %v9497_v41  ;;  %v9589_v40 = vld [vmem:[%s10964_s6 + $0xa2c] ss:$16 sps:$4 sm:$0xff]   ;;  %v1370_v41 = vcombine.high %v11304_v36, %v11304_v36  ;;  %v9590_v36 = vld [vmem:[%s10964_s6 + $0xa40] ss:$16 sps:$4 sm:$0xff]  }
 0x19f   : > { %6299 = vmatprep.subr.bf16.mxu0 %v9502_v42  ;;  %6914 = vmatprep.subr.bf16.mxu1 %v9505_v43  ;;  %v9587_v42 = vld [vmem:[%s10964_s6 + $0xa28] ss:$16 sps:$4 sm:$0xff]   ;;  %v9592_v43 = vld [vmem:[%s10964_s6 + $0xa44] ss:$16 sps:$4 sm:$0xff]  }
 0x1a2   : > { %6300 = vmatpush1.bf16.msra.mxu0 %v9500_v45  ;;  %6915 = vmatpush1.bf16.msra.mxu1 %v9503_v46  ;;  %v9595_v45 = vld [vmem:[%s10964_s6 + $0xa4c] ss:$16 sps:$4 sm:$0xff]   ;;  %v9593_v46 = vld [vmem:[%s10964_s6 + $0xa48] ss:$16 sps:$4 sm:$0xff]  }
 0x1a3   : > { %6301 = vmatprep.subr.bf16.mxu0 %v9508_v47  ;;  %6916 = vmatprep.subr.bf16.mxu1 %v9511_v48  ;;  %v9598_v47 = vld [vmem:[%s10964_s6 + $0xa64] ss:$16 sps:$4 sm:$0xff]   ;;  %v9601_v48 = vld [vmem:[%s10964_s6 + $0xa6c] ss:$16 sps:$4 sm:$0xff]  }
 0x1a6   : > { %6302 = vmatpush1.bf16.msra.mxu0 %v9506_v49  ;;  %6917 = vmatpush1.bf16.msra.mxu1 %v9509_v51  ;;  %v9596_v49 = vld [vmem:[%s10964_s6 + $0xa60] ss:$16 sps:$4 sm:$0xff]   ;;  %v9599_v51 = vld [vmem:[%s10964_s6 + $0xa68] ss:$16 sps:$4 sm:$0xff]  }
 0x1a7   : > { %6303 = vmatprep.subr.bf16.mxu0 %v9514_v52  ;;  %6918 = vmatprep.subr.bf16.mxu1 %v9517_v54  ;;  %v9604_v52 = vld [vmem:[%s10964_s6 + $0xa84] ss:$16 sps:$4 sm:$0xff]   ;;  %v9607_v54 = vld [vmem:[%s10964_s6 + $0xa8c] ss:$16 sps:$4 sm:$0xff]  }
 0x1aa   : > { %6304 = vmatpush1.bf16.msra.mxu0 %v9512_v55  ;;  %6919 = vmatpush1.bf16.msra.mxu1 %v9515_v56  ;;  %v9602_v55 = vld [vmem:[%s10964_s6 + $0xa80] ss:$16 sps:$4 sm:$0xff]   ;;  %v9605_v56 = vld [vmem:[%s10964_s6 + $0xa88] ss:$16 sps:$4 sm:$0xff]  }
 0x1ab   : > { %6305 = vmatprep.subr.bf16.mxu0 %v9520_v57  ;;  %6920 = vmatprep.subr.bf16.mxu1 %v9523_v58  ;;  %v9610_v57 = vld [vmem:[%s10964_s6 + $0xaa4] ss:$16 sps:$4 sm:$0xff]   ;;  %v9613_v58 = vld [vmem:[%s10964_s6 + $0xaac] ss:$16 sps:$4 sm:$0xff]  }
 0x1ae   : > { %6306 = vmatpush1.bf16.msra.mxu0 %v9518_v59  ;;  %6921 = vmatpush1.bf16.msra.mxu1 %v9521_v60  ;;  %v9608_v59 = vld [vmem:[%s10964_s6 + $0xaa0] ss:$16 sps:$4 sm:$0xff]   ;;  %v9611_v60 = vld [vmem:[%s10964_s6 + $0xaa8] ss:$16 sps:$4 sm:$0xff]  }
 0x1af   : > { %6307 = vmatprep.subr.bf16.mxu0 %v9526_v61  ;;  %6922 = vmatprep.subr.bf16.mxu1 %v9529_v62  ;;  %v9616_v61 = vld [vmem:[%s10964_s6 + $0xac4] ss:$16 sps:$4 sm:$0xff]   ;;  %v9619_v62 = vld [vmem:[%s10964_s6 + $0xacc] ss:$16 sps:$4 sm:$0xff]  }
 0x1b2   : > { %6308 = vmatpush1.bf16.msra.mxu0 %v9524_v63  ;;  %6923 = vmatpush1.bf16.msra.mxu1 %v9527_v0  ;;  %v9614_v63 = vld [vmem:[%s10964_s6 + $0xac0] ss:$16 sps:$4 sm:$0xff]   ;;  %v9617_v0 = vld [vmem:[%s10964_s6 + $0xac8] ss:$16 sps:$4 sm:$0xff]  }
 0x1b3   : > { %6309 = vmatprep.subr.bf16.mxu0 %v9532_v1  ;;  %6924 = vmatprep.subr.bf16.mxu1 %v9535_v2  ;;  %v9622_v1 = vld [vmem:[%s10964_s6 + $0xae4] ss:$16 sps:$4 sm:$0xff]   ;;  %v9625_v2 = vld [vmem:[%s10964_s6 + $0xaec] ss:$16 sps:$4 sm:$0xff]  }
 0x1b6   : > { %6310 = vmatpush1.bf16.msra.mxu0 %v9530_v3  ;;  %6925 = vmatpush1.bf16.msra.mxu1 %v9533_v4  ;;  %v9620_v3 = vld [vmem:[%s10964_s6 + $0xae0] ss:$16 sps:$4 sm:$0xff]   ;;  %v9623_v4 = vld [vmem:[%s10964_s6 + $0xae8] ss:$16 sps:$4 sm:$0xff]  }
 0x1b7   : > { %6311 = vmatprep.subr.bf16.mxu0 %v9538_v5  ;;  %6926 = vmatprep.subr.bf16.mxu1 %v9541_v6  ;;  %v9628_v5 = vld [vmem:[%s10964_s6 + $0xb04] ss:$16 sps:$4 sm:$0xff]   ;;  %v9631_v6 = vld [vmem:[%s10964_s6 + $0xb0c] ss:$16 sps:$4 sm:$0xff]  }
 0x1ba   : > { %6312 = vmatpush1.bf16.msra.mxu0 %v9536_v7  ;;  %6927 = vmatpush1.bf16.msra.mxu1 %v9539_v8  ;;  %v9626_v7 = vld [vmem:[%s10964_s6 + $0xb00] ss:$16 sps:$4 sm:$0xff]   ;;  %v9629_v8 = vld [vmem:[%s10964_s6 + $0xb08] ss:$16 sps:$4 sm:$0xff]  }
 0x1bb   : > { %6313 = vmatprep.subr.bf16.mxu0 %v9544_v9  ;;  %6928 = vmatprep.subr.bf16.mxu1 %v9547_v10  ;;  %v9634_v9 = vld [vmem:[%s10964_s6 + $0xb24] ss:$16 sps:$4 sm:$0xff]   ;;  %v9637_v10 = vld [vmem:[%s10964_s6 + $0xb2c] ss:$16 sps:$4 sm:$0xff]  }
 0x1be   : > { %6314 = vmatpush1.bf16.msra.mxu0 %v9542_v11  ;;  %6929 = vmatpush1.bf16.msra.mxu1 %v9545_v12  ;;  %v9632_v11 = vld [vmem:[%s10964_s6 + $0xb20] ss:$16 sps:$4 sm:$0xff]   ;;  %v9635_v12 = vld [vmem:[%s10964_s6 + $0xb28] ss:$16 sps:$4 sm:$0xff]  }
 0x1bf   : > { %6315 = vmatprep.subr.bf16.mxu0 %v9550_v13  ;;  %6930 = vmatprep.subr.bf16.mxu1 %v9553_v15  ;;  %v9640_v13 = vld [vmem:[%s10964_s6 + $0xb44] ss:$16 sps:$4 sm:$0xff]   ;;  %v9643_v15 = vld [vmem:[%s10964_s6 + $0xb4c] ss:$16 sps:$4 sm:$0xff]  }
 0x1c2   : > { %6316 = vmatpush1.bf16.msra.mxu0 %v9548_v17  ;;  %6931 = vmatpush1.bf16.msra.mxu1 %v9551_v53  ;;  %v9638_v17 = vld [vmem:[%s10964_s6 + $0xb40] ss:$16 sps:$4 sm:$0xff]   ;;  %v9641_v53 = vld [vmem:[%s10964_s6 + $0xb48] ss:$16 sps:$4 sm:$0xff]  }
 0x1c3   : > { %6317 = vmatprep.subr.bf16.mxu0 %v9556_v18  ;;  %6932 = vmatprep.subr.bf16.mxu1 %v9559_v19  ;;  %v9646_v18 = vld [vmem:[%s10964_s6 + $0xb64] ss:$16 sps:$4 sm:$0xff]   ;;  %v9649_v19 = vld [vmem:[%s10964_s6 + $0xb6c] ss:$16 sps:$4 sm:$0xff]  }
 0x1c6   : > { %6318 = vmatpush1.bf16.msra.mxu0 %v9554_v20  ;;  %6933 = vmatpush1.bf16.msra.mxu1 %v9557_v21  ;;  %v9644_v20 = vld [vmem:[%s10964_s6 + $0xb60] ss:$16 sps:$4 sm:$0xff]   ;;  %v9647_v21 = vld [vmem:[%s10964_s6 + $0xb68] ss:$16 sps:$4 sm:$0xff]  }
 0x1c7   : > { %6319 = vmatprep.subr.bf16.mxu0 %v9562_v23  ;;  %6934 = vmatprep.subr.bf16.mxu1 %v9565_v24  ;;  %v9652_v23 = vld [vmem:[%s10964_s6 + $0xb84] ss:$16 sps:$4 sm:$0xff]   ;;  %v9655_v24 = vld [vmem:[%s10964_s6 + $0xb8c] ss:$16 sps:$4 sm:$0xff]  }
 0x1ca   : > { %6320 = vmatpush1.bf16.msra.mxu0 %v9560_v25  ;;  %6935 = vmatpush1.bf16.msra.mxu1 %v9563_v27  ;;  %v9650_v25 = vld [vmem:[%s10964_s6 + $0xb80] ss:$16 sps:$4 sm:$0xff]   ;;  %v9653_v27 = vld [vmem:[%s10964_s6 + $0xb88] ss:$16 sps:$4 sm:$0xff]  }
 0x1cb   : > { %6321 = vmatprep.subr.bf16.mxu0 %v9568_v28  ;;  %6936 = vmatprep.subr.bf16.mxu1 %v9571_v29  ;;  %v9658_v28 = vld [vmem:[%s10964_s6 + $0xba4] ss:$16 sps:$4 sm:$0xff]   ;;  %v9661_v29 = vld [vmem:[%s10964_s6 + $0xbac] ss:$16 sps:$4 sm:$0xff]  }
 0x1ce   : > { %6322 = vmatpush1.bf16.msra.mxu0 %v9566_v30  ;;  %6937 = vmatpush1.bf16.msra.mxu1 %v9569_v31  ;;  %v9656_v30 = vld [vmem:[%s10964_s6 + $0xba0] ss:$16 sps:$4 sm:$0xff]   ;;  %v9659_v31 = vld [vmem:[%s10964_s6 + $0xba8] ss:$16 sps:$4 sm:$0xff]  }
 0x1cf   : > { %6323 = vmatprep.subr.bf16.mxu0 %v9574_v16  ;;  %6938 = vmatprep.subr.bf16.mxu1 %v9577_v32  ;;  %v9664_v16 = vld [vmem:[%s10964_s6 + $0xbc4] ss:$16 sps:$4 sm:$0xff]   ;;  %v9667_v32 = vld [vmem:[%s10964_s6 + $0xbcc] ss:$16 sps:$4 sm:$0xff]  }
 0x1d2   : > { %6324 = vmatpush1.bf16.msra.mxu0 %v9572_v33  ;;  %6939 = vmatpush1.bf16.msra.mxu1 %v9575_v34  ;;  %v10493_v33 = vld [vmem:[%s10986_s2 + $0x8] sm:$0xff] }
 0x1d3   : > { %6334 = vmatprep.subr.bf16.mxu0 %v9580_v26  ;;  %6949 = vmatprep.subr.bf16.mxu1 %v9583_v35  ;;  %v1323_v34 = vcombine.high %v10493_v33, %v10493_v33  ;;  %v9662_v26 = vld [vmem:[%s10964_s6 + $0xbc0] ss:$16 sps:$4 sm:$0xff]   ;;  %v9665_v35 = vld [vmem:[%s10964_s6 + $0xbc8] ss:$16 sps:$4 sm:$0xff]  }
 0x1d4   : > { %v9746_v33 = vld [vmem:[%s10964_s6 + $0xd80] ss:$16 sps:$4 sm:$0xff]  }
 0x1d5   : > { %6326 = vmatmul.mubr.bf16.vlgmr.msra.gmra.mrb[0].mxu0 %v11370_v14  ;;  %6941 = vmatmul.mubr.bf16.vlgmr.msra.gmra.mrb[0].mxu1 %v11370_v14 }
 0x1d6   : > { %6335 = vmatpush1.bf16.msra.mxu0 %v9578_v37  ;;  %6950 = vmatpush1.bf16.msra.mxu1 %v9581_v38  ;;  %v9670_v37 = vld [vmem:[%s10964_s6 + $0xbe4] ss:$16 sps:$4 sm:$0xff]   ;;  %v9673_v38 = vld [vmem:[%s10964_s6 + $0xbec] ss:$16 sps:$4 sm:$0xff]  }
 0x1d7   : > { %6336 = vmatprep.subr.bf16.mxu0 %v9586_v39  ;;  %6951 = vmatprep.subr.bf16.mxu1 %v9589_v40  ;;  %v11438_v39 = vrot.slane %v1323_v34, %v11043_v50  ;;  %v9668_v40 = vld [vmem:[%s10964_s6 + $0xbe0] ss:$16 sps:$4 sm:$0xff]   ;;  %v9749_v34 = vld [vmem:[%s10964_s6 + $0xd88] ss:$16 sps:$4 sm:$0xff]  }
 0x1d8   : > { %6366 = vmatprep.mubr.bf16.mxu0 %v1370_v41  ;;  %6981 = vmatprep.mubr.bf16.mxu1 %v1370_v41  ;;  %v9671_v41 = vld [vmem:[%s10964_s6 + $0xbe8] ss:$16 sps:$4 sm:$0xff]  }
 0x1da   : > { %6337 = vmatpush1.bf16.msra.mxu0 %v9584_v22  ;;  %6952 = vmatpush1.bf16.msra.mxu1 %v9587_v42  ;;  %v9676_v22 = vld [vmem:[%s10964_s6 + $0xc04] ss:$16 sps:$4 sm:$0xff]   ;;  %v9679_v42 = vld [vmem:[%s10964_s6 + $0xc0c] ss:$16 sps:$4 sm:$0xff]  }
 0x1db   : > { %6338 = vmatprep.subr.bf16.mxu0 %v9592_v43  ;;  %6953 = vmatprep.subr.bf16.mxu1 %v9595_v45  ;;  %v1339_v43 = vcombine.high %v11438_v39, %v11438_v39  ;;  %v1368_v45 = vcombine.high %v11370_v14, %v11370_v14  ;;  %v9680_v14 = vld [vmem:[%s10964_s6 + $0xc20] ss:$16 sps:$4 sm:$0xff]  }
 0x1de   : > { %6339 = vmatpush1.bf16.msra.mxu0 %v9590_v36  ;;  %6954 = vmatpush1.bf16.msra.mxu1 %v9593_v46  ;;  %v9674_v36 = vld [vmem:[%s10964_s6 + $0xc00] ss:$16 sps:$4 sm:$0xff]   ;;  %v9677_v46 = vld [vmem:[%s10964_s6 + $0xc08] ss:$16 sps:$4 sm:$0xff]  }
 0x1df   : > { %6340 = vmatprep.subr.bf16.mxu0 %v9598_v47  ;;  %6955 = vmatprep.subr.bf16.mxu1 %v9601_v48  ;;  %v9682_v47 = vld [vmem:[%s10964_s6 + $0xc24] ss:$16 sps:$4 sm:$0xff]   ;;  %v9685_v48 = vld [vmem:[%s10964_s6 + $0xc2c] ss:$16 sps:$4 sm:$0xff]  }
 0x1e2   : > { %6341 = vmatpush1.bf16.msra.mxu0 %v9596_v49  ;;  %6956 = vmatpush1.bf16.msra.mxu1 %v9599_v51  ;;  %v11453_v49 = vrot.slane %v1339_v43, %v11043_v50  ;;  %v9683_v51 = vld [vmem:[%s10964_s6 + $0xc28] ss:$16 sps:$4 sm:$0xff]   ;;  %v9766_v43 = vld [vmem:[%s10964_s6 + $0xde4] ss:$16 sps:$4 sm:$0xff]  }
 0x1e3   : > { %6342 = vmatprep.subr.bf16.mxu0 %v9604_v52  ;;  %6957 = vmatprep.subr.bf16.mxu1 %v9607_v54  ;;  %v9688_v52 = vld [vmem:[%s10964_s6 + $0xc44] ss:$16 sps:$4 sm:$0xff]   ;;  %v9691_v54 = vld [vmem:[%s10964_s6 + $0xc4c] ss:$16 sps:$4 sm:$0xff]  }
 0x1e6   : > { %6343 = vmatpush1.bf16.msra.mxu0 %v9602_v55  ;;  %6958 = vmatpush1.bf16.msra.mxu1 %v9605_v56  ;;  %v9686_v55 = vld [vmem:[%s10964_s6 + $0xc40] ss:$16 sps:$4 sm:$0xff]   ;;  %v9689_v56 = vld [vmem:[%s10964_s6 + $0xc48] ss:$16 sps:$4 sm:$0xff]  }
 0x1e7   : > { %6344 = vmatprep.subr.bf16.mxu0 %v9610_v57  ;;  %6959 = vmatprep.subr.bf16.mxu1 %v9613_v58  ;;  %v9694_v57 = vld [vmem:[%s10964_s6 + $0xc64] ss:$16 sps:$4 sm:$0xff]   ;;  %v9697_v58 = vld [vmem:[%s10964_s6 + $0xc6c] ss:$16 sps:$4 sm:$0xff]  }
 0x1ea   : > { %6345 = vmatpush1.bf16.msra.mxu0 %v9608_v59  ;;  %6960 = vmatpush1.bf16.msra.mxu1 %v9611_v60  ;;  %v9692_v59 = vld [vmem:[%s10964_s6 + $0xc60] ss:$16 sps:$4 sm:$0xff]   ;;  %v9695_v60 = vld [vmem:[%s10964_s6 + $0xc68] ss:$16 sps:$4 sm:$0xff]  }
 0x1eb   : > { %6346 = vmatprep.subr.bf16.mxu0 %v9616_v61  ;;  %6961 = vmatprep.subr.bf16.mxu1 %v9619_v62  ;;  %v9700_v61 = vld [vmem:[%s10964_s6 + $0xc84] ss:$16 sps:$4 sm:$0xff]   ;;  %v9703_v62 = vld [vmem:[%s10964_s6 + $0xc8c] ss:$16 sps:$4 sm:$0xff]  }
 0x1ee   : > { %6347 = vmatpush1.bf16.msra.mxu0 %v9614_v63  ;;  %6962 = vmatpush1.bf16.msra.mxu1 %v9617_v0  ;;  %v9698_v63 = vld [vmem:[%s10964_s6 + $0xc80] ss:$16 sps:$4 sm:$0xff]   ;;  %v9701_v0 = vld [vmem:[%s10964_s6 + $0xc88] ss:$16 sps:$4 sm:$0xff]  }
 0x1ef   : > { %6348 = vmatprep.subr.bf16.mxu0 %v9622_v1  ;;  %6963 = vmatprep.subr.bf16.mxu1 %v9625_v2  ;;  %v9706_v1 = vld [vmem:[%s10964_s6 + $0xca4] ss:$16 sps:$4 sm:$0xff]   ;;  %v9709_v2 = vld [vmem:[%s10964_s6 + $0xcac] ss:$16 sps:$4 sm:$0xff]  }
 0x1f2   : > { %6349 = vmatpush1.bf16.msra.mxu0 %v9620_v3  ;;  %6964 = vmatpush1.bf16.msra.mxu1 %v9623_v4  ;;  %v9704_v3 = vld [vmem:[%s10964_s6 + $0xca0] ss:$16 sps:$4 sm:$0xff]   ;;  %v9707_v4 = vld [vmem:[%s10964_s6 + $0xca8] ss:$16 sps:$4 sm:$0xff]  }
 0x1f3   : > { %6350 = vmatprep.subr.bf16.mxu0 %v9628_v5  ;;  %6965 = vmatprep.subr.bf16.mxu1 %v9631_v6  ;;  %v9712_v5 = vld [vmem:[%s10964_s6 + $0xcc4] ss:$16 sps:$4 sm:$0xff]   ;;  %v9715_v6 = vld [vmem:[%s10964_s6 + $0xccc] ss:$16 sps:$4 sm:$0xff]  }
 0x1f6   : > { %6351 = vmatpush1.bf16.msra.mxu0 %v9626_v7  ;;  %6966 = vmatpush1.bf16.msra.mxu1 %v9629_v8  ;;  %v9710_v7 = vld [vmem:[%s10964_s6 + $0xcc0] ss:$16 sps:$4 sm:$0xff]   ;;  %v9713_v8 = vld [vmem:[%s10964_s6 + $0xcc8] ss:$16 sps:$4 sm:$0xff]  }
 0x1f7   : > { %6352 = vmatprep.subr.bf16.mxu0 %v9634_v9  ;;  %6967 = vmatprep.subr.bf16.mxu1 %v9637_v10  ;;  %v9718_v9 = vld [vmem:[%s10964_s6 + $0xce4] ss:$16 sps:$4 sm:$0xff]   ;;  %v9721_v10 = vld [vmem:[%s10964_s6 + $0xcec] ss:$16 sps:$4 sm:$0xff]  }
 0x1fa   : > { %6353 = vmatpush1.bf16.msra.mxu0 %v9632_v11  ;;  %6968 = vmatpush1.bf16.msra.mxu1 %v9635_v12  ;;  %v9716_v11 = vld [vmem:[%s10964_s6 + $0xce0] ss:$16 sps:$4 sm:$0xff]   ;;  %v9719_v12 = vld [vmem:[%s10964_s6 + $0xce8] ss:$16 sps:$4 sm:$0xff]  }
 0x1fb   : > { %6354 = vmatprep.subr.bf16.mxu0 %v9640_v13  ;;  %6969 = vmatprep.subr.bf16.mxu1 %v9643_v15  ;;  %v9724_v13 = vld [vmem:[%s10964_s6 + $0xd04] ss:$16 sps:$4 sm:$0xff]   ;;  %v9727_v15 = vld [vmem:[%s10964_s6 + $0xd0c] ss:$16 sps:$4 sm:$0xff]  }
 0x1fe   : > { %6355 = vmatpush1.bf16.msra.mxu0 %v9638_v17  ;;  %6970 = vmatpush1.bf16.msra.mxu1 %v9641_v53  ;;  %v9722_v17 = vld [vmem:[%s10964_s6 + $0xd00] ss:$16 sps:$4 sm:$0xff]   ;;  %v9725_v53 = vld [vmem:[%s10964_s6 + $0xd08] ss:$16 sps:$4 sm:$0xff]  }
 0x1ff   : > { %6356 = vmatprep.subr.bf16.mxu0 %v9646_v18  ;;  %6971 = vmatprep.subr.bf16.mxu1 %v9649_v19  ;;  %v9730_v18 = vld [vmem:[%s10964_s6 + $0xd24] ss:$16 sps:$4 sm:$0xff]   ;;  %v9733_v19 = vld [vmem:[%s10964_s6 + $0xd2c] ss:$16 sps:$4 sm:$0xff]  }
 0x202   : > { %6357 = vmatpush1.bf16.msra.mxu0 %v9644_v20  ;;  %6972 = vmatpush1.bf16.msra.mxu1 %v9647_v21  ;;  %v9728_v20 = vld [vmem:[%s10964_s6 + $0xd20] ss:$16 sps:$4 sm:$0xff]   ;;  %v9731_v21 = vld [vmem:[%s10964_s6 + $0xd28] ss:$16 sps:$4 sm:$0xff]  }
 0x203   : > { %6358 = vmatprep.subr.bf16.mxu0 %v9652_v23  ;;  %6973 = vmatprep.subr.bf16.mxu1 %v9655_v24  ;;  %v9736_v23 = vld [vmem:[%s10964_s6 + $0xd44] ss:$16 sps:$4 sm:$0xff]   ;;  %v9739_v24 = vld [vmem:[%s10964_s6 + $0xd4c] ss:$16 sps:$4 sm:$0xff]  }
 0x206   : > { %6359 = vmatpush1.bf16.msra.mxu0 %v9650_v25  ;;  %6974 = vmatpush1.bf16.msra.mxu1 %v9653_v27  ;;  %v9734_v25 = vld [vmem:[%s10964_s6 + $0xd40] ss:$16 sps:$4 sm:$0xff]   ;;  %v9737_v27 = vld [vmem:[%s10964_s6 + $0xd48] ss:$16 sps:$4 sm:$0xff]  }
 0x207   : > { %6360 = vmatprep.subr.bf16.mxu0 %v9658_v28  ;;  %6975 = vmatprep.subr.bf16.mxu1 %v9661_v29  ;;  %v9742_v28 = vld [vmem:[%s10964_s6 + $0xd64] ss:$16 sps:$4 sm:$0xff]   ;;  %v9745_v29 = vld [vmem:[%s10964_s6 + $0xd6c] ss:$16 sps:$4 sm:$0xff]  }
 0x20a   : > { %6361 = vmatpush1.bf16.msra.mxu0 %v9656_v30  ;;  %6976 = vmatpush1.bf16.msra.mxu1 %v9659_v31  ;;  %v9740_v30 = vld [vmem:[%s10964_s6 + $0xd60] ss:$16 sps:$4 sm:$0xff]   ;;  %v9743_v31 = vld [vmem:[%s10964_s6 + $0xd68] ss:$16 sps:$4 sm:$0xff]  }
 0x20b   : > { %6362 = vmatprep.subr.bf16.mxu0 %v9664_v16  ;;  %6977 = vmatprep.subr.bf16.mxu1 %v9667_v32  ;;  %v9748_v16 = vld [vmem:[%s10964_s6 + $0xd84] ss:$16 sps:$4 sm:$0xff]   ;;  %v9751_v32 = vld [vmem:[%s10964_s6 + $0xd8c] ss:$16 sps:$4 sm:$0xff]  }
 0x20e   : > { %6363 = vmatpush1.bf16.msra.mxu0 %v9662_v26  ;;  %6978 = vmatpush1.bf16.msra.mxu1 %v9665_v35  ;;  %v9754_v26 = vld [vmem:[%s10964_s6 + $0xda4] ss:$16 sps:$4 sm:$0xff]   ;;  %v9757_v35 = vld [vmem:[%s10964_s6 + $0xdac] ss:$16 sps:$4 sm:$0xff]  }
 0x20f   : > { %6364 = vmatprep.subr.bf16.mxu0 %v9670_v37  ;;  %6979 = vmatprep.subr.bf16.mxu1 %v9673_v38  ;;  %v9752_v37 = vld [vmem:[%s10964_s6 + $0xda0] ss:$16 sps:$4 sm:$0xff]   ;;  %v9755_v38 = vld [vmem:[%s10964_s6 + $0xda8] ss:$16 sps:$4 sm:$0xff]  }
 0x212   : > { %6365 = vmatpush1.bf16.msra.mxu0 %v9668_v40  ;;  %6980 = vmatpush1.bf16.msra.mxu1 %v9671_v41  ;;  %v9760_v40 = vld [vmem:[%s10964_s6 + $0xdc4] ss:$16 sps:$4 sm:$0xff]   ;;  %v9763_v41 = vld [vmem:[%s10964_s6 + $0xdcc] ss:$16 sps:$4 sm:$0xff]  }
 0x213   : > { %6375 = vmatprep.subr.bf16.mxu0 %v9676_v22  ;;  %6990 = vmatprep.subr.bf16.mxu1 %v9679_v42  ;;  %v9758_v22 = vld [vmem:[%s10964_s6 + $0xdc0] ss:$16 sps:$4 sm:$0xff]   ;;  %v9761_v42 = vld [vmem:[%s10964_s6 + $0xdc8] ss:$16 sps:$4 sm:$0xff]  }
 0x215   : > { %6367 = vmatmul.mubr.bf16.vlgmr.msra.gmra.mrb[0].mxu0 %v1368_v45  ;;  %6982 = vmatmul.mubr.bf16.vlgmr.msra.gmra.mrb[0].mxu1 %v1368_v45  ;;  %v9769_v45 = vld [vmem:[%s10964_s6 + $0xdec] ss:$16 sps:$4 sm:$0xff]  }
 0x216   : > { %6376 = vmatpush1.bf16.msra.mxu0 %v9674_v36  ;;  %6991 = vmatpush1.bf16.msra.mxu1 %v9677_v46  ;;  %v9764_v36 = vld [vmem:[%s10964_s6 + $0xde0] ss:$16 sps:$4 sm:$0xff]   ;;  %v9767_v46 = vld [vmem:[%s10964_s6 + $0xde8] ss:$16 sps:$4 sm:$0xff]  }
 0x217   : > { %6377 = vmatprep.subr.bf16.mxu0 %v9682_v47  ;;  %6992 = vmatprep.subr.bf16.mxu1 %v9685_v48  ;;  %v9773_v47 = vld [vmem:[%s10964_s6 + $0xe04] ss:$16 sps:$4 sm:$0xff]   ;;  %v9776_v48 = vld [vmem:[%s10964_s6 + $0xe0c] ss:$16 sps:$4 sm:$0xff]  }
 0x218   : > { %6407 = vmatprep.mubr.bf16.mxu0 %v11453_v49  ;;  %7022 = vmatprep.mubr.bf16.mxu1 %v11453_v49 }
 0x21a   : > { %6378 = vmatpush1.bf16.msra.mxu0 %v9680_v14  ;;  %6993 = vmatpush1.bf16.msra.mxu1 %v9683_v51  ;;  %v11519_v14 = vrot.slane %v11438_v39, %v11043_v50  ;;  %v9771_v51 = vld [vmem:[%s10964_s6 + $0xe00] ss:$16 sps:$4 sm:$0xff]  }
 0x21b   : > { %6379 = vmatprep.subr.bf16.mxu0 %v9688_v52  ;;  %6994 = vmatprep.subr.bf16.mxu1 %v9691_v54  ;;  %v9774_v52 = vld [vmem:[%s10964_s6 + $0xe08] ss:$16 sps:$4 sm:$0xff]   ;;  %v9779_v54 = vld [vmem:[%s10964_s6 + $0xe24] ss:$16 sps:$4 sm:$0xff]   ;;  %v9777_v39 = vld [vmem:[%s10964_s6 + $0xe20] ss:$16 sps:$4 sm:$0xff]  }
 0x21e   : > { %6380 = vmatpush1.bf16.msra.mxu0 %v9686_v55  ;;  %6995 = vmatpush1.bf16.msra.mxu1 %v9689_v56  ;;  %v9782_v55 = vld [vmem:[%s10964_s6 + $0xe2c] ss:$16 sps:$4 sm:$0xff]   ;;  %v1371_v56 = vcombine.high %v11453_v49, %v11453_v49  ;;  %v9783_v49 = vld [vmem:[%s10964_s6 + $0xe40] ss:$16 sps:$4 sm:$0xff]  }
 0x21f   : > { %6381 = vmatprep.subr.bf16.mxu0 %v9694_v57  ;;  %6996 = vmatprep.subr.bf16.mxu1 %v9697_v58  ;;  %v9780_v57 = vld [vmem:[%s10964_s6 + $0xe28] ss:$16 sps:$4 sm:$0xff]   ;;  %v9785_v58 = vld [vmem:[%s10964_s6 + $0xe44] ss:$16 sps:$4 sm:$0xff]  }
 0x222   : > { %6382 = vmatpush1.bf16.msra.mxu0 %v9692_v59  ;;  %6997 = vmatpush1.bf16.msra.mxu1 %v9695_v60  ;;  %v9788_v59 = vld [vmem:[%s10964_s6 + $0xe4c] ss:$16 sps:$4 sm:$0xff]   ;;  %v9786_v60 = vld [vmem:[%s10964_s6 + $0xe48] ss:$16 sps:$4 sm:$0xff]  }
 0x223   : > { %6383 = vmatprep.subr.bf16.mxu0 %v9700_v61  ;;  %6998 = vmatprep.subr.bf16.mxu1 %v9703_v62  ;;  %v9791_v61 = vld [vmem:[%s10964_s6 + $0xe64] ss:$16 sps:$4 sm:$0xff]   ;;  %v9794_v62 = vld [vmem:[%s10964_s6 + $0xe6c] ss:$16 sps:$4 sm:$0xff]  }
 0x226   : > { %6384 = vmatpush1.bf16.msra.mxu0 %v9698_v63  ;;  %6999 = vmatpush1.bf16.msra.mxu1 %v9701_v0  ;;  %v9789_v63 = vld [vmem:[%s10964_s6 + $0xe60] ss:$16 sps:$4 sm:$0xff]   ;;  %v9792_v0 = vld [vmem:[%s10964_s6 + $0xe68] ss:$16 sps:$4 sm:$0xff]  }
 0x227   : > { %6385 = vmatprep.subr.bf16.mxu0 %v9706_v1  ;;  %7000 = vmatprep.subr.bf16.mxu1 %v9709_v2  ;;  %v9797_v1 = vld [vmem:[%s10964_s6 + $0xe84] ss:$16 sps:$4 sm:$0xff]   ;;  %v9800_v2 = vld [vmem:[%s10964_s6 + $0xe8c] ss:$16 sps:$4 sm:$0xff]  }
 0x22a   : > { %6386 = vmatpush1.bf16.msra.mxu0 %v9704_v3  ;;  %7001 = vmatpush1.bf16.msra.mxu1 %v9707_v4  ;;  %v9795_v3 = vld [vmem:[%s10964_s6 + $0xe80] ss:$16 sps:$4 sm:$0xff]   ;;  %v9798_v4 = vld [vmem:[%s10964_s6 + $0xe88] ss:$16 sps:$4 sm:$0xff]  }
 0x22b   : > { %6387 = vmatprep.subr.bf16.mxu0 %v9712_v5  ;;  %7002 = vmatprep.subr.bf16.mxu1 %v9715_v6  ;;  %v9803_v5 = vld [vmem:[%s10964_s6 + $0xea4] ss:$16 sps:$4 sm:$0xff]   ;;  %v9806_v6 = vld [vmem:[%s10964_s6 + $0xeac] ss:$16 sps:$4 sm:$0xff]  }
 0x22e   : > { %6388 = vmatpush1.bf16.msra.mxu0 %v9710_v7  ;;  %7003 = vmatpush1.bf16.msra.mxu1 %v9713_v8  ;;  %v9801_v7 = vld [vmem:[%s10964_s6 + $0xea0] ss:$16 sps:$4 sm:$0xff]   ;;  %v9804_v8 = vld [vmem:[%s10964_s6 + $0xea8] ss:$16 sps:$4 sm:$0xff]  }
 0x22f   : > { %6389 = vmatprep.subr.bf16.mxu0 %v9718_v9  ;;  %7004 = vmatprep.subr.bf16.mxu1 %v9721_v10  ;;  %v9809_v9 = vld [vmem:[%s10964_s6 + $0xec4] ss:$16 sps:$4 sm:$0xff]   ;;  %v9812_v10 = vld [vmem:[%s10964_s6 + $0xecc] ss:$16 sps:$4 sm:$0xff]  }
 0x232   : > { %6390 = vmatpush1.bf16.msra.mxu0 %v9716_v11  ;;  %7005 = vmatpush1.bf16.msra.mxu1 %v9719_v12  ;;  %v9807_v11 = vld [vmem:[%s10964_s6 + $0xec0] ss:$16 sps:$4 sm:$0xff]   ;;  %v9810_v12 = vld [vmem:[%s10964_s6 + $0xec8] ss:$16 sps:$4 sm:$0xff]  }
 0x233   : > { %6391 = vmatprep.subr.bf16.mxu0 %v9724_v13  ;;  %7006 = vmatprep.subr.bf16.mxu1 %v9727_v15  ;;  %v9815_v13 = vld [vmem:[%s10964_s6 + $0xee4] ss:$16 sps:$4 sm:$0xff]   ;;  %v9818_v15 = vld [vmem:[%s10964_s6 + $0xeec] ss:$16 sps:$4 sm:$0xff]  }
 0x236   : > { %6392 = vmatpush1.bf16.msra.mxu0 %v9722_v17  ;;  %7007 = vmatpush1.bf16.msra.mxu1 %v9725_v53  ;;  %v9813_v17 = vld [vmem:[%s10964_s6 + $0xee0] ss:$16 sps:$4 sm:$0xff]   ;;  %v9816_v53 = vld [vmem:[%s10964_s6 + $0xee8] ss:$16 sps:$4 sm:$0xff]  }
 0x237   : > { %6393 = vmatprep.subr.bf16.mxu0 %v9730_v18  ;;  %7008 = vmatprep.subr.bf16.mxu1 %v9733_v19  ;;  %v9821_v18 = vld [vmem:[%s10964_s6 + $0xf04] ss:$16 sps:$4 sm:$0xff]   ;;  %v9824_v19 = vld [vmem:[%s10964_s6 + $0xf0c] ss:$16 sps:$4 sm:$0xff]  }
 0x23a   : > { %6394 = vmatpush1.bf16.msra.mxu0 %v9728_v20  ;;  %7009 = vmatpush1.bf16.msra.mxu1 %v9731_v21  ;;  %v9819_v20 = vld [vmem:[%s10964_s6 + $0xf00] ss:$16 sps:$4 sm:$0xff]   ;;  %v9822_v21 = vld [vmem:[%s10964_s6 + $0xf08] ss:$16 sps:$4 sm:$0xff]  }
 0x23b   : > { %6395 = vmatprep.subr.bf16.mxu0 %v9736_v23  ;;  %7010 = vmatprep.subr.bf16.mxu1 %v9739_v24  ;;  %v9827_v23 = vld [vmem:[%s10964_s6 + $0xf24] ss:$16 sps:$4 sm:$0xff]   ;;  %v9830_v24 = vld [vmem:[%s10964_s6 + $0xf2c] ss:$16 sps:$4 sm:$0xff]  }
 0x23e   : > { %6396 = vmatpush1.bf16.msra.mxu0 %v9734_v25  ;;  %7011 = vmatpush1.bf16.msra.mxu1 %v9737_v27  ;;  %v9825_v25 = vld [vmem:[%s10964_s6 + $0xf20] ss:$16 sps:$4 sm:$0xff]   ;;  %v9828_v27 = vld [vmem:[%s10964_s6 + $0xf28] ss:$16 sps:$4 sm:$0xff]  }
 0x23f   : > { %6397 = vmatprep.subr.bf16.mxu0 %v9742_v28  ;;  %7012 = vmatprep.subr.bf16.mxu1 %v9745_v29  ;;  %v9833_v28 = vld [vmem:[%s10964_s6 + $0xf44] ss:$16 sps:$4 sm:$0xff]   ;;  %v9836_v29 = vld [vmem:[%s10964_s6 + $0xf4c] ss:$16 sps:$4 sm:$0xff]  }
 0x242   : > { %6398 = vmatpush1.bf16.msra.mxu0 %v9740_v30  ;;  %7013 = vmatpush1.bf16.msra.mxu1 %v9743_v31  ;;  %v9831_v30 = vld [vmem:[%s10964_s6 + $0xf40] ss:$16 sps:$4 sm:$0xff]   ;;  %v9834_v31 = vld [vmem:[%s10964_s6 + $0xf48] ss:$16 sps:$4 sm:$0xff]  }
 0x243   : > { %6399 = vmatprep.subr.bf16.mxu0 %v9748_v16  ;;  %7014 = vmatprep.subr.bf16.mxu1 %v9751_v32  ;;  %v9839_v16 = vld [vmem:[%s10964_s6 + $0xf64] ss:$16 sps:$4 sm:$0xff]   ;;  %v9842_v32 = vld [vmem:[%s10964_s6 + $0xf6c] ss:$16 sps:$4 sm:$0xff]  }
 0x246   : > { %6400 = vmatpush1.bf16.msra.mxu0 %v9746_v33  ;;  %7015 = vmatpush1.bf16.msra.mxu1 %v9749_v34  ;;  %v9837_v33 = vld [vmem:[%s10964_s6 + $0xf60] ss:$16 sps:$4 sm:$0xff]   ;;  %v9840_v34 = vld [vmem:[%s10964_s6 + $0xf68] ss:$16 sps:$4 sm:$0xff]  }
 0x247   : > { %6401 = vmatprep.subr.bf16.mxu0 %v9754_v26  ;;  %7016 = vmatprep.subr.bf16.mxu1 %v9757_v35  ;;  %v9845_v26 = vld [vmem:[%s10964_s6 + $0xf84] ss:$16 sps:$4 sm:$0xff]   ;;  %v9848_v35 = vld [vmem:[%s10964_s6 + $0xf8c] ss:$16 sps:$4 sm:$0xff]  }
 0x24a   : > { %6402 = vmatpush1.bf16.msra.mxu0 %v9752_v37  ;;  %7017 = vmatpush1.bf16.msra.mxu1 %v9755_v38  ;;  %v9843_v37 = vld [vmem:[%s10964_s6 + $0xf80] ss:$16 sps:$4 sm:$0xff]   ;;  %v9846_v38 = vld [vmem:[%s10964_s6 + $0xf88] ss:$16 sps:$4 sm:$0xff]  }
 0x24b   : > { %6403 = vmatprep.subr.bf16.mxu0 %v9760_v40  ;;  %7018 = vmatprep.subr.bf16.mxu1 %v9763_v41  ;;  %v9851_v40 = vld [vmem:[%s10964_s6 + $0xfa4] ss:$16 sps:$4 sm:$0xff]   ;;  %v9854_v41 = vld [vmem:[%s10964_s6 + $0xfac] ss:$16 sps:$4 sm:$0xff]  }
 0x24e   : > { %6404 = vmatpush1.bf16.msra.mxu0 %v9758_v22  ;;  %7019 = vmatpush1.bf16.msra.mxu1 %v9761_v42  ;;  %v9849_v22 = vld [vmem:[%s10964_s6 + $0xfa0] ss:$16 sps:$4 sm:$0xff]   ;;  %v9852_v42 = vld [vmem:[%s10964_s6 + $0xfa8] ss:$16 sps:$4 sm:$0xff]  }
 0x24f   : > { %6405 = vmatprep.subr.bf16.mxu0 %v9766_v43  ;;  %7020 = vmatprep.subr.bf16.mxu1 %v9769_v45  ;;  %v9857_v43 = vld [vmem:[%s10964_s6 + $0xfc4] ss:$16 sps:$4 sm:$0xff]   ;;  %v9860_v45 = vld [vmem:[%s10964_s6 + $0xfcc] ss:$16 sps:$4 sm:$0xff]  }
 0x252   : > { %6406 = vmatpush1.bf16.msra.mxu0 %v9764_v36  ;;  %7021 = vmatpush1.bf16.msra.mxu1 %v9767_v46  ;;  %v11582_v36 = vld [vmem:[%s10986_s2 + $0x10] sm:$0xff]  ;;  %v9855_v46 = vld [vmem:[%s10964_s6 + $0xfc0] ss:$16 sps:$4 sm:$0xff]  }
 0x253   : > { %6416 = vmatprep.subr.bf16.mxu0 %v9773_v47  ;;  %7031 = vmatprep.subr.bf16.mxu1 %v9776_v48  ;;  %v9858_v47 = vld [vmem:[%s10964_s6 + $0xfc8] ss:$16 sps:$4 sm:$0xff]   ;;  %v9863_v48 = vld [vmem:[%s10964_s6 + $0xfe4] ss:$16 sps:$4 sm:$0xff]  }
 0x255   : > { %6408 = vmatmul.mubr.bf16.vlgmr.msra.gmra.mrb[0].mxu0 %v11519_v14  ;;  %7023 = vmatmul.mubr.bf16.vlgmr.msra.gmra.mrb[0].mxu1 %v11519_v14 }
 0x256   : > { %6417 = vmatpush1.bf16.msra.mxu0 %v9771_v51  ;;  %7032 = vmatpush1.bf16.msra.mxu1 %v9774_v52  ;;  %v9866_v51 = vld [vmem:[%s10964_s6 + $0xfec] ss:$16 sps:$4 sm:$0xff]   ;;  %v11590_v52 = vrot.slane %v11582_v36, %v11043_v50 }
 0x257   : > { %6418 = vmatprep.subr.bf16.mxu0 %v9779_v54  ;;  %7033 = vmatprep.subr.bf16.mxu1 %v9782_v55  ;;  %v9861_v54 = vld [vmem:[%s10964_s6 + $0xfe0] ss:$16 sps:$4 sm:$0xff]   ;;  %v9864_v55 = vld [vmem:[%s10964_s6 + $0xfe8] ss:$16 sps:$4 sm:$0xff]  }
 0x258   : > { %6448 = vmatprep.mubr.bf16.mxu0 %v1371_v56  ;;  %7063 = vmatprep.mubr.bf16.mxu1 %v1371_v56  ;;  %v9869_v56 = vld [vmem:[%s10964_s6 + $0x1004] ss:$16 sps:$4 sm:$0xff]  }
 0x25a   : > { %6419 = vmatpush1.bf16.msra.mxu0 %v9777_v39  ;;  %7034 = vmatpush1.bf16.msra.mxu1 %v9780_v57  ;;  %v9872_v39 = vld [vmem:[%s10964_s6 + $0x100c] ss:$16 sps:$4 sm:$0xff]   ;;  %v1387_v57 = vcombine.high %v11590_v52, %v11590_v52 }
 0x25b   : > { %6420 = vmatprep.subr.bf16.mxu0 %v9785_v58  ;;  %7035 = vmatprep.subr.bf16.mxu1 %v9788_v59  ;;  %v1369_v58 = vcombine.high %v11519_v14, %v11519_v14  ;;  %v9867_v59 = vld [vmem:[%s10964_s6 + $0x1000] ss:$16 sps:$4 sm:$0xff]  }
 0x25c   : > { %v9873_v14 = vld [vmem:[%s10964_s6 + $0x1020] ss:$16 sps:$4 sm:$0xff]  }
 0x25e   : > { %6421 = vmatpush1.bf16.msra.mxu0 %v9783_v49  ;;  %7036 = vmatpush1.bf16.msra.mxu1 %v9786_v60  ;;  %v9870_v49 = vld [vmem:[%s10964_s6 + $0x1008] ss:$16 sps:$4 sm:$0xff]   ;;  %v9875_v60 = vld [vmem:[%s10964_s6 + $0x1024] ss:$16 sps:$4 sm:$0xff]  }
 0x25f   : > { %6422 = vmatprep.subr.bf16.mxu0 %v9791_v61  ;;  %7037 = vmatprep.subr.bf16.mxu1 %v9794_v62  ;;  %v9878_v61 = vld [vmem:[%s10964_s6 + $0x102c] ss:$16 sps:$4 sm:$0xff]   ;;  %v11605_v62 = vrot.slane %v1387_v57, %v11043_v50  ;;  %v9954_v57 = vld [vmem:[%s10964_s6 + $0x11c8] ss:$16 sps:$4 sm:$0xff]  }
 0x262   : > { %6423 = vmatpush1.bf16.msra.mxu0 %v9789_v63  ;;  %7038 = vmatpush1.bf16.msra.mxu1 %v9792_v0  ;;  %v9876_v63 = vld [vmem:[%s10964_s6 + $0x1028] ss:$16 sps:$4 sm:$0xff]   ;;  %v9881_v0 = vld [vmem:[%s10964_s6 + $0x1044] ss:$16 sps:$4 sm:$0xff]  }
 0x263   : > { %6424 = vmatprep.subr.bf16.mxu0 %v9797_v1  ;;  %7039 = vmatprep.subr.bf16.mxu1 %v9800_v2  ;;  %v9884_v1 = vld [vmem:[%s10964_s6 + $0x104c] ss:$16 sps:$4 sm:$0xff]   ;;  %v9879_v2 = vld [vmem:[%s10964_s6 + $0x1040] ss:$16 sps:$4 sm:$0xff]  }
 0x266   : > { %6425 = vmatpush1.bf16.msra.mxu0 %v9795_v3  ;;  %7040 = vmatpush1.bf16.msra.mxu1 %v9798_v4  ;;  %v9882_v3 = vld [vmem:[%s10964_s6 + $0x1048] ss:$16 sps:$4 sm:$0xff]   ;;  %v9887_v4 = vld [vmem:[%s10964_s6 + $0x1064] ss:$16 sps:$4 sm:$0xff]  }
 0x267   : > { %6426 = vmatprep.subr.bf16.mxu0 %v9803_v5  ;;  %7041 = vmatprep.subr.bf16.mxu1 %v9806_v6  ;;  %v9890_v5 = vld [vmem:[%s10964_s6 + $0x106c] ss:$16 sps:$4 sm:$0xff]   ;;  %v9885_v6 = vld [vmem:[%s10964_s6 + $0x1060] ss:$16 sps:$4 sm:$0xff]  }
 0x26a   : > { %6427 = vmatpush1.bf16.msra.mxu0 %v9801_v7  ;;  %7042 = vmatpush1.bf16.msra.mxu1 %v9804_v8  ;;  %v9888_v7 = vld [vmem:[%s10964_s6 + $0x1068] ss:$16 sps:$4 sm:$0xff]   ;;  %v9893_v8 = vld [vmem:[%s10964_s6 + $0x1084] ss:$16 sps:$4 sm:$0xff]  }
 0x26b   : > { %6428 = vmatprep.subr.bf16.mxu0 %v9809_v9  ;;  %7043 = vmatprep.subr.bf16.mxu1 %v9812_v10  ;;  %v9896_v9 = vld [vmem:[%s10964_s6 + $0x108c] ss:$16 sps:$4 sm:$0xff]   ;;  %v9891_v10 = vld [vmem:[%s10964_s6 + $0x1080] ss:$16 sps:$4 sm:$0xff]  }
 0x26e   : > { %6429 = vmatpush1.bf16.msra.mxu0 %v9807_v11  ;;  %7044 = vmatpush1.bf16.msra.mxu1 %v9810_v12  ;;  %v9894_v11 = vld [vmem:[%s10964_s6 + $0x1088] ss:$16 sps:$4 sm:$0xff]   ;;  %v9899_v12 = vld [vmem:[%s10964_s6 + $0x10a4] ss:$16 sps:$4 sm:$0xff]  }
 0x26f   : > { %6430 = vmatprep.subr.bf16.mxu0 %v9815_v13  ;;  %7045 = vmatprep.subr.bf16.mxu1 %v9818_v15  ;;  %v9902_v13 = vld [vmem:[%s10964_s6 + $0x10ac] ss:$16 sps:$4 sm:$0xff]   ;;  %v9897_v15 = vld [vmem:[%s10964_s6 + $0x10a0] ss:$16 sps:$4 sm:$0xff]  }
 0x272   : > { %6431 = vmatpush1.bf16.msra.mxu0 %v9813_v17  ;;  %7046 = vmatpush1.bf16.msra.mxu1 %v9816_v53  ;;  %v9900_v17 = vld [vmem:[%s10964_s6 + $0x10a8] ss:$16 sps:$4 sm:$0xff]   ;;  %v9905_v53 = vld [vmem:[%s10964_s6 + $0x10c4] ss:$16 sps:$4 sm:$0xff]  }
 0x273   : > { %6432 = vmatprep.subr.bf16.mxu0 %v9821_v18  ;;  %7047 = vmatprep.subr.bf16.mxu1 %v9824_v19  ;;  %v9908_v18 = vld [vmem:[%s10964_s6 + $0x10cc] ss:$16 sps:$4 sm:$0xff]   ;;  %v9903_v19 = vld [vmem:[%s10964_s6 + $0x10c0] ss:$16 sps:$4 sm:$0xff]  }
 0x276   : > { %6433 = vmatpush1.bf16.msra.mxu0 %v9819_v20  ;;  %7048 = vmatpush1.bf16.msra.mxu1 %v9822_v21  ;;  %v9906_v20 = vld [vmem:[%s10964_s6 + $0x10c8] ss:$16 sps:$4 sm:$0xff]   ;;  %v9911_v21 = vld [vmem:[%s10964_s6 + $0x10e4] ss:$16 sps:$4 sm:$0xff]  }
 0x277   : > { %6434 = vmatprep.subr.bf16.mxu0 %v9827_v23  ;;  %7049 = vmatprep.subr.bf16.mxu1 %v9830_v24  ;;  %v9914_v23 = vld [vmem:[%s10964_s6 + $0x10ec] ss:$16 sps:$4 sm:$0xff]   ;;  %v9909_v24 = vld [vmem:[%s10964_s6 + $0x10e0] ss:$16 sps:$4 sm:$0xff]  }
 0x27a   : > { %6435 = vmatpush1.bf16.msra.mxu0 %v9825_v25  ;;  %7050 = vmatpush1.bf16.msra.mxu1 %v9828_v27  ;;  %v9912_v25 = vld [vmem:[%s10964_s6 + $0x10e8] ss:$16 sps:$4 sm:$0xff]   ;;  %v9917_v27 = vld [vmem:[%s10964_s6 + $0x1104] ss:$16 sps:$4 sm:$0xff]  }
 0x27b   : > { %6436 = vmatprep.subr.bf16.mxu0 %v9833_v28  ;;  %7051 = vmatprep.subr.bf16.mxu1 %v9836_v29  ;;  %v9920_v28 = vld [vmem:[%s10964_s6 + $0x110c] ss:$16 sps:$4 sm:$0xff]   ;;  %v9915_v29 = vld [vmem:[%s10964_s6 + $0x1100] ss:$16 sps:$4 sm:$0xff]  }
 0x27e   : > { %6437 = vmatpush1.bf16.msra.mxu0 %v9831_v30  ;;  %7052 = vmatpush1.bf16.msra.mxu1 %v9834_v31  ;;  %v9918_v30 = vld [vmem:[%s10964_s6 + $0x1108] ss:$16 sps:$4 sm:$0xff]   ;;  %v9923_v31 = vld [vmem:[%s10964_s6 + $0x1124] ss:$16 sps:$4 sm:$0xff]  }
 0x27f   : > { %6438 = vmatprep.subr.bf16.mxu0 %v9839_v16  ;;  %7053 = vmatprep.subr.bf16.mxu1 %v9842_v32  ;;  %v9926_v16 = vld [vmem:[%s10964_s6 + $0x112c] ss:$16 sps:$4 sm:$0xff]   ;;  %v9921_v32 = vld [vmem:[%s10964_s6 + $0x1120] ss:$16 sps:$4 sm:$0xff]  }
 0x282   : > { %6439 = vmatpush1.bf16.msra.mxu0 %v9837_v33  ;;  %7054 = vmatpush1.bf16.msra.mxu1 %v9840_v34  ;;  %v9924_v33 = vld [vmem:[%s10964_s6 + $0x1128] ss:$16 sps:$4 sm:$0xff]   ;;  %v9929_v34 = vld [vmem:[%s10964_s6 + $0x1144] ss:$16 sps:$4 sm:$0xff]  }
 0x283   : > { %6440 = vmatprep.subr.bf16.mxu0 %v9845_v26  ;;  %7055 = vmatprep.subr.bf16.mxu1 %v9848_v35  ;;  %v9932_v26 = vld [vmem:[%s10964_s6 + $0x114c] ss:$16 sps:$4 sm:$0xff]   ;;  %v9927_v35 = vld [vmem:[%s10964_s6 + $0x1140] ss:$16 sps:$4 sm:$0xff]  }
 0x286   : > { %6441 = vmatpush1.bf16.msra.mxu0 %v9843_v37  ;;  %7056 = vmatpush1.bf16.msra.mxu1 %v9846_v38  ;;  %v9930_v37 = vld [vmem:[%s10964_s6 + $0x1148] ss:$16 sps:$4 sm:$0xff]   ;;  %v9935_v38 = vld [vmem:[%s10964_s6 + $0x1164] ss:$16 sps:$4 sm:$0xff]  }
 0x287   : > { %6442 = vmatprep.subr.bf16.mxu0 %v9851_v40  ;;  %7057 = vmatprep.subr.bf16.mxu1 %v9854_v41  ;;  %v9938_v40 = vld [vmem:[%s10964_s6 + $0x116c] ss:$16 sps:$4 sm:$0xff]   ;;  %v9933_v41 = vld [vmem:[%s10964_s6 + $0x1160] ss:$16 sps:$4 sm:$0xff]  }
 0x28a   : > { %6443 = vmatpush1.bf16.msra.mxu0 %v9849_v22  ;;  %7058 = vmatpush1.bf16.msra.mxu1 %v9852_v42  ;;  %v9936_v22 = vld [vmem:[%s10964_s6 + $0x1168] ss:$16 sps:$4 sm:$0xff]   ;;  %v9941_v42 = vld [vmem:[%s10964_s6 + $0x1184] ss:$16 sps:$4 sm:$0xff]  }
 0x28b   : > { %6444 = vmatprep.subr.bf16.mxu0 %v9857_v43  ;;  %7059 = vmatprep.subr.bf16.mxu1 %v9860_v45  ;;  %v9944_v43 = vld [vmem:[%s10964_s6 + $0x118c] ss:$16 sps:$4 sm:$0xff]   ;;  %v9939_v45 = vld [vmem:[%s10964_s6 + $0x1180] ss:$16 sps:$4 sm:$0xff]  }
 0x28e   : > { %6445 = vmatpush1.bf16.msra.mxu0 %v9855_v46  ;;  %7060 = vmatpush1.bf16.msra.mxu1 %v9858_v47  ;;  %v9942_v46 = vld [vmem:[%s10964_s6 + $0x1188] ss:$16 sps:$4 sm:$0xff]   ;;  %v9947_v47 = vld [vmem:[%s10964_s6 + $0x11a4] ss:$16 sps:$4 sm:$0xff]  }
 0x28f   : > { %6446 = vmatprep.subr.bf16.mxu0 %v9863_v48  ;;  %7061 = vmatprep.subr.bf16.mxu1 %v9866_v51  ;;  %v9950_v48 = vld [vmem:[%s10964_s6 + $0x11ac] ss:$16 sps:$4 sm:$0xff]   ;;  %v9945_v51 = vld [vmem:[%s10964_s6 + $0x11a0] ss:$16 sps:$4 sm:$0xff]  }
 0x292   : > { %6447 = vmatpush1.bf16.msra.mxu0 %v9861_v54  ;;  %7062 = vmatpush1.bf16.msra.mxu1 %v9864_v55  ;;  %v9948_v54 = vld [vmem:[%s10964_s6 + $0x11a8] ss:$16 sps:$4 sm:$0xff]   ;;  %v9953_v55 = vld [vmem:[%s10964_s6 + $0x11c4] ss:$16 sps:$4 sm:$0xff]  }
 0x293   : > { %6457 = vmatprep.subr.bf16.mxu0 %v9869_v56  ;;  %7072 = vmatprep.subr.bf16.mxu1 %v9872_v39  ;;  %v9956_v56 = vld [vmem:[%s10964_s6 + $0x11cc] ss:$16 sps:$4 sm:$0xff]   ;;  %v9951_v39 = vld [vmem:[%s10964_s6 + $0x11c0] ss:$16 sps:$4 sm:$0xff]  }
 0x295   : > { %6449 = vmatmul.mubr.bf16.vlgmr.msra.gmra.mrb[0].mxu0 %v1369_v58  ;;  %7064 = vmatmul.mubr.bf16.vlgmr.msra.gmra.mrb[0].mxu1 %v1369_v58  ;;  %v9959_v58 = vld [vmem:[%s10964_s6 + $0x11e4] ss:$16 sps:$4 sm:$0xff]  }
 0x296   : > { %6458 = vmatpush1.bf16.msra.mxu0 %v9867_v59  ;;  %7073 = vmatpush1.bf16.msra.mxu1 %v9870_v49  ;;  %v9962_v59 = vld [vmem:[%s10964_s6 + $0x11ec] ss:$16 sps:$4 sm:$0xff]   ;;  %v9957_v49 = vld [vmem:[%s10964_s6 + $0x11e0] ss:$16 sps:$4 sm:$0xff]  }
 0x297   : > { %6459 = vmatprep.subr.bf16.mxu0 %v9875_v60  ;;  %7074 = vmatprep.subr.bf16.mxu1 %v9878_v61  ;;  %v9960_v60 = vld [vmem:[%s10964_s6 + $0x11e8] ss:$16 sps:$4 sm:$0xff]   ;;  %v9965_v61 = vld [vmem:[%s10964_s6 + $0x1204] ss:$16 sps:$4 sm:$0xff]  }
 0x298   : > { %6489 = vmatprep.mubr.bf16.mxu0 %v11605_v62  ;;  %7104 = vmatprep.mubr.bf16.mxu1 %v11605_v62 }
 0x29a   : > { %6460 = vmatpush1.bf16.msra.mxu0 %v9873_v14  ;;  %7075 = vmatpush1.bf16.msra.mxu1 %v9876_v63  ;;  %v9968_v14 = vld [vmem:[%s10964_s6 + $0x120c] ss:$16 sps:$4 sm:$0xff]   ;;  %v11671_v63 = vrot.slane %v11590_v52, %v11043_v50  ;;  %v9969_v52 = vld [vmem:[%s10964_s6 + $0x1220] ss:$16 sps:$4 sm:$0xff]  }
 0x29b   : > { %6461 = vmatprep.subr.bf16.mxu0 %v9881_v0  ;;  %7076 = vmatprep.subr.bf16.mxu1 %v9884_v1  ;;  %v9963_v0 = vld [vmem:[%s10964_s6 + $0x1200] ss:$16 sps:$4 sm:$0xff]   ;;  %v9966_v1 = vld [vmem:[%s10964_s6 + $0x1208] ss:$16 sps:$4 sm:$0xff]  }
 0x29e   : > { %6462 = vmatpush1.bf16.msra.mxu0 %v9879_v2  ;;  %7077 = vmatpush1.bf16.msra.mxu1 %v9882_v3  ;;  %v9971_v2 = vld [vmem:[%s10964_s6 + $0x1224] ss:$16 sps:$4 sm:$0xff]   ;;  %v9974_v3 = vld [vmem:[%s10964_s6 + $0x122c] ss:$16 sps:$4 sm:$0xff]  }
 0x29f   : > { %6463 = vmatprep.subr.bf16.mxu0 %v9887_v4  ;;  %7078 = vmatprep.subr.bf16.mxu1 %v9890_v5  ;;  %v1419_v4 = vcombine.high %v11605_v62, %v11605_v62  ;;  %v9972_v5 = vld [vmem:[%s10964_s6 + $0x1228] ss:$16 sps:$4 sm:$0xff]   ;;  %v9975_v62 = vld [vmem:[%s10964_s6 + $0x1240] ss:$16 sps:$4 sm:$0xff]  }
 0x2a2   : > { %6464 = vmatpush1.bf16.msra.mxu0 %v9885_v6  ;;  %7079 = vmatpush1.bf16.msra.mxu1 %v9888_v7  ;;  %v9977_v6 = vld [vmem:[%s10964_s6 + $0x1244] ss:$16 sps:$4 sm:$0xff]   ;;  %v9980_v7 = vld [vmem:[%s10964_s6 + $0x124c] ss:$16 sps:$4 sm:$0xff]  }
 0x2a3   : > { %6465 = vmatprep.subr.bf16.mxu0 %v9893_v8  ;;  %7080 = vmatprep.subr.bf16.mxu1 %v9896_v9  ;;  %v9978_v8 = vld [vmem:[%s10964_s6 + $0x1248] ss:$16 sps:$4 sm:$0xff]   ;;  %v9983_v9 = vld [vmem:[%s10964_s6 + $0x1264] ss:$16 sps:$4 sm:$0xff]  }
 0x2a6   : > { %6466 = vmatpush1.bf16.msra.mxu0 %v9891_v10  ;;  %7081 = vmatpush1.bf16.msra.mxu1 %v9894_v11  ;;  %v9986_v10 = vld [vmem:[%s10964_s6 + $0x126c] ss:$16 sps:$4 sm:$0xff]   ;;  %v9981_v11 = vld [vmem:[%s10964_s6 + $0x1260] ss:$16 sps:$4 sm:$0xff]  }
 0x2a7   : > { %6467 = vmatprep.subr.bf16.mxu0 %v9899_v12  ;;  %7082 = vmatprep.subr.bf16.mxu1 %v9902_v13  ;;  %v9984_v12 = vld [vmem:[%s10964_s6 + $0x1268] ss:$16 sps:$4 sm:$0xff]   ;;  %v9989_v13 = vld [vmem:[%s10964_s6 + $0x1284] ss:$16 sps:$4 sm:$0xff]  }
 0x2aa   : > { %6468 = vmatpush1.bf16.msra.mxu0 %v9897_v15  ;;  %7083 = vmatpush1.bf16.msra.mxu1 %v9900_v17  ;;  %v9992_v15 = vld [vmem:[%s10964_s6 + $0x128c] ss:$16 sps:$4 sm:$0xff]   ;;  %v9987_v17 = vld [vmem:[%s10964_s6 + $0x1280] ss:$16 sps:$4 sm:$0xff]  }
 0x2ab   : > { %6469 = vmatprep.subr.bf16.mxu0 %v9905_v53  ;;  %7084 = vmatprep.subr.bf16.mxu1 %v9908_v18  ;;  %v9990_v53 = vld [vmem:[%s10964_s6 + $0x1288] ss:$16 sps:$4 sm:$0xff]   ;;  %v9995_v18 = vld [vmem:[%s10964_s6 + $0x12a4] ss:$16 sps:$4 sm:$0xff]  }
 0x2ae   : > { %6470 = vmatpush1.bf16.msra.mxu0 %v9903_v19  ;;  %7085 = vmatpush1.bf16.msra.mxu1 %v9906_v20  ;;  %v9998_v19 = vld [vmem:[%s10964_s6 + $0x12ac] ss:$16 sps:$4 sm:$0xff]   ;;  %v9993_v20 = vld [vmem:[%s10964_s6 + $0x12a0] ss:$16 sps:$4 sm:$0xff]  }
 0x2af   : > { %6471 = vmatprep.subr.bf16.mxu0 %v9911_v21  ;;  %7086 = vmatprep.subr.bf16.mxu1 %v9914_v23  ;;  %v9996_v21 = vld [vmem:[%s10964_s6 + $0x12a8] ss:$16 sps:$4 sm:$0xff]   ;;  %v10001_v23 = vld [vmem:[%s10964_s6 + $0x12c4] ss:$16 sps:$4 sm:$0xff]  }
 0x2b2   : > { %6472 = vmatpush1.bf16.msra.mxu0 %v9909_v24  ;;  %7087 = vmatpush1.bf16.msra.mxu1 %v9912_v25  ;;  %v10004_v24 = vld [vmem:[%s10964_s6 + $0x12cc] ss:$16 sps:$4 sm:$0xff]   ;;  %v9999_v25 = vld [vmem:[%s10964_s6 + $0x12c0] ss:$16 sps:$4 sm:$0xff]  }
 0x2b3   : > { %6473 = vmatprep.subr.bf16.mxu0 %v9917_v27  ;;  %7088 = vmatprep.subr.bf16.mxu1 %v9920_v28  ;;  %v10002_v27 = vld [vmem:[%s10964_s6 + $0x12c8] ss:$16 sps:$4 sm:$0xff]   ;;  %v10007_v28 = vld [vmem:[%s10964_s6 + $0x12e4] ss:$16 sps:$4 sm:$0xff]  }
 0x2b6   : > { %6474 = vmatpush1.bf16.msra.mxu0 %v9915_v29  ;;  %7089 = vmatpush1.bf16.msra.mxu1 %v9918_v30  ;;  %v10010_v29 = vld [vmem:[%s10964_s6 + $0x12ec] ss:$16 sps:$4 sm:$0xff]   ;;  %v10005_v30 = vld [vmem:[%s10964_s6 + $0x12e0] ss:$16 sps:$4 sm:$0xff]  }
 0x2b7   : > { %6475 = vmatprep.subr.bf16.mxu0 %v9923_v31  ;;  %7090 = vmatprep.subr.bf16.mxu1 %v9926_v16  ;;  %v10008_v31 = vld [vmem:[%s10964_s6 + $0x12e8] ss:$16 sps:$4 sm:$0xff]   ;;  %v10013_v16 = vld [vmem:[%s10964_s6 + $0x1304] ss:$16 sps:$4 sm:$0xff]  }
 0x2ba   : > { %6476 = vmatpush1.bf16.msra.mxu0 %v9921_v32  ;;  %7091 = vmatpush1.bf16.msra.mxu1 %v9924_v33  ;;  %v10016_v32 = vld [vmem:[%s10964_s6 + $0x130c] ss:$16 sps:$4 sm:$0xff]   ;;  %v10011_v33 = vld [vmem:[%s10964_s6 + $0x1300] ss:$16 sps:$4 sm:$0xff]  }
 0x2bb   : > { %6477 = vmatprep.subr.bf16.mxu0 %v9929_v34  ;;  %7092 = vmatprep.subr.bf16.mxu1 %v9932_v26  ;;  %v10014_v34 = vld [vmem:[%s10964_s6 + $0x1308] ss:$16 sps:$4 sm:$0xff]   ;;  %v10019_v26 = vld [vmem:[%s10964_s6 + $0x1324] ss:$16 sps:$4 sm:$0xff]  }
 0x2be   : > { %6478 = vmatpush1.bf16.msra.mxu0 %v9927_v35  ;;  %7093 = vmatpush1.bf16.msra.mxu1 %v9930_v37  ;;  %v10022_v35 = vld [vmem:[%s10964_s6 + $0x132c] ss:$16 sps:$4 sm:$0xff]   ;;  %v10017_v37 = vld [vmem:[%s10964_s6 + $0x1320] ss:$16 sps:$4 sm:$0xff]  }
 0x2bf   : > { %6479 = vmatprep.subr.bf16.mxu0 %v9935_v38  ;;  %7094 = vmatprep.subr.bf16.mxu1 %v9938_v40  ;;  %v10020_v38 = vld [vmem:[%s10964_s6 + $0x1328] ss:$16 sps:$4 sm:$0xff]   ;;  %v10025_v40 = vld [vmem:[%s10964_s6 + $0x1344] ss:$16 sps:$4 sm:$0xff]  }
 0x2c2   : > { %6480 = vmatpush1.bf16.msra.mxu0 %v9933_v41  ;;  %7095 = vmatpush1.bf16.msra.mxu1 %v9936_v22  ;;  %v10028_v41 = vld [vmem:[%s10964_s6 + $0x134c] ss:$16 sps:$4 sm:$0xff]   ;;  %v10023_v22 = vld [vmem:[%s10964_s6 + $0x1340] ss:$16 sps:$4 sm:$0xff]  }
 0x2c3   : > { %6481 = vmatprep.subr.bf16.mxu0 %v9941_v42  ;;  %7096 = vmatprep.subr.bf16.mxu1 %v9944_v43  ;;  %v10026_v42 = vld [vmem:[%s10964_s6 + $0x1348] ss:$16 sps:$4 sm:$0xff]   ;;  %v10031_v43 = vld [vmem:[%s10964_s6 + $0x1364] ss:$16 sps:$4 sm:$0xff]  }
 0x2c6   : > { %6482 = vmatpush1.bf16.msra.mxu0 %v9939_v45  ;;  %7097 = vmatpush1.bf16.msra.mxu1 %v9942_v46  ;;  %v10034_v45 = vld [vmem:[%s10964_s6 + $0x136c] ss:$16 sps:$4 sm:$0xff]   ;;  %v10029_v46 = vld [vmem:[%s10964_s6 + $0x1360] ss:$16 sps:$4 sm:$0xff]  }
 0x2c7   : > { %6483 = vmatprep.subr.bf16.mxu0 %v9947_v47  ;;  %7098 = vmatprep.subr.bf16.mxu1 %v9950_v48  ;;  %v10032_v47 = vld [vmem:[%s10964_s6 + $0x1368] ss:$16 sps:$4 sm:$0xff]   ;;  %v10037_v48 = vld [vmem:[%s10964_s6 + $0x1384] ss:$16 sps:$4 sm:$0xff]  }
 0x2ca   : > { %6484 = vmatpush1.bf16.msra.mxu0 %v9945_v51  ;;  %7099 = vmatpush1.bf16.msra.mxu1 %v9948_v54  ;;  %v10040_v51 = vld [vmem:[%s10964_s6 + $0x138c] ss:$16 sps:$4 sm:$0xff]   ;;  %v10035_v54 = vld [vmem:[%s10964_s6 + $0x1380] ss:$16 sps:$4 sm:$0xff]  }
 0x2cb   : > { %6485 = vmatprep.subr.bf16.mxu0 %v9953_v55  ;;  %7100 = vmatprep.subr.bf16.mxu1 %v9956_v56  ;;  %v10038_v55 = vld [vmem:[%s10964_s6 + $0x1388] ss:$16 sps:$4 sm:$0xff]   ;;  %v10043_v56 = vld [vmem:[%s10964_s6 + $0x13a4] ss:$16 sps:$4 sm:$0xff]  }
 0x2ce   : > { %6486 = vmatpush1.bf16.msra.mxu0 %v9951_v39  ;;  %7101 = vmatpush1.bf16.msra.mxu1 %v9954_v57  ;;  %v10046_v39 = vld [vmem:[%s10964_s6 + $0x13ac] ss:$16 sps:$4 sm:$0xff]   ;;  %v10041_v57 = vld [vmem:[%s10964_s6 + $0x13a0] ss:$16 sps:$4 sm:$0xff]  }
 0x2cf   : > { %6487 = vmatprep.subr.bf16.mxu0 %v9959_v58  ;;  %7102 = vmatprep.subr.bf16.mxu1 %v9962_v59  ;;  %v10044_v58 = vld [vmem:[%s10964_s6 + $0x13a8] ss:$16 sps:$4 sm:$0xff]   ;;  %v10049_v59 = vld [vmem:[%s10964_s6 + $0x13c4] ss:$16 sps:$4 sm:$0xff]  }
 0x2d2   : > { %6488 = vmatpush1.bf16.msra.mxu0 %v9957_v49  ;;  %7103 = vmatpush1.bf16.msra.mxu1 %v9960_v60  ;;  %v10052_v49 = vld [vmem:[%s10964_s6 + $0x13cc] ss:$16 sps:$4 sm:$0xff]   ;;  %v1372_v60 = vcombine.high %v11582_v36, %v11582_v36  ;;  %v10053_v36 = vld [vmem:[%s10964_s6 + $0x13e0] ss:$16 sps:$4 sm:$0xff]  }
 0x2d3   : > { %6498 = vmatprep.subr.bf16.mxu0 %v9965_v61  ;;  %7113 = vmatprep.subr.bf16.mxu1 %v9968_v14  ;;  %v10047_v61 = vld [vmem:[%s10964_s6 + $0x13c0] ss:$16 sps:$4 sm:$0xff]   ;;  %v10050_v14 = vld [vmem:[%s10964_s6 + $0x13c8] ss:$16 sps:$4 sm:$0xff]  }
 0x2d5   : > { %6490 = vmatmul.mubr.bf16.vlgmr.msra.gmra.mrb[0].mxu0 %v11671_v63  ;;  %7105 = vmatmul.mubr.bf16.vlgmr.msra.gmra.mrb[0].mxu1 %v11671_v63 }
 0x2d6   : > { %6499 = vmatpush1.bf16.msra.mxu0 %v9963_v0  ;;  %7114 = vmatpush1.bf16.msra.mxu1 %v9966_v1  ;;  %v10055_v0 = vld [vmem:[%s10964_s6 + $0x13e4] ss:$16 sps:$4 sm:$0xff]   ;;  %v10058_v1 = vld [vmem:[%s10964_s6 + $0x13ec] ss:$16 sps:$4 sm:$0xff]  }
 0x2d7   : > { %6500 = vmatprep.subr.bf16.mxu0 %v9971_v2  ;;  %7115 = vmatprep.subr.bf16.mxu1 %v9974_v3  ;;  %v11740_v2 = vrot.slane %v1372_v60, %v11043_v50  ;;  %v10056_v3 = vld [vmem:[%s10964_s6 + $0x13e8] ss:$16 sps:$4 sm:$0xff]  }
 0x2d8   : > { %6530 = vmatprep.mubr.bf16.mxu0 %v1419_v4  ;;  %7145 = vmatprep.mubr.bf16.mxu1 %v1419_v4  ;;  %v10061_v4 = vld [vmem:[%s10964_s6 + $0x1404] ss:$16 sps:$4 sm:$0xff]   ;;  %v10134_v60 = vld [vmem:[%s10964_s6 + $0x1588] ss:$16 sps:$4 sm:$0xff]  }
 0x2da   : > { %6501 = vmatpush1.bf16.msra.mxu0 %v9969_v52  ;;  %7116 = vmatpush1.bf16.msra.mxu1 %v9972_v5  ;;  %v10064_v52 = vld [vmem:[%s10964_s6 + $0x140c] ss:$16 sps:$4 sm:$0xff]   ;;  %v1388_v5 = vcombine.high %v11740_v2, %v11740_v2 }
 0x2db   : > { %6502 = vmatprep.subr.bf16.mxu0 %v9977_v6  ;;  %7117 = vmatprep.subr.bf16.mxu1 %v9980_v7  ;;  %v1417_v6 = vcombine.high %v11671_v63, %v11671_v63  ;;  %v10059_v7 = vld [vmem:[%s10964_s6 + $0x1400] ss:$16 sps:$4 sm:$0xff]  }
 0x2dc   : > { %v10065_v63 = vld [vmem:[%s10964_s6 + $0x1420] ss:$16 sps:$4 sm:$0xff]  }
 0x2de   : > { %6503 = vmatpush1.bf16.msra.mxu0 %v9975_v62  ;;  %7118 = vmatpush1.bf16.msra.mxu1 %v9978_v8  ;;  %v10062_v62 = vld [vmem:[%s10964_s6 + $0x1408] ss:$16 sps:$4 sm:$0xff]   ;;  %v10067_v8 = vld [vmem:[%s10964_s6 + $0x1424] ss:$16 sps:$4 sm:$0xff]  }
 0x2df   : > { %6504 = vmatprep.subr.bf16.mxu0 %v9983_v9  ;;  %7119 = vmatprep.subr.bf16.mxu1 %v9986_v10  ;;  %v10070_v9 = vld [vmem:[%s10964_s6 + $0x142c] ss:$16 sps:$4 sm:$0xff]   ;;  %v11755_v10 = vrot.slane %v1388_v5, %v11043_v50  ;;  %v10151_v5 = vld [vmem:[%s10964_s6 + $0x15e4] ss:$16 sps:$4 sm:$0xff]  }
 0x2e2   : > { %6505 = vmatpush1.bf16.msra.mxu0 %v9981_v11  ;;  %7120 = vmatpush1.bf16.msra.mxu1 %v9984_v12  ;;  %v10068_v11 = vld [vmem:[%s10964_s6 + $0x1428] ss:$16 sps:$4 sm:$0xff]   ;;  %v10073_v12 = vld [vmem:[%s10964_s6 + $0x1444] ss:$16 sps:$4 sm:$0xff]  }
 0x2e3   : > { %6506 = vmatprep.subr.bf16.mxu0 %v9989_v13  ;;  %7121 = vmatprep.subr.bf16.mxu1 %v9992_v15  ;;  %v10076_v13 = vld [vmem:[%s10964_s6 + $0x144c] ss:$16 sps:$4 sm:$0xff]   ;;  %v10071_v15 = vld [vmem:[%s10964_s6 + $0x1440] ss:$16 sps:$4 sm:$0xff]  }
 0x2e6   : > { %6507 = vmatpush1.bf16.msra.mxu0 %v9987_v17  ;;  %7122 = vmatpush1.bf16.msra.mxu1 %v9990_v53  ;;  %v10074_v17 = vld [vmem:[%s10964_s6 + $0x1448] ss:$16 sps:$4 sm:$0xff]   ;;  %v10079_v53 = vld [vmem:[%s10964_s6 + $0x1464] ss:$16 sps:$4 sm:$0xff]  }
 0x2e7   : > { %6508 = vmatprep.subr.bf16.mxu0 %v9995_v18  ;;  %7123 = vmatprep.subr.bf16.mxu1 %v9998_v19  ;;  %v10082_v18 = vld [vmem:[%s10964_s6 + $0x146c] ss:$16 sps:$4 sm:$0xff]   ;;  %v10077_v19 = vld [vmem:[%s10964_s6 + $0x1460] ss:$16 sps:$4 sm:$0xff]  }
 0x2ea   : > { %6509 = vmatpush1.bf16.msra.mxu0 %v9993_v20  ;;  %7124 = vmatpush1.bf16.msra.mxu1 %v9996_v21  ;;  %v10080_v20 = vld [vmem:[%s10964_s6 + $0x1468] ss:$16 sps:$4 sm:$0xff]   ;;  %v10085_v21 = vld [vmem:[%s10964_s6 + $0x1484] ss:$16 sps:$4 sm:$0xff]  }
 0x2eb   : > { %6510 = vmatprep.subr.bf16.mxu0 %v10001_v23  ;;  %7125 = vmatprep.subr.bf16.mxu1 %v10004_v24  ;;  %v10088_v23 = vld [vmem:[%s10964_s6 + $0x148c] ss:$16 sps:$4 sm:$0xff]   ;;  %v10083_v24 = vld [vmem:[%s10964_s6 + $0x1480] ss:$16 sps:$4 sm:$0xff]  }
 0x2ee   : > { %6511 = vmatpush1.bf16.msra.mxu0 %v9999_v25  ;;  %7126 = vmatpush1.bf16.msra.mxu1 %v10002_v27  ;;  %v10086_v25 = vld [vmem:[%s10964_s6 + $0x1488] ss:$16 sps:$4 sm:$0xff]   ;;  %v10091_v27 = vld [vmem:[%s10964_s6 + $0x14a4] ss:$16 sps:$4 sm:$0xff]  }
 0x2ef   : > { %6512 = vmatprep.subr.bf16.mxu0 %v10007_v28  ;;  %7127 = vmatprep.subr.bf16.mxu1 %v10010_v29  ;;  %v10094_v28 = vld [vmem:[%s10964_s6 + $0x14ac] ss:$16 sps:$4 sm:$0xff]   ;;  %v10089_v29 = vld [vmem:[%s10964_s6 + $0x14a0] ss:$16 sps:$4 sm:$0xff]  }
 0x2f2   : > { %6513 = vmatpush1.bf16.msra.mxu0 %v10005_v30  ;;  %7128 = vmatpush1.bf16.msra.mxu1 %v10008_v31  ;;  %v10092_v30 = vld [vmem:[%s10964_s6 + $0x14a8] ss:$16 sps:$4 sm:$0xff]   ;;  %v10097_v31 = vld [vmem:[%s10964_s6 + $0x14c4] ss:$16 sps:$4 sm:$0xff]  }
 0x2f3   : > { %6514 = vmatprep.subr.bf16.mxu0 %v10013_v16  ;;  %7129 = vmatprep.subr.bf16.mxu1 %v10016_v32  ;;  %v10100_v16 = vld [vmem:[%s10964_s6 + $0x14cc] ss:$16 sps:$4 sm:$0xff]   ;;  %v10095_v32 = vld [vmem:[%s10964_s6 + $0x14c0] ss:$16 sps:$4 sm:$0xff]  }
 0x2f6   : > { %6515 = vmatpush1.bf16.msra.mxu0 %v10011_v33  ;;  %7130 = vmatpush1.bf16.msra.mxu1 %v10014_v34  ;;  %v10098_v33 = vld [vmem:[%s10964_s6 + $0x14c8] ss:$16 sps:$4 sm:$0xff]   ;;  %v10103_v34 = vld [vmem:[%s10964_s6 + $0x14e4] ss:$16 sps:$4 sm:$0xff]  }
 0x2f7   : > { %6516 = vmatprep.subr.bf16.mxu0 %v10019_v26  ;;  %7131 = vmatprep.subr.bf16.mxu1 %v10022_v35  ;;  %v10106_v26 = vld [vmem:[%s10964_s6 + $0x14ec] ss:$16 sps:$4 sm:$0xff]   ;;  %v10101_v35 = vld [vmem:[%s10964_s6 + $0x14e0] ss:$16 sps:$4 sm:$0xff]  }
 0x2fa   : > { %6517 = vmatpush1.bf16.msra.mxu0 %v10017_v37  ;;  %7132 = vmatpush1.bf16.msra.mxu1 %v10020_v38  ;;  %v10104_v37 = vld [vmem:[%s10964_s6 + $0x14e8] ss:$16 sps:$4 sm:$0xff]   ;;  %v10109_v38 = vld [vmem:[%s10964_s6 + $0x1504] ss:$16 sps:$4 sm:$0xff]  }
 0x2fb   : > { %6518 = vmatprep.subr.bf16.mxu0 %v10025_v40  ;;  %7133 = vmatprep.subr.bf16.mxu1 %v10028_v41  ;;  %v10112_v40 = vld [vmem:[%s10964_s6 + $0x150c] ss:$16 sps:$4 sm:$0xff]   ;;  %v10107_v41 = vld [vmem:[%s10964_s6 + $0x1500] ss:$16 sps:$4 sm:$0xff]  }
 0x2fe   : > { %6519 = vmatpush1.bf16.msra.mxu0 %v10023_v22  ;;  %7134 = vmatpush1.bf16.msra.mxu1 %v10026_v42  ;;  %v10110_v22 = vld [vmem:[%s10964_s6 + $0x1508] ss:$16 sps:$4 sm:$0xff]   ;;  %v10115_v42 = vld [vmem:[%s10964_s6 + $0x1524] ss:$16 sps:$4 sm:$0xff]  }
 0x2ff   : > { %6520 = vmatprep.subr.bf16.mxu0 %v10031_v43  ;;  %7135 = vmatprep.subr.bf16.mxu1 %v10034_v45  ;;  %v10118_v43 = vld [vmem:[%s10964_s6 + $0x152c] ss:$16 sps:$4 sm:$0xff]   ;;  %v10113_v45 = vld [vmem:[%s10964_s6 + $0x1520] ss:$16 sps:$4 sm:$0xff]  }
 0x302   : > { %6521 = vmatpush1.bf16.msra.mxu0 %v10029_v46  ;;  %7136 = vmatpush1.bf16.msra.mxu1 %v10032_v47  ;;  %v10116_v46 = vld [vmem:[%s10964_s6 + $0x1528] ss:$16 sps:$4 sm:$0xff]   ;;  %v10121_v47 = vld [vmem:[%s10964_s6 + $0x1544] ss:$16 sps:$4 sm:$0xff]  }
 0x303   : > { %6522 = vmatprep.subr.bf16.mxu0 %v10037_v48  ;;  %7137 = vmatprep.subr.bf16.mxu1 %v10040_v51  ;;  %v10124_v48 = vld [vmem:[%s10964_s6 + $0x154c] ss:$16 sps:$4 sm:$0xff]   ;;  %v10119_v51 = vld [vmem:[%s10964_s6 + $0x1540] ss:$16 sps:$4 sm:$0xff]  }
 0x306   : > { %6523 = vmatpush1.bf16.msra.mxu0 %v10035_v54  ;;  %7138 = vmatpush1.bf16.msra.mxu1 %v10038_v55  ;;  %v10122_v54 = vld [vmem:[%s10964_s6 + $0x1548] ss:$16 sps:$4 sm:$0xff]   ;;  %v10127_v55 = vld [vmem:[%s10964_s6 + $0x1564] ss:$16 sps:$4 sm:$0xff]  }
 0x307   : > { %6524 = vmatprep.subr.bf16.mxu0 %v10043_v56  ;;  %7139 = vmatprep.subr.bf16.mxu1 %v10046_v39  ;;  %v10130_v56 = vld [vmem:[%s10964_s6 + $0x156c] ss:$16 sps:$4 sm:$0xff]   ;;  %v10125_v39 = vld [vmem:[%s10964_s6 + $0x1560] ss:$16 sps:$4 sm:$0xff]  }
 0x30a   : > { %6525 = vmatpush1.bf16.msra.mxu0 %v10041_v57  ;;  %7140 = vmatpush1.bf16.msra.mxu1 %v10044_v58  ;;  %v10128_v57 = vld [vmem:[%s10964_s6 + $0x1568] ss:$16 sps:$4 sm:$0xff]   ;;  %v10133_v58 = vld [vmem:[%s10964_s6 + $0x1584] ss:$16 sps:$4 sm:$0xff]  }
 0x30b   : > { %6526 = vmatprep.subr.bf16.mxu0 %v10049_v59  ;;  %7141 = vmatprep.subr.bf16.mxu1 %v10052_v49  ;;  %v10136_v59 = vld [vmem:[%s10964_s6 + $0x158c] ss:$16 sps:$4 sm:$0xff]   ;;  %v10131_v49 = vld [vmem:[%s10964_s6 + $0x1580] ss:$16 sps:$4 sm:$0xff]  }
 0x30e   : > { %6527 = vmatpush1.bf16.msra.mxu0 %v10047_v61  ;;  %7142 = vmatpush1.bf16.msra.mxu1 %v10050_v14  ;;  %v10139_v61 = vld [vmem:[%s10964_s6 + $0x15a4] ss:$16 sps:$4 sm:$0xff]   ;;  %v10142_v14 = vld [vmem:[%s10964_s6 + $0x15ac] ss:$16 sps:$4 sm:$0xff]  }
 0x30f   : > { %6528 = vmatprep.subr.bf16.mxu0 %v10055_v0  ;;  %7143 = vmatprep.subr.bf16.mxu1 %v10058_v1  ;;  %v10137_v0 = vld [vmem:[%s10964_s6 + $0x15a0] ss:$16 sps:$4 sm:$0xff]   ;;  %v10140_v1 = vld [vmem:[%s10964_s6 + $0x15a8] ss:$16 sps:$4 sm:$0xff]  }
 0x312   : > { %6529 = vmatpush1.bf16.msra.mxu0 %v10053_v36  ;;  %7144 = vmatpush1.bf16.msra.mxu1 %v10056_v3  ;;  %v10145_v36 = vld [vmem:[%s10964_s6 + $0x15c4] ss:$16 sps:$4 sm:$0xff]   ;;  %v10148_v3 = vld [vmem:[%s10964_s6 + $0x15cc] ss:$16 sps:$4 sm:$0xff]  }
 0x313   : > { %6539 = vmatprep.subr.bf16.mxu0 %v10061_v4  ;;  %7154 = vmatprep.subr.bf16.mxu1 %v10064_v52  ;;  %v10143_v4 = vld [vmem:[%s10964_s6 + $0x15c0] ss:$16 sps:$4 sm:$0xff]   ;;  %v10146_v52 = vld [vmem:[%s10964_s6 + $0x15c8] ss:$16 sps:$4 sm:$0xff]  }
 0x315   : > { %6531 = vmatmul.mubr.bf16.vlgmr.msra.gmra.mrb[0].mxu0 %v1417_v6  ;;  %7146 = vmatmul.mubr.bf16.vlgmr.msra.gmra.mrb[0].mxu1 %v1417_v6  ;;  %v10154_v6 = vld [vmem:[%s10964_s6 + $0x15ec] ss:$16 sps:$4 sm:$0xff]  }
 0x316   : > { %6540 = vmatpush1.bf16.msra.mxu0 %v10059_v7  ;;  %7155 = vmatpush1.bf16.msra.mxu1 %v10062_v62  ;;  %v10149_v7 = vld [vmem:[%s10964_s6 + $0x15e0] ss:$16 sps:$4 sm:$0xff]   ;;  %v10152_v62 = vld [vmem:[%s10964_s6 + $0x15e8] ss:$16 sps:$4 sm:$0xff]  }
 0x317   : > { %6541 = vmatprep.subr.bf16.mxu0 %v10067_v8  ;;  %7156 = vmatprep.subr.bf16.mxu1 %v10070_v9  ;;  %v10158_v8 = vld [vmem:[%s10964_s6 + $0x1604] ss:$16 sps:$4 sm:$0xff]   ;;  %v10161_v9 = vld [vmem:[%s10964_s6 + $0x160c] ss:$16 sps:$4 sm:$0xff]  }
 0x318   : > { %6571 = vmatprep.mubr.bf16.mxu0 %v11755_v10  ;;  %7186 = vmatprep.mubr.bf16.mxu1 %v11755_v10 }
 0x31a   : > { %6542 = vmatpush1.bf16.msra.mxu0 %v10065_v63  ;;  %7157 = vmatpush1.bf16.msra.mxu1 %v10068_v11  ;;  %v11821_v63 = vrot.slane %v11740_v2, %v11043_v50  ;;  %v10156_v11 = vld [vmem:[%s10964_s6 + $0x1600] ss:$16 sps:$4 sm:$0xff]  }
 0x31b   : > { %6543 = vmatprep.subr.bf16.mxu0 %v10073_v12  ;;  %7158 = vmatprep.subr.bf16.mxu1 %v10076_v13  ;;  %v10159_v12 = vld [vmem:[%s10964_s6 + $0x1608] ss:$16 sps:$4 sm:$0xff]   ;;  %v10164_v13 = vld [vmem:[%s10964_s6 + $0x1624] ss:$16 sps:$4 sm:$0xff]   ;;  %v10162_v2 = vld [vmem:[%s10964_s6 + $0x1620] ss:$16 sps:$4 sm:$0xff]  }
 0x31e   : > { %6544 = vmatpush1.bf16.msra.mxu0 %v10071_v15  ;;  %7159 = vmatpush1.bf16.msra.mxu1 %v10074_v17  ;;  %v10167_v15 = vld [vmem:[%s10964_s6 + $0x162c] ss:$16 sps:$4 sm:$0xff]   ;;  %v1420_v17 = vcombine.high %v11755_v10, %v11755_v10  ;;  %v10168_v10 = vld [vmem:[%s10964_s6 + $0x1640] ss:$16 sps:$4 sm:$0xff]  }
 0x31f   : > { %6545 = vmatprep.subr.bf16.mxu0 %v10079_v53  ;;  %7160 = vmatprep.subr.bf16.mxu1 %v10082_v18  ;;  %v10165_v53 = vld [vmem:[%s10964_s6 + $0x1628] ss:$16 sps:$4 sm:$0xff]   ;;  %v10170_v18 = vld [vmem:[%s10964_s6 + $0x1644] ss:$16 sps:$4 sm:$0xff]  }
 0x322   : > { %6546 = vmatpush1.bf16.msra.mxu0 %v10077_v19  ;;  %7161 = vmatpush1.bf16.msra.mxu1 %v10080_v20  ;;  %v10173_v19 = vld [vmem:[%s10964_s6 + $0x164c] ss:$16 sps:$4 sm:$0xff]   ;;  %v10171_v20 = vld [vmem:[%s10964_s6 + $0x1648] ss:$16 sps:$4 sm:$0xff]  }
 0x323   : > { %6547 = vmatprep.subr.bf16.mxu0 %v10085_v21  ;;  %7162 = vmatprep.subr.bf16.mxu1 %v10088_v23  ;;  %v10176_v21 = vld [vmem:[%s10964_s6 + $0x1664] ss:$16 sps:$4 sm:$0xff]   ;;  %v10179_v23 = vld [vmem:[%s10964_s6 + $0x166c] ss:$16 sps:$4 sm:$0xff]  }
 0x326   : > { %6548 = vmatpush1.bf16.msra.mxu0 %v10083_v24  ;;  %7163 = vmatpush1.bf16.msra.mxu1 %v10086_v25  ;;  %v10174_v24 = vld [vmem:[%s10964_s6 + $0x1660] ss:$16 sps:$4 sm:$0xff]   ;;  %v10177_v25 = vld [vmem:[%s10964_s6 + $0x1668] ss:$16 sps:$4 sm:$0xff]  }
 0x327   : > { %6549 = vmatprep.subr.bf16.mxu0 %v10091_v27  ;;  %7164 = vmatprep.subr.bf16.mxu1 %v10094_v28  ;;  %v10182_v27 = vld [vmem:[%s10964_s6 + $0x1684] ss:$16 sps:$4 sm:$0xff]   ;;  %v10185_v28 = vld [vmem:[%s10964_s6 + $0x168c] ss:$16 sps:$4 sm:$0xff]  }
 0x32a   : > { %6550 = vmatpush1.bf16.msra.mxu0 %v10089_v29  ;;  %7165 = vmatpush1.bf16.msra.mxu1 %v10092_v30  ;;  %v10180_v29 = vld [vmem:[%s10964_s6 + $0x1680] ss:$16 sps:$4 sm:$0xff]   ;;  %v10183_v30 = vld [vmem:[%s10964_s6 + $0x1688] ss:$16 sps:$4 sm:$0xff]  }
 0x32b   : > { %6551 = vmatprep.subr.bf16.mxu0 %v10097_v31  ;;  %7166 = vmatprep.subr.bf16.mxu1 %v10100_v16  ;;  %v10188_v31 = vld [vmem:[%s10964_s6 + $0x16a4] ss:$16 sps:$4 sm:$0xff]   ;;  %v10191_v16 = vld [vmem:[%s10964_s6 + $0x16ac] ss:$16 sps:$4 sm:$0xff]  }
 0x32e   : > { %6552 = vmatpush1.bf16.msra.mxu0 %v10095_v32  ;;  %7167 = vmatpush1.bf16.msra.mxu1 %v10098_v33  ;;  %v10186_v32 = vld [vmem:[%s10964_s6 + $0x16a0] ss:$16 sps:$4 sm:$0xff]   ;;  %v10189_v33 = vld [vmem:[%s10964_s6 + $0x16a8] ss:$16 sps:$4 sm:$0xff]  }
 0x32f   : > { %6553 = vmatprep.subr.bf16.mxu0 %v10103_v34  ;;  %7168 = vmatprep.subr.bf16.mxu1 %v10106_v26  ;;  %v10194_v34 = vld [vmem:[%s10964_s6 + $0x16c4] ss:$16 sps:$4 sm:$0xff]   ;;  %v10197_v26 = vld [vmem:[%s10964_s6 + $0x16cc] ss:$16 sps:$4 sm:$0xff]  }
 0x332   : > { %6554 = vmatpush1.bf16.msra.mxu0 %v10101_v35  ;;  %7169 = vmatpush1.bf16.msra.mxu1 %v10104_v37  ;;  %v10192_v35 = vld [vmem:[%s10964_s6 + $0x16c0] ss:$16 sps:$4 sm:$0xff]   ;;  %v10195_v37 = vld [vmem:[%s10964_s6 + $0x16c8] ss:$16 sps:$4 sm:$0xff]  }
 0x333   : > { %6555 = vmatprep.subr.bf16.mxu0 %v10109_v38  ;;  %7170 = vmatprep.subr.bf16.mxu1 %v10112_v40  ;;  %v10200_v38 = vld [vmem:[%s10964_s6 + $0x16e4] ss:$16 sps:$4 sm:$0xff]   ;;  %v10203_v40 = vld [vmem:[%s10964_s6 + $0x16ec] ss:$16 sps:$4 sm:$0xff]  }
 0x336   : > { %6556 = vmatpush1.bf16.msra.mxu0 %v10107_v41  ;;  %7171 = vmatpush1.bf16.msra.mxu1 %v10110_v22  ;;  %v10198_v41 = vld [vmem:[%s10964_s6 + $0x16e0] ss:$16 sps:$4 sm:$0xff]   ;;  %v10201_v22 = vld [vmem:[%s10964_s6 + $0x16e8] ss:$16 sps:$4 sm:$0xff]  }
 0x337   : > { %6557 = vmatprep.subr.bf16.mxu0 %v10115_v42  ;;  %7172 = vmatprep.subr.bf16.mxu1 %v10118_v43  ;;  %v10206_v42 = vld [vmem:[%s10964_s6 + $0x1704] ss:$16 sps:$4 sm:$0xff]   ;;  %v10209_v43 = vld [vmem:[%s10964_s6 + $0x170c] ss:$16 sps:$4 sm:$0xff]  }
 0x33a   : > { %6558 = vmatpush1.bf16.msra.mxu0 %v10113_v45  ;;  %7173 = vmatpush1.bf16.msra.mxu1 %v10116_v46  ;;  %v10204_v45 = vld [vmem:[%s10964_s6 + $0x1700] ss:$16 sps:$4 sm:$0xff]   ;;  %v10207_v46 = vld [vmem:[%s10964_s6 + $0x1708] ss:$16 sps:$4 sm:$0xff]  }
 0x33b   : > { %6559 = vmatprep.subr.bf16.mxu0 %v10121_v47  ;;  %7174 = vmatprep.subr.bf16.mxu1 %v10124_v48  ;;  %v10212_v47 = vld [vmem:[%s10964_s6 + $0x1724] ss:$16 sps:$4 sm:$0xff]   ;;  %v10215_v48 = vld [vmem:[%s10964_s6 + $0x172c] ss:$16 sps:$4 sm:$0xff]  }
 0x33e   : > { %6560 = vmatpush1.bf16.msra.mxu0 %v10119_v51  ;;  %7175 = vmatpush1.bf16.msra.mxu1 %v10122_v54  ;;  %v10210_v51 = vld [vmem:[%s10964_s6 + $0x1720] ss:$16 sps:$4 sm:$0xff]   ;;  %v10213_v54 = vld [vmem:[%s10964_s6 + $0x1728] ss:$16 sps:$4 sm:$0xff]  }
 0x33f   : > { %6561 = vmatprep.subr.bf16.mxu0 %v10127_v55  ;;  %7176 = vmatprep.subr.bf16.mxu1 %v10130_v56  ;;  %v10218_v55 = vld [vmem:[%s10964_s6 + $0x1744] ss:$16 sps:$4 sm:$0xff]   ;;  %v10221_v56 = vld [vmem:[%s10964_s6 + $0x174c] ss:$16 sps:$4 sm:$0xff]  }
 0x342   : > { %6562 = vmatpush1.bf16.msra.mxu0 %v10125_v39  ;;  %7177 = vmatpush1.bf16.msra.mxu1 %v10128_v57  ;;  %v10216_v39 = vld [vmem:[%s10964_s6 + $0x1740] ss:$16 sps:$4 sm:$0xff]   ;;  %v10219_v57 = vld [vmem:[%s10964_s6 + $0x1748] ss:$16 sps:$4 sm:$0xff]  }
 0x343   : > { %6563 = vmatprep.subr.bf16.mxu0 %v10133_v58  ;;  %7178 = vmatprep.subr.bf16.mxu1 %v10136_v59  ;;  %v10224_v58 = vld [vmem:[%s10964_s6 + $0x1764] ss:$16 sps:$4 sm:$0xff]   ;;  %v10227_v59 = vld [vmem:[%s10964_s6 + $0x176c] ss:$16 sps:$4 sm:$0xff]  }
 0x346   : > { %6564 = vmatpush1.bf16.msra.mxu0 %v10131_v49  ;;  %7179 = vmatpush1.bf16.msra.mxu1 %v10134_v60  ;;  %v10222_v49 = vld [vmem:[%s10964_s6 + $0x1760] ss:$16 sps:$4 sm:$0xff]   ;;  %v10225_v60 = vld [vmem:[%s10964_s6 + $0x1768] ss:$16 sps:$4 sm:$0xff]  }
 0x347   : > { %6565 = vmatprep.subr.bf16.mxu0 %v10139_v61  ;;  %7180 = vmatprep.subr.bf16.mxu1 %v10142_v14  ;;  %v10230_v61 = vld [vmem:[%s10964_s6 + $0x1784] ss:$16 sps:$4 sm:$0xff]   ;;  %v10233_v14 = vld [vmem:[%s10964_s6 + $0x178c] ss:$16 sps:$4 sm:$0xff]  }
 0x34a   : > { %6566 = vmatpush1.bf16.msra.mxu0 %v10137_v0  ;;  %7181 = vmatpush1.bf16.msra.mxu1 %v10140_v1  ;;  %v10228_v0 = vld [vmem:[%s10964_s6 + $0x1780] ss:$16 sps:$4 sm:$0xff]   ;;  %v10231_v1 = vld [vmem:[%s10964_s6 + $0x1788] ss:$16 sps:$4 sm:$0xff]  }
 0x34b   : > { %6567 = vmatprep.subr.bf16.mxu0 %v10145_v36  ;;  %7182 = vmatprep.subr.bf16.mxu1 %v10148_v3  ;;  %v10236_v36 = vld [vmem:[%s10964_s6 + $0x17a4] ss:$16 sps:$4 sm:$0xff]   ;;  %v10239_v3 = vld [vmem:[%s10964_s6 + $0x17ac] ss:$16 sps:$4 sm:$0xff]  }
 0x34e   : > { %6568 = vmatpush1.bf16.msra.mxu0 %v10143_v4  ;;  %7183 = vmatpush1.bf16.msra.mxu1 %v10146_v52  ;;  %v10234_v4 = vld [vmem:[%s10964_s6 + $0x17a0] ss:$16 sps:$4 sm:$0xff]   ;;  %v10237_v52 = vld [vmem:[%s10964_s6 + $0x17a8] ss:$16 sps:$4 sm:$0xff]  }
 0x34f   : > { %6569 = vmatprep.subr.bf16.mxu0 %v10151_v5  ;;  %7184 = vmatprep.subr.bf16.mxu1 %v10154_v6  ;;  %v10242_v5 = vld [vmem:[%s10964_s6 + $0x17c4] ss:$16 sps:$4 sm:$0xff]   ;;  %v10245_v6 = vld [vmem:[%s10964_s6 + $0x17cc] ss:$16 sps:$4 sm:$0xff]  }
 0x352   : > { %6570 = vmatpush1.bf16.msra.mxu0 %v10149_v7  ;;  %7185 = vmatpush1.bf16.msra.mxu1 %v10152_v62  ;;  %v11884_v7 = vld [vmem:[%s10986_s2 + $0x18] sm:$0x1f] }
 0x353   : > { %6580 = vmatprep.subr.bf16.mxu0 %v10158_v8  ;;  %7195 = vmatprep.subr.bf16.mxu1 %v10161_v9  ;;  %v10240_v62 = vld [vmem:[%s10964_s6 + $0x17c0] ss:$16 sps:$4 sm:$0xff]   ;;  %v10243_v8 = vld [vmem:[%s10964_s6 + $0x17c8] ss:$16 sps:$4 sm:$0xff]   ;;  %v10248_v9 = vld [vmem:[%s10964_s6 + $0x17e4] ss:$16 sps:$4 sm:$0xff]  }
 0x355   : > { %6572 = vmatmul.mubr.bf16.vlgmr.msra.gmra.mrb[0].mxu0 %v11821_v63  ;;  %7187 = vmatmul.mubr.bf16.vlgmr.msra.gmra.mrb[0].mxu1 %v11821_v63 }
 0x356   : > { %6581 = vmatpush1.bf16.msra.mxu0 %v10156_v11  ;;  %7196 = vmatpush1.bf16.msra.mxu1 %v10159_v12  ;;  %v10251_v11 = vld [vmem:[%s10964_s6 + $0x17ec] ss:$16 sps:$4 sm:$0xff]   ;;  %v11892_v12 = vrot.slane %v11884_v7, %v11043_v50 }
 0x357   : > { %6582 = vmatprep.subr.bf16.mxu0 %v10164_v13  ;;  %7197 = vmatprep.subr.bf16.mxu1 %v10167_v15  ;;  %v10246_v13 = vld [vmem:[%s10964_s6 + $0x17e0] ss:$16 sps:$4 sm:$0xff]   ;;  %v10249_v15 = vld [vmem:[%s10964_s6 + $0x17e8] ss:$16 sps:$4 sm:$0xff]  }
 0x358   : > { %6612 = vmatprep.mubr.bf16.mxu0 %v1420_v17  ;;  %7227 = vmatprep.mubr.bf16.mxu1 %v1420_v17  ;;  %v10254_v17 = vld [vmem:[%s10964_s6 + $0x1804] ss:$16 sps:$4 sm:$0xff]  }
 0x35a   : > { %6583 = vmatpush1.bf16.msra.mxu0 %v10162_v2  ;;  %7198 = vmatpush1.bf16.msra.mxu1 %v10165_v53  ;;  %v10257_v2 = vld [vmem:[%s10964_s6 + $0x180c] ss:$16 sps:$4 sm:$0xff]   ;;  %v1436_v53 = vcombine.high %v11892_v12, %v11892_v12 }
 0x35b   : > { %6584 = vmatprep.subr.bf16.mxu0 %v10170_v18  ;;  %7199 = vmatprep.subr.bf16.mxu1 %v10173_v19  ;;  %v1418_v18 = vcombine.high %v11821_v63, %v11821_v63  ;;  %v10252_v19 = vld [vmem:[%s10964_s6 + $0x1800] ss:$16 sps:$4 sm:$0xff]  }
 0x35c   : > { %v10258_v63 = vld [vmem:[%s10964_s6 + $0x1820] ss:$16 sps:$4 sm:$0xff]  }
 0x35e   : > { %6585 = vmatpush1.bf16.msra.mxu0 %v10168_v10  ;;  %7200 = vmatpush1.bf16.msra.mxu1 %v10171_v20  ;;  %v10255_v10 = vld [vmem:[%s10964_s6 + $0x1808] ss:$16 sps:$4 sm:$0xff]   ;;  %v10260_v20 = vld [vmem:[%s10964_s6 + $0x1824] ss:$16 sps:$4 sm:$0xff]  }
 0x35f   : > { %6586 = vmatprep.subr.bf16.mxu0 %v10176_v21  ;;  %7201 = vmatprep.subr.bf16.mxu1 %v10179_v23  ;;  %v10263_v21 = vld [vmem:[%s10964_s6 + $0x182c] ss:$16 sps:$4 sm:$0xff]   ;;  %v11907_v23 = vrot.slane %v1436_v53, %v11043_v50  ;;  %v10339_v53 = vld [vmem:[%s10964_s6 + $0x19c8] ss:$16 sps:$4 sm:$0xff]  }
 0x362   : > { %6587 = vmatpush1.bf16.msra.mxu0 %v10174_v24  ;;  %7202 = vmatpush1.bf16.msra.mxu1 %v10177_v25  ;;  %v10261_v24 = vld [vmem:[%s10964_s6 + $0x1828] ss:$16 sps:$4 sm:$0xff]   ;;  %v10266_v25 = vld [vmem:[%s10964_s6 + $0x1844] ss:$16 sps:$4 sm:$0xff]  }
 0x363   : > { %6588 = vmatprep.subr.bf16.mxu0 %v10182_v27  ;;  %7203 = vmatprep.subr.bf16.mxu1 %v10185_v28  ;;  %v10269_v27 = vld [vmem:[%s10964_s6 + $0x184c] ss:$16 sps:$4 sm:$0xff]   ;;  %v10264_v28 = vld [vmem:[%s10964_s6 + $0x1840] ss:$16 sps:$4 sm:$0xff]  }
 0x366   : > { %6589 = vmatpush1.bf16.msra.mxu0 %v10180_v29  ;;  %7204 = vmatpush1.bf16.msra.mxu1 %v10183_v30  ;;  %v10267_v29 = vld [vmem:[%s10964_s6 + $0x1848] ss:$16 sps:$4 sm:$0xff]   ;;  %v10272_v30 = vld [vmem:[%s10964_s6 + $0x1864] ss:$16 sps:$4 sm:$0xff]  }
 0x367   : > { %6590 = vmatprep.subr.bf16.mxu0 %v10188_v31  ;;  %7205 = vmatprep.subr.bf16.mxu1 %v10191_v16  ;;  %v10275_v31 = vld [vmem:[%s10964_s6 + $0x186c] ss:$16 sps:$4 sm:$0xff]   ;;  %v10270_v16 = vld [vmem:[%s10964_s6 + $0x1860] ss:$16 sps:$4 sm:$0xff]  }
 0x36a   : > { %6591 = vmatpush1.bf16.msra.mxu0 %v10186_v32  ;;  %7206 = vmatpush1.bf16.msra.mxu1 %v10189_v33  ;;  %v10273_v32 = vld [vmem:[%s10964_s6 + $0x1868] ss:$16 sps:$4 sm:$0xff]   ;;  %v10278_v33 = vld [vmem:[%s10964_s6 + $0x1884] ss:$16 sps:$4 sm:$0xff]  }
 0x36b   : > { %6592 = vmatprep.subr.bf16.mxu0 %v10194_v34  ;;  %7207 = vmatprep.subr.bf16.mxu1 %v10197_v26  ;;  %v10281_v34 = vld [vmem:[%s10964_s6 + $0x188c] ss:$16 sps:$4 sm:$0xff]   ;;  %v10276_v26 = vld [vmem:[%s10964_s6 + $0x1880] ss:$16 sps:$4 sm:$0xff]  }
 0x36e   : > { %6593 = vmatpush1.bf16.msra.mxu0 %v10192_v35  ;;  %7208 = vmatpush1.bf16.msra.mxu1 %v10195_v37  ;;  %v10279_v35 = vld [vmem:[%s10964_s6 + $0x1888] ss:$16 sps:$4 sm:$0xff]   ;;  %v10284_v37 = vld [vmem:[%s10964_s6 + $0x18a4] ss:$16 sps:$4 sm:$0xff]  }
 0x36f   : > { %6594 = vmatprep.subr.bf16.mxu0 %v10200_v38  ;;  %7209 = vmatprep.subr.bf16.mxu1 %v10203_v40  ;;  %v10287_v38 = vld [vmem:[%s10964_s6 + $0x18ac] ss:$16 sps:$4 sm:$0xff]   ;;  %v10282_v40 = vld [vmem:[%s10964_s6 + $0x18a0] ss:$16 sps:$4 sm:$0xff]  }
 0x372   : > { %6595 = vmatpush1.bf16.msra.mxu0 %v10198_v41  ;;  %7210 = vmatpush1.bf16.msra.mxu1 %v10201_v22  ;;  %v10285_v41 = vld [vmem:[%s10964_s6 + $0x18a8] ss:$16 sps:$4 sm:$0xff]   ;;  %v10290_v22 = vld [vmem:[%s10964_s6 + $0x18c4] ss:$16 sps:$4 sm:$0xff]  }
 0x373   : > { %6596 = vmatprep.subr.bf16.mxu0 %v10206_v42  ;;  %7211 = vmatprep.subr.bf16.mxu1 %v10209_v43  ;;  %v10293_v42 = vld [vmem:[%s10964_s6 + $0x18cc] ss:$16 sps:$4 sm:$0xff]   ;;  %v10288_v43 = vld [vmem:[%s10964_s6 + $0x18c0] ss:$16 sps:$4 sm:$0xff]  }
 0x376   : > { %6597 = vmatpush1.bf16.msra.mxu0 %v10204_v45  ;;  %7212 = vmatpush1.bf16.msra.mxu1 %v10207_v46  ;;  %v10291_v45 = vld [vmem:[%s10964_s6 + $0x18c8] ss:$16 sps:$4 sm:$0xff]   ;;  %v10296_v46 = vld [vmem:[%s10964_s6 + $0x18e4] ss:$16 sps:$4 sm:$0xff]  }
 0x377   : > { %6598 = vmatprep.subr.bf16.mxu0 %v10212_v47  ;;  %7213 = vmatprep.subr.bf16.mxu1 %v10215_v48  ;;  %v10299_v47 = vld [vmem:[%s10964_s6 + $0x18ec] ss:$16 sps:$4 sm:$0xff]   ;;  %v10294_v48 = vld [vmem:[%s10964_s6 + $0x18e0] ss:$16 sps:$4 sm:$0xff]  }
 0x37a   : > { %6599 = vmatpush1.bf16.msra.mxu0 %v10210_v51  ;;  %7214 = vmatpush1.bf16.msra.mxu1 %v10213_v54  ;;  %v10297_v51 = vld [vmem:[%s10964_s6 + $0x18e8] ss:$16 sps:$4 sm:$0xff]   ;;  %v10302_v54 = vld [vmem:[%s10964_s6 + $0x1904] ss:$16 sps:$4 sm:$0xff]  }
 0x37b   : > { %6600 = vmatprep.subr.bf16.mxu0 %v10218_v55  ;;  %7215 = vmatprep.subr.bf16.mxu1 %v10221_v56  ;;  %v10305_v55 = vld [vmem:[%s10964_s6 + $0x190c] ss:$16 sps:$4 sm:$0xff]   ;;  %v10300_v56 = vld [vmem:[%s10964_s6 + $0x1900] ss:$16 sps:$4 sm:$0xff]  }
 0x37e   : > { %6601 = vmatpush1.bf16.msra.mxu0 %v10216_v39  ;;  %7216 = vmatpush1.bf16.msra.mxu1 %v10219_v57  ;;  %v10303_v39 = vld [vmem:[%s10964_s6 + $0x1908] ss:$16 sps:$4 sm:$0xff]   ;;  %v10308_v57 = vld [vmem:[%s10964_s6 + $0x1924] ss:$16 sps:$4 sm:$0xff]  }
 0x37f   : > { %6602 = vmatprep.subr.bf16.mxu0 %v10224_v58  ;;  %7217 = vmatprep.subr.bf16.mxu1 %v10227_v59  ;;  %v10311_v58 = vld [vmem:[%s10964_s6 + $0x192c] ss:$16 sps:$4 sm:$0xff]   ;;  %v10306_v59 = vld [vmem:[%s10964_s6 + $0x1920] ss:$16 sps:$4 sm:$0xff]  }
 0x382   : > { %6603 = vmatpush1.bf16.msra.mxu0 %v10222_v49  ;;  %7218 = vmatpush1.bf16.msra.mxu1 %v10225_v60  ;;  %v10309_v49 = vld [vmem:[%s10964_s6 + $0x1928] ss:$16 sps:$4 sm:$0xff]   ;;  %v10314_v60 = vld [vmem:[%s10964_s6 + $0x1944] ss:$16 sps:$4 sm:$0xff]  }
 0x383   : > { %6604 = vmatprep.subr.bf16.mxu0 %v10230_v61  ;;  %7219 = vmatprep.subr.bf16.mxu1 %v10233_v14  ;;  %v10317_v61 = vld [vmem:[%s10964_s6 + $0x194c] ss:$16 sps:$4 sm:$0xff]   ;;  %v10312_v14 = vld [vmem:[%s10964_s6 + $0x1940] ss:$16 sps:$4 sm:$0xff]  }
 0x386   : > { %6605 = vmatpush1.bf16.msra.mxu0 %v10228_v0  ;;  %7220 = vmatpush1.bf16.msra.mxu1 %v10231_v1  ;;  %v10315_v0 = vld [vmem:[%s10964_s6 + $0x1948] ss:$16 sps:$4 sm:$0xff]   ;;  %v10320_v1 = vld [vmem:[%s10964_s6 + $0x1964] ss:$16 sps:$4 sm:$0xff]  }
 0x387   : > { %6606 = vmatprep.subr.bf16.mxu0 %v10236_v36  ;;  %7221 = vmatprep.subr.bf16.mxu1 %v10239_v3  ;;  %v10323_v36 = vld [vmem:[%s10964_s6 + $0x196c] ss:$16 sps:$4 sm:$0xff]   ;;  %v10318_v3 = vld [vmem:[%s10964_s6 + $0x1960] ss:$16 sps:$4 sm:$0xff]  }
 0x38a   : > { %6607 = vmatpush1.bf16.msra.mxu0 %v10234_v4  ;;  %7222 = vmatpush1.bf16.msra.mxu1 %v10237_v52  ;;  %v10321_v4 = vld [vmem:[%s10964_s6 + $0x1968] ss:$16 sps:$4 sm:$0xff]   ;;  %v10326_v52 = vld [vmem:[%s10964_s6 + $0x1984] ss:$16 sps:$4 sm:$0xff]  }
 0x38b   : > { %6608 = vmatprep.subr.bf16.mxu0 %v10242_v5  ;;  %7223 = vmatprep.subr.bf16.mxu1 %v10245_v6  ;;  %v10329_v5 = vld [vmem:[%s10964_s6 + $0x198c] ss:$16 sps:$4 sm:$0xff]   ;;  %v10324_v6 = vld [vmem:[%s10964_s6 + $0x1980] ss:$16 sps:$4 sm:$0xff]  }
 0x38e   : > { %6609 = vmatpush1.bf16.msra.mxu0 %v10240_v62  ;;  %7224 = vmatpush1.bf16.msra.mxu1 %v10243_v8  ;;  %v10327_v62 = vld [vmem:[%s10964_s6 + $0x1988] ss:$16 sps:$4 sm:$0xff]   ;;  %v10332_v8 = vld [vmem:[%s10964_s6 + $0x19a4] ss:$16 sps:$4 sm:$0xff]  }
 0x38f   : > { %6610 = vmatprep.subr.bf16.mxu0 %v10248_v9  ;;  %7225 = vmatprep.subr.bf16.mxu1 %v10251_v11  ;;  %v10335_v9 = vld [vmem:[%s10964_s6 + $0x19ac] ss:$16 sps:$4 sm:$0xff]   ;;  %v10330_v11 = vld [vmem:[%s10964_s6 + $0x19a0] ss:$16 sps:$4 sm:$0xff]  }
 0x392   : > { %6611 = vmatpush1.bf16.msra.mxu0 %v10246_v13  ;;  %7226 = vmatpush1.bf16.msra.mxu1 %v10249_v15  ;;  %v10333_v13 = vld [vmem:[%s10964_s6 + $0x19a8] ss:$16 sps:$4 sm:$0xff]   ;;  %v10338_v15 = vld [vmem:[%s10964_s6 + $0x19c4] ss:$16 sps:$4 sm:$0xff]  }
 0x393   : > { %6621 = vmatprep.subr.bf16.mxu0 %v10254_v17  ;;  %7236 = vmatprep.subr.bf16.mxu1 %v10257_v2  ;;  %v10341_v17 = vld [vmem:[%s10964_s6 + $0x19cc] ss:$16 sps:$4 sm:$0xff]   ;;  %v10336_v2 = vld [vmem:[%s10964_s6 + $0x19c0] ss:$16 sps:$4 sm:$0xff]  }
 0x395   : > { %6613 = vmatmul.mubr.bf16.vlgmr.msra.gmra.mrb[0].mxu0 %v1418_v18  ;;  %7228 = vmatmul.mubr.bf16.vlgmr.msra.gmra.mrb[0].mxu1 %v1418_v18  ;;  %v10344_v18 = vld [vmem:[%s10964_s6 + $0x19e4] ss:$16 sps:$4 sm:$0xff]  }
 0x396   : > { %6622 = vmatpush1.bf16.msra.mxu0 %v10252_v19  ;;  %7237 = vmatpush1.bf16.msra.mxu1 %v10255_v10  ;;  %v10347_v19 = vld [vmem:[%s10964_s6 + $0x19ec] ss:$16 sps:$4 sm:$0xff]   ;;  %v10342_v10 = vld [vmem:[%s10964_s6 + $0x19e0] ss:$16 sps:$4 sm:$0xff]  }
 0x397   : > { %6623 = vmatprep.subr.bf16.mxu0 %v10260_v20  ;;  %7238 = vmatprep.subr.bf16.mxu1 %v10263_v21  ;;  %v10345_v20 = vld [vmem:[%s10964_s6 + $0x19e8] ss:$16 sps:$4 sm:$0xff]   ;;  %v10351_v21 = vld [vmem:[%s10964_s6 + $0x1a04] ss:$16 sps:$4 sm:$0xff]  }
 0x398   : > { %6653 = vmatprep.mubr.bf16.mxu0 %v11907_v23  ;;  %7268 = vmatprep.mubr.bf16.mxu1 %v11907_v23 }
 0x39a   : > { %6624 = vmatpush1.bf16.msra.mxu0 %v10258_v63  ;;  %7239 = vmatpush1.bf16.msra.mxu1 %v10261_v24  ;;  %v10354_v63 = vld [vmem:[%s10964_s6 + $0x1a0c] ss:$16 sps:$4 sm:$0xff]   ;;  %v11973_v24 = vrot.slane %v11892_v12, %v11043_v50  ;;  %v10355_v12 = vld [vmem:[%s10964_s6 + $0x1a20] ss:$16 sps:$4 sm:$0xff]  }
 0x39b   : > { %6625 = vmatprep.subr.bf16.mxu0 %v10266_v25  ;;  %7240 = vmatprep.subr.bf16.mxu1 %v10269_v27  ;;  %v10349_v25 = vld [vmem:[%s10964_s6 + $0x1a00] ss:$16 sps:$4 sm:$0xff]   ;;  %v10352_v27 = vld [vmem:[%s10964_s6 + $0x1a08] ss:$16 sps:$4 sm:$0xff]  }
 0x39e   : > { %6626 = vmatpush1.bf16.msra.mxu0 %v10264_v28  ;;  %7241 = vmatpush1.bf16.msra.mxu1 %v10267_v29  ;;  %v10357_v28 = vld [vmem:[%s10964_s6 + $0x1a24] ss:$16 sps:$4 sm:$0xff]   ;;  %v10360_v29 = vld [vmem:[%s10964_s6 + $0x1a2c] ss:$16 sps:$4 sm:$0xff]  }
 0x39f   : > { %6627 = vmatprep.subr.bf16.mxu0 %v10272_v30  ;;  %7242 = vmatprep.subr.bf16.mxu1 %v10275_v31  ;;  %v1459_v30 = vcombine.high %v11907_v23, %v11907_v23  ;;  %v10358_v31 = vld [vmem:[%s10964_s6 + $0x1a28] ss:$16 sps:$4 sm:$0xff]   ;;  %v10361_v23 = vld [vmem:[%s10964_s6 + $0x1a40] ss:$16 sps:$4 sm:$0xff]  }
 0x3a2   : > { %6628 = vmatpush1.bf16.msra.mxu0 %v10270_v16  ;;  %7243 = vmatpush1.bf16.msra.mxu1 %v10273_v32  ;;  %v10363_v16 = vld [vmem:[%s10964_s6 + $0x1a44] ss:$16 sps:$4 sm:$0xff]   ;;  %v10366_v32 = vld [vmem:[%s10964_s6 + $0x1a4c] ss:$16 sps:$4 sm:$0xff]  }
 0x3a3   : > { %6629 = vmatprep.subr.bf16.mxu0 %v10278_v33  ;;  %7244 = vmatprep.subr.bf16.mxu1 %v10281_v34  ;;  %v10364_v33 = vld [vmem:[%s10964_s6 + $0x1a48] ss:$16 sps:$4 sm:$0xff]   ;;  %v10369_v34 = vld [vmem:[%s10964_s6 + $0x1a64] ss:$16 sps:$4 sm:$0xff]  }
 0x3a6   : > { %6630 = vmatpush1.bf16.msra.mxu0 %v10276_v26  ;;  %7245 = vmatpush1.bf16.msra.mxu1 %v10279_v35  ;;  %v10372_v26 = vld [vmem:[%s10964_s6 + $0x1a6c] ss:$16 sps:$4 sm:$0xff]   ;;  %v10367_v35 = vld [vmem:[%s10964_s6 + $0x1a60] ss:$16 sps:$4 sm:$0xff]  }
 0x3a7   : > { %6631 = vmatprep.subr.bf16.mxu0 %v10284_v37  ;;  %7246 = vmatprep.subr.bf16.mxu1 %v10287_v38  ;;  %v10370_v37 = vld [vmem:[%s10964_s6 + $0x1a68] ss:$16 sps:$4 sm:$0xff]   ;;  %v10375_v38 = vld [vmem:[%s10964_s6 + $0x1a84] ss:$16 sps:$4 sm:$0xff]  }
 0x3aa   : > { %6632 = vmatpush1.bf16.msra.mxu0 %v10282_v40  ;;  %7247 = vmatpush1.bf16.msra.mxu1 %v10285_v41  ;;  %v10378_v40 = vld [vmem:[%s10964_s6 + $0x1a8c] ss:$16 sps:$4 sm:$0xff]   ;;  %v10373_v41 = vld [vmem:[%s10964_s6 + $0x1a80] ss:$16 sps:$4 sm:$0xff]  }
 0x3ab   : > { %6633 = vmatprep.subr.bf16.mxu0 %v10290_v22  ;;  %7248 = vmatprep.subr.bf16.mxu1 %v10293_v42  ;;  %v10376_v22 = vld [vmem:[%s10964_s6 + $0x1a88] ss:$16 sps:$4 sm:$0xff]   ;;  %v10381_v42 = vld [vmem:[%s10964_s6 + $0x1aa4] ss:$16 sps:$4 sm:$0xff]  }
 0x3ae   : > { %6634 = vmatpush1.bf16.msra.mxu0 %v10288_v43  ;;  %7249 = vmatpush1.bf16.msra.mxu1 %v10291_v45  ;;  %v10384_v43 = vld [vmem:[%s10964_s6 + $0x1aac] ss:$16 sps:$4 sm:$0xff]   ;;  %v10379_v45 = vld [vmem:[%s10964_s6 + $0x1aa0] ss:$16 sps:$4 sm:$0xff]  }
 0x3af   : > { %6635 = vmatprep.subr.bf16.mxu0 %v10296_v46  ;;  %7250 = vmatprep.subr.bf16.mxu1 %v10299_v47  ;;  %v10382_v46 = vld [vmem:[%s10964_s6 + $0x1aa8] ss:$16 sps:$4 sm:$0xff]   ;;  %v10387_v47 = vld [vmem:[%s10964_s6 + $0x1ac4] ss:$16 sps:$4 sm:$0xff]  }
 0x3b2   : > { %6636 = vmatpush1.bf16.msra.mxu0 %v10294_v48  ;;  %7251 = vmatpush1.bf16.msra.mxu1 %v10297_v51  ;;  %v10390_v48 = vld [vmem:[%s10964_s6 + $0x1acc] ss:$16 sps:$4 sm:$0xff]   ;;  %v10385_v51 = vld [vmem:[%s10964_s6 + $0x1ac0] ss:$16 sps:$4 sm:$0xff]  }
 0x3b3   : > { %6637 = vmatprep.subr.bf16.mxu0 %v10302_v54  ;;  %7252 = vmatprep.subr.bf16.mxu1 %v10305_v55  ;;  %v10388_v54 = vld [vmem:[%s10964_s6 + $0x1ac8] ss:$16 sps:$4 sm:$0xff]   ;;  %v10393_v55 = vld [vmem:[%s10964_s6 + $0x1ae4] ss:$16 sps:$4 sm:$0xff]  }
 0x3b6   : > { %6638 = vmatpush1.bf16.msra.mxu0 %v10300_v56  ;;  %7253 = vmatpush1.bf16.msra.mxu1 %v10303_v39  ;;  %v10396_v56 = vld [vmem:[%s10964_s6 + $0x1aec] ss:$16 sps:$4 sm:$0xff]   ;;  %v10391_v39 = vld [vmem:[%s10964_s6 + $0x1ae0] ss:$16 sps:$4 sm:$0xff]  }
 0x3b7   : > { %6639 = vmatprep.subr.bf16.mxu0 %v10308_v57  ;;  %7254 = vmatprep.subr.bf16.mxu1 %v10311_v58  ;;  %v10394_v57 = vld [vmem:[%s10964_s6 + $0x1ae8] ss:$16 sps:$4 sm:$0xff]   ;;  %v10399_v58 = vld [vmem:[%s10964_s6 + $0x1b04] ss:$16 sps:$4 sm:$0xff]  }
 0x3ba   : > { %6640 = vmatpush1.bf16.msra.mxu0 %v10306_v59  ;;  %7255 = vmatpush1.bf16.msra.mxu1 %v10309_v49  ;;  %v10402_v59 = vld [vmem:[%s10964_s6 + $0x1b0c] ss:$16 sps:$4 sm:$0xff]   ;;  %v10397_v49 = vld [vmem:[%s10964_s6 + $0x1b00] ss:$16 sps:$4 sm:$0xff]  }
 0x3bb   : > { %6641 = vmatprep.subr.bf16.mxu0 %v10314_v60  ;;  %7256 = vmatprep.subr.bf16.mxu1 %v10317_v61  ;;  %v10400_v60 = vld [vmem:[%s10964_s6 + $0x1b08] ss:$16 sps:$4 sm:$0xff]   ;;  %v10405_v61 = vld [vmem:[%s10964_s6 + $0x1b24] ss:$16 sps:$4 sm:$0xff]  }
 0x3be   : > { %6642 = vmatpush1.bf16.msra.mxu0 %v10312_v14  ;;  %7257 = vmatpush1.bf16.msra.mxu1 %v10315_v0  ;;  %v10408_v14 = vld [vmem:[%s10964_s6 + $0x1b2c] ss:$16 sps:$4 sm:$0xff]   ;;  %v10403_v0 = vld [vmem:[%s10964_s6 + $0x1b20] ss:$16 sps:$4 sm:$0xff]  }
 0x3bf   : > { %6643 = vmatprep.subr.bf16.mxu0 %v10320_v1  ;;  %7258 = vmatprep.subr.bf16.mxu1 %v10323_v36  ;;  %v10406_v1 = vld [vmem:[%s10964_s6 + $0x1b28] ss:$16 sps:$4 sm:$0xff]   ;;  %v10411_v36 = vld [vmem:[%s10964_s6 + $0x1b44] ss:$16 sps:$4 sm:$0xff]  }
 0x3c2   : > { %6644 = vmatpush1.bf16.msra.mxu0 %v10318_v3  ;;  %7259 = vmatpush1.bf16.msra.mxu1 %v10321_v4  ;;  %v10414_v3 = vld [vmem:[%s10964_s6 + $0x1b4c] ss:$16 sps:$4 sm:$0xff]   ;;  %v10409_v4 = vld [vmem:[%s10964_s6 + $0x1b40] ss:$16 sps:$4 sm:$0xff]  }
 0x3c3   : > { %6645 = vmatprep.subr.bf16.mxu0 %v10326_v52  ;;  %7260 = vmatprep.subr.bf16.mxu1 %v10329_v5  ;;  %v10412_v52 = vld [vmem:[%s10964_s6 + $0x1b48] ss:$16 sps:$4 sm:$0xff]   ;;  %v10417_v5 = vld [vmem:[%s10964_s6 + $0x1b64] ss:$16 sps:$4 sm:$0xff]  }
 0x3c6   : > { %6646 = vmatpush1.bf16.msra.mxu0 %v10324_v6  ;;  %7261 = vmatpush1.bf16.msra.mxu1 %v10327_v62  ;;  %v10420_v6 = vld [vmem:[%s10964_s6 + $0x1b6c] ss:$16 sps:$4 sm:$0xff]   ;;  %v10415_v62 = vld [vmem:[%s10964_s6 + $0x1b60] ss:$16 sps:$4 sm:$0xff]  }
 0x3c7   : > { %6647 = vmatprep.subr.bf16.mxu0 %v10332_v8  ;;  %7262 = vmatprep.subr.bf16.mxu1 %v10335_v9  ;;  %v10418_v8 = vld [vmem:[%s10964_s6 + $0x1b68] ss:$16 sps:$4 sm:$0xff]   ;;  %v10423_v9 = vld [vmem:[%s10964_s6 + $0x1b84] ss:$16 sps:$4 sm:$0xff]  }
 0x3ca   : > { %6648 = vmatpush1.bf16.msra.mxu0 %v10330_v11  ;;  %7263 = vmatpush1.bf16.msra.mxu1 %v10333_v13  ;;  %v10426_v11 = vld [vmem:[%s10964_s6 + $0x1b8c] ss:$16 sps:$4 sm:$0xff]   ;;  %v10421_v13 = vld [vmem:[%s10964_s6 + $0x1b80] ss:$16 sps:$4 sm:$0xff]  }
 0x3cb   : > { %6649 = vmatprep.subr.bf16.mxu0 %v10338_v15  ;;  %7264 = vmatprep.subr.bf16.mxu1 %v10341_v17  ;;  %v10424_v15 = vld [vmem:[%s10964_s6 + $0x1b88] ss:$16 sps:$4 sm:$0xff]   ;;  %v10429_v17 = vld [vmem:[%s10964_s6 + $0x1ba4] ss:$16 sps:$4 sm:$0xff]  }
 0x3ce   : > { %6650 = vmatpush1.bf16.msra.mxu0 %v10336_v2  ;;  %7265 = vmatpush1.bf16.msra.mxu1 %v10339_v53  ;;  %v10432_v2 = vld [vmem:[%s10964_s6 + $0x1bac] ss:$16 sps:$4 sm:$0xff]   ;;  %v10427_v53 = vld [vmem:[%s10964_s6 + $0x1ba0] ss:$16 sps:$4 sm:$0xff]  }
 0x3cf   : > { %6651 = vmatprep.subr.bf16.mxu0 %v10344_v18  ;;  %7266 = vmatprep.subr.bf16.mxu1 %v10347_v19  ;;  %v10430_v18 = vld [vmem:[%s10964_s6 + $0x1ba8] ss:$16 sps:$4 sm:$0xff]   ;;  %v10435_v19 = vld [vmem:[%s10964_s6 + $0x1bc4] ss:$16 sps:$4 sm:$0xff]  }
 0x3d2   : > { %6652 = vmatpush1.bf16.msra.mxu0 %v10342_v10  ;;  %7267 = vmatpush1.bf16.msra.mxu1 %v10345_v20  ;;  %v10438_v10 = vld [vmem:[%s10964_s6 + $0x1bcc] ss:$16 sps:$4 sm:$0xff]   ;;  %v10433_v20 = vld [vmem:[%s10964_s6 + $0x1bc0] ss:$16 sps:$4 sm:$0xff]  }
 0x3d3   : > { %6662 = vmatprep.subr.bf16.mxu0 %v10351_v21  ;;  %7277 = vmatprep.subr.bf16.mxu1 %v10354_v63  ;;  %v10436_v21 = vld [vmem:[%s10964_s6 + $0x1bc8] ss:$16 sps:$4 sm:$0xff]   ;;  %v10441_v63 = vld [vmem:[%s10964_s6 + $0x1be4] ss:$16 sps:$4 sm:$0xff]  }
 0x3d5   : > { %6654 = vmatmul.mubr.bf16.vlgmr.msra.gmra.mrb[0].mxu0 %v11973_v24  ;;  %7269 = vmatmul.mubr.bf16.vlgmr.msra.gmra.mrb[0].mxu1 %v11973_v24 }
 0x3d6   : > { %6663 = vmatpush1.bf16.msra.mxu0 %v10349_v25  ;;  %7278 = vmatpush1.bf16.msra.mxu1 %v10352_v27  ;;  %v10444_v25 = vld [vmem:[%s10964_s6 + $0x1bec] ss:$16 sps:$4 sm:$0xff]   ;;  %v10439_v27 = vld [vmem:[%s10964_s6 + $0x1be0] ss:$16 sps:$4 sm:$0xff]  }
 0x3d7   : > { %6664 = vmatprep.subr.bf16.mxu0 %v10357_v28  ;;  %7279 = vmatprep.subr.bf16.mxu1 %v10360_v29  ;;  %v10442_v28 = vld [vmem:[%s10964_s6 + $0x1be8] ss:$16 sps:$4 sm:$0xff]   ;;  %v10447_v29 = vld [vmem:[%s10964_s6 + $0x1c04] ss:$16 sps:$4 sm:$0xff]  }
 0x3d8   : > { %6694 = vmatprep.mubr.bf16.mxu0 %v1459_v30  ;;  %7309 = vmatprep.mubr.bf16.mxu1 %v1459_v30  ;;  %v10450_v30 = vld [vmem:[%s10964_s6 + $0x1c0c] ss:$16 sps:$4 sm:$0xff]  }
 0x3da   : > { %6665 = vmatpush1.bf16.msra.mxu0 %v10355_v12  ;;  %7280 = vmatpush1.bf16.msra.mxu1 %v10358_v31  ;;  %v1458_v12 = vcombine.high %v11973_v24, %v11973_v24  ;;  %v10445_v31 = vld [vmem:[%s10964_s6 + $0x1c00] ss:$16 sps:$4 sm:$0xff]   ;;  %v10454_v24 = vld [vmem:[%s10964_s6 + $0x1c28] ss:$16 sps:$4 sm:$0xff]  }
 0x3db   : > { %6666 = vmatprep.subr.bf16.mxu0 %v10363_v16  ;;  %7281 = vmatprep.subr.bf16.mxu1 %v10366_v32  ;;  %v10448_v16 = vld [vmem:[%s10964_s6 + $0x1c08] ss:$16 sps:$4 sm:$0xff]   ;;  %v10453_v32 = vld [vmem:[%s10964_s6 + $0x1c24] ss:$16 sps:$4 sm:$0xff]  }
 0x3de   : > { %6667 = vmatpush1.bf16.msra.mxu0 %v10361_v23  ;;  %7282 = vmatpush1.bf16.msra.mxu1 %v10364_v33  ;;  %v10456_v23 = vld [vmem:[%s10964_s6 + $0x1c2c] ss:$16 sps:$4 sm:$0xff]   ;;  %v10451_v33 = vld [vmem:[%s10964_s6 + $0x1c20] ss:$16 sps:$4 sm:$0xff]  }
 0x3df   : > { %6668 = vmatprep.subr.bf16.mxu0 %v10369_v34  ;;  %7283 = vmatprep.subr.bf16.mxu1 %v10372_v26  ;;  %v10459_v34 = vld [vmem:[%s10964_s6 + $0x1c44] ss:$16 sps:$4 sm:$0xff]   ;;  %v10462_v26 = vld [vmem:[%s10964_s6 + $0x1c4c] ss:$16 sps:$4 sm:$0xff]  }
 0x3e2   : > { %6669 = vmatpush1.bf16.msra.mxu0 %v10367_v35  ;;  %7284 = vmatpush1.bf16.msra.mxu1 %v10370_v37  ;;  %v10691_v35 = vmov 0   ;;  %v10457_v37 = vld [vmem:[%s10964_s6 + $0x1c40] ss:$16 sps:$4 sm:$0xff]  }
 0x3e3   : > { %6670 = vmatprep.subr.bf16.mxu0 %v10375_v38  ;;  %7285 = vmatprep.subr.bf16.mxu1 %v10378_v40  ;;  %v10460_v38 = vld [vmem:[%s10964_s6 + $0x1c48] ss:$16 sps:$4 sm:$0xff]   ;;  %v10465_v40 = vld [vmem:[%s10964_s6 + $0x1c64] ss:$16 sps:$4 sm:$0xff]  }
 0x3e6   : > { %6671 = vmatpush1.bf16.msra.mxu0 %v10373_v41  ;;  %7286 = vmatpush1.bf16.msra.mxu1 %v10376_v22  ;;  %v10468_v41 = vld [vmem:[%s10964_s6 + $0x1c6c] ss:$16 sps:$4 sm:$0xff]   ;;  %v10463_v22 = vld [vmem:[%s10964_s6 + $0x1c60] ss:$16 sps:$4 sm:$0xff]  }
 0x3e7   : > { %6672 = vmatprep.subr.bf16.mxu0 %v10381_v42  ;;  %7287 = vmatprep.subr.bf16.mxu1 %v10384_v43  ;;  %v10466_v42 = vld [vmem:[%s10964_s6 + $0x1c68] ss:$16 sps:$4 sm:$0xff]   ;;  %v10471_v43 = vld [vmem:[%s10964_s6 + $0x1c84] ss:$16 sps:$4 sm:$0xff]  }
 0x3ea   : > { %6673 = vmatpush1.bf16.msra.mxu0 %v10379_v45  ;;  %7288 = vmatpush1.bf16.msra.mxu1 %v10382_v46  ;;  %v10474_v45 = vld [vmem:[%s10964_s6 + $0x1c8c] ss:$16 sps:$4 sm:$0xff]   ;;  %v10469_v46 = vld [vmem:[%s10964_s6 + $0x1c80] ss:$16 sps:$4 sm:$0xff]  }
 0x3eb   : > { %6674 = vmatprep.subr.bf16.mxu0 %v10387_v47  ;;  %7289 = vmatprep.subr.bf16.mxu1 %v10390_v48  ;;  %v10472_v47 = vld [vmem:[%s10964_s6 + $0x1c88] ss:$16 sps:$4 sm:$0xff]   ;;  %v10477_v48 = vld [vmem:[%s10964_s6 + $0x1ca4] ss:$16 sps:$4 sm:$0xff]  }
 0x3ee   : > { %6675 = vmatpush1.bf16.msra.mxu0 %v10385_v51  ;;  %7290 = vmatpush1.bf16.msra.mxu1 %v10388_v54  ;;  %v10480_v51 = vld [vmem:[%s10964_s6 + $0x1cac] ss:$16 sps:$4 sm:$0xff]   ;;  %v10475_v54 = vld [vmem:[%s10964_s6 + $0x1ca0] ss:$16 sps:$4 sm:$0xff]  }
 0x3ef   : > { %6676 = vmatprep.subr.bf16.mxu0 %v10393_v55  ;;  %7291 = vmatprep.subr.bf16.mxu1 %v10396_v56  ;;  %v10478_v55 = vld [vmem:[%s10964_s6 + $0x1ca8] ss:$16 sps:$4 sm:$0xff]   ;;  %v10483_v56 = vld [vmem:[%s10964_s6 + $0x1cc4] ss:$16 sps:$4 sm:$0xff]  }
 0x3f2   : > { %6677 = vmatpush1.bf16.msra.mxu0 %v10391_v39  ;;  %7292 = vmatpush1.bf16.msra.mxu1 %v10394_v57  ;;  %v10486_v39 = vld [vmem:[%s10964_s6 + $0x1ccc] ss:$16 sps:$4 sm:$0xff]   ;;  %v1421_v57 = vcombine.high %v11884_v7, %v11884_v7  ;;  %v10692_v7 = vmov 1983009808  }
 0x3f3   : > { %6678 = vmatprep.subr.bf16.mxu0 %v10399_v58  ;;  %7293 = vmatprep.subr.bf16.mxu1 %v10402_v59  ;;  %v10481_v58 = vld [vmem:[%s10964_s6 + $0x1cc0] ss:$16 sps:$4 sm:$0xff]   ;;  %v10484_v59 = vld [vmem:[%s10964_s6 + $0x1cc8] ss:$16 sps:$4 sm:$0xff]  }
 0x3f6   : > { %6679 = vmatpush1.bf16.msra.mxu0 %v10397_v49  ;;  %7294 = vmatpush1.bf16.msra.mxu1 %v10400_v60  ;;  %v10489_v49 = vld [vmem:[%s10964_s6 + $0x1ce4] ss:$16 sps:$4 sm:$0xff]   ;;  %v10492_v60 = vld [vmem:[%s10964_s6 + $0x1cec] ss:$16 sps:$4 sm:$0xff]  }
 0x3f7   : > { %6680 = vmatprep.subr.bf16.mxu0 %v10405_v61  ;;  %7295 = vmatprep.subr.bf16.mxu1 %v10408_v14  ;;  %v1435_v61 = vrot.slane %v1421_v57, %v11043_v50  ;;  %v10487_v14 = vld [vmem:[%s10964_s6 + $0x1ce0] ss:$16 sps:$4 sm:$0xff]   ;;  %v7447_v57 = vld [vmem:[%s10993_s11 + $0xb0] sm:$0xff] (!%p8729_p6) }
 0x3fa   : > { %6681 = vmatpush1.bf16.msra.mxu0 %v10403_v0  ;;  %7296 = vmatpush1.bf16.msra.mxu1 %v10406_v1  ;;  %v10490_v0 = vld [vmem:[%s10964_s6 + $0x1ce8] ss:$16 sps:$4 sm:$0xff]   ;;  %v1450_v1 = vrot.slane %v1435_v61, %v11043_v50  ;;  %v7480_v61 = vld [vmem:[%s10993_s11 + $0x1b8] sm:$0xff] (!%p8729_p6) }
 0x3fb   : > { %6682 = vmatprep.subr.bf16.mxu0 %v10411_v36  ;;  %7297 = vmatprep.subr.bf16.mxu1 %v10414_v3  ;;  %v7366_v36 = vunpack.c.l.s4 %v10692_v7  ;;  %v7463_v7 = vld [vmem:[%s10993_s11 + $0x130] sm:$0xff] (!%p8729_p6) }
 0x3fd   : > { %v7367_v3 = vunpack.c.0.s8 %v7366_v36  ;;  %v7464_v36 = vld [vmem:[%s10993_s11 + $0x138] sm:$0xff] (!%p8729_p6) }
 0x3fe   : > { %6683 = vmatpush1.bf16.msra.mxu0 %v10409_v4  ;;  %7298 = vmatpush1.bf16.msra.mxu1 %v10412_v52 }
 0x3ff   : > { %6684 = vmatprep.subr.bf16.mxu0 %v10417_v5  ;;  %7299 = vmatprep.subr.bf16.mxu1 %v10420_v6  ;;  %v12080_v5 = vsub.s32 %v7367_v3, %v11035_v44  ;;  %v7449_v3 = vld [vmem:[%s10993_s11 + $0xc0] sm:$0xff] (!%p8729_p6) }
 0x402   : > { %6685 = vmatpush1.bf16.msra.mxu0 %v10415_v62  ;;  %7300 = vmatpush1.bf16.msra.mxu1 %v10418_v8 }
 0x403   : > { %6686 = vmatprep.subr.bf16.mxu0 %v10423_v9  ;;  %7301 = vmatprep.subr.bf16.mxu1 %v10426_v11 }
 0x406   : > { %6687 = vmatpush1.bf16.msra.mxu0 %v10421_v13  ;;  %7302 = vmatpush1.bf16.msra.mxu1 %v10424_v15 }
 0x407   : > { %6688 = vmatprep.subr.bf16.mxu0 %v10429_v17  ;;  %7303 = vmatprep.subr.bf16.mxu1 %v10432_v2 }
 0x40a   : > { %6689 = vmatpush1.bf16.msra.mxu0 %v10427_v53  ;;  %7304 = vmatpush1.bf16.msra.mxu1 %v10430_v18  ;;  %v337_v53 = vld [vmem:[#allocation2] sm:$0xff] }
 0x40b   : > { %6690 = vmatprep.subr.bf16.mxu0 %v10435_v19  ;;  %7305 = vmatprep.subr.bf16.mxu1 %v10438_v10  ;;  %v7441_v10 = vld [vmem:[%s10993_s11 + $0x80] sm:$0xff] (!%p8729_p6) }
 0x40e   : > { %6691 = vmatpush1.bf16.msra.mxu0 %v10433_v20  ;;  %7306 = vmatpush1.bf16.msra.mxu1 %v10436_v21  ;;  %v7442_v20 = vld [vmem:[%s10993_s11 + $0x88] sm:$0xff] (!%p8729_p6)  ;;  %v7473_v21 = vld [vmem:[%s10993_s11 + $0x180] sm:$0xff] (!%p8729_p6) }
 0x40f   : > { %6692 = vmatprep.subr.bf16.mxu0 %v10441_v63  ;;  %7307 = vmatprep.subr.bf16.mxu1 %v10444_v25  ;;  %v8805_v63 = vpack.c.bf16 (!%p8729_p6), %v7442_v20, %v7441_v10  ;;  %v7474_v25 = vld [vmem:[%s10993_s11 + $0x188] sm:$0xff] (!%p8729_p6) }
 0x412   : > { %6693 = vmatpush1.bf16.msra.mxu0 %v10439_v27  ;;  %7308 = vmatpush1.bf16.msra.mxu1 %v10442_v28  ;;  %v7425_v27 = vld [vmem:[%s10993_s11] sm:$0xff] (!%p8729_p6)  ;;  %v7426_v28 = vld [vmem:[%s10993_s11 + $0x8] sm:$0xff] (!%p8729_p6) }
 0x413   : > { %6703 = vmatprep.subr.bf16.mxu0 %v10447_v29  ;;  %7318 = vmatprep.subr.bf16.mxu1 %v10450_v30  ;;  %v8837_v29 = vpack.c.bf16 (!%p8729_p6), %v7474_v25, %v7473_v21  ;;  %v8807_v30 = vpack.c.bf16 (!%p8729_p6), %v7426_v28, %v7425_v27  ;;  %v7436_v25 = vld [vmem:[%s10993_s11 + $0x58] sm:$0xff] (!%p8729_p6)  ;;  %v7467_v27 = vld [vmem:[%s10993_s11 + $0x150] sm:$0xff] (!%p8729_p6) }
 0x415   : > { %6695 = vmatmul.mubr.bf16.vlgmr.msra.gmra.mrb[0].mxu0 %v1458_v12  ;;  %7310 = vmatmul.mubr.bf16.vlgmr.msra.gmra.mrb[0].mxu1 %v1458_v12  ;;  %v7457_v12 = vld [vmem:[%s10993_s11 + $0x100] sm:$0xff] (!%p8729_p6) }
 0x416   : > { %6704 = vmatpush1.bf16.msra.mxu0 %v10445_v31  ;;  %7319 = vmatpush1.bf16.msra.mxu1 %v10448_v16  ;;  %v7458_v31 = vld [vmem:[%s10993_s11 + $0x108] sm:$0xff] (!%p8729_p6)  ;;  %v7443_v16 = vld [vmem:[%s10993_s11 + $0x90] sm:$0xff] (!%p8729_p6) }
 0x417   : > { %6705 = vmatprep.subr.bf16.mxu0 %v10453_v32  ;;  %7320 = vmatprep.subr.bf16.mxu1 %v10456_v23  ;;  %v8839_v32 = vpack.c.bf16 (!%p8729_p6), %v7458_v31, %v7457_v12  ;;  %v7444_v23 = vld [vmem:[%s10993_s11 + $0x98] sm:$0xff] (!%p8729_p6)  ;;  %v7454_v12 = vld [vmem:[%s10993_s11 + $0xe8] sm:$0xff] (!%p8729_p6)  ;;  %v7392_v31 = vsub.s32 (!%p8729_p6), 0, %v11035_v44 }
 0x418   : > { %6735 = vmatprep.mubr.bf16.mxu0 %v10691_v35  ;;  %7350 = vmatprep.mubr.bf16.mxu1 %v10691_v35  ;;  %v7427_v35 = vld [vmem:[%s10993_s11 + $0x10] sm:$0xff] (!%p8729_p6) }
 0x41a   : > { %6706 = vmatpush1.bf16.msra.mxu0 %v10451_v33  ;;  %7321 = vmatpush1.bf16.msra.mxu1 %v10454_v24  ;;  %v7475_v33 = vld [vmem:[%s10993_s11 + $0x190] sm:$0xff] (!%p8729_p6)  ;;  %v7476_v24 = vld [vmem:[%s10993_s11 + $0x198] sm:$0xff] (!%p8729_p6) }
 0x41b   : > { %6707 = vmatprep.subr.bf16.mxu0 %v10459_v34  ;;  %7322 = vmatprep.subr.bf16.mxu1 %v10462_v26  ;;  %v8809_v34 = vpack.c.bf16 (!%p8729_p6), %v7444_v23, %v7443_v16  ;;  %v8841_v26 = vpack.c.bf16 (!%p8729_p6), %v7476_v24, %v7475_v33  ;;  %v7396_v16 = vsub.s32 (!%p8729_p6), 1, %v11035_v44  ;;  %v7485_v23 = vld [vmem:[%s10993_s11 + $0x1e0] sm:$0xff] (!%p8729_p6)  ;;  %v7486_v33 = vld [vmem:[%s10993_s11 + $0x1e8] sm:$0xff] (!%p8729_p6)  ;;  %v7404_v24 = vsub.s32 (!%p8729_p6), 3, %v11035_v44 }
 0x41e   : > { %6708 = vmatpush1.bf16.msra.mxu0 %v10457_v37  ;;  %7323 = vmatpush1.bf16.msra.mxu1 %v10460_v38  ;;  %v7428_v37 = vld [vmem:[%s10993_s11 + $0x18] sm:$0xff] (!%p8729_p6)  ;;  %v7459_v38 = vld [vmem:[%s10993_s11 + $0x110] sm:$0xff] (!%p8729_p6) }
 0x41f   : > { %6709 = vmatprep.subr.bf16.mxu0 %v10465_v40  ;;  %7324 = vmatprep.subr.bf16.mxu1 %v10468_v41  ;;  %v8811_v40 = vpack.c.bf16 (!%p8729_p6), %v7428_v37, %v7427_v35  ;;  %v7460_v41 = vld [vmem:[%s10993_s11 + $0x118] sm:$0xff] (!%p8729_p6) }
 0x422   : > { %6710 = vmatpush1.bf16.msra.mxu0 %v10463_v22  ;;  %7325 = vmatpush1.bf16.msra.mxu1 %v10466_v42  ;;  %v7445_v22 = vld [vmem:[%s10993_s11 + $0xa0] sm:$0xff] (!%p8729_p6)  ;;  %v7446_v42 = vld [vmem:[%s10993_s11 + $0xa8] sm:$0xff] (!%p8729_p6) }
 0x423   : > { %6711 = vmatprep.subr.bf16.mxu0 %v10471_v43  ;;  %7326 = vmatprep.subr.bf16.mxu1 %v10474_v45  ;;  %v8843_v43 = vpack.c.bf16 (!%p8729_p6), %v7460_v41, %v7459_v38  ;;  %v8813_v45 = vpack.c.bf16 (!%p8729_p6), %v7446_v42, %v7445_v22  ;;  %v7438_v38 = vld [vmem:[%s10993_s11 + $0x68] sm:$0xff] (!%p8729_p6)  ;;  %v7388_v41 = vld [vmem:[%s271_s29] sm:$0xf] (!%p8729_p6)  ;;  %v8861_v22 = vpack.c.bf16 (!%p8729_p6), %v7486_v33, %v7485_v23 }
 0x424   : > { %v7470_v42 = vld [vmem:[%s10993_s11 + $0x168] sm:$0xff] (!%p8729_p6) }
 0x426   : > { %6712 = vmatpush1.bf16.msra.mxu0 %v10469_v46  ;;  %7327 = vmatpush1.bf16.msra.mxu1 %v10472_v47  ;;  %v7477_v46 = vld [vmem:[%s10993_s11 + $0x1a0] sm:$0xff] (!%p8729_p6)  ;;  %v7478_v47 = vld [vmem:[%s10993_s11 + $0x1a8] sm:$0xff] (!%p8729_p6) }
 0x427   : > { %6713 = vmatprep.subr.bf16.mxu0 %v10477_v48  ;;  %7328 = vmatprep.subr.bf16.mxu1 %v10480_v51  ;;  %v7429_v48 = vld [vmem:[%s10993_s11 + $0x20] sm:$0xff] (!%p8729_p6)  ;;  %v8845_v51 = vpack.c.bf16 (!%p8729_p6), %v7478_v47, %v7477_v46  ;;  %v7397_v46 = vrot.slane (!%p8729_p6), %v7388_v41, %v7396_v16 }
 0x42a   : > { %6714 = vmatpush1.bf16.msra.mxu0 %v10475_v54  ;;  %7329 = vmatpush1.bf16.msra.mxu1 %v10478_v55  ;;  %v7430_v54 = vld [vmem:[%s10993_s11 + $0x28] sm:$0xff] (!%p8729_p6)  ;;  %v7461_v55 = vld [vmem:[%s10993_s11 + $0x120] sm:$0xff] (!%p8729_p6) }
 0x42b   : > { %6715 = vmatprep.subr.bf16.mxu0 %v10483_v56  ;;  %7330 = vmatprep.subr.bf16.mxu1 %v10486_v39  ;;  %v7462_v56 = vld [vmem:[%s10993_s11 + $0x128] sm:$0xff] (!%p8729_p6)  ;;  %v8815_v39 = vpack.c.bf16 (!%p8729_p6), %v7430_v54, %v7429_v48  ;;  %v7487_v48 = vld [vmem:[%s10993_s11 + $0x1f0] sm:$0xff] (!%p8729_p6)  ;;  %v7405_v54 = vrot.slane (!%p8729_p6), %v7388_v41, %v7404_v24 }
 0x42e   : > { %6716 = vmatpush1.bf16.msra.mxu0 %v10481_v58  ;;  %7331 = vmatpush1.bf16.msra.mxu1 %v10484_v59  ;;  %v7448_v58 = vld [vmem:[%s10993_s11 + $0xb8] sm:$0xff] (!%p8729_p6)  ;;  %v7479_v59 = vld [vmem:[%s10993_s11 + $0x1b0] sm:$0xff] (!%p8729_p6) }
 0x42f   : > { %6717 = vmatprep.subr.bf16.mxu0 %v10489_v49  ;;  %7332 = vmatprep.subr.bf16.mxu1 %v10492_v60  ;;  %v8847_v49 = vpack.c.bf16 (!%p8729_p6), %v7462_v56, %v7461_v55  ;;  %v8817_v60 = vpack.c.bf16 (!%p8729_p6), %v7448_v58, %v7447_v57  ;;  %v7439_v58 = vld [vmem:[%s10993_s11 + $0x70] sm:$0xff] (!%p8729_p6) }
 0x432   : > { %6718 = vmatpush1.bf16.msra.mxu0 %v10487_v14  ;;  %7333 = vmatpush1.bf16.msra.mxu1 %v10490_v0  ;;  %v7431_v14 = vld [vmem:[%s10993_s11 + $0x30] sm:$0xff] (!%p8729_p6)  ;;  %v7432_v0 = vld [vmem:[%s10993_s11 + $0x38] sm:$0xff] (!%p8729_p6) }
 0x433   : > { %8806 = vmatprep.subr.bf16.mxu0 (!%p8729_p6), %v8805_v63  ;;  %8838 = vmatprep.subr.bf16.mxu1 (!%p8729_p6), %v8837_v29  ;;  %v7435_v63 = vld [vmem:[%s10993_s11 + $0x50] sm:$0xff] (!%p8729_p6)  ;;  %v7468_v29 = vld [vmem:[%s10993_s11 + $0x158] sm:$0xff] (!%p8729_p6) }
 0x434   : > { %v8859_v35 = vpack.c.bf16 (!%p8729_p6), %v7468_v29, %v7467_v27 }
 0x435   : > { %6736 = vmatmul.mubr.bf16.vlgmr.msra.gmra.mrb[0].mxu0 %v1450_v1  ;;  %7351 = vmatmul.mubr.bf16.vlgmr.msra.gmra.mrb[0].mxu1 %v1450_v1  ;;  %v8849_v1 = vpack.c.bf16 (!%p8729_p6), %v7480_v61, %v7479_v59  ;;  %v7440_v59 = vld [vmem:[%s10993_s11 + $0x78] sm:$0xff] (!%p8729_p6)  ;;  %v7471_v61 = vld [vmem:[%s10993_s11 + $0x170] sm:$0xff] (!%p8729_p6) }
 0x436   : > { %8808 = vmatpush3.bf16.msra.mxu0 (!%p8729_p6), %v8807_v30  ;;  %8840 = vmatpush3.bf16.msra.mxu1 (!%p8729_p6), %v8839_v32  ;;  %v7453_v30 = vld [vmem:[%s10993_s11 + $0xe0] sm:$0xff] (!%p8729_p6)  ;;  %v7400_v32 = vsub.s32 (!%p8729_p6), 2, %v11035_v44  ;;  %v7456_v44 = vld [vmem:[%s10993_s11 + $0xf8] sm:$0xff] (!%p8729_p6) }
 0x437   : > { %8810 = vmatprep.subr.bf16.mxu0 (!%p8729_p6), %v8809_v34  ;;  %8842 = vmatprep.subr.bf16.mxu1 (!%p8729_p6), %v8841_v26  ;;  %v8827_v34 = vpack.c.bf16 (!%p8729_p6), %v7436_v25, %v7435_v63  ;;  %v7437_v26 = vld [vmem:[%s10993_s11 + $0x60] sm:$0xff] (!%p8729_p6)  ;;  %v8829_v37 = vpack.c.bf16 (!%p8729_p6), %v7454_v12, %v7453_v30 }
 0x438   : > { %v7401_v47 = vrot.slane (!%p8729_p6), %v7388_v41, %v7400_v32  ;;  %v8831_v55 = vpack.c.bf16 (!%p8729_p6), %v7438_v38, %v7437_v26 }
 0x43a   : > { %8812 = vmatpush3.bf16.msra.mxu0 (!%p8729_p6), %v8811_v40  ;;  %8844 = vmatpush3.bf16.msra.mxu1 (!%p8729_p6), %v8843_v43  ;;  %v7469_v40 = vld [vmem:[%s10993_s11 + $0x160] sm:$0xff] (!%p8729_p6)  ;;  %v7455_v43 = vld [vmem:[%s10993_s11 + $0xf0] sm:$0xff] (!%p8729_p6) }
 0x43b   : > { %8814 = vmatprep.subr.bf16.mxu0 (!%p8729_p6), %v8813_v45  ;;  %8846 = vmatprep.subr.bf16.mxu1 (!%p8729_p6), %v8845_v51  ;;  %v7393_v45 = vrot.slane (!%p8729_p6), %v7388_v41, %v7392_v31  ;;  %v7488_v51 = vld [vmem:[%s10993_s11 + $0x1f8] sm:$0xff] (!%p8729_p6)  ;;  %v8833_v57 = vpack.c.bf16 (!%p8729_p6), %v7456_v44, %v7455_v43 }
 0x43d   : > { %v7406_v56 = vcombine.low (!%p8729_p6), %v7393_v45, %v7397_v46 }
 0x43e   : > { %8816 = vmatpush3.bf16.msra.mxu0 (!%p8729_p6), %v8815_v39  ;;  %8848 = vmatpush3.bf16.msra.mxu1 (!%p8729_p6), %v8847_v49  ;;  %v8863_v39 = vpack.c.bf16 (!%p8729_p6), %v7470_v42, %v7469_v40  ;;  %v7407_v49 = vcombine.low (!%p8729_p6), %v7401_v47, %v7405_v54 }
 0x43f   : > { %8818 = vmatprep.subr.bf16.mxu0 (!%p8729_p6), %v8817_v60  ;;  %8850 = vmatprep.subr.bf16.mxu1 (!%p8729_p6), %v8849_v1  ;;  %v8865_v60 = vpack.c.bf16 (!%p8729_p6), %v7488_v51, %v7487_v48 }
 0x440   : > { %v7421_v1 = vrot.slane (!%p8729_p6), %v7407_v49, %v12080_v5 }
 0x508   : > { %v6737_v4 = vpop.f32.mrb[0].mxu0  ;;  %v7352_v52 = vpop.f32.mrb[0].mxu1 }
 0x509   : > { %v6739_v6 = vpop.f32.mrb[1].mxu0  ;;  %v7354_v62 = vpop.f32.mrb[1].mxu1 }
 0x50a   : > { %v7363_v8 = vcombine.low %v6737_v4, %v6739_v6  ;;  %v7364_v9 = vcombine.low %v7352_v52, %v7354_v62  ;;  %v6741_v11 = vpop.f32.mrb[2].mxu0  ;;  %v7356_v13 = vpop.f32.mrb[2].mxu1  ;;  %v7450_v4 = vld [vmem:[%s10993_s11 + $0xc8] sm:$0xff] (!%p8729_p6)  ;;  %v7481_v52 = vld [vmem:[%s10993_s11 + $0x1c0] sm:$0xff] (!%p8729_p6)  ;;  %v8819_v62 = vpack.c.bf16 (!%p8729_p6), %v7432_v0, %v7431_v14  ;;  %v7472_v14 = vld [vmem:[%s10993_s11 + $0x178] sm:$0xff] (!%p8729_p6)  ;;  %v7414_v0 = vrot.slane (!%p8729_p6), %v7406_v56, %v12080_v5 }
 0x50b   : > { %v6742_v15 = vpop.f32.mrb[3].mxu0  ;;  %v7357_v50 = vpop.f32.mrb[3].mxu1  ;;  %v7482_v6 = vld [vmem:[%s10993_s11 + $0x1c8] sm:$0xff] (!%p8729_p6)  ;;  %v7433_v11 = vld [vmem:[%s10993_s11 + $0x40] sm:$0xff] (!%p8729_p6) }
 0x50c   : > { %v7371_v17 = vrot.slane %v7363_v8, %v12080_v5  ;;  %v7378_v2 = vrot.slane %v7364_v9, %v12080_v5  ;;  %7386 = sbr.rel (%p8729_p6) target bundleno = 1533 (0x5fd), region = 56  ;;  %v8851_v8 = vpack.c.bf16 (!%p8729_p6), %v7464_v36, %v7463_v7  ;;  %v8821_v9 = vpack.c.bf16 (!%p8729_p6), %v7450_v4, %v7449_v3  ;;  %v7434_v13 = vld [vmem:[%s10993_s11 + $0x48] sm:$0xff] (!%p8729_p6)  ;;  %v7465_v15 = vld [vmem:[%s10993_s11 + $0x140] sm:$0xff] (!%p8729_p6)  ;;  %8820 = vmatpush3.bf16.msra.mxu0 (!%p8729_p6), %v8819_v62 }
 0x50d   : > { %v8853_v50 = vpack.c.bf16 (!%p8729_p6), %v7482_v6, %v7481_v52  ;;  %v8823_v10 = vpack.c.bf16 (!%p8729_p6), %v7434_v13, %v7433_v11  ;;  %v8835_v7 = vpack.c.bf16 (!%p8729_p6), %v7440_v59, %v7439_v58  ;;  %v8867_v3 = vpack.c.bf16 (!%p8729_p6), %v7472_v14, %v7471_v61 }
 0x50e   : > { %v7379_v18 = vcombine.low %v7371_v17, %v7378_v2  ;;  %v7466_v17 = vld [vmem:[%s10993_s11 + $0x148] sm:$0xff] (!%p8729_p6)  ;;  %v7451_v2 = vld [vmem:[%s10993_s11 + $0xd0] sm:$0xff] (!%p8729_p6)  ;;  %8852 = vmatpush3.bf16.msra.mxu1 (!%p8729_p6), %v8851_v8  ;;  %8822 = vmatprep.subr.bf16.mxu0 (!%p8729_p6), %v8821_v9  ;;  %v7422_v4 = vcombine.low (!%p8729_p6), %v7414_v0, %v7421_v1 }
 0x50f   : > { %v8855_v20 = vpack.c.bf16 (!%p8729_p6), %v7466_v17, %v7465_v15  ;;  %8854 = vmatprep.subr.bf16.mxu1 (!%p8729_p6), %v8853_v50 }
 0x510   : > { %v7381_v19 = vadd.f32 %v7379_v18, %v337_v53  ;;  %v7452_v53 = vld [vmem:[%s10993_s11 + $0xd8] sm:$0xff] (!%p8729_p6)  ;;  %v7483_v18 = vld [vmem:[%s10993_s11 + $0x1d0] sm:$0xff] (!%p8729_p6)  ;;  %8824 = vmatpush3.bf16.msra.mxu0 (!%p8729_p6), %v8823_v10 }
 0x511   : > { %v8825_v21 = vpack.c.bf16 (!%p8729_p6), %v7452_v53, %v7451_v2 }
 0x512   : > { %7382 = vst [vmem:[#allocation2] sm:$0xff] %v7381_v19  ;;  %v7484_v19 = vld [vmem:[%s10993_s11 + $0x1d8] sm:$0xff] (!%p8729_p6)  ;;  %8856 = vmatpush3.bf16.msra.mxu1 (!%p8729_p6), %v8855_v20 }
 0x513   : > { %v8857_v28 = vpack.c.bf16 %v7484_v19, %v7483_v18  ;;  %8826 = vmatprep.subr.bf16.mxu0 %v8825_v21 }
 0x514   : > { %8828 = vmatpush3.bf16.msra.mxu0 %v8827_v34 }
 0x515   : > { %8858 = vmatprep.subr.bf16.mxu1 %v8857_v28  ;;  %8830 = vmatprep.subr.bf16.mxu0 %v8829_v37 }
 0x516   : > { %8860 = vmatpush3.bf16.msra.mxu1 %v8859_v35 }
 0x517   : > { %8862 = vmatprep.subr.bf16.mxu1 %v8861_v22 }
 0x518   : > { %8832 = vmatpush3.bf16.msra.mxu0 %v8831_v55 }
 0x519   : > { %v7387_v36 = vld [vmem:[#allocation2] sm:$0xff]  ;;  %8834 = vmatprep.subr.bf16.mxu0 %v8833_v57 }
 0x51a   : > { %8864 = vmatpush3.bf16.msra.mxu1 %v8863_v39  ;;  %v7424_v52 = vadd.f32 %v7422_v4, %v7387_v36 }
 0x51b   : > { %8866 = vmatprep.subr.bf16.mxu1 %v8865_v60 }
 0x51c   : > { %8836 = vmatpush3.bf16.msra.mxu0 %v8835_v7  ;;  %v7497_v6 = vrot.slane %v7424_v52, %v12080_v5  ;;  %v7490_v62 = vcombine.high %v7424_v52, %v7424_v52 }
 0x51e   : > { %8868 = vmatpush3.bf16.msra.mxu1 %v8867_v3  ;;  %v7505_v8 = vcombine.high %v7497_v6, %v7497_v6  ;;  %v7504_v9 = vrot.slane %v7490_v62, %v12080_v5 }
 0x520   : > { %7575 = vmatprep.mubr.f32.mxu0 %v7505_v8  ;;  %v7506_v11 = vcombine.high %v7504_v9, %v7504_v9 }
 0x521   : > { %7576 = vmatmul.mubr.f32.vlgmr.msra.gmra.mrb[0].mxu0 %v7497_v6 }
 0x522   : > { %7645 = vmatprep.mubr.f32.mxu1 %v7506_v11 }
 0x523   : > { %7646 = vmatmul.mubr.f32.vlgmr.msra.gmra.mrb[0].mxu1 %v7504_v9 }
 0x5f4   : > { %v8767_v13 = vpop.f32.mrb[0].mxu0 }
 0x5f5   : > { %v8768_v15 = vpop.f32.mrb[1].mxu0 }
 0x5f6   : > { %v8802_v50 = vpop.f32.mrb[0].mxu1  ;;  %v8769_v17 = vadd.f32 %v8768_v15, %v8767_v13 }
 0x5f7   : > { %v8803_v2 = vpop.f32.mrb[1].mxu1 }
 0x5f8   : > { %v8804_v53 = vadd.f32 %v8803_v2, %v8802_v50 }
 0x5fa   : > { %v7648_v18 = vadd.f32 %v8804_v53, %v8769_v17 }
 0x5fc   : > { %7651 = vst [vmem:[%s10991_s18] sm:$0x3] %v7648_v18 }
 0x5fd PF: > { %s20_s25 = sadd.s32 1, %s10679_s25   ;;  %s12229_s21 = sld [smem:[#allocation10_spill]] }
 0x5fe   : > { %p17_p9 = scmp.ge.s32.totalorder %s20_s25, 10   ;;  %s12230_s17 = sld [smem:[#allocation14_spill]] }
 0x5ff   : > { %s12231_s22 = sld [smem:[#allocation11_spill]]  ;;  %s12232_s20 = sld [smem:[#allocation15_spill]] }
 0x600   : > { %s12233_s13 = sld [smem:[#allocation12_spill]]  ;;  %s12234_s27 = sld [smem:[#allocation13_spill]] }
 0x601   : > { %s12235_s15 = smov %s10643_s16  ;;  %s12237_s18 = smov %s10655_s19 }
 0x602   :  { %19 = sbr.rel (!%p17_p9) target bundleno = 11 (0xb), region = 111 }
 0x603   : > { %s12236_s16 = smov %s12229_s21  ;;  %s12239_s21 = smov %s10671_s23 }
 0x605   : > { %s12238_s19 = smov %s12231_s22  ;;  %s12240_s22 = smov %s10675_s24 }
 0x606   : > { %s12241_s23 = smov %s12233_s13  ;;  %s12242_s24 = smov %s12234_s27 }
 0x609   :  { %7671 = vsyncpa [#allocation4], 1 }
 0x60a   :  { %7673 = vsyncpa [#allocation4 + $0x1], 1 }
 0x60b   :  { %7674 = vsyncpa [#allocation6], 1 }
 0x60c   :  { %7676 = vsyncpa [#allocation6 + $0x1], 1 }

</bundles_post_ra>
